<compile_context>
chip_gen: v7x
topology: tpu7x:2x2x1
jax: 0.10.0
libtpu: 0.0.40
codegen_flags: <defaults>
</compile_context>

<pallas_src>
import functools
import math

import jax
import jax.numpy as jnp
from jax.experimental import pallas as pl
from jax.experimental.pallas import tpu as pltpu


# ----------------------------------------------------------------------------
# Small helpers
# ----------------------------------------------------------------------------

def _round_up(n, m):
    return ((n + m - 1) // m) * m


def _choose_tile(n):
    """Point-tile size: prefer large, evenly-dividing tiles (roofline), cap 512."""
    for t in (512, 256, 128):
        if n >= t and n % t == 0:
            return t
    for t in (512, 256, 128):
        if n >= t:
            return t
    return _round_up(max(n, 8), 8)


def _const_spec(a):
    """Full-extent BlockSpec with a constant (all-zero) block index."""
    zeros = (0,) * a.ndim
    return pl.BlockSpec(a.shape, lambda bi, j: zeros)


def _batch_spec(a):
    """Per-batch (1, ...) block indexed by the batch grid axis only."""
    tail = (0,) * (a.ndim - 1)
    return pl.BlockSpec((1,) + a.shape[1:], lambda bi, j: (bi,) + tail)


def _relu_linear(h, w_ref, s_ref, relu=True):
    """y = act(h @ w + shift); bf16 MXU operands, f32 accumulation/elementwise."""
    w = w_ref[...]
    y = jnp.dot(h.astype(w.dtype), w, preferred_element_type=jnp.float32)
    y = y + s_ref[...]
    return jnp.maximum(y, 0.0) if relu else y


# ----------------------------------------------------------------------------
# Pallas kernels
# ----------------------------------------------------------------------------

def _stn3_kernel(x_ref, c1w, c1s, c2w, c2s, c3w, c3s, gmax_ref):
    """STN(3) conv stack with running per-batch global max (accumulated in out)."""
    @pl.when(pl.program_id(1) == 0)
    def _():
        gmax_ref[...] = jnp.full(gmax_ref.shape, -jnp.inf, jnp.float32)

    h = x_ref[0]                                      # (tn, 8) f32
    h = _relu_linear(h, c1w, c1s)                     # (tn, 64)
    h = _relu_linear(h, c2w, c2s)                     # (tn, 128)
    h = _relu_linear(h, c3w, c3s)                     # (tn, 1024)
    gmax_ref[0] = jnp.maximum(gmax_ref[0], jnp.max(h, axis=0, keepdims=True))


def _mlp1_fstn_kernel(x_ref, wf1, s1, w2, s2, c1w, c1s, c2w, c2s, c3w, c3s,
                      pf_ref, gmax_ref):
    """mlp1 (input transform folded into layer 1) + feature-STN conv stack."""
    @pl.when(pl.program_id(1) == 0)
    def _():
        gmax_ref[...] = jnp.full(gmax_ref.shape, -jnp.inf, jnp.float32)

    x = x_ref[0]                                      # (tn, 8) f32
    w = wf1[0]                                        # (8, 64) bf16, T folded
    h = jnp.dot(x.astype(w.dtype), w, preferred_element_type=jnp.float32)
    h = jnp.maximum(h + s1[...], 0.0)                 # (tn, 64)
    h = _relu_linear(h, w2, s2)                       # (tn, 64)  point feature
    pf_ref[0] = h.astype(pf_ref.dtype)                # bf16 HBM slab

    g = _relu_linear(h, c1w, c1s)                     # (tn, 64)
    g = _relu_linear(g, c2w, c2s)                     # (tn, 128)
    g = _relu_linear(g, c3w, c3s)                     # (tn, 1024)
    gmax_ref[0] = jnp.maximum(gmax_ref[0], jnp.max(g, axis=0, keepdims=True))


def _mlp2_gmax_kernel(pf_ref, wf2, s0, w1, s1, w2, s2, gf_ref):
    """mlp2 (feature transform folded into layer 1) + global max-pool."""
    @pl.when(pl.program_id(1) == 0)
    def _():
        gf_ref[...] = jnp.full(gf_ref.shape, -jnp.inf, jnp.float32)

    pf = pf_ref[0]                                    # (tn, 64) bf16
    w = wf2[0]                                        # (64, 64) bf16, F folded
    h = jnp.dot(pf.astype(w.dtype), w, preferred_element_type=jnp.float32)
    h = jnp.maximum(h + s0[...], 0.0)                 # (tn, 64)
    h = _relu_linear(h, w1, s1)                       # (tn, 128)
    h = _relu_linear(h, w2, s2)                       # (tn, 1024)
    gf_ref[0] = jnp.maximum(gf_ref[0], jnp.max(h, axis=0, keepdims=True))


def _seg_head_kernel(pf_ref, w1p, b1, w2, s2, w3, s3, w4, s4, o_ref):
    """Fused segmentation head; concat/broadcast folded into per-batch bias."""
    pf = pf_ref[0]                                    # (tn, 64) bf16
    w = w1p[0]                                        # (64, 512) bf16, F & W1[:64] folded
    h = jnp.dot(pf.astype(w.dtype), w, preferred_element_type=jnp.float32)
    h = jnp.maximum(h + b1[0], 0.0)                   # + per-batch global-feature bias
    h = _relu_linear(h, w2, s2)                       # (tn, 256)
    h = _relu_linear(h, w3, s3)                       # (tn, 128)
    h = _relu_linear(h, w4, s4, relu=False)           # (tn, 128)  lane-dense
    o_ref[0] = h.astype(o_ref.dtype)


# ----------------------------------------------------------------------------
# pallas_call wrappers  (grid = (batch "parallel", point-tiles "arbitrary"))
# ----------------------------------------------------------------------------

def _stn3_call(x, conv, tn):
    b, n_pad, cin = x.shape
    ops = [conv[0]["w"], conv[0]["s"], conv[1]["w"], conv[1]["s"],
           conv[2]["w"], conv[2]["s"]]
    return pl.pallas_call(
        _stn3_kernel,
        out_shape=jax.ShapeDtypeStruct((b, 1, 1024), jnp.float32),
        grid=(b, n_pad // tn),
        in_specs=[pl.BlockSpec((1, tn, cin), lambda bi, j: (bi, j, 0))]
                 + [_const_spec(a) for a in ops],
        out_specs=pl.BlockSpec((1, 1, 1024), lambda bi, j: (bi, 0, 0)),
        compiler_params=pltpu.CompilerParams(
            dimension_semantics=("parallel", "arbitrary")),
    )(x, *ops)


def _mlp1_fstn_call(x, wf1, s1, l1, stn_conv, tn):
    b, n_pad, cin = x.shape
    consts = [s1, l1["w"], l1["s"],
              stn_conv[0]["w"], stn_conv[0]["s"],
              stn_conv[1]["w"], stn_conv[1]["s"],
              stn_conv[2]["w"], stn_conv[2]["s"]]
    return pl.pallas_call(
        _mlp1_fstn_kernel,
        out_shape=(jax.ShapeDtypeStruct((b, n_pad, 64), jnp.bfloat16),
                   jax.ShapeDtypeStruct((b, 1, 1024), jnp.float32)),
        grid=(b, n_pad // tn),
        in_specs=[pl.BlockSpec((1, tn, cin), lambda bi, j: (bi, j, 0)),
                  _batch_spec(wf1)]
                 + [_const_spec(a) for a in consts],
        out_specs=(pl.BlockSpec((1, tn, 64), lambda bi, j: (bi, j, 0)),
                   pl.BlockSpec((1, 1, 1024), lambda bi, j: (bi, 0, 0))),
        compiler_params=pltpu.CompilerParams(
            dimension_semantics=("parallel", "arbitrary")),
    )(x, wf1, *consts)


def _mlp2_gmax_call(pf, wf2, s0, l1, l2, tn):
    b, n_pad, _ = pf.shape
    consts = [s0, l1["w"], l1["s"], l2["w"], l2["s"]]
    return pl.pallas_call(
        _mlp2_gmax_kernel,
        out_shape=jax.ShapeDtypeStruct((b, 1, 1024), jnp.float32),
        grid=(b, n_pad // tn),
        in_specs=[pl.BlockSpec((1, tn, 64), lambda bi, j: (bi, j, 0)),
                  _batch_spec(wf2)]
                 + [_const_spec(a) for a in consts],
        out_specs=pl.BlockSpec((1, 1, 1024), lambda bi, j: (bi, 0, 0)),
        compiler_params=pltpu.CompilerParams(
            dimension_semantics=("parallel", "arbitrary")),
    )(pf, wf2, *consts)


def _seg_head_call(pf, w1p, b1, l2, l3, l4, tn):
    b, n_pad, _ = pf.shape
    cpad = l4["w"].shape[1]
    consts = [l2["w"], l2["s"], l3["w"], l3["s"], l4["w"], l4["s"]]
    return pl.pallas_call(
        _seg_head_kernel,
        out_shape=jax.ShapeDtypeStruct((b, n_pad, cpad), jnp.float32),
        grid=(b, n_pad // tn),
        in_specs=[pl.BlockSpec((1, tn, 64), lambda bi, j: (bi, j, 0)),
                  _batch_spec(w1p), _batch_spec(b1)]
                 + [_const_spec(a) for a in consts],
        out_specs=pl.BlockSpec((1, tn, cpad), lambda bi, j: (bi, j, 0)),
        compiler_params=pltpu.CompilerParams(
            dimension_semantics=("parallel", "parallel")),
    )(pf, w1p, b1, *consts)


# ----------------------------------------------------------------------------
# Deterministic parameter construction (synthetic weights, eval-mode BN folded)
# ----------------------------------------------------------------------------

def _init_layer(key, cin, cout, *, batchnorm=True):
    k1, k2, k3, k4, k5, k6 = jax.random.split(key, 6)
    w = jax.random.normal(k1, (cin, cout), jnp.float32) * (1.0 / math.sqrt(cin))
    b = 0.01 * jax.random.normal(k2, (cout,), jnp.float32)
    if batchnorm:
        gamma = 1.0 + 0.1 * jax.random.normal(k3, (cout,), jnp.float32)
        beta = 0.01 * jax.random.normal(k4, (cout,), jnp.float32)
        mean = 0.01 * jax.random.normal(k5, (cout,), jnp.float32)
        var = 1.0 + 0.1 * jax.random.uniform(k6, (cout,), jnp.float32)
        scale = gamma / jnp.sqrt(var + 1e-5)
        shift = beta - mean * scale
    else:
        scale = jnp.ones((cout,), jnp.float32)
        shift = jnp.zeros((cout,), jnp.float32)
    # Fold conv/linear bias + BatchNorm into a single (w', shift') pair:
    #   y = (x @ w + b) * scale + shift = x @ (w * scale) + (shift + b * scale)
    return {"w": w * scale[None, :],
            "s": (shift + b * scale).reshape(1, cout)}


def make_params(key, num_parts=50):
    keys = iter(jax.random.split(key, 32))
    p = {}
    p["stn3"] = {
        "c1": _init_layer(next(keys), 3, 64),
        "c2": _init_layer(next(keys), 64, 128),
        "c3": _init_layer(next(keys), 128, 1024),
        "f1": _init_layer(next(keys), 1024, 512),
        "f2": _init_layer(next(keys), 512, 256),
        "f3": _init_layer(next(keys), 256, 3 * 3, batchnorm=False),
    }
    p["mlp1"] = [
        _init_layer(next(keys), 3, 64),
        _init_layer(next(keys), 64, 64),
    ]
    p["stn64"] = {
        "c1": _init_layer(next(keys), 64, 64),
        "c2": _init_layer(next(keys), 64, 128),
        "c3": _init_layer(next(keys), 128, 1024),
        "f1": _init_layer(next(keys), 1024, 512),
        "f2": _init_layer(next(keys), 512, 256),
        "f3": _init_layer(next(keys), 256, 64 * 64, batchnorm=False),
    }
    p["mlp2"] = [
        _init_layer(next(keys), 64, 64),
        _init_layer(next(keys), 64, 128),
        _init_layer(next(keys), 128, 1024),
    ]
    p["seg"] = [
        _init_layer(next(keys), 64 + 1024, 512),
        _init_layer(next(keys), 512, 256),
        _init_layer(next(keys), 256, 128),
        _init_layer(next(keys), 128, num_parts, batchnorm=False),
    ]
    return p


def prepare_params(p):
    """One-time static preprocessing: bf16 kernel weights, channel/lane pads,
    and weight splits (done once, outside the jitted forward)."""
    def conv_bf16(layer, pad_rows_to=None):
        w = layer["w"]
        if pad_rows_to is not None and w.shape[0] < pad_rows_to:
            w = jnp.pad(w, ((0, pad_rows_to - w.shape[0]), (0, 0)))
        return {"w": w.astype(jnp.bfloat16), "s": layer["s"]}

    kp = {}
    kp["stn3_conv"] = [conv_bf16(p["stn3"]["c1"], pad_rows_to=8),
                       conv_bf16(p["stn3"]["c2"]),
                       conv_bf16(p["stn3"]["c3"])]
    kp["stn3_head"] = {k: p["stn3"][k] for k in ("f1", "f2", "f3")}     # f32 (XLA)
    kp["stn64_conv"] = [conv_bf16(p["stn64"]["c1"]),
                        conv_bf16(p["stn64"]["c2"]),
                        conv_bf16(p["stn64"]["c3"])]
    kp["stn64_head"] = {k: p["stn64"][k] for k in ("f1", "f2", "f3")}   # f32 (XLA)
    kp["mlp1_w0"] = p["mlp1"][0]["w"]          # (3, 64) f32, folded with T at runtime
    kp["mlp1_s0"] = p["mlp1"][0]["s"]
    kp["mlp1_l1"] = conv_bf16(p["mlp1"][1])
    kp["mlp2_w0"] = p["mlp2"][0]["w"]          # (64, 64) f32, folded with F at runtime
    kp["mlp2_s0"] = p["mlp2"][0]["s"]
    kp["mlp2_l1"] = conv_bf16(p["mlp2"][1])
    kp["mlp2_l2"] = conv_bf16(p["mlp2"][2])
    seg1w = p["seg"][0]["w"]                   # (1088, 512)
    kp["seg1_wp"] = seg1w[:64]                 # point-feature part, folded with F
    kp["seg1_wg"] = seg1w[64:]                 # global-feature part -> per-batch bias
    kp["seg1_s"] = p["seg"][0]["s"]
    kp["seg_l2"] = conv_bf16(p["seg"][1])
    kp["seg_l3"] = conv_bf16(p["seg"][2])
    num_parts = p["seg"][3]["w"].shape[1]
    cpad = _round_up(num_parts, 128)           # lane-dense final output
    kp["seg_l4"] = {
        "w": jnp.pad(p["seg"][3]["w"],
                     ((0, 0), (0, cpad - num_parts))).astype(jnp.bfloat16),
        "s": jnp.pad(p["seg"][3]["s"], ((0, 0), (0, cpad - num_parts))),
    }
    return kp


# ----------------------------------------------------------------------------
# Forward pass
# ----------------------------------------------------------------------------

def _fc_head(g, hp):
    """Tiny STN FC head (B x 1024 -> k*k) in plain f32 JAX (outside the grid)."""
    h = jnp.maximum(g @ hp["f1"]["w"] + hp["f1"]["s"], 0.0)
    h = jnp.maximum(h @ hp["f2"]["w"] + hp["f2"]["s"], 0.0)
    return h @ hp["f3"]["w"] + hp["f3"]["s"]


def pointnet_part_seg_forward(x, kp, *, num_parts):
    """x: (B, num_points, 3) -> (logits (B, num_parts, N), T (B,3,3), F (B,64,64))."""
    b, n, _ = x.shape

    tn = _choose_tile(n)
    n_pad = _round_up(n, tn)

    # channels-last, channel-pad 3 -> 8 (zeros; matching weight rows are zero),
    # point-pad by replicating the last point (replication is global-max-safe).
    x8 = jnp.pad(x.astype(jnp.float32), ((0, 0), (0, 0), (0, 5)))
    if n_pad != n:
        pad = jnp.broadcast_to(x8[:, n - 1:n, :], (b, n_pad - n, 8))
        x8 = jnp.concatenate([x8, pad], axis=1)

    # ---- K1: input-STN conv stack + per-batch global max; FC head in XLA ----
    g3 = _stn3_call(x8, kp["stn3_conv"], tn).reshape(b, 1024)
    t_raw = _fc_head(g3, kp["stn3_head"])                             # (B, 9)
    T = t_raw.reshape(b, 3, 3) + jnp.eye(3, dtype=jnp.float32)[None]

    # ---- K2: mlp1 (T folded into layer 1) + feature-STN conv + global max ----
    wf1 = jnp.einsum("bji,jk->bik", T, kp["mlp1_w0"])                 # (B, 3, 64)
    wf1 = jnp.pad(wf1, ((0, 0), (0, 5), (0, 0))).astype(jnp.bfloat16)  # rows 3->8
    pf, g64 = _mlp1_fstn_call(x8, wf1, kp["mlp1_s0"], kp["mlp1_l1"],
                              kp["stn64_conv"], tn)
    f_raw = _fc_head(g64.reshape(b, 1024), kp["stn64_head"])          # (B, 4096)
    F = f_raw.reshape(b, 64, 64) + jnp.eye(64, dtype=jnp.float32)[None]

    # ---- K3: mlp2 (F folded into layer 1) + global max-pool ----
    wf2 = jnp.einsum("bji,jk->bik", F, kp["mlp2_w0"]).astype(jnp.bfloat16)
    gf = _mlp2_gmax_call(pf, wf2, kp["mlp2_s0"], kp["mlp2_l1"], kp["mlp2_l2"],
                         tn).reshape(b, 1024)

    # ---- K4: segmentation head ----
    # concat([pf @ F^T, broadcast(gf)]) @ W1 == pf @ (F^T W1[:64]) + gf @ W1[64:]
    w1p = jnp.einsum("bji,jk->bik", F, kp["seg1_wp"]).astype(jnp.bfloat16)
    b1 = (gf @ kp["seg1_wg"] + kp["seg1_s"]).reshape(b, 1, -1)        # (B, 1, 512)
    logits_p = _seg_head_call(pf, w1p, b1, kp["seg_l2"], kp["seg_l3"],
                              kp["seg_l4"], tn)
    logits = logits_p[:, :n, :num_parts].transpose(0, 2, 1)           # (B, parts, N)
    return logits, T, F


# ----------------------------------------------------------------------------
# Main
# ----------------------------------------------------------------------------

if __name__ == "__main__":
    B, N, NUM_PARTS = 2, 128, 50

    key = jax.random.PRNGKey(0)
    k_params, k_x = jax.random.split(key)
    params = make_params(k_params, num_parts=NUM_PARTS)
    kernel_params = prepare_params(params)
    x = jax.random.normal(k_x, (B, N, 3), jnp.float32)   # (batch, num_points, 3)

    fwd = jax.jit(functools.partial(pointnet_part_seg_forward,
                                    num_parts=NUM_PARTS))
    logits, T, F = fwd(x, kernel_params)
    jax.block_until_ready((logits, T, F))

    assert logits.shape == (B, NUM_PARTS, N)
    assert T.shape == (B, 3, 3)
    assert F.shape == (B, 64, 64)
    assert bool(jnp.all(jnp.isfinite(logits)))
    assert bool(jnp.all(jnp.isfinite(T)))
    assert bool(jnp.all(jnp.isfinite(F)))

    print("KERNEL_OK")
</pallas_src>

<mosaic_0001>
module attributes {stable_mosaic.version = 11 : i64} {
  func.func @_stn3_kernel(%arg0: i32, %arg1: i32, %arg2: memref<1x128x8xf32, #tpu.memory_space<vmem>>, %arg3: memref<8x64xbf16, #tpu.memory_space<vmem>>, %arg4: memref<1x64xf32, #tpu.memory_space<vmem>>, %arg5: memref<64x128xbf16, #tpu.memory_space<vmem>>, %arg6: memref<1x128xf32, #tpu.memory_space<vmem>>, %arg7: memref<128x1024xbf16, #tpu.memory_space<vmem>>, %arg8: memref<1x1024xf32, #tpu.memory_space<vmem>>, %arg9: memref<1x1x1024xf32, #tpu.memory_space<vmem>>) attributes {dimension_semantics = [#tpu.dimension_semantics<parallel>, #tpu.dimension_semantics<arbitrary>], iteration_bounds = array<i64: 2, 1>, scalar_prefetch = 0 : i64, scratch_operands = 0 : i64, tpu.core_type = #tpu.core_type<tc>, window_params = [{transform_indices = @transform_0, window_bounds = array<i64: 1, 128, 8>}, {pipeline_mode = #tpu.pipeline_mode<synchronous>, transform_indices = @transform_1, window_bounds = array<i64: 8, 64>}, {pipeline_mode = #tpu.pipeline_mode<synchronous>, transform_indices = @transform_2, window_bounds = array<i64: 1, 64>}, {pipeline_mode = #tpu.pipeline_mode<synchronous>, transform_indices = @transform_3, window_bounds = array<i64: 64, 128>}, {pipeline_mode = #tpu.pipeline_mode<synchronous>, transform_indices = @transform_4, window_bounds = array<i64: 1, 128>}, {pipeline_mode = #tpu.pipeline_mode<synchronous>, transform_indices = @transform_5, window_bounds = array<i64: 128, 1024>}, {pipeline_mode = #tpu.pipeline_mode<synchronous>, transform_indices = @transform_6, window_bounds = array<i64: 1, 1024>}, {transform_indices = @transform_7, window_bounds = array<i64: 1, 1, 1024>}]} {
    %c0_i32 = arith.constant 0 : i32
    %0 = arith.cmpi eq, %arg1, %c0_i32 : i32
    %1 = arith.extui %0 : i1 to i32
    %c0_i32_0 = arith.constant 0 : i32
    %2 = arith.cmpi ne, %1, %c0_i32_0 : i32
    scf.if %2 {
      %cst_27 = arith.constant 0xFF800000 : f32
      %37 = vector.broadcast %cst_27 : f32 to vector<1x1x1024xf32>
      %c0_28 = arith.constant 0 : index
      %c0_29 = arith.constant 0 : index
      %c0_30 = arith.constant 0 : index
      %38 = vector.load %arg9[%c0_28, %c0_29, %c0_30] : memref<1x1x1024xf32, #tpu.memory_space<vmem>>, vector<1x1x1024xf32>
      tpu.vector_store %arg9[%c0_28, %c0_29, %c0_30], %37 {strides = array<i32>} : memref<1x1x1024xf32, #tpu.memory_space<vmem>>, vector<1x1x1024xf32>,
    } else {
    }
    %c0 = arith.constant 0 : index
    %c0_1 = arith.constant 0 : index
    %c0_2 = arith.constant 0 : index
    %3 = vector.load %arg2[%c0, %c0_1, %c0_2] : memref<1x128x8xf32, #tpu.memory_space<vmem>>, vector<1x128x8xf32>
    %4 = vector.shape_cast %3 : vector<1x128x8xf32> to vector<128x8xf32>
    %c0_3 = arith.constant 0 : index
    %c0_4 = arith.constant 0 : index
    %5 = vector.load %arg3[%c0_3, %c0_4] : memref<8x64xbf16, #tpu.memory_space<vmem>>, vector<8x64xbf16>
    %6 = arith.truncf %4 : vector<128x8xf32> to vector<128x8xbf16>
    %cst = arith.constant dense<0.000000e+00> : vector<128x64xf32>
    %7 = tpu.matmul %6, %5, %cst {dimension_numbers = #tpu.dot_dimension_numbers<[1], [0], [0], [1], [0, 0, 1, 1], [], []>} : vector<128x8xbf16>, vector<8x64xbf16>, vector<128x64xf32> -> vector<128x64xf32>
    %c0_5 = arith.constant 0 : index
    %c0_6 = arith.constant 0 : index
    %8 = vector.load %arg4[%c0_5, %c0_6] : memref<1x64xf32, #tpu.memory_space<vmem>>, vector<1x64xf32>
    %9 = vector.broadcast %8 : vector<1x64xf32> to vector<128x64xf32>
    %10 = arith.addf %7, %9 : vector<128x64xf32>
    %cst_7 = arith.constant 0.000000e+00 : f32
    %11 = vector.broadcast %cst_7 : f32 to vector<128x64xf32>
    %12 = arith.maximumf %10, %11 : vector<128x64xf32>
    %c0_8 = arith.constant 0 : index
    %c0_9 = arith.constant 0 : index
    %13 = vector.load %arg5[%c0_8, %c0_9] : memref<64x128xbf16, #tpu.memory_space<vmem>>, vector<64x128xbf16>
    %14 = arith.truncf %12 : vector<128x64xf32> to vector<128x64xbf16>
    %cst_10 = arith.constant dense<0.000000e+00> : vector<128x128xf32>
    %15 = tpu.matmul %14, %13, %cst_10 {dimension_numbers = #tpu.dot_dimension_numbers<[1], [0], [0], [1], [0, 0, 1, 1], [], []>} : vector<128x64xbf16>, vector<64x128xbf16>, vector<128x128xf32> -> vector<128x128xf32>
    %c0_11 = arith.constant 0 : index
    %c0_12 = arith.constant 0 : index
    %16 = vector.load %arg6[%c0_11, %c0_12] : memref<1x128xf32, #tpu.memory_space<vmem>>, vector<1x128xf32>
    %17 = vector.broadcast %16 : vector<1x128xf32> to vector<128x128xf32>
    %18 = arith.addf %15, %17 : vector<128x128xf32>
    %cst_13 = arith.constant 0.000000e+00 : f32
    %19 = vector.broadcast %cst_13 : f32 to vector<128x128xf32>
    %20 = arith.maximumf %18, %19 : vector<128x128xf32>
    %c0_14 = arith.constant 0 : index
    %c0_15 = arith.constant 0 : index
    %21 = vector.load %arg7[%c0_14, %c0_15] : memref<128x1024xbf16, #tpu.memory_space<vmem>>, vector<128x1024xbf16>
    %22 = arith.truncf %20 : vector<128x128xf32> to vector<128x128xbf16>
    %cst_16 = arith.constant dense<0.000000e+00> : vector<128x1024xf32>
    %23 = tpu.matmul %22, %21, %cst_16 {dimension_numbers = #tpu.dot_dimension_numbers<[1], [0], [0], [1], [0, 0, 1, 1], [], []>} : vector<128x128xbf16>, vector<128x1024xbf16>, vector<128x1024xf32> -> vector<128x1024xf32>
    %c0_17 = arith.constant 0 : index
    %c0_18 = arith.constant 0 : index
    %24 = vector.load %arg8[%c0_17, %c0_18] : memref<1x1024xf32, #tpu.memory_space<vmem>>, vector<1x1024xf32>
    %25 = vector.broadcast %24 : vector<1x1024xf32> to vector<128x1024xf32>
    %26 = arith.addf %23, %25 : vector<128x1024xf32>
    %cst_19 = arith.constant 0.000000e+00 : f32
    %27 = vector.broadcast %cst_19 : f32 to vector<128x1024xf32>
    %28 = arith.maximumf %26, %27 : vector<128x1024xf32>
    %c0_20 = arith.constant 0 : index
    %c0_21 = arith.constant 0 : index
    %c0_22 = arith.constant 0 : index
    %29 = vector.load %arg9[%c0_20, %c0_21, %c0_22] : memref<1x1x1024xf32, #tpu.memory_space<vmem>>, vector<1x1x1024xf32>
    %30 = vector.shape_cast %29 : vector<1x1x1024xf32> to vector<1x1024xf32>
    %cst_23 = arith.constant dense<0xFF800000> : vector<1024xf32>
    %31 = vector.multi_reduction <maximumf>, %28, %cst_23 [0] : vector<128x1024xf32> to vector<1024xf32>
    %32 = vector.shape_cast %31 : vector<1024xf32> to vector<1x1024xf32>
    %33 = arith.maximumf %30, %32 : vector<1x1024xf32>
    %c0_24 = arith.constant 0 : index
    %c0_25 = arith.constant 0 : index
    %c0_26 = arith.constant 0 : index
    %34 = vector.load %arg9[%c0_24, %c0_25, %c0_26] : memref<1x1x1024xf32, #tpu.memory_space<vmem>>, vector<1x1x1024xf32>
    %35 = vector.shape_cast %34 : vector<1x1x1024xf32> to vector<1x1024xf32>
    %36 = vector.shape_cast %33 : vector<1x1024xf32> to vector<1x1x1024xf32>
    tpu.vector_store %arg9[%c0_24, %c0_25, %c0_26], %36 {strides = array<i32>} : memref<1x1x1024xf32, #tpu.memory_space<vmem>>, vector<1x1x1024xf32>,
    return
  }
  func.func @transform_0(%arg0: i32, %arg1: i32) -> (i32, i32, i32) {
    %c0_i32 = arith.constant 0 : i32
    %c0_i32_0 = arith.constant 0 : i32
    return %arg0, %arg1, %c0_i32 : i32, i32, i32
  }
  func.func @transform_1(%arg0: i32, %arg1: i32) -> (i32, i32) {
    %c0_i32 = arith.constant 0 : i32
    %c0_i32_0 = arith.constant 0 : i32
    %c0_i32_1 = arith.constant 0 : i32
    return %c0_i32, %c0_i32_0 : i32, i32
  }
  func.func @transform_2(%arg0: i32, %arg1: i32) -> (i32, i32) {
    %c0_i32 = arith.constant 0 : i32
    %c0_i32_0 = arith.constant 0 : i32
    %c0_i32_1 = arith.constant 0 : i32
    return %c0_i32, %c0_i32_0 : i32, i32
  }
  func.func @transform_3(%arg0: i32, %arg1: i32) -> (i32, i32) {
    %c0_i32 = arith.constant 0 : i32
    %c0_i32_0 = arith.constant 0 : i32
    %c0_i32_1 = arith.constant 0 : i32
    return %c0_i32, %c0_i32_0 : i32, i32
  }
  func.func @transform_4(%arg0: i32, %arg1: i32) -> (i32, i32) {
    %c0_i32 = arith.constant 0 : i32
    %c0_i32_0 = arith.constant 0 : i32
    %c0_i32_1 = arith.constant 0 : i32
    return %c0_i32, %c0_i32_0 : i32, i32
  }
  func.func @transform_5(%arg0: i32, %arg1: i32) -> (i32, i32) {
    %c0_i32 = arith.constant 0 : i32
    %c0_i32_0 = arith.constant 0 : i32
    %c0_i32_1 = arith.constant 0 : i32
    return %c0_i32, %c0_i32_0 : i32, i32
  }
  func.func @transform_6(%arg0: i32, %arg1: i32) -> (i32, i32) {
    %c0_i32 = arith.constant 0 : i32
    %c0_i32_0 = arith.constant 0 : i32
    %c0_i32_1 = arith.constant 0 : i32
    return %c0_i32, %c0_i32_0 : i32, i32
  }
  func.func @transform_7(%arg0: i32, %arg1: i32) -> (i32, i32, i32) {
    %c0_i32 = arith.constant 0 : i32
    %c0_i32_0 = arith.constant 0 : i32
    %c0_i32_1 = arith.constant 0 : i32
    return %arg0, %c0_i32, %c0_i32_0 : i32, i32, i32
  }
}

module attributes {stable_mosaic.version = 11 : i64} {
  func.func @_mlp1_fstn_kernel(%arg0: i32, %arg1: i32, %arg2: memref<1x128x8xf32, #tpu.memory_space<vmem>>, %arg3: memref<1x8x64xbf16, #tpu.memory_space<vmem>>, %arg4: memref<1x64xf32, #tpu.memory_space<vmem>>, %arg5: memref<64x64xbf16, #tpu.memory_space<vmem>>, %arg6: memref<1x64xf32, #tpu.memory_space<vmem>>, %arg7: memref<64x64xbf16, #tpu.memory_space<vmem>>, %arg8: memref<1x64xf32, #tpu.memory_space<vmem>>, %arg9: memref<64x128xbf16, #tpu.memory_space<vmem>>, %arg10: memref<1x128xf32, #tpu.memory_space<vmem>>, %arg11: memref<128x1024xbf16, #tpu.memory_space<vmem>>, %arg12: memref<1x1024xf32, #tpu.memory_space<vmem>>, %arg13: memref<1x128x64xbf16, #tpu.memory_space<vmem>>, %arg14: memref<1x1x1024xf32, #tpu.memory_space<vmem>>) attributes {dimension_semantics = [#tpu.dimension_semantics<parallel>, #tpu.dimension_semantics<arbitrary>], iteration_bounds = array<i64: 2, 1>, scalar_prefetch = 0 : i64, scratch_operands = 0 : i64, tpu.core_type = #tpu.core_type<tc>, window_params = [{transform_indices = @transform_0, window_bounds = array<i64: 1, 128, 8>}, {transform_indices = @transform_1, window_bounds = array<i64: 1, 8, 64>}, {pipeline_mode = #tpu.pipeline_mode<synchronous>, transform_indices = @transform_2, window_bounds = array<i64: 1, 64>}, {pipeline_mode = #tpu.pipeline_mode<synchronous>, transform_indices = @transform_3, window_bounds = array<i64: 64, 64>}, {pipeline_mode = #tpu.pipeline_mode<synchronous>, transform_indices = @transform_4, window_bounds = array<i64: 1, 64>}, {pipeline_mode = #tpu.pipeline_mode<synchronous>, transform_indices = @transform_5, window_bounds = array<i64: 64, 64>}, {pipeline_mode = #tpu.pipeline_mode<synchronous>, transform_indices = @transform_6, window_bounds = array<i64: 1, 64>}, {pipeline_mode = #tpu.pipeline_mode<synchronous>, transform_indices = @transform_7, window_bounds = array<i64: 64, 128>}, {pipeline_mode = #tpu.pipeline_mode<synchronous>, transform_indices = @transform_8, window_bounds = array<i64: 1, 128>}, {pipeline_mode = #tpu.pipeline_mode<synchronous>, transform_indices = @transform_9, window_bounds = array<i64: 128, 1024>}, {pipeline_mode = #tpu.pipeline_mode<synchronous>, transform_indices = @transform_10, window_bounds = array<i64: 1, 1024>}, {transform_indices = @transform_11, window_bounds = array<i64: 1, 128, 64>}, {transform_indices = @transform_12, window_bounds = array<i64: 1, 1, 1024>}]} {
    %c0_i32 = arith.constant 0 : i32
    %0 = arith.cmpi eq, %arg1, %c0_i32 : i32
    %1 = arith.extui %0 : i1 to i32
    %c0_i32_0 = arith.constant 0 : i32
    %2 = arith.cmpi ne, %1, %c0_i32_0 : i32
    scf.if %2 {
      %cst_43 = arith.constant 0xFF800000 : f32
      %58 = vector.broadcast %cst_43 : f32 to vector<1x1x1024xf32>
      %c0_44 = arith.constant 0 : index
      %c0_45 = arith.constant 0 : index
      %c0_46 = arith.constant 0 : index
      %59 = vector.load %arg14[%c0_44, %c0_45, %c0_46] : memref<1x1x1024xf32, #tpu.memory_space<vmem>>, vector<1x1x1024xf32>
      tpu.vector_store %arg14[%c0_44, %c0_45, %c0_46], %58 {strides = array<i32>} : memref<1x1x1024xf32, #tpu.memory_space<vmem>>, vector<1x1x1024xf32>,
    } else {
    }
    %c0 = arith.constant 0 : index
    %c0_1 = arith.constant 0 : index
    %c0_2 = arith.constant 0 : index
    %3 = vector.load %arg2[%c0, %c0_1, %c0_2] : memref<1x128x8xf32, #tpu.memory_space<vmem>>, vector<1x128x8xf32>
    %4 = vector.shape_cast %3 : vector<1x128x8xf32> to vector<128x8xf32>
    %c0_3 = arith.constant 0 : index
    %c0_4 = arith.constant 0 : index
    %c0_5 = arith.constant 0 : index
    %5 = vector.load %arg3[%c0_3, %c0_4, %c0_5] : memref<1x8x64xbf16, #tpu.memory_space<vmem>>, vector<1x8x64xbf16>
    %6 = vector.shape_cast %5 : vector<1x8x64xbf16> to vector<8x64xbf16>
    %7 = arith.truncf %4 : vector<128x8xf32> to vector<128x8xbf16>
    %cst = arith.constant dense<0.000000e+00> : vector<128x64xf32>
    %8 = tpu.matmul %7, %6, %cst {dimension_numbers = #tpu.dot_dimension_numbers<[1], [0], [0], [1], [0, 0, 1, 1], [], []>} : vector<128x8xbf16>, vector<8x64xbf16>, vector<128x64xf32> -> vector<128x64xf32>
    %c0_6 = arith.constant 0 : index
    %c0_7 = arith.constant 0 : index
    %9 = vector.load %arg4[%c0_6, %c0_7] : memref<1x64xf32, #tpu.memory_space<vmem>>, vector<1x64xf32>
    %10 = vector.broadcast %9 : vector<1x64xf32> to vector<128x64xf32>
    %11 = arith.addf %8, %10 : vector<128x64xf32>
    %cst_8 = arith.constant 0.000000e+00 : f32
    %12 = vector.broadcast %cst_8 : f32 to vector<128x64xf32>
    %13 = arith.maximumf %11, %12 : vector<128x64xf32>
    %c0_9 = arith.constant 0 : index
    %c0_10 = arith.constant 0 : index
    %14 = vector.load %arg5[%c0_9, %c0_10] : memref<64x64xbf16, #tpu.memory_space<vmem>>, vector<64x64xbf16>
    %15 = arith.truncf %13 : vector<128x64xf32> to vector<128x64xbf16>
    %cst_11 = arith.constant dense<0.000000e+00> : vector<128x64xf32>
    %16 = tpu.matmul %15, %14, %cst_11 {dimension_numbers = #tpu.dot_dimension_numbers<[1], [0], [0], [1], [0, 0, 1, 1], [], []>} : vector<128x64xbf16>, vector<64x64xbf16>, vector<128x64xf32> -> vector<128x64xf32>
    %c0_12 = arith.constant 0 : index
    %c0_13 = arith.constant 0 : index
    %17 = vector.load %arg6[%c0_12, %c0_13] : memref<1x64xf32, #tpu.memory_space<vmem>>, vector<1x64xf32>
    %18 = vector.broadcast %17 : vector<1x64xf32> to vector<128x64xf32>
    %19 = arith.addf %16, %18 : vector<128x64xf32>
    %cst_14 = arith.constant 0.000000e+00 : f32
    %20 = vector.broadcast %cst_14 : f32 to vector<128x64xf32>
    %21 = arith.maximumf %19, %20 : vector<128x64xf32>
    %22 = arith.truncf %21 : vector<128x64xf32> to vector<128x64xbf16>
    %c0_15 = arith.constant 0 : index
    %c0_16 = arith.constant 0 : index
    %c0_17 = arith.constant 0 : index
    %23 = vector.load %arg13[%c0_15, %c0_16, %c0_17] : memref<1x128x64xbf16, #tpu.memory_space<vmem>>, vector<1x128x64xbf16>
    %24 = vector.shape_cast %23 : vector<1x128x64xbf16> to vector<128x64xbf16>
    %25 = vector.shape_cast %22 : vector<128x64xbf16> to vector<1x128x64xbf16>
    tpu.vector_store %arg13[%c0_15, %c0_16, %c0_17], %25 {strides = array<i32>} : memref<1x128x64xbf16, #tpu.memory_space<vmem>>, vector<1x128x64xbf16>,
    %c0_18 = arith.constant 0 : index
    %c0_19 = arith.constant 0 : index
    %26 = vector.load %arg7[%c0_18, %c0_19] : memref<64x64xbf16, #tpu.memory_space<vmem>>, vector<64x64xbf16>
    %27 = arith.truncf %21 : vector<128x64xf32> to vector<128x64xbf16>
    %cst_20 = arith.constant dense<0.000000e+00> : vector<128x64xf32>
    %28 = tpu.matmul %27, %26, %cst_20 {dimension_numbers = #tpu.dot_dimension_numbers<[1], [0], [0], [1], [0, 0, 1, 1], [], []>} : vector<128x64xbf16>, vector<64x64xbf16>, vector<128x64xf32> -> vector<128x64xf32>
    %c0_21 = arith.constant 0 : index
    %c0_22 = arith.constant 0 : index
    %29 = vector.load %arg8[%c0_21, %c0_22] : memref<1x64xf32, #tpu.memory_space<vmem>>, vector<1x64xf32>
    %30 = vector.broadcast %29 : vector<1x64xf32> to vector<128x64xf32>
    %31 = arith.addf %28, %30 : vector<128x64xf32>
    %cst_23 = arith.constant 0.000000e+00 : f32
    %32 = vector.broadcast %cst_23 : f32 to vector<128x64xf32>
    %33 = arith.maximumf %31, %32 : vector<128x64xf32>
    %c0_24 = arith.constant 0 : index
    %c0_25 = arith.constant 0 : index
    %34 = vector.load %arg9[%c0_24, %c0_25] : memref<64x128xbf16, #tpu.memory_space<vmem>>, vector<64x128xbf16>
    %35 = arith.truncf %33 : vector<128x64xf32> to vector<128x64xbf16>
    %cst_26 = arith.constant dense<0.000000e+00> : vector<128x128xf32>
    %36 = tpu.matmul %35, %34, %cst_26 {dimension_numbers = #tpu.dot_dimension_numbers<[1], [0], [0], [1], [0, 0, 1, 1], [], []>} : vector<128x64xbf16>, vector<64x128xbf16>, vector<128x128xf32> -> vector<128x128xf32>
    %c0_27 = arith.constant 0 : index
    %c0_28 = arith.constant 0 : index
    %37 = vector.load %arg10[%c0_27, %c0_28] : memref<1x128xf32, #tpu.memory_space<vmem>>, vector<1x128xf32>
    %38 = vector.broadcast %37 : vector<1x128xf32> to vector<128x128xf32>
    %39 = arith.addf %36, %38 : vector<128x128xf32>
    %cst_29 = arith.constant 0.000000e+00 : f32
    %40 = vector.broadcast %cst_29 : f32 to vector<128x128xf32>
    %41 = arith.maximumf %39, %40 : vector<128x128xf32>
    %c0_30 = arith.constant 0 : index
    %c0_31 = arith.constant 0 : index
    %42 = vector.load %arg11[%c0_30, %c0_31] : memref<128x1024xbf16, #tpu.memory_space<vmem>>, vector<128x1024xbf16>
    %43 = arith.truncf %41 : vector<128x128xf32> to vector<128x128xbf16>
    %cst_32 = arith.constant dense<0.000000e+00> : vector<128x1024xf32>
    %44 = tpu.matmul %43, %42, %cst_32 {dimension_numbers = #tpu.dot_dimension_numbers<[1], [0], [0], [1], [0, 0, 1, 1], [], []>} : vector<128x128xbf16>, vector<128x1024xbf16>, vector<128x1024xf32> -> vector<128x1024xf32>
    %c0_33 = arith.constant 0 : index
    %c0_34 = arith.constant 0 : index
    %45 = vector.load %arg12[%c0_33, %c0_34] : memref<1x1024xf32, #tpu.memory_space<vmem>>, vector<1x1024xf32>
    %46 = vector.broadcast %45 : vector<1x1024xf32> to vector<128x1024xf32>
    %47 = arith.addf %44, %46 : vector<128x1024xf32>
    %cst_35 = arith.constant 0.000000e+00 : f32
    %48 = vector.broadcast %cst_35 : f32 to vector<128x1024xf32>
    %49 = arith.maximumf %47, %48 : vector<128x1024xf32>
    %c0_36 = arith.constant 0 : index
    %c0_37 = arith.constant 0 : index
    %c0_38 = arith.constant 0 : index
    %50 = vector.load %arg14[%c0_36, %c0_37, %c0_38] : memref<1x1x1024xf32, #tpu.memory_space<vmem>>, vector<1x1x1024xf32>
    %51 = vector.shape_cast %50 : vector<1x1x1024xf32> to vector<1x1024xf32>
    %cst_39 = arith.constant dense<0xFF800000> : vector<1024xf32>
    %52 = vector.multi_reduction <maximumf>, %49, %cst_39 [0] : vector<128x1024xf32> to vector<1024xf32>
    %53 = vector.shape_cast %52 : vector<1024xf32> to vector<1x1024xf32>
    %54 = arith.maximumf %51, %53 : vector<1x1024xf32>
    %c0_40 = arith.constant 0 : index
    %c0_41 = arith.constant 0 : index
    %c0_42 = arith.constant 0 : index
    %55 = vector.load %arg14[%c0_40, %c0_41, %c0_42] : memref<1x1x1024xf32, #tpu.memory_space<vmem>>, vector<1x1x1024xf32>
    %56 = vector.shape_cast %55 : vector<1x1x1024xf32> to vector<1x1024xf32>
    %57 = vector.shape_cast %54 : vector<1x1024xf32> to vector<1x1x1024xf32>
    tpu.vector_store %arg14[%c0_40, %c0_41, %c0_42], %57 {strides = array<i32>} : memref<1x1x1024xf32, #tpu.memory_space<vmem>>, vector<1x1x1024xf32>,
    return
  }
  func.func @transform_0(%arg0: i32, %arg1: i32) -> (i32, i32, i32) {
    %c0_i32 = arith.constant 0 : i32
    %c0_i32_0 = arith.constant 0 : i32
    return %arg0, %arg1, %c0_i32 : i32, i32, i32
  }
  func.func @transform_1(%arg0: i32, %arg1: i32) -> (i32, i32, i32) {
    %c0_i32 = arith.constant 0 : i32
    %c0_i32_0 = arith.constant 0 : i32
    %c0_i32_1 = arith.constant 0 : i32
    return %arg0, %c0_i32, %c0_i32_0 : i32, i32, i32
  }
  func.func @transform_2(%arg0: i32, %arg1: i32) -> (i32, i32) {
    %c0_i32 = arith.constant 0 : i32
    %c0_i32_0 = arith.constant 0 : i32
    %c0_i32_1 = arith.constant 0 : i32
    return %c0_i32, %c0_i32_0 : i32, i32
  }
  func.func @transform_3(%arg0: i32, %arg1: i32) -> (i32, i32) {
    %c0_i32 = arith.constant 0 : i32
    %c0_i32_0 = arith.constant 0 : i32
    %c0_i32_1 = arith.constant 0 : i32
    return %c0_i32, %c0_i32_0 : i32, i32
  }
  func.func @transform_4(%arg0: i32, %arg1: i32) -> (i32, i32) {
    %c0_i32 = arith.constant 0 : i32
    %c0_i32_0 = arith.constant 0 : i32
    %c0_i32_1 = arith.constant 0 : i32
    return %c0_i32, %c0_i32_0 : i32, i32
  }
  func.func @transform_5(%arg0: i32, %arg1: i32) -> (i32, i32) {
    %c0_i32 = arith.constant 0 : i32
    %c0_i32_0 = arith.constant 0 : i32
    %c0_i32_1 = arith.constant 0 : i32
    return %c0_i32, %c0_i32_0 : i32, i32
  }
  func.func @transform_6(%arg0: i32, %arg1: i32) -> (i32, i32) {
    %c0_i32 = arith.constant 0 : i32
    %c0_i32_0 = arith.constant 0 : i32
    %c0_i32_1 = arith.constant 0 : i32
    return %c0_i32, %c0_i32_0 : i32, i32
  }
  func.func @transform_7(%arg0: i32, %arg1: i32) -> (i32, i32) {
    %c0_i32 = arith.constant 0 : i32
    %c0_i32_0 = arith.constant 0 : i32
    %c0_i32_1 = arith.constant 0 : i32
    return %c0_i32, %c0_i32_0 : i32, i32
  }
  func.func @transform_8(%arg0: i32, %arg1: i32) -> (i32, i32) {
    %c0_i32 = arith.constant 0 : i32
    %c0_i32_0 = arith.constant 0 : i32
    %c0_i32_1 = arith.constant 0 : i32
    return %c0_i32, %c0_i32_0 : i32, i32
  }
  func.func @transform_9(%arg0: i32, %arg1: i32) -> (i32, i32) {
    %c0_i32 = arith.constant 0 : i32
    %c0_i32_0 = arith.constant 0 : i32
    %c0_i32_1 = arith.constant 0 : i32
    return %c0_i32, %c0_i32_0 : i32, i32
  }
  func.func @transform_10(%arg0: i32, %arg1: i32) -> (i32, i32) {
    %c0_i32 = arith.constant 0 : i32
    %c0_i32_0 = arith.constant 0 : i32
    %c0_i32_1 = arith.constant 0 : i32
    return %c0_i32, %c0_i32_0 : i32, i32
  }
  func.func @transform_11(%arg0: i32, %arg1: i32) -> (i32, i32, i32) {
    %c0_i32 = arith.constant 0 : i32
    %c0_i32_0 = arith.constant 0 : i32
    return %arg0, %arg1, %c0_i32 : i32, i32, i32
  }
  func.func @transform_12(%arg0: i32, %arg1: i32) -> (i32, i32, i32) {
    %c0_i32 = arith.constant 0 : i32
    %c0_i32_0 = arith.constant 0 : i32
    %c0_i32_1 = arith.constant 0 : i32
    return %arg0, %c0_i32, %c0_i32_0 : i32, i32, i32
  }
}

module attributes {stable_mosaic.version = 11 : i64} {
  func.func @_mlp2_gmax_kernel(%arg0: i32, %arg1: i32, %arg2: memref<1x128x64xbf16, #tpu.memory_space<vmem>>, %arg3: memref<1x64x64xbf16, #tpu.memory_space<vmem>>, %arg4: memref<1x64xf32, #tpu.memory_space<vmem>>, %arg5: memref<64x128xbf16, #tpu.memory_space<vmem>>, %arg6: memref<1x128xf32, #tpu.memory_space<vmem>>, %arg7: memref<128x1024xbf16, #tpu.memory_space<vmem>>, %arg8: memref<1x1024xf32, #tpu.memory_space<vmem>>, %arg9: memref<1x1x1024xf32, #tpu.memory_space<vmem>>) attributes {dimension_semantics = [#tpu.dimension_semantics<parallel>, #tpu.dimension_semantics<arbitrary>], iteration_bounds = array<i64: 2, 1>, scalar_prefetch = 0 : i64, scratch_operands = 0 : i64, tpu.core_type = #tpu.core_type<tc>, window_params = [{transform_indices = @transform_0, window_bounds = array<i64: 1, 128, 64>}, {transform_indices = @transform_1, window_bounds = array<i64: 1, 64, 64>}, {pipeline_mode = #tpu.pipeline_mode<synchronous>, transform_indices = @transform_2, window_bounds = array<i64: 1, 64>}, {pipeline_mode = #tpu.pipeline_mode<synchronous>, transform_indices = @transform_3, window_bounds = array<i64: 64, 128>}, {pipeline_mode = #tpu.pipeline_mode<synchronous>, transform_indices = @transform_4, window_bounds = array<i64: 1, 128>}, {pipeline_mode = #tpu.pipeline_mode<synchronous>, transform_indices = @transform_5, window_bounds = array<i64: 128, 1024>}, {pipeline_mode = #tpu.pipeline_mode<synchronous>, transform_indices = @transform_6, window_bounds = array<i64: 1, 1024>}, {transform_indices = @transform_7, window_bounds = array<i64: 1, 1, 1024>}]} {
    %c0_i32 = arith.constant 0 : i32
    %0 = arith.cmpi eq, %arg1, %c0_i32 : i32
    %1 = arith.extui %0 : i1 to i32
    %c0_i32_0 = arith.constant 0 : i32
    %2 = arith.cmpi ne, %1, %c0_i32_0 : i32
    scf.if %2 {
      %cst_28 = arith.constant 0xFF800000 : f32
      %37 = vector.broadcast %cst_28 : f32 to vector<1x1x1024xf32>
      %c0_29 = arith.constant 0 : index
      %c0_30 = arith.constant 0 : index
      %c0_31 = arith.constant 0 : index
      %38 = vector.load %arg9[%c0_29, %c0_30, %c0_31] : memref<1x1x1024xf32, #tpu.memory_space<vmem>>, vector<1x1x1024xf32>
      tpu.vector_store %arg9[%c0_29, %c0_30, %c0_31], %37 {strides = array<i32>} : memref<1x1x1024xf32, #tpu.memory_space<vmem>>, vector<1x1x1024xf32>,
    } else {
    }
    %c0 = arith.constant 0 : index
    %c0_1 = arith.constant 0 : index
    %c0_2 = arith.constant 0 : index
    %3 = vector.load %arg2[%c0, %c0_1, %c0_2] : memref<1x128x64xbf16, #tpu.memory_space<vmem>>, vector<1x128x64xbf16>
    %4 = vector.shape_cast %3 : vector<1x128x64xbf16> to vector<128x64xbf16>
    %c0_3 = arith.constant 0 : index
    %c0_4 = arith.constant 0 : index
    %c0_5 = arith.constant 0 : index
    %5 = vector.load %arg3[%c0_3, %c0_4, %c0_5] : memref<1x64x64xbf16, #tpu.memory_space<vmem>>, vector<1x64x64xbf16>
    %6 = vector.shape_cast %5 : vector<1x64x64xbf16> to vector<64x64xbf16>
    %cst = arith.constant dense<0.000000e+00> : vector<128x64xf32>
    %7 = tpu.matmul %4, %6, %cst {dimension_numbers = #tpu.dot_dimension_numbers<[1], [0], [0], [1], [0, 0, 1, 1], [], []>} : vector<128x64xbf16>, vector<64x64xbf16>, vector<128x64xf32> -> vector<128x64xf32>
    %c0_6 = arith.constant 0 : index
    %c0_7 = arith.constant 0 : index
    %8 = vector.load %arg4[%c0_6, %c0_7] : memref<1x64xf32, #tpu.memory_space<vmem>>, vector<1x64xf32>
    %9 = vector.broadcast %8 : vector<1x64xf32> to vector<128x64xf32>
    %10 = arith.addf %7, %9 : vector<128x64xf32>
    %cst_8 = arith.constant 0.000000e+00 : f32
    %11 = vector.broadcast %cst_8 : f32 to vector<128x64xf32>
    %12 = arith.maximumf %10, %11 : vector<128x64xf32>
    %c0_9 = arith.constant 0 : index
    %c0_10 = arith.constant 0 : index
    %13 = vector.load %arg5[%c0_9, %c0_10] : memref<64x128xbf16, #tpu.memory_space<vmem>>, vector<64x128xbf16>
    %14 = arith.truncf %12 : vector<128x64xf32> to vector<128x64xbf16>
    %cst_11 = arith.constant dense<0.000000e+00> : vector<128x128xf32>
    %15 = tpu.matmul %14, %13, %cst_11 {dimension_numbers = #tpu.dot_dimension_numbers<[1], [0], [0], [1], [0, 0, 1, 1], [], []>} : vector<128x64xbf16>, vector<64x128xbf16>, vector<128x128xf32> -> vector<128x128xf32>
    %c0_12 = arith.constant 0 : index
    %c0_13 = arith.constant 0 : index
    %16 = vector.load %arg6[%c0_12, %c0_13] : memref<1x128xf32, #tpu.memory_space<vmem>>, vector<1x128xf32>
    %17 = vector.broadcast %16 : vector<1x128xf32> to vector<128x128xf32>
    %18 = arith.addf %15, %17 : vector<128x128xf32>
    %cst_14 = arith.constant 0.000000e+00 : f32
    %19 = vector.broadcast %cst_14 : f32 to vector<128x128xf32>
    %20 = arith.maximumf %18, %19 : vector<128x128xf32>
    %c0_15 = arith.constant 0 : index
    %c0_16 = arith.constant 0 : index
    %21 = vector.load %arg7[%c0_15, %c0_16] : memref<128x1024xbf16, #tpu.memory_space<vmem>>, vector<128x1024xbf16>
    %22 = arith.truncf %20 : vector<128x128xf32> to vector<128x128xbf16>
    %cst_17 = arith.constant dense<0.000000e+00> : vector<128x1024xf32>
    %23 = tpu.matmul %22, %21, %cst_17 {dimension_numbers = #tpu.dot_dimension_numbers<[1], [0], [0], [1], [0, 0, 1, 1], [], []>} : vector<128x128xbf16>, vector<128x1024xbf16>, vector<128x1024xf32> -> vector<128x1024xf32>
    %c0_18 = arith.constant 0 : index
    %c0_19 = arith.constant 0 : index
    %24 = vector.load %arg8[%c0_18, %c0_19] : memref<1x1024xf32, #tpu.memory_space<vmem>>, vector<1x1024xf32>
    %25 = vector.broadcast %24 : vector<1x1024xf32> to vector<128x1024xf32>
    %26 = arith.addf %23, %25 : vector<128x1024xf32>
    %cst_20 = arith.constant 0.000000e+00 : f32
    %27 = vector.broadcast %cst_20 : f32 to vector<128x1024xf32>
    %28 = arith.maximumf %26, %27 : vector<128x1024xf32>
    %c0_21 = arith.constant 0 : index
    %c0_22 = arith.constant 0 : index
    %c0_23 = arith.constant 0 : index
    %29 = vector.load %arg9[%c0_21, %c0_22, %c0_23] : memref<1x1x1024xf32, #tpu.memory_space<vmem>>, vector<1x1x1024xf32>
    %30 = vector.shape_cast %29 : vector<1x1x1024xf32> to vector<1x1024xf32>
    %cst_24 = arith.constant dense<0xFF800000> : vector<1024xf32>
    %31 = vector.multi_reduction <maximumf>, %28, %cst_24 [0] : vector<128x1024xf32> to vector<1024xf32>
    %32 = vector.shape_cast %31 : vector<1024xf32> to vector<1x1024xf32>
    %33 = arith.maximumf %30, %32 : vector<1x1024xf32>
    %c0_25 = arith.constant 0 : index
    %c0_26 = arith.constant 0 : index
    %c0_27 = arith.constant 0 : index
    %34 = vector.load %arg9[%c0_25, %c0_26, %c0_27] : memref<1x1x1024xf32, #tpu.memory_space<vmem>>, vector<1x1x1024xf32>
    %35 = vector.shape_cast %34 : vector<1x1x1024xf32> to vector<1x1024xf32>
    %36 = vector.shape_cast %33 : vector<1x1024xf32> to vector<1x1x1024xf32>
    tpu.vector_store %arg9[%c0_25, %c0_26, %c0_27], %36 {strides = array<i32>} : memref<1x1x1024xf32, #tpu.memory_space<vmem>>, vector<1x1x1024xf32>,
    return
  }
  func.func @transform_0(%arg0: i32, %arg1: i32) -> (i32, i32, i32) {
    %c0_i32 = arith.constant 0 : i32
    %c0_i32_0 = arith.constant 0 : i32
    return %arg0, %arg1, %c0_i32 : i32, i32, i32
  }
  func.func @transform_1(%arg0: i32, %arg1: i32) -> (i32, i32, i32) {
    %c0_i32 = arith.constant 0 : i32
    %c0_i32_0 = arith.constant 0 : i32
    %c0_i32_1 = arith.constant 0 : i32
    return %arg0, %c0_i32, %c0_i32_0 : i32, i32, i32
  }
  func.func @transform_2(%arg0: i32, %arg1: i32) -> (i32, i32) {
    %c0_i32 = arith.constant 0 : i32
    %c0_i32_0 = arith.constant 0 : i32
    %c0_i32_1 = arith.constant 0 : i32
    return %c0_i32, %c0_i32_0 : i32, i32
  }
  func.func @transform_3(%arg0: i32, %arg1: i32) -> (i32, i32) {
    %c0_i32 = arith.constant 0 : i32
    %c0_i32_0 = arith.constant 0 : i32
    %c0_i32_1 = arith.constant 0 : i32
    return %c0_i32, %c0_i32_0 : i32, i32
  }
  func.func @transform_4(%arg0: i32, %arg1: i32) -> (i32, i32) {
    %c0_i32 = arith.constant 0 : i32
    %c0_i32_0 = arith.constant 0 : i32
    %c0_i32_1 = arith.constant 0 : i32
    return %c0_i32, %c0_i32_0 : i32, i32
  }
  func.func @transform_5(%arg0: i32, %arg1: i32) -> (i32, i32) {
    %c0_i32 = arith.constant 0 : i32
    %c0_i32_0 = arith.constant 0 : i32
    %c0_i32_1 = arith.constant 0 : i32
    return %c0_i32, %c0_i32_0 : i32, i32
  }
  func.func @transform_6(%arg0: i32, %arg1: i32) -> (i32, i32) {
    %c0_i32 = arith.constant 0 : i32
    %c0_i32_0 = arith.constant 0 : i32
    %c0_i32_1 = arith.constant 0 : i32
    return %c0_i32, %c0_i32_0 : i32, i32
  }
  func.func @transform_7(%arg0: i32, %arg1: i32) -> (i32, i32, i32) {
    %c0_i32 = arith.constant 0 : i32
    %c0_i32_0 = arith.constant 0 : i32
    %c0_i32_1 = arith.constant 0 : i32
    return %arg0, %c0_i32, %c0_i32_0 : i32, i32, i32
  }
}

module attributes {stable_mosaic.version = 11 : i64} {
  func.func @_seg_head_kernel(%arg0: i32, %arg1: i32, %arg2: memref<1x128x64xbf16, #tpu.memory_space<vmem>>, %arg3: memref<1x64x512xbf16, #tpu.memory_space<vmem>>, %arg4: memref<1x1x512xf32, #tpu.memory_space<vmem>>, %arg5: memref<512x256xbf16, #tpu.memory_space<vmem>>, %arg6: memref<1x256xf32, #tpu.memory_space<vmem>>, %arg7: memref<256x128xbf16, #tpu.memory_space<vmem>>, %arg8: memref<1x128xf32, #tpu.memory_space<vmem>>, %arg9: memref<128x128xbf16, #tpu.memory_space<vmem>>, %arg10: memref<1x128xf32, #tpu.memory_space<vmem>>, %arg11: memref<1x128x128xf32, #tpu.memory_space<vmem>>) attributes {dimension_semantics = [#tpu.dimension_semantics<parallel>, #tpu.dimension_semantics<parallel>], iteration_bounds = array<i64: 2, 1>, scalar_prefetch = 0 : i64, scratch_operands = 0 : i64, tpu.core_type = #tpu.core_type<tc>, window_params = [{transform_indices = @transform_0, window_bounds = array<i64: 1, 128, 64>}, {transform_indices = @transform_1, window_bounds = array<i64: 1, 64, 512>}, {transform_indices = @transform_2, window_bounds = array<i64: 1, 1, 512>}, {pipeline_mode = #tpu.pipeline_mode<synchronous>, transform_indices = @transform_3, window_bounds = array<i64: 512, 256>}, {pipeline_mode = #tpu.pipeline_mode<synchronous>, transform_indices = @transform_4, window_bounds = array<i64: 1, 256>}, {pipeline_mode = #tpu.pipeline_mode<synchronous>, transform_indices = @transform_5, window_bounds = array<i64: 256, 128>}, {pipeline_mode = #tpu.pipeline_mode<synchronous>, transform_indices = @transform_6, window_bounds = array<i64: 1, 128>}, {pipeline_mode = #tpu.pipeline_mode<synchronous>, transform_indices = @transform_7, window_bounds = array<i64: 128, 128>}, {pipeline_mode = #tpu.pipeline_mode<synchronous>, transform_indices = @transform_8, window_bounds = array<i64: 1, 128>}, {transform_indices = @transform_9, window_bounds = array<i64: 1, 128, 128>}]} {
    %c0 = arith.constant 0 : index
    %c0_0 = arith.constant 0 : index
    %c0_1 = arith.constant 0 : index
    %0 = vector.load %arg2[%c0, %c0_0, %c0_1] : memref<1x128x64xbf16, #tpu.memory_space<vmem>>, vector<1x128x64xbf16>
    %1 = vector.shape_cast %0 : vector<1x128x64xbf16> to vector<128x64xbf16>
    %c0_2 = arith.constant 0 : index
    %c0_3 = arith.constant 0 : index
    %c0_4 = arith.constant 0 : index
    %2 = vector.load %arg3[%c0_2, %c0_3, %c0_4] : memref<1x64x512xbf16, #tpu.memory_space<vmem>>, vector<1x64x512xbf16>
    %3 = vector.shape_cast %2 : vector<1x64x512xbf16> to vector<64x512xbf16>
    %cst = arith.constant dense<0.000000e+00> : vector<128x512xf32>
    %4 = tpu.matmul %1, %3, %cst {dimension_numbers = #tpu.dot_dimension_numbers<[1], [0], [0], [1], [0, 0, 1, 1], [], []>} : vector<128x64xbf16>, vector<64x512xbf16>, vector<128x512xf32> -> vector<128x512xf32>
    %c0_5 = arith.constant 0 : index
    %c0_6 = arith.constant 0 : index
    %c0_7 = arith.constant 0 : index
    %5 = vector.load %arg4[%c0_5, %c0_6, %c0_7] : memref<1x1x512xf32, #tpu.memory_space<vmem>>, vector<1x1x512xf32>
    %6 = vector.shape_cast %5 : vector<1x1x512xf32> to vector<1x512xf32>
    %7 = vector.broadcast %6 : vector<1x512xf32> to vector<128x512xf32>
    %8 = arith.addf %4, %7 : vector<128x512xf32>
    %cst_8 = arith.constant 0.000000e+00 : f32
    %9 = vector.broadcast %cst_8 : f32 to vector<128x512xf32>
    %10 = arith.maximumf %8, %9 : vector<128x512xf32>
    %c0_9 = arith.constant 0 : index
    %c0_10 = arith.constant 0 : index
    %11 = vector.load %arg5[%c0_9, %c0_10] : memref<512x256xbf16, #tpu.memory_space<vmem>>, vector<512x256xbf16>
    %12 = arith.truncf %10 : vector<128x512xf32> to vector<128x512xbf16>
    %cst_11 = arith.constant dense<0.000000e+00> : vector<128x256xf32>
    %13 = tpu.matmul %12, %11, %cst_11 {dimension_numbers = #tpu.dot_dimension_numbers<[1], [0], [0], [1], [0, 0, 1, 1], [], []>} : vector<128x512xbf16>, vector<512x256xbf16>, vector<128x256xf32> -> vector<128x256xf32>
    %c0_12 = arith.constant 0 : index
    %c0_13 = arith.constant 0 : index
    %14 = vector.load %arg6[%c0_12, %c0_13] : memref<1x256xf32, #tpu.memory_space<vmem>>, vector<1x256xf32>
    %15 = vector.broadcast %14 : vector<1x256xf32> to vector<128x256xf32>
    %16 = arith.addf %13, %15 : vector<128x256xf32>
    %cst_14 = arith.constant 0.000000e+00 : f32
    %17 = vector.broadcast %cst_14 : f32 to vector<128x256xf32>
    %18 = arith.maximumf %16, %17 : vector<128x256xf32>
    %c0_15 = arith.constant 0 : index
    %c0_16 = arith.constant 0 : index
    %19 = vector.load %arg7[%c0_15, %c0_16] : memref<256x128xbf16, #tpu.memory_space<vmem>>, vector<256x128xbf16>
    %20 = arith.truncf %18 : vector<128x256xf32> to vector<128x256xbf16>
    %cst_17 = arith.constant dense<0.000000e+00> : vector<128x128xf32>
    %21 = tpu.matmul %20, %19, %cst_17 {dimension_numbers = #tpu.dot_dimension_numbers<[1], [0], [0], [1], [0, 0, 1, 1], [], []>} : vector<128x256xbf16>, vector<256x128xbf16>, vector<128x128xf32> -> vector<128x128xf32>
    %c0_18 = arith.constant 0 : index
    %c0_19 = arith.constant 0 : index
    %22 = vector.load %arg8[%c0_18, %c0_19] : memref<1x128xf32, #tpu.memory_space<vmem>>, vector<1x128xf32>
    %23 = vector.broadcast %22 : vector<1x128xf32> to vector<128x128xf32>
    %24 = arith.addf %21, %23 : vector<128x128xf32>
    %cst_20 = arith.constant 0.000000e+00 : f32
    %25 = vector.broadcast %cst_20 : f32 to vector<128x128xf32>
    %26 = arith.maximumf %24, %25 : vector<128x128xf32>
    %c0_21 = arith.constant 0 : index
    %c0_22 = arith.constant 0 : index
    %27 = vector.load %arg9[%c0_21, %c0_22] : memref<128x128xbf16, #tpu.memory_space<vmem>>, vector<128x128xbf16>
    %28 = arith.truncf %26 : vector<128x128xf32> to vector<128x128xbf16>
    %cst_23 = arith.constant dense<0.000000e+00> : vector<128x128xf32>
    %29 = tpu.matmul %28, %27, %cst_23 {dimension_numbers = #tpu.dot_dimension_numbers<[1], [0], [0], [1], [0, 0, 1, 1], [], []>} : vector<128x128xbf16>, vector<128x128xbf16>, vector<128x128xf32> -> vector<128x128xf32>
    %c0_24 = arith.constant 0 : index
    %c0_25 = arith.constant 0 : index
    %30 = vector.load %arg10[%c0_24, %c0_25] : memref<1x128xf32, #tpu.memory_space<vmem>>, vector<1x128xf32>
    %31 = vector.broadcast %30 : vector<1x128xf32> to vector<128x128xf32>
    %32 = arith.addf %29, %31 : vector<128x128xf32>
    %c0_26 = arith.constant 0 : index
    %c0_27 = arith.constant 0 : index
    %c0_28 = arith.constant 0 : index
    %33 = vector.load %arg11[%c0_26, %c0_27, %c0_28] : memref<1x128x128xf32, #tpu.memory_space<vmem>>, vector<1x128x128xf32>
    %34 = vector.shape_cast %33 : vector<1x128x128xf32> to vector<128x128xf32>
    %35 = vector.shape_cast %32 : vector<128x128xf32> to vector<1x128x128xf32>
    tpu.vector_store %arg11[%c0_26, %c0_27, %c0_28], %35 {strides = array<i32>} : memref<1x128x128xf32, #tpu.memory_space<vmem>>, vector<1x128x128xf32>,
    return
  }
  func.func @transform_0(%arg0: i32, %arg1: i32) -> (i32, i32, i32) {
    %c0_i32 = arith.constant 0 : i32
    %c0_i32_0 = arith.constant 0 : i32
    return %arg0, %arg1, %c0_i32 : i32, i32, i32
  }
  func.func @transform_1(%arg0: i32, %arg1: i32) -> (i32, i32, i32) {
    %c0_i32 = arith.constant 0 : i32
    %c0_i32_0 = arith.constant 0 : i32
    %c0_i32_1 = arith.constant 0 : i32
    return %arg0, %c0_i32, %c0_i32_0 : i32, i32, i32
  }
  func.func @transform_2(%arg0: i32, %arg1: i32) -> (i32, i32, i32) {
    %c0_i32 = arith.constant 0 : i32
    %c0_i32_0 = arith.constant 0 : i32
    %c0_i32_1 = arith.constant 0 : i32
    return %arg0, %c0_i32, %c0_i32_0 : i32, i32, i32
  }
  func.func @transform_3(%arg0: i32, %arg1: i32) -> (i32, i32) {
    %c0_i32 = arith.constant 0 : i32
    %c0_i32_0 = arith.constant 0 : i32
    %c0_i32_1 = arith.constant 0 : i32
    return %c0_i32, %c0_i32_0 : i32, i32
  }
  func.func @transform_4(%arg0: i32, %arg1: i32) -> (i32, i32) {
    %c0_i32 = arith.constant 0 : i32
    %c0_i32_0 = arith.constant 0 : i32
    %c0_i32_1 = arith.constant 0 : i32
    return %c0_i32, %c0_i32_0 : i32, i32
  }
  func.func @transform_5(%arg0: i32, %arg1: i32) -> (i32, i32) {
    %c0_i32 = arith.constant 0 : i32
    %c0_i32_0 = arith.constant 0 : i32
    %c0_i32_1 = arith.constant 0 : i32
    return %c0_i32, %c0_i32_0 : i32, i32
  }
  func.func @transform_6(%arg0: i32, %arg1: i32) -> (i32, i32) {
    %c0_i32 = arith.constant 0 : i32
    %c0_i32_0 = arith.constant 0 : i32
    %c0_i32_1 = arith.constant 0 : i32
    return %c0_i32, %c0_i32_0 : i32, i32
  }
  func.func @transform_7(%arg0: i32, %arg1: i32) -> (i32, i32) {
    %c0_i32 = arith.constant 0 : i32
    %c0_i32_0 = arith.constant 0 : i32
    %c0_i32_1 = arith.constant 0 : i32
    return %c0_i32, %c0_i32_0 : i32, i32
  }
  func.func @transform_8(%arg0: i32, %arg1: i32) -> (i32, i32) {
    %c0_i32 = arith.constant 0 : i32
    %c0_i32_0 = arith.constant 0 : i32
    %c0_i32_1 = arith.constant 0 : i32
    return %c0_i32, %c0_i32_0 : i32, i32
  }
  func.func @transform_9(%arg0: i32, %arg1: i32) -> (i32, i32, i32) {
    %c0_i32 = arith.constant 0 : i32
    %c0_i32_0 = arith.constant 0 : i32
    return %arg0, %arg1, %c0_i32 : i32, i32, i32
  }
}

</mosaic_0001>

<bundles_post_ra>
// kernel: pointnet_part_seg_forward.4
= control target key start
LH: loop header
LB: loop body
LE: loop exit
PB: predicated region body
PF: predicated region fallthrough
CT: control target
= control target key end

     0   :  { %12 = vsyncpa [#allocation3], 0  ;;  %s3195_s0 = inlined_call_operand.vmem [shape: f32[2,128,8], index: 0, kind: input, shape index: {}]   ;;  %s3196_s1 = inlined_call_operand.hbm [shape: bf16[8,64], index: 1, kind: input, shape index: {}]   ;;  %s3197_s2 = inlined_call_operand.hbm [shape: f32[1,64], index: 2, kind: input, shape index: {}]   ;;  %s3198_s3 = inlined_call_operand.hbm [shape: bf16[64,128], index: 3, kind: input, shape index: {}]   ;;  %s3199_s4 = inlined_call_operand.hbm [shape: f32[1,128], index: 4, kind: input, shape index: {}]   ;;  %s3200_s5 = inlined_call_operand.hbm [shape: bf16[128,1024], index: 5, kind: input, shape index: {}]   ;;  %s3201_s6 = inlined_call_operand.hbm [shape: f32[1,1024], index: 6, kind: input, shape index: {}]   ;;  %s3202_s7 = inlined_call_operand.vmem [shape: f32[2,1,1024], index: 7, kind: output, shape index: {}]  }
   0x1   :  { %13 = vsyncpa [#allocation5], 0 }
   0x2   :  { %14 = vsyncpa [#allocation8], 0 }
   0x3   :  { %15 = vsyncpa [#allocation11], 0  ;;  %s2650_s24 = smov 0   ;;  %s2652_s25 = smov 0  }
   0x4   :  { %s2654_s26 = smov 0  }
   0x5 LB: > { %s2598_s27 = smov [#allocation4]   ;;  %s2121_s29 = sadd.s32 4294967295, %s2596_s26   ;;  %s2596_s26 = sphi %s2654_s26, %s21_s26   ;;  %s2592_s25 = sphi %s2652_s25, %s3215_s25   ;;  %s2588_s24 = sphi %s2650_s24, %s3214_s24  }
   0x6   : > { %s242_s28 = sshll.u32 %s2598_s27, 4  ;;  %p2123_p0 = scmp.ge.s32.totalorder %s2596_s26, 1  ;;  %s243_s28 = int_to_ptr.vmem [resolvable:$true] %s242_s28 }
   0x7   : > { %p218_p1 = scmp.lt.s32.totalorder %s2596_s26, 3  ;;  %p2668_p2 = scmp.eq.s32.totalorder %s2121_s29, 0 }
   0x8   : > { %s2599_s9 = smov [#allocation7]   ;;  %s33_s12 = sadd.s32 1, %s2592_s25 }
   0x9   : > { %s3206_s30 = scalar_select %p2668_p2, 1, 0 }
   0xa   : > { %p2672_p3 = pnand %p2123_p0, %p218_p1  ;;  %s266_s10 = sshll.u32 %s2599_s9, 4  ;;  %s2678_s10 = int_to_ptr.vmem [resolvable:$true] %s266_s10 }
   0xb   : > { %p2689_p6 = scmp.ge.s32.totalorder %s33_s12, 2  ;;  %s2390_s16 = scalar_lea.hbm %s3197_s2, 16 }
   0xc   : > { %s3207_s8 = scalar_select %p2672_p3, 1, 0 }
   0xd   : > { %p2318_p4 = pneg %p2672_p3  ;;  %p2391_p7 = scmp.ne.s32.totalorder %s3197_s2, %s2390_s16 }
   0xe   : > { %s3209_s13 = scalar_select %p2689_p6, 1, 0 }
   0xf   : > { %p2682_p5 = pnand %p2668_p2, %p2318_p4  ;;  %p2397_p11 = scmp.lt.u32.totalorder %s2390_s16, %s3197_s2 }
  0x11   : > { %p2701_p8 = pneg %p2682_p5 }
  0x13   : > { %p2393_p9 = pnand %p2701_p8, %p2391_p7 }
  0x15   : > { %p2394_p10 = pneg %p2393_p9 }
  0x17   : > { %p2399_p12 = pnand %p2397_p11, %p2394_p10 }
  0x19   : > { %2402 = shalt.err (!%p2399_p12)
}
  0x1a   : > { %s2403_s22 = scalar_lea.vmem %s243_s28, 16  ;;  %s2410_s23 = scalar_lea.vmem %s243_s28, 32 }
  0x1b   : > { %p2404_p13 = scmp.ne.s32.totalorder %s243_s28, %s2403_s22  ;;  %p2411_p4 = scmp.lt.s32.totalorder %s243_s28, %s243_s28 }
  0x1c   : > { %p2412_p2 = scmp.lt.s32.totalorder %s2410_s23, %s2403_s22 }
  0x1d   : > { %p2406_p0 = pnand %p2404_p13, %p2701_p8 }
  0x1e   : > { %p2413_p3 = por %p2412_p2, %p2411_p4 }
  0x1f   : > { %p2407_p1 = pneg %p2406_p0 }
  0x21   : > { %p2414_p6 = pnand %p2413_p3, %p2407_p1 }
  0x23   : > { %2417 = shalt.err (!%p2414_p6)
}
  0x24   : > { %2324 = dma.hbm_to_vmem [thread:$0]  (!%p2682_p5), %s3197_s2, 16, %s243_s28, [#allocation5]  }
  0x25   : > { %s2418_s15 = scalar_lea.hbm %s3199_s4, 16 }
  0x26   : > { %p2419_p7 = scmp.ne.s32.totalorder %s3199_s4, %s2418_s15  ;;  %p2425_p3 = scmp.lt.u32.totalorder %s2418_s15, %s3199_s4 }
  0x28   : > { %p2421_p9 = pnand %p2419_p7, %p2701_p8 }
  0x2a   : > { %p2422_p2 = pneg %p2421_p9 }
  0x2c   : > { %p2427_p6 = pnand %p2425_p3, %p2422_p2 }
  0x2e   : > { %2430 = shalt.err (!%p2427_p6)
}
  0x2f   : > { %s2431_s28 = scalar_lea.vmem %s2678_s10, 16  ;;  %s2438_s21 = scalar_lea.vmem %s2678_s10, 32 }
  0x30   : > { %p2432_p10 = scmp.ne.s32.totalorder %s2678_s10, %s2431_s28  ;;  %p2439_p13 = scmp.lt.s32.totalorder %s2678_s10, %s2678_s10 }
  0x31   : > { %p2440_p0 = scmp.lt.s32.totalorder %s2438_s21, %s2431_s28 }
  0x32   : > { %p2434_p11 = pnand %p2432_p10, %p2701_p8 }
  0x33   : > { %p2441_p1 = por %p2440_p0, %p2439_p13 }
  0x34   : > { %p2435_p12 = pneg %p2434_p11 }
  0x36   : > { %p2442_p4 = pnand %p2441_p1, %p2435_p12 }
  0x38   : > { %2445 = shalt.err (!%p2442_p4)
}
  0x39   : > { %2330 = dma.hbm_to_vmem [thread:$0]  (!%p2682_p5), %s3199_s4, 16, %s2678_s10, [#allocation8]  }
  0x3a   : > { %p3211_p7 = scmp.ne.s32.totalorder %s3209_s13, 0  ;;  %s2600_s27 = smov [#allocation2]  }
  0x3b   : > { %s231_s29 = sshll.u32 %s2600_s27, 4  ;;  %s2601_s9 = smov [#allocation6]   ;;  %s232_s29 = int_to_ptr.vmem [resolvable:$true] %s231_s29 }
  0x3c   : > { %s3217_s12 = smov (%p3211_p7, %s33_s12), 0  ;;  %s252_s14 = sshll.u32 %s2601_s9, 4  ;;  %s253_s14 = int_to_ptr.vmem [resolvable:$true] %s252_s14 }
  0x3d   : > { %s2446_s17 = scalar_lea.hbm %s3196_s1, 64 }
  0x3e   : > { %p2447_p9 = scmp.ne.s32.totalorder %s3196_s1, %s2446_s17  ;;  %p2453_p6 = scmp.lt.u32.totalorder %s2446_s17, %s3196_s1 }
  0x40   : > { %p2449_p2 = pnand %p2447_p9, %p2701_p8 }
  0x42   : > { %p2450_p3 = pneg %p2449_p2 }
  0x44   : > { %p2455_p10 = pnand %p2453_p6, %p2450_p3 }
  0x46   : > { %2458 = shalt.err (!%p2455_p10)
}
  0x47   : > { %s2459_s28 = scalar_lea.vmem %s232_s29, 64  ;;  %p2467_p0 = scmp.lt.s32.totalorder %s232_s29, %s232_s29 }
  0x48   : > { %p2460_p11 = scmp.ne.s32.totalorder %s232_s29, %s2459_s28  ;;  %p2468_p1 = scmp.lt.s32.totalorder %s2459_s28, %s2459_s28 }
  0x4a   : > { %p2462_p12 = pnand %p2460_p11, %p2701_p8  ;;  %p2469_p4 = por %p2468_p1, %p2467_p0 }
  0x4c   : > { %p2463_p13 = pneg %p2462_p12 }
  0x4e   : > { %p2470_p7 = pnand %p2469_p4, %p2463_p13 }
  0x50   : > { %2473 = shalt.err (!%p2470_p7)
}
  0x51   : > { %2321 = dma.hbm_to_vmem [thread:$0]  (!%p2682_p5), %s3196_s1, 64, %s232_s29, [#allocation3]  }
  0x52   : > { %s2474_s9 = scalar_lea.hbm %s3198_s3, 512 }
  0x53   : > { %p2475_p9 = scmp.ne.s32.totalorder %s3198_s3, %s2474_s9  ;;  %p2481_p6 = scmp.lt.u32.totalorder %s2474_s9, %s3198_s3 }
  0x55   : > { %p2477_p2 = pnand %p2475_p9, %p2701_p8 }
  0x57   : > { %p2478_p3 = pneg %p2477_p2 }
  0x59   : > { %p2483_p10 = pnand %p2481_p6, %p2478_p3 }
  0x5b   : > { %2486 = shalt.err (!%p2483_p10)
}
  0x5c   : > { %s2487_s20 = scalar_lea.vmem %s253_s14, 512  ;;  %p2495_p0 = scmp.lt.s32.totalorder %s253_s14, %s253_s14 }
  0x5d   : > { %p2488_p11 = scmp.ne.s32.totalorder %s253_s14, %s2487_s20  ;;  %p2496_p1 = scmp.lt.s32.totalorder %s2487_s20, %s2487_s20 }
  0x5f   : > { %p2490_p12 = pnand %p2488_p11, %p2701_p8  ;;  %p2497_p4 = por %p2496_p1, %p2495_p0 }
  0x61   : > { %p2491_p13 = pneg %p2490_p12 }
  0x63   : > { %p2498_p7 = pnand %p2497_p4, %p2491_p13 }
  0x65   : > { %2501 = shalt.err (!%p2498_p7)
}
  0x66   : > { %s2602_s29 = smov 64   ;;  %s2603_s10 = smov 4  }
  0x67   : > { %2327 = dma.hbm_to_vmem [thread:$0]  (!%p2682_p5), %s3198_s3, 512, %s253_s14, [#allocation5], %s2602_s29, %s2602_s29, %s2603_s10  }
  0x68   : > { %s2604_s21 = smov [#allocation9]   ;;  %s2502_s9 = scalar_lea.hbm %s3200_s5, 8192 }
  0x69   : > { %s276_s22 = sshll.u32 %s2604_s21, 4  ;;  %p2503_p9 = scmp.ne.s32.totalorder %s3200_s5, %s2502_s9  ;;  %s277_s22 = int_to_ptr.vmem [resolvable:$true] %s276_s22 }
  0x6a   : > { %p2509_p6 = scmp.lt.u32.totalorder %s2502_s9, %s3200_s5 }
  0x6b   : > { %p2505_p2 = pnand %p2503_p9, %p2701_p8 }
  0x6d   : > { %p2506_p3 = pneg %p2505_p2 }
  0x6f   : > { %p2511_p10 = pnand %p2509_p6, %p2506_p3 }
  0x71   : > { %2514 = shalt.err (!%p2511_p10)
}
  0x72   : > { %s2515_s14 = scalar_lea.vmem %s277_s22, 8192  ;;  %p2523_p0 = scmp.lt.s32.totalorder %s277_s22, %s277_s22 }
  0x73   : > { %p2516_p11 = scmp.ne.s32.totalorder %s277_s22, %s2515_s14  ;;  %p2524_p1 = scmp.lt.s32.totalorder %s2515_s14, %s2515_s14 }
  0x75   : > { %p2518_p12 = pnand %p2516_p11, %p2701_p8  ;;  %p2525_p4 = por %p2524_p1, %p2523_p0 }
  0x77   : > { %p2519_p13 = pneg %p2518_p12 }
  0x79   : > { %p2526_p7 = pnand %p2525_p4, %p2519_p13 }
  0x7b   : > { %2529 = shalt.err (!%p2526_p7)
}
  0x7c   : > { %s2605_s20 = smov 512   ;;  %s2606_s29 = smov 32  }
  0x7d   : > { %2333 = dma.hbm_to_vmem [thread:$0]  (!%p2682_p5), %s3200_s5, 8192, %s277_s22, [#allocation8], %s2605_s20, %s2605_s20, %s2606_s29  }
  0x7e   : > { %s2607_s28 = smov [#allocation10]   ;;  %s2530_s9 = scalar_lea.hbm %s3201_s6, 128 }
  0x7f   : > { %s290_s21 = sshll.u32 %s2607_s28, 4  ;;  %p2531_p9 = scmp.ne.s32.totalorder %s3201_s6, %s2530_s9  ;;  %s291_s21 = int_to_ptr.vmem [resolvable:$true] %s290_s21 }
  0x80   : > { %p2537_p6 = scmp.lt.u32.totalorder %s2530_s9, %s3201_s6 }
  0x81   : > { %p2533_p2 = pnand %p2531_p9, %p2701_p8 }
  0x83   : > { %p2534_p3 = pneg %p2533_p2 }
  0x85   : > { %p2539_p10 = pnand %p2537_p6, %p2534_p3 }
  0x87   : > { %2542 = shalt.err (!%p2539_p10)
}
  0x88   : > { %s2543_s22 = scalar_lea.vmem %s291_s21, 128  ;;  %p2551_p0 = scmp.lt.s32.totalorder %s291_s21, %s291_s21 }
  0x89   : > { %p2544_p11 = scmp.ne.s32.totalorder %s291_s21, %s2543_s22  ;;  %p2552_p1 = scmp.lt.s32.totalorder %s2543_s22, %s2543_s22 }
  0x8b   : > { %p2546_p12 = pnand %p2544_p11, %p2701_p8  ;;  %p2553_p4 = por %p2552_p1, %p2551_p0 }
  0x8d   : > { %p2547_p13 = pneg %p2546_p12 }
  0x8f   : > { %p2554_p7 = pnand %p2553_p4, %p2547_p13 }
  0x91   : > { %2557 = shalt.err (!%p2554_p7)
}
  0x92   : > { %2336 = dma.hbm_to_vmem [thread:$0]  (!%p2682_p5), %s3201_s6, 128, %s291_s21, [#allocation11]  }
  0x93   : > { %p3212_p9 = scmp.ne.s32.totalorder %s3207_s8, 0 }
  0x94   : > { %p3213_p2 = scmp.ne.s32.totalorder (!%p3212_p9), %s3206_s30, 0 }
  0x95   : > { %316 = sbr.rel (%p3212_p9) target bundleno = 979 (0x3d3), region = 48 }
  0x9c   : > { %2571 = dma.done.wait (%p3213_p2), [#allocation3], 64  }
  0x9d   : > { %2573 = vsyncadd (%p3213_p2), [#allocation3], 4294967232 }
  0x9e   : > { %2575 = dma.done.wait (%p3213_p2), [#allocation5], 528  }
  0x9f   : > { %2577 = vsyncadd (%p3213_p2), [#allocation5], 4294966768 }
  0xa0   : > { %2579 = dma.done.wait (%p3213_p2), [#allocation8], 8208  }
  0xa1   : > { %2581 = vsyncadd (%p3213_p2), [#allocation8], 4294959088 }
  0xa2   : > { %2583 = dma.done.wait (%p3213_p2), [#allocation11], 128  }
  0xa3   : > { %2585 = vsyncadd (%p3213_p2), [#allocation11], 4294967168  ;;  %p372_p5 = scmp.lt.s32.totalorder %s2588_s24, 1  ;;  %vm448_vm0 = vcmask 1043456   ;;  %v407_v0 = vld [vmem:[#allocation2] sm:$0xf] }
  0xa4   : > { %vm423_vm1 = vcmask 64512   ;;  %2293 = vmatprep.subr.msk.bf16.mxu0 %vm448_vm0, %v407_v0  ;;  %v450_v3 = vsel %vm448_vm0, %v407_v0, 0  ;;  %v2386_v15 = vld [vmem:[#allocation6] sm:$0xff]   ;;  %v2387_v16 = vld [vmem:[#allocation6 + $0x8] sm:$0xff]   ;;  %v2388_v28 = vld [vmem:[#allocation6 + $0x10] sm:$0xff]   ;;  %vm612_vm2 = vcmask 523264  }
  0xa5   : > { %s3219_s24 = smov (!%p372_p5, %s2588_s24), 1  ;;  %2252 = vmatpush3.bf16.msra.mxu0 %v450_v3  ;;  %2269 = vmatprep.subr.bf16.mxu1 %v2386_v15  ;;  %v2389_v29 = vld [vmem:[#allocation6 + $0x18] sm:$0xff]   ;;  %v750_v30 = vld [vmem:[#allocation9] sm:$0xff]  ;;  %v2871_v32 = vld [vmem:[#allocation9 + $0x8] sm:$0xff] }
  0xa6   : > { %s2229_s8 = sshll.u32 %s3219_s24, 7  ;;  %2270 = vmatpush3.bf16.msra.mxu1 %v2386_v15  ;;  %v754_v31 = vld [vmem:[#allocation9 + $0x20] sm:$0xff]  ;;  %v2873_v35 = vld [vmem:[#allocation9 + $0x28] sm:$0xff]  ;;  %v2879_v58 = vld [vmem:[#allocation4] ss:$0 sm:$0xff]  ;;  %s2140_s30 = sshll.u32 %s3219_s24, 3 }
  0xa7   : > { %s2845_s29 = scalar_lea.vmem %s3195_s0, %s2229_s8  ;;  %2271 = vmatprep.subr.bf16.mxu1 %v2387_v16  ;;  %v2163_v33 = vcombine.low %v750_v30, %v754_v31  ;;  %v2164_v34 = vcombine.high %v750_v30, %v754_v31  ;;  %v758_v36 = vld [vmem:[#allocation9 + $0x40] sm:$0xff]  ;;  %v2165_v38 = vcombine.low %v2871_v32, %v2873_v35  ;;  %v2166_v39 = vcombine.high %v2871_v32, %v2873_v35  ;;  %s384_s28 = scalar_lea.vmem %s3202_s7, %s2140_s30 }
  0xa8   : > { %v391_v1 = vld [vmem:[%s2845_s29] sm:$0xff]  ;;  %v392_v2 = vld [vmem:[%s2845_s29 + $0x8] sm:$0xff]  ;;  %v393_v5 = vld [vmem:[%s2845_s29 + $0x10] sm:$0xff] }
  0xa9   : > { %v408_v4 = vpack.c.bf16 %v392_v2, %v391_v1  ;;  %v394_v6 = vld [vmem:[%s2845_s29 + $0x18] sm:$0xff]  ;;  %v395_v7 = vld [vmem:[%s2845_s29 + $0x20] sm:$0xff]  ;;  %v396_v9 = vld [vmem:[%s2845_s29 + $0x28] sm:$0xff]  ;;  %1184 = vmatprep.subr.bf16.mxu0 %v2164_v34 }
  0xaa   : > { %v409_v8 = vpack.c.bf16 %v394_v6, %v393_v5  ;;  %v410_v10 = vpack.c.bf16 %v396_v9, %v395_v7  ;;  %v397_v11 = vld [vmem:[%s2845_s29 + $0x30] sm:$0xff]  ;;  %v398_v12 = vld [vmem:[%s2845_s29 + $0x38] sm:$0xff]  ;;  %v399_v13 = vld [vmem:[%s2845_s29 + $0x40] sm:$0xff]  ;;  %2272 = vmatpush3.bf16.msra.mxu1 %v2387_v16 }
  0xab   : > { %2253 = vmatprep.mubr.msk.bf16.mxu0 %vm423_vm1, %v408_v4  ;;  %v400_v14 = vld [vmem:[%s2845_s29 + $0x48] sm:$0xff]  ;;  %v411_v17 = vpack.c.bf16 %v398_v12, %v397_v11  ;;  %v401_v19 = vld [vmem:[%s2845_s29 + $0x50] sm:$0xff]  ;;  %v402_v20 = vld [vmem:[%s2845_s29 + $0x58] sm:$0xff]  ;;  %2273 = vmatprep.subr.bf16.mxu1 %v2388_v28 }
  0xac   : > { %2254 = vmatmul.mubr.msk.bf16.vlgmr.msra.gmra.mrb[0].mxu0 %vm423_vm1, %v409_v8  ;;  %v412_v18 = vpack.c.bf16 %v400_v14, %v399_v13  ;;  %v403_v21 = vld [vmem:[%s2845_s29 + $0x60] sm:$0xff]  ;;  %v404_v22 = vld [vmem:[%s2845_s29 + $0x68] sm:$0xff]  ;;  %v413_v23 = vpack.c.bf16 %v402_v20, %v401_v19  ;;  %v405_v25 = vld [vmem:[%s2845_s29 + $0x70] sm:$0xff] }
  0xad   : > { %2257 = vmatprep.mubr.msk.bf16.mxu0 %vm423_vm1, %v410_v10  ;;  %v414_v24 = vpack.c.bf16 %v404_v22, %v403_v21  ;;  %v406_v26 = vld [vmem:[%s2845_s29 + $0x78] sm:$0xff]  ;;  %v762_v37 = vld [vmem:[#allocation9 + $0x60] sm:$0xff]  ;;  %1185 = vmatpush1.bf16.msra.mxu0 %v2163_v33  ;;  %v759_v7 = vld [vmem:[#allocation9 + $0x48] sm:$0xff] }
  0xae   : > { %v415_v27 = vpack.c.bf16 %v406_v26, %v405_v25  ;;  %2274 = vmatpush3.bf16.msra.mxu1 %v2388_v28  ;;  %v2172_v40 = vcombine.high %v758_v36, %v762_v37  ;;  %v766_v41 = vld [vmem:[#allocation9 + $0x80] sm:$0xff]  ;;  %v2171_v43 = vcombine.low %v758_v36, %v762_v37  ;;  %v763_v8 = vld [vmem:[#allocation9 + $0x68] sm:$0xff] }
  0xaf   : > { %2275 = vmatprep.subr.bf16.mxu1 %v2389_v29  ;;  %v770_v42 = vld [vmem:[#allocation9 + $0xa0] sm:$0xff]  ;;  %v2174_v14 = vcombine.high %v759_v7, %v763_v8  ;;  %v775_v28 = vld [vmem:[#allocation9 + $0xc8] sm:$0xff] }
  0xb0   : > { %1186 = vmatprep.subr.bf16.mxu0 %v2172_v40  ;;  %v2180_v44 = vcombine.high %v766_v41, %v770_v42  ;;  %v774_v45 = vld [vmem:[#allocation9 + $0xc0] sm:$0xff]  ;;  %v2179_v47 = vcombine.low %v766_v41, %v770_v42  ;;  %v787_v40 = vld [vmem:[#allocation9 + $0x128] sm:$0xff] }
  0xb1   : > { %v778_v46 = vld [vmem:[#allocation9 + $0xe0] sm:$0xff]  ;;  %1187 = vmatpush1.bf16.msra.mxu0 %v2171_v43 }
  0xb2   : > { %2276 = vmatpush3.bf16.msra.mxu1 %v2389_v29  ;;  %1188 = vmatprep.subr.bf16.mxu0 %v2180_v44  ;;  %v2188_v48 = vcombine.high %v774_v45, %v778_v46  ;;  %v782_v49 = vld [vmem:[#allocation9 + $0x100] sm:$0xff]  ;;  %v2187_v51 = vcombine.low %v774_v45, %v778_v46  ;;  %v779_v29 = vld [vmem:[#allocation9 + $0xe8] sm:$0xff] }
  0xb3   : > { %1297 = vmatprep.subr.bf16.mxu1 %v2166_v39  ;;  %v786_v50 = vld [vmem:[#allocation9 + $0x120] sm:$0xff]  ;;  %v2190_v39 = vcombine.high %v775_v28, %v779_v29  ;;  %v2189_v46 = vcombine.low %v775_v28, %v779_v29  ;;  %v757_v29 = vld [vmem:[#allocation9 + $0x38] sm:$0xff] }
  0xb4   : > { %2258 = vmatmul.mubr.msk.bf16.gmra.mrb[4].mxu0 %vm423_vm1, %v411_v17  ;;  %v2196_v52 = vcombine.high %v782_v49, %v786_v50  ;;  %v790_v53 = vld [vmem:[#allocation9 + $0x140] sm:$0xff]  ;;  %v2195_v55 = vcombine.low %v782_v49, %v786_v50  ;;  %v767_v17 = vld [vmem:[#allocation9 + $0x88] sm:$0xff] }
  0xb5   : > { %2261 = vmatprep.mubr.msk.bf16.mxu0 %vm423_vm1, %v412_v18  ;;  %1189 = vmatpush1.bf16.msra.mxu0 %v2179_v47  ;;  %v794_v54 = vld [vmem:[#allocation9 + $0x160] sm:$0xff]  ;;  %v771_v18 = vld [vmem:[#allocation9 + $0xa8] sm:$0xff] }
  0xb6   : > { %1190 = vmatprep.subr.bf16.mxu0 %v2188_v48  ;;  %v2204_v56 = vcombine.high %v790_v53, %v794_v54  ;;  %v2203_v57 = vcombine.low %v790_v53, %v794_v54  ;;  %v2182_v26 = vcombine.high %v767_v17, %v771_v18  ;;  %v2181_v34 = vcombine.low %v767_v17, %v771_v18  ;;  %v791_v50 = vld [vmem:[#allocation9 + $0x148] sm:$0xff] }
  0xb7   : > { %v807_v17 = vld [vmem:[#allocation9 + $0x1c8] sm:$0xff] }
  0xb9   : > { %1191 = vmatpush1.bf16.msra.mxu0 %v2187_v51  ;;  %v795_v51 = vld [vmem:[#allocation9 + $0x168] sm:$0xff] }
  0xba   : > { %1192 = vmatprep.subr.bf16.mxu0 %v2196_v52 }
  0xbc   : > { %2262 = vmatmul.mubr.msk.bf16.gmra.mrb[8].mxu0 %vm423_vm1, %v413_v23 }
  0xbd   : > { %2265 = vmatprep.mubr.msk.bf16.mxu0 %vm423_vm1, %v414_v24  ;;  %1193 = vmatpush1.bf16.msra.mxu0 %v2195_v55  ;;  %v2173_v24 = vcombine.low %v759_v7, %v763_v8  ;;  %v798_v8 = vld [vmem:[#allocation9 + $0x180] sm:$0xff] }
  0xbe   : > { %1194 = vmatprep.subr.bf16.mxu0 %v2204_v56 }
  0xc1   : > { %1195 = vmatpush1.bf16.msra.mxu0 %v2203_v57 }
  0xc4   : > { %2266 = vmatmul.mubr.msk.bf16.gmra.mrb[12].mxu0 %vm423_vm1, %v415_v27 }
 0x17f   : > { %v2255_v59 = vpop.f32.mrb[0].mxu0 }
 0x180   : > { %v495_v60 = vadd.f32 %v2255_v59, %v2879_v58  ;;  %v486_v61 = vpop.f32.mrb[1].mxu0  ;;  %v2206_v59 = vcombine.high %v791_v50, %v795_v51 }
 0x181   : > { %v487_v62 = vadd.f32 %v2879_v58, %v486_v61  ;;  %v2256_v63 = vpop.f32.mrb[2].mxu0 }
 0x182   : > { %v498_v0 = vadd.f32 %v2256_v63, %v2879_v58  ;;  %v489_v1 = vpop.f32.mrb[3].mxu0  ;;  %v551_v3 = vmax.f32 %v495_v60, 0.0 }
 0x183   : > { %v490_v2 = vadd.f32 %v2879_v58, %v489_v1  ;;  %v549_v5 = vmax.f32 %v487_v62, 0.0 }
 0x184   : > { %v552_v4 = vmax.f32 %v498_v0, 0.0 }
 0x185   : > { %v550_v6 = vmax.f32 %v490_v2, 0.0 }
 0x186   : > { %v574_v9 = vpack.c.bf16 %v552_v4, %v551_v3  ;;  %v2205_v3 = vcombine.low %v791_v50, %v795_v51 }
 0x187   : > { %v2259_v10 = vpop.f32.mrb[4].mxu0  ;;  %v573_v11 = vpack.c.bf16 %v550_v6, %v549_v5 }
 0x188   : > { %v511_v12 = vadd.f32 %v2259_v10, %v2879_v58  ;;  %v502_v13 = vpop.f32.mrb[5].mxu0  ;;  %v799_v10 = vld [vmem:[#allocation9 + $0x188] sm:$0xff] }
 0x189   : > { %v503_v15 = vadd.f32 %v2879_v58, %v502_v13  ;;  %2277 = vmatprep.mubr.msk.bf16.mxu1 %vm612_vm2, %v573_v11  ;;  %v2260_v16 = vpop.f32.mrb[6].mxu0 }
 0x18a   : > { %v555_v19 = vmax.f32 %v511_v12, 0.0  ;;  %v514_v20 = vadd.f32 %v2260_v16, %v2879_v58  ;;  %2278 = vmatmul.mubr.msk.bf16.vlgmr.msra.gmra.mrb[0].mxu1 %vm612_vm2, %v574_v9  ;;  %v505_v21 = vpop.f32.mrb[7].mxu0  ;;  %v802_v9 = vld [vmem:[#allocation9 + $0x1a0] sm:$0xff]  ;;  %v803_v12 = vld [vmem:[#allocation9 + $0x1a8] sm:$0xff] }
 0x18b   : > { %v553_v22 = vmax.f32 %v503_v15, 0.0  ;;  %v506_v23 = vadd.f32 %v2879_v58, %v505_v21  ;;  %1298 = vmatpush1.bf16.msra.mxu1 %v2165_v38  ;;  %v783_v38 = vld [vmem:[#allocation9 + $0x108] sm:$0xff]  ;;  %v2212_v11 = vcombine.high %v798_v8, %v802_v9  ;;  %v2211_v13 = vcombine.low %v798_v8, %v802_v9  ;;  %v806_v15 = vld [vmem:[#allocation9 + $0x1c0] sm:$0xff]  ;;  %v776_v9 = vld [vmem:[#allocation9 + $0xd0] sm:$0xff] }
 0x18c   : > { %v556_v25 = vmax.f32 %v514_v20, 0.0  ;;  %1299 = vmatprep.subr.bf16.mxu1 %v2174_v14  ;;  %v2198_v48 = vcombine.high %v783_v38, %v787_v40  ;;  %v2197_v55 = vcombine.low %v783_v38, %v787_v40  ;;  %v2213_v14 = vcombine.low %v799_v10, %v803_v12  ;;  %v810_v16 = vld [vmem:[#allocation9 + $0x1e0] sm:$0xff] }
 0x18d   : > { %v554_v27 = vmax.f32 %v506_v23, 0.0  ;;  %1196 = vmatprep.subr.bf16.mxu0 %v2212_v11  ;;  %v2220_v18 = vcombine.high %v806_v15, %v810_v16  ;;  %v2219_v20 = vcombine.low %v806_v15, %v810_v16  ;;  %v2608_v23 = vmov 0   ;;  %v780_v11 = vld [vmem:[#allocation9 + $0xf0] sm:$0xff] }
 0x18e   : > { %v576_v30 = vpack.c.bf16 %v556_v25, %v555_v19  ;;  %1197 = vmatpush1.bf16.msra.mxu0 %v2211_v13  ;;  %v811_v19 = vld [vmem:[#allocation9 + $0x1e8] sm:$0xff]  ;;  %1216 = vmatprep.mubr.bf16.mxu0 %v2608_v23  ;;  %v756_v25 = vld [vmem:[#allocation9 + $0x30] sm:$0xff]  ;;  %v781_v13 = vld [vmem:[#allocation9 + $0xf8] sm:$0xff] }
 0x18f   : > { %v575_v31 = vpack.c.bf16 %v554_v27, %v553_v22  ;;  %v2263_v33 = vpop.f32.mrb[8].mxu0  ;;  %1300 = vmatpush1.bf16.msra.mxu1 %v2173_v24  ;;  %v2221_v21 = vcombine.low %v807_v17, %v811_v19  ;;  %v2222_v22 = vcombine.high %v807_v17, %v811_v19  ;;  %1198 = vmatprep.subr.bf16.mxu0 %v2220_v18  ;;  %v752_v24 = vld [vmem:[#allocation9 + $0x10] sm:$0xff] }
 0x190   : > { %v527_v36 = vadd.f32 %v2263_v33, %v2879_v58  ;;  %v518_v37 = vpop.f32.mrb[9].mxu0  ;;  %1301 = vmatprep.subr.bf16.mxu1 %v2182_v26  ;;  %v753_v26 = vld [vmem:[#allocation9 + $0x18] sm:$0xff]  ;;  %v2167_v27 = vcombine.low %v752_v24, %v756_v25  ;;  %v2168_v28 = vcombine.high %v752_v24, %v756_v25 }
 0x191   : > { %2281 = vmatprep.mubr.msk.bf16.mxu1 %vm612_vm2, %v575_v31  ;;  %v519_v32 = vadd.f32 %v2879_v58, %v518_v37  ;;  %v2264_v35 = vpop.f32.mrb[10].mxu0  ;;  %v2170_v31 = vcombine.high %v753_v26, %v757_v29  ;;  %v2910_v33 = vld [vmem:[#allocation7] ss:$0 sm:$0xff] }
 0x192   : > { %2282 = vmatmul.mubr.msk.bf16.gmra.mrb[4].mxu1 %vm612_vm2, %v576_v30  ;;  %v559_v41 = vmax.f32 %v527_v36, 0.0  ;;  %v530_v42 = vadd.f32 %v2264_v35, %v2879_v58  ;;  %v521_v43 = vpop.f32.mrb[11].mxu0  ;;  %1199 = vmatpush1.bf16.msra.mxu0 %v2219_v20  ;;  %v2169_v30 = vcombine.low %v753_v26, %v757_v29  ;;  %v2192_v20 = vcombine.high %v776_v9, %v780_v11  ;;  %v788_v26 = vld [vmem:[#allocation9 + $0x130] sm:$0xff] }
 0x193   : > { %v557_v44 = vmax.f32 %v519_v32, 0.0  ;;  %v522_v45 = vadd.f32 %v2879_v58, %v521_v43  ;;  %1302 = vmatpush1.bf16.msra.mxu1 %v2181_v34  ;;  %1410 = vmatprep.subr.bf16.mxu0 %v2168_v28  ;;  %v760_v43 = vld [vmem:[#allocation9 + $0x50] sm:$0xff]  ;;  %v789_v28 = vld [vmem:[#allocation9 + $0x138] sm:$0xff] }
 0x194   : > { %v560_v47 = vmax.f32 %v530_v42, 0.0  ;;  %1303 = vmatprep.subr.bf16.mxu1 %v2190_v39 }
 0x195   : > { %v558_v49 = vmax.f32 %v522_v45, 0.0 }
 0x196   : > { %v578_v52 = vpack.c.bf16 %v560_v47, %v559_v41  ;;  %v761_v47 = vld [vmem:[#allocation9 + $0x58] sm:$0xff] }
 0x197   : > { %v577_v53 = vpack.c.bf16 %v558_v49, %v557_v44  ;;  %v2267_v54 = vpop.f32.mrb[12].mxu0  ;;  %1304 = vmatpush1.bf16.msra.mxu1 %v2189_v46  ;;  %v764_v46 = vld [vmem:[#allocation9 + $0x70] sm:$0xff] }
 0x198   : > { %v543_v56 = vadd.f32 %v2267_v54, %v2879_v58  ;;  %v534_v57 = vpop.f32.mrb[13].mxu0  ;;  %1305 = vmatprep.subr.bf16.mxu1 %v2198_v48  ;;  %v765_v48 = vld [vmem:[#allocation9 + $0x78] sm:$0xff] }
 0x199   : > { %2285 = vmatprep.mubr.msk.bf16.mxu1 %vm612_vm2, %v577_v53  ;;  %v535_v60 = vadd.f32 %v2879_v58, %v534_v57  ;;  %v2268_v61 = vpop.f32.mrb[14].mxu0  ;;  %v772_v57 = vld [vmem:[#allocation9 + $0xb0] sm:$0xff] }
 0x19a   : > { %2286 = vmatmul.mubr.msk.bf16.gmra.mrb[8].mxu1 %vm612_vm2, %v578_v52  ;;  %v563_v62 = vmax.f32 %v543_v56, 0.0  ;;  %v546_v63 = vadd.f32 %v2268_v61, %v2879_v58  ;;  %v537_v0 = vpop.f32.mrb[15].mxu0  ;;  %v768_v52 = vld [vmem:[#allocation9 + $0x90] sm:$0xff]  ;;  %v2178_v56 = vcombine.high %v761_v47, %v765_v48 }
 0x19b   : > { %v561_v1 = vmax.f32 %v535_v60, 0.0  ;;  %v538_v2 = vadd.f32 %v2879_v58, %v537_v0  ;;  %1306 = vmatpush1.bf16.msra.mxu1 %v2197_v55  ;;  %v2214_v58 = vcombine.high %v799_v10, %v803_v12  ;;  %v2176_v55 = vcombine.high %v760_v43, %v764_v46  ;;  %v773_v60 = vld [vmem:[#allocation9 + $0xb8] sm:$0xff] }
 0x19c   : > { %v564_v4 = vmax.f32 %v546_v63, 0.0  ;;  %1307 = vmatprep.subr.bf16.mxu1 %v2206_v59  ;;  %v769_v59 = vld [vmem:[#allocation9 + $0x98] sm:$0xff]  ;;  %v2183_v16 = vcombine.low %v768_v52, %v772_v57 }
 0x19d   : > { %v562_v5 = vmax.f32 %v538_v2, 0.0  ;;  %v2175_v2 = vcombine.low %v760_v43, %v764_v46  ;;  %v777_v12 = vld [vmem:[#allocation9 + $0xd8] sm:$0xff]  ;;  %v2185_v17 = vcombine.low %v769_v59, %v773_v60 }
 0x19e   : > { %v580_v6 = vpack.c.bf16 %v564_v4, %v563_v62  ;;  %v793_v43 = vld [vmem:[#allocation9 + $0x158] sm:$0xff] }
 0x19f   : > { %v579_v7 = vpack.c.bf16 %v562_v5, %v561_v1  ;;  %1308 = vmatpush1.bf16.msra.mxu1 %v2205_v3  ;;  %v2177_v3 = vcombine.low %v761_v47, %v765_v48 }
 0x1a0   : > { %1309 = vmatprep.subr.bf16.mxu1 %v2214_v58 }
 0x1a1   : > { %2289 = vmatprep.mubr.msk.bf16.mxu1 %vm612_vm2, %v579_v7  ;;  %v2186_v7 = vcombine.high %v769_v59, %v773_v60  ;;  %v804_v60 = vld [vmem:[#allocation9 + $0x1b0] sm:$0xff] }
 0x1a2   : > { %2290 = vmatmul.mubr.msk.bf16.gmra.mrb[12].mxu1 %vm612_vm2, %v580_v6  ;;  %v2184_v6 = vcombine.high %v768_v52, %v772_v57 }
 0x1a3   : > { %1310 = vmatpush1.bf16.msra.mxu1 %v2213_v14  ;;  %1329 = vmatprep.mubr.bf16.mxu1 %v2608_v23 }
 0x1a4   : > { %1311 = vmatprep.subr.bf16.mxu1 %v2222_v22  ;;  %v784_v22 = vld [vmem:[#allocation9 + $0x110] sm:$0xff] }
 0x1a5   : > { %v2199_v48 = vcombine.low %v784_v22, %v788_v26 }
 0x1a7   : > { %1312 = vmatpush1.bf16.msra.mxu1 %v2221_v21  ;;  %v2194_v21 = vcombine.high %v777_v12, %v781_v13 }
 0x1a8   : > { %1523 = vmatprep.subr.bf16.mxu1 %v2170_v31 }
 0x25d   : > { %v2279_v34 = vpop.f32.mrb[0].mxu1 }
 0x25e   : > { %v680_v36 = vadd.f32 %v2279_v34, %v2910_v33  ;;  %v671_v37 = vpop.f32.mrb[1].mxu1 }
 0x25f   : > { %v672_v39 = vadd.f32 %v2910_v33, %v671_v37  ;;  %v2280_v32 = vpop.f32.mrb[2].mxu1  ;;  %v2191_v37 = vcombine.low %v776_v9, %v780_v11  ;;  %v808_v9 = vld [vmem:[#allocation9 + $0x1d0] sm:$0xff] }
 0x260   : > { %v683_v35 = vadd.f32 %v2280_v32, %v2910_v33  ;;  %v674_v38 = vpop.f32.mrb[3].mxu1  ;;  %v736_v41 = vmax.f32 %v680_v36, 0.0  ;;  %v812_v11 = vld [vmem:[#allocation9 + $0x1f0] sm:$0xff] }
 0x261   : > { %v675_v40 = vadd.f32 %v2910_v33, %v674_v38  ;;  %v734_v44 = vmax.f32 %v672_v39, 0.0  ;;  %v2193_v39 = vcombine.low %v777_v12, %v781_v13  ;;  %v809_v12 = vld [vmem:[#allocation9 + $0x1d8] sm:$0xff] }
 0x262   : > { %v737_v42 = vmax.f32 %v683_v35, 0.0  ;;  %v2200_v35 = vcombine.high %v784_v22, %v788_v26  ;;  %v813_v13 = vld [vmem:[#allocation9 + $0x1f8] sm:$0xff]  ;;  %v3004_v22 = vld [vmem:[#allocation10] sm:$0xff] }
 0x263   : > { %v735_v45 = vmax.f32 %v675_v40, 0.0  ;;  %v792_v40 = vld [vmem:[#allocation9 + $0x150] sm:$0xff] }
 0x264   : > { %v2916_v49 = vpack.c.bf16 %v737_v42, %v736_v41  ;;  %v796_v42 = vld [vmem:[#allocation9 + $0x170] sm:$0xff] }
 0x265   : > { %v2918_v50 = vpack.c.bf16 %v735_v45, %v734_v44  ;;  %v2283_v51 = vpop.f32.mrb[4].mxu1  ;;  %v797_v44 = vld [vmem:[#allocation9 + $0x178] sm:$0xff] }
 0x266   : > { %v696_v53 = vadd.f32 %v2283_v51, %v2910_v33  ;;  %v687_v54 = vpop.f32.mrb[5].mxu1 }
 0x267   : > { %v688_v61 = vadd.f32 %v2910_v33, %v687_v54  ;;  %1217 = vmatmul.mubr.bf16.vlgmr.msra.gmra.mrb[16].mxu0 %v2918_v50  ;;  %1330 = vmatmul.mubr.bf16.vlgmr.msra.gmra.mrb[16].mxu1 %v2918_v50  ;;  %v2284_v62 = vpop.f32.mrb[6].mxu1  ;;  %v2208_v54 = vcombine.high %v792_v40, %v796_v42 }
 0x268   : > { %v740_v63 = vmax.f32 %v696_v53, 0.0  ;;  %1411 = vmatpush1.bf16.msra.mxu0 %v2167_v27  ;;  %1524 = vmatpush1.bf16.msra.mxu1 %v2169_v30  ;;  %v699_v0 = vadd.f32 %v2284_v62, %v2910_v33  ;;  %v690_v1 = vpop.f32.mrb[7].mxu1  ;;  %v785_v27 = vld [vmem:[#allocation9 + $0x118] sm:$0xff] }
 0x269   : > { %v738_v4 = vmax.f32 %v688_v61, 0.0  ;;  %v691_v5 = vadd.f32 %v2910_v33, %v690_v1  ;;  %1226 = vmatprep.mubr.bf16.mxu0 %v2608_v23  ;;  %1339 = vmatprep.mubr.bf16.mxu1 %v2608_v23  ;;  %v2202_v38 = vcombine.high %v785_v27, %v789_v28  ;;  %v2201_v51 = vcombine.low %v785_v27, %v789_v28  ;;  %v801_v61 = vld [vmem:[#allocation9 + $0x198] sm:$0xff] }
 0x26a   : > { %v741_v8 = vmax.f32 %v699_v0, 0.0  ;;  %1412 = vmatprep.subr.bf16.mxu0 %v2176_v55  ;;  %1525 = vmatprep.subr.bf16.mxu1 %v2178_v56  ;;  %v2210_v55 = vcombine.high %v793_v43, %v797_v44  ;;  %v800_v56 = vld [vmem:[#allocation9 + $0x190] sm:$0xff]  ;;  %v805_v62 = vld [vmem:[#allocation9 + $0x1b8] sm:$0xff] }
 0x26b   : > { %v739_v10 = vmax.f32 %v691_v5, 0.0  ;;  %v2209_v5 = vcombine.low %v793_v43, %v797_v44 }
 0x26c   : > { %v2928_v14 = vpack.c.bf16 %v741_v8, %v740_v63  ;;  %1413 = vmatpush1.bf16.msra.mxu0 %v2175_v2  ;;  %1526 = vmatpush1.bf16.msra.mxu1 %v2177_v3  ;;  %v2218_v8 = vcombine.high %v801_v61, %v805_v62 }
 0x26d   : > { %v2930_v58 = vpack.c.bf16 %v739_v10, %v738_v4  ;;  %v2287_v15 = vpop.f32.mrb[8].mxu1  ;;  %1414 = vmatprep.subr.bf16.mxu0 %v2184_v6  ;;  %1527 = vmatprep.subr.bf16.mxu1 %v2186_v7  ;;  %v2207_v4 = vcombine.low %v792_v40, %v796_v42  ;;  %v2216_v7 = vcombine.high %v800_v56, %v804_v60 }
 0x26e   : > { %v712_v18 = vadd.f32 %v2287_v15, %v2910_v33  ;;  %v703_v19 = vpop.f32.mrb[9].mxu1 }
 0x26f   : > { %1227 = vmatmul.mubr.bf16.gmra.mrb[20].mxu0 %v2916_v49  ;;  %1340 = vmatmul.mubr.bf16.gmra.mrb[20].mxu1 %v2916_v49  ;;  %v704_v24 = vadd.f32 %v2910_v33, %v703_v19  ;;  %v2288_v25 = vpop.f32.mrb[10].mxu1  ;;  %v2226_v19 = vcombine.high %v809_v12, %v813_v13 }
 0x270   : > { %v744_v29 = vmax.f32 %v712_v18, 0.0  ;;  %1236 = vmatprep.mubr.bf16.mxu0 %v2608_v23  ;;  %1349 = vmatprep.mubr.bf16.mxu1 %v2608_v23  ;;  %v715_v30 = vadd.f32 %v2288_v25, %v2910_v33  ;;  %v706_v31 = vpop.f32.mrb[11].mxu1  ;;  %v2217_v18 = vcombine.low %v801_v61, %v805_v62 }
 0x271   : > { %v742_v34 = vmax.f32 %v704_v24, 0.0  ;;  %1415 = vmatpush1.bf16.msra.mxu0 %v2183_v16  ;;  %1528 = vmatpush1.bf16.msra.mxu1 %v2185_v17  ;;  %v707_v36 = vadd.f32 %v2910_v33, %v706_v31  ;;  %v2215_v17 = vcombine.low %v800_v56, %v804_v60 }
 0x272   : > { %v745_v32 = vmax.f32 %v715_v30, 0.0  ;;  %1416 = vmatprep.subr.bf16.mxu0 %v2192_v20  ;;  %1529 = vmatprep.subr.bf16.mxu1 %v2194_v21  ;;  %v2223_v20 = vcombine.low %v808_v9, %v812_v11  ;;  %v2225_v21 = vcombine.low %v809_v12, %v813_v13 }
 0x273   : > { %v743_v41 = vmax.f32 %v707_v36, 0.0 }
 0x274   : > { %v2940_v45 = vpack.c.bf16 %v745_v32, %v744_v29 }
 0x275   : > { %v2942_v46 = vpack.c.bf16 %v743_v41, %v742_v34  ;;  %1417 = vmatpush1.bf16.msra.mxu0 %v2191_v37  ;;  %1530 = vmatpush1.bf16.msra.mxu1 %v2193_v39  ;;  %v2291_v47 = vpop.f32.mrb[12].mxu1 }
 0x276   : > { %v728_v52 = vadd.f32 %v2291_v47, %v2910_v33  ;;  %1418 = vmatprep.subr.bf16.mxu0 %v2200_v35  ;;  %1531 = vmatprep.subr.bf16.mxu1 %v2202_v38  ;;  %v719_v53 = vpop.f32.mrb[13].mxu1 }
 0x277   : > { %1237 = vmatmul.mubr.bf16.gmra.mrb[24].mxu0 %v2930_v58  ;;  %1350 = vmatmul.mubr.bf16.gmra.mrb[24].mxu1 %v2930_v58  ;;  %v720_v57 = vadd.f32 %v2910_v33, %v719_v53  ;;  %v2292_v59 = vpop.f32.mrb[14].mxu1 }
 0x278   : > { %1246 = vmatprep.mubr.bf16.mxu0 %v2608_v23  ;;  %1359 = vmatprep.mubr.bf16.mxu1 %v2608_v23  ;;  %v748_v63 = vmax.f32 %v728_v52, 0.0  ;;  %v731_v0 = vadd.f32 %v2292_v59, %v2910_v33  ;;  %v722_v1 = vpop.f32.mrb[15].mxu1 }
 0x279   : > { %v746_v2 = vmax.f32 %v720_v57, 0.0  ;;  %1419 = vmatpush1.bf16.msra.mxu0 %v2199_v48  ;;  %1532 = vmatpush1.bf16.msra.mxu1 %v2201_v51  ;;  %v723_v3 = vadd.f32 %v2910_v33, %v722_v1  ;;  %v2224_v33 = vcombine.high %v808_v9, %v812_v11 }
 0x27a   : > { %v749_v6 = vmax.f32 %v731_v0, 0.0  ;;  %1420 = vmatprep.subr.bf16.mxu0 %v2208_v54  ;;  %1533 = vmatprep.subr.bf16.mxu1 %v2210_v55 }
 0x27b   : > { %v747_v10 = vmax.f32 %v723_v3, 0.0 }
 0x27c   : > { %v2952_v15 = vpack.c.bf16 %v749_v6, %v748_v63 }
 0x27d   : > { %v820_v16 = vpack.c.bf16 %v747_v10, %v746_v2  ;;  %1421 = vmatpush1.bf16.msra.mxu0 %v2207_v4  ;;  %1534 = vmatpush1.bf16.msra.mxu1 %v2209_v5 }
 0x27e   : > { %1422 = vmatprep.subr.bf16.mxu0 %v2216_v7  ;;  %1535 = vmatprep.subr.bf16.mxu1 %v2218_v8 }
 0x27f   : > { %1247 = vmatmul.mubr.bf16.gmra.mrb[28].mxu0 %v2928_v14  ;;  %1360 = vmatmul.mubr.bf16.gmra.mrb[28].mxu1 %v2928_v14 }
 0x280   : > { %1256 = vmatprep.mubr.bf16.mxu0 %v2608_v23  ;;  %1369 = vmatprep.mubr.bf16.mxu1 %v2608_v23 }
 0x281   : > { %1423 = vmatpush1.bf16.msra.mxu0 %v2215_v17  ;;  %1536 = vmatpush1.bf16.msra.mxu1 %v2217_v18 }
 0x282   : > { %1424 = vmatprep.subr.bf16.mxu0 %v2224_v33  ;;  %1537 = vmatprep.subr.bf16.mxu1 %v2226_v19 }
 0x285   : > { %1425 = vmatpush1.bf16.msra.mxu0 %v2223_v20  ;;  %1538 = vmatpush1.bf16.msra.mxu1 %v2225_v21 }
 0x287   : > { %1257 = vmatmul.mubr.bf16.gmra.mrb[32].mxu0 %v2942_v46  ;;  %1370 = vmatmul.mubr.bf16.gmra.mrb[32].mxu1 %v2942_v46 }
 0x288   : > { %1266 = vmatprep.mubr.bf16.mxu0 %v2608_v23  ;;  %1379 = vmatprep.mubr.bf16.mxu1 %v2608_v23 }
 0x28f   : > { %1267 = vmatmul.mubr.bf16.gmra.mrb[36].mxu0 %v2940_v45  ;;  %1380 = vmatmul.mubr.bf16.gmra.mrb[36].mxu1 %v2940_v45 }
 0x290   : > { %1276 = vmatprep.mubr.bf16.mxu0 %v2608_v23  ;;  %1389 = vmatprep.mubr.bf16.mxu1 %v2608_v23 }
 0x297   : > { %1277 = vmatmul.mubr.bf16.gmra.mrb[40].mxu0 %v820_v16  ;;  %1390 = vmatmul.mubr.bf16.gmra.mrb[40].mxu1 %v820_v16 }
 0x298   : > { %1286 = vmatprep.mubr.bf16.mxu0 %v2608_v23  ;;  %1399 = vmatprep.mubr.bf16.mxu1 %v2608_v23 }
 0x29f   : > { %1287 = vmatmul.mubr.bf16.gmra.mrb[44].mxu0 %v2952_v15  ;;  %1400 = vmatmul.mubr.bf16.gmra.mrb[44].mxu1 %v2952_v15 }
 0x2a0   : > { %1442 = vmatprep.mubr.bf16.mxu0 %v2608_v23  ;;  %1555 = vmatprep.mubr.bf16.mxu1 %v2608_v23 }
 0x2a7   : > { %1443 = vmatmul.mubr.bf16.vlgmr.msra.gmra.mrb[48].mxu0 %v2918_v50  ;;  %1556 = vmatmul.mubr.bf16.vlgmr.msra.gmra.mrb[48].mxu1 %v2918_v50 }
 0x2a8   : > { %1452 = vmatprep.mubr.bf16.mxu0 %v2608_v23  ;;  %1565 = vmatprep.mubr.bf16.mxu1 %v2608_v23 }
 0x2af   : > { %1453 = vmatmul.mubr.bf16.gmra.mrb[52].mxu0 %v2916_v49  ;;  %1566 = vmatmul.mubr.bf16.gmra.mrb[52].mxu1 %v2916_v49  ;;  %v824_v49 = vlaneseq }
 0x2b0   : > { %1462 = vmatprep.mubr.bf16.mxu0 %v2608_v23  ;;  %1575 = vmatprep.mubr.bf16.mxu1 %v2608_v23 }
 0x2b1   : > { %v3000_v50 = vshrl.u32 %v824_v49, 7 }
 0x2b3   : > { %v830_v24 = vsub.s32 1, %v3000_v50  ;;  %v838_v25 = vsub.s32 3, %v3000_v50 }
 0x2b5   : > { %v3015_v27 = vrot.slane %v3004_v22, %v830_v24  ;;  %v3018_v28 = vrot.slane %v3004_v22, %v838_v25 }
 0x2b7   : > { %1463 = vmatmul.mubr.bf16.gmra.mrb[56].mxu0 %v2930_v58  ;;  %1576 = vmatmul.mubr.bf16.gmra.mrb[56].mxu1 %v2930_v58  ;;  %v834_v58 = vsub.s32 2, %v3000_v50 }
 0x2b8   : > { %1472 = vmatprep.mubr.bf16.mxu0 %v2608_v23  ;;  %1585 = vmatprep.mubr.bf16.mxu1 %v2608_v23 }
 0x2bf   : > { %1473 = vmatmul.mubr.bf16.gmra.mrb[60].mxu0 %v2928_v14  ;;  %1586 = vmatmul.mubr.bf16.gmra.mrb[60].mxu1 %v2928_v14  ;;  %v826_v14 = vsub.s32 0, %v3000_v50 }
 0x2c0   : > { %1482 = vmatprep.mubr.bf16.mxu0 %v2608_v23  ;;  %1595 = vmatprep.mubr.bf16.mxu1 %v2608_v23 }
 0x2c1   : > { %v3009_v26 = vrot.slane %v3004_v22, %v826_v14 }
 0x2c7   : > { %1483 = vmatmul.mubr.bf16.gmra.mrb[64].mxu0 %v2942_v46  ;;  %1596 = vmatmul.mubr.bf16.gmra.mrb[64].mxu1 %v2942_v46 }
 0x2c8   : > { %1492 = vmatprep.mubr.bf16.mxu0 %v2608_v23  ;;  %1605 = vmatprep.mubr.bf16.mxu1 %v2608_v23 }
 0x2cf   : > { %1493 = vmatmul.mubr.bf16.gmra.mrb[68].mxu0 %v2940_v45  ;;  %1606 = vmatmul.mubr.bf16.gmra.mrb[68].mxu1 %v2940_v45 }
 0x2d0   : > { %1502 = vmatprep.mubr.bf16.mxu0 %v2608_v23  ;;  %1615 = vmatprep.mubr.bf16.mxu1 %v2608_v23 }
 0x2d7   : > { %1503 = vmatmul.mubr.bf16.gmra.mrb[72].mxu0 %v820_v16  ;;  %1616 = vmatmul.mubr.bf16.gmra.mrb[72].mxu1 %v820_v16 }
 0x2d8   : > { %1512 = vmatprep.mubr.bf16.mxu0 %v2608_v23  ;;  %1625 = vmatprep.mubr.bf16.mxu1 %v2608_v23  ;;  %v3012_v23 = vrot.slane %v3004_v22, %v834_v58 }
 0x2df   : > { %1513 = vmatmul.mubr.bf16.gmra.mrb[76].mxu0 %v2952_v15  ;;  %1626 = vmatmul.mubr.bf16.gmra.mrb[76].mxu1 %v2952_v15 }
 0x33a   : > { %v1218_v29 = vpop.f32.mrb[16].mxu0  ;;  %v1331_v30 = vpop.f32.mrb[16].mxu1 }
 0x33b   : > { %v1219_v31 = vadd.f32 %v1218_v29, %v3009_v26  ;;  %v1332_v34 = vadd.f32 %v1331_v30, %v3012_v23  ;;  %v1220_v36 = vpop.f32.mrb[17].mxu0  ;;  %v1333_v37 = vpop.f32.mrb[17].mxu1 }
 0x33c   : > { %v1221_v39 = vadd.f32 %v1220_v36, %v3015_v27  ;;  %v1334_v32 = vadd.f32 %v1333_v37, %v3018_v28  ;;  %v1222_v35 = vpop.f32.mrb[18].mxu0  ;;  %v1335_v38 = vpop.f32.mrb[18].mxu1 }
 0x33d   : > { %v1223_v40 = vadd.f32 %v1222_v35, %v3009_v26  ;;  %v1336_v41 = vadd.f32 %v1335_v38, %v3012_v23  ;;  %v1224_v42 = vpop.f32.mrb[19].mxu0  ;;  %v1337_v43 = vpop.f32.mrb[19].mxu1  ;;  %v1636_v46 = vmax.f32 %v1219_v31, 0.0  ;;  %v1638_v47 = vmax.f32 %v1332_v34, 0.0 }
 0x33e   : > { %v1225_v44 = vadd.f32 %v1224_v42, %v3015_v27  ;;  %v1338_v45 = vadd.f32 %v1337_v43, %v3018_v28  ;;  %v1637_v52 = vmax.f32 %v1221_v39, 0.0  ;;  %v1639_v53 = vmax.f32 %v1334_v32, 0.0 }
 0x33f   : > { %v1644_v48 = vmax.f32 %v1223_v40, 0.0  ;;  %v1646_v51 = vmax.f32 %v1336_v41, 0.0 }
 0x340   : > { %v1645_v54 = vmax.f32 %v1225_v44, 0.0  ;;  %v1647_v55 = vmax.f32 %v1338_v45, 0.0 }
 0x341   : > { %v1765_v56 = vmax.f32 %v1636_v46, %v1644_v48  ;;  %v1807_v57 = vmax.f32 %v1638_v47, %v1646_v51 }
 0x342   : > { %v1786_v59 = vmax.f32 %v1637_v52, %v1645_v54  ;;  %v1828_v60 = vmax.f32 %v1639_v53, %v1647_v55  ;;  %v1228_v61 = vpop.f32.mrb[20].mxu0  ;;  %v1341_v62 = vpop.f32.mrb[20].mxu1 }
 0x343   : > { %v1229_v63 = vadd.f32 %v1228_v61, %v3009_v26  ;;  %v1342_v0 = vadd.f32 %v1341_v62, %v3012_v23  ;;  %v1230_v1 = vpop.f32.mrb[21].mxu0  ;;  %v1343_v2 = vpop.f32.mrb[21].mxu1 }
 0x344   : > { %v1231_v3 = vadd.f32 %v1230_v1, %v3015_v27  ;;  %v1344_v4 = vadd.f32 %v1343_v2, %v3018_v28  ;;  %v1232_v5 = vpop.f32.mrb[22].mxu0  ;;  %v1345_v6 = vpop.f32.mrb[22].mxu1 }
 0x345   : > { %v1652_v7 = vmax.f32 %v1229_v63, 0.0  ;;  %v1654_v8 = vmax.f32 %v1342_v0, 0.0  ;;  %v1233_v9 = vadd.f32 %v1232_v5, %v3009_v26  ;;  %v1346_v10 = vadd.f32 %v1345_v6, %v3012_v23  ;;  %v1234_v11 = vpop.f32.mrb[23].mxu0  ;;  %v1347_v12 = vpop.f32.mrb[23].mxu1 }
 0x346   : > { %v1653_v13 = vmax.f32 %v1231_v3, 0.0  ;;  %v1655_v15 = vmax.f32 %v1344_v4, 0.0  ;;  %v1235_v16 = vadd.f32 %v1234_v11, %v3015_v27  ;;  %v1348_v17 = vadd.f32 %v1347_v12, %v3018_v28 }
 0x347   : > { %v1766_v18 = vmax.f32 %v1765_v56, %v1652_v7  ;;  %v1808_v33 = vmax.f32 %v1807_v57, %v1654_v8  ;;  %v1660_v19 = vmax.f32 %v1233_v9, 0.0  ;;  %v1662_v20 = vmax.f32 %v1346_v10, 0.0 }
 0x348   : > { %v1787_v21 = vmax.f32 %v1786_v59, %v1653_v13  ;;  %v1829_v49 = vmax.f32 %v1828_v60, %v1655_v15  ;;  %v1661_v14 = vmax.f32 %v1235_v16, 0.0  ;;  %v1663_v58 = vmax.f32 %v1348_v17, 0.0 }
 0x349   : > { %v1767_v24 = vmax.f32 %v1766_v18, %v1660_v19  ;;  %v1809_v25 = vmax.f32 %v1808_v33, %v1662_v20 }
 0x34a   : > { %v1788_v29 = vmax.f32 %v1787_v21, %v1661_v14  ;;  %v1830_v30 = vmax.f32 %v1829_v49, %v1663_v58  ;;  %v1238_v31 = vpop.f32.mrb[24].mxu0  ;;  %v1351_v34 = vpop.f32.mrb[24].mxu1 }
 0x34b   : > { %v1239_v36 = vadd.f32 %v1238_v31, %v3009_v26  ;;  %v1352_v37 = vadd.f32 %v1351_v34, %v3012_v23  ;;  %v1240_v39 = vpop.f32.mrb[25].mxu0  ;;  %v1353_v32 = vpop.f32.mrb[25].mxu1 }
 0x34c   : > { %v1241_v35 = vadd.f32 %v1240_v39, %v3015_v27  ;;  %v1354_v38 = vadd.f32 %v1353_v32, %v3018_v28  ;;  %v1242_v40 = vpop.f32.mrb[26].mxu0  ;;  %v1355_v41 = vpop.f32.mrb[26].mxu1 }
 0x34d   : > { %v1668_v42 = vmax.f32 %v1239_v36, 0.0  ;;  %v1670_v43 = vmax.f32 %v1352_v37, 0.0  ;;  %v1243_v44 = vadd.f32 %v1242_v40, %v3009_v26  ;;  %v1356_v45 = vadd.f32 %v1355_v41, %v3012_v23  ;;  %v1244_v46 = vpop.f32.mrb[27].mxu0  ;;  %v1357_v47 = vpop.f32.mrb[27].mxu1 }
 0x34e   : > { %v1669_v48 = vmax.f32 %v1241_v35, 0.0  ;;  %v1671_v51 = vmax.f32 %v1354_v38, 0.0  ;;  %v1245_v52 = vadd.f32 %v1244_v46, %v3015_v27  ;;  %v1358_v53 = vadd.f32 %v1357_v47, %v3018_v28 }
 0x34f   : > { %v1768_v54 = vmax.f32 %v1767_v24, %v1668_v42  ;;  %v1810_v55 = vmax.f32 %v1809_v25, %v1670_v43  ;;  %v1676_v56 = vmax.f32 %v1243_v44, 0.0  ;;  %v1678_v57 = vmax.f32 %v1356_v45, 0.0 }
 0x350   : > { %v1789_v59 = vmax.f32 %v1788_v29, %v1669_v48  ;;  %v1831_v60 = vmax.f32 %v1830_v30, %v1671_v51  ;;  %v1677_v61 = vmax.f32 %v1245_v52, 0.0  ;;  %v1679_v62 = vmax.f32 %v1358_v53, 0.0 }
 0x351   : > { %v1769_v63 = vmax.f32 %v1768_v54, %v1676_v56  ;;  %v1811_v0 = vmax.f32 %v1810_v55, %v1678_v57 }
 0x352   : > { %v1790_v1 = vmax.f32 %v1789_v59, %v1677_v61  ;;  %v1832_v2 = vmax.f32 %v1831_v60, %v1679_v62  ;;  %v1248_v3 = vpop.f32.mrb[28].mxu0  ;;  %v1361_v4 = vpop.f32.mrb[28].mxu1 }
 0x353   : > { %v1249_v5 = vadd.f32 %v1248_v3, %v3009_v26  ;;  %v1362_v6 = vadd.f32 %v1361_v4, %v3012_v23  ;;  %v1250_v7 = vpop.f32.mrb[29].mxu0  ;;  %v1363_v8 = vpop.f32.mrb[29].mxu1 }
 0x354   : > { %v1251_v9 = vadd.f32 %v1250_v7, %v3015_v27  ;;  %v1364_v10 = vadd.f32 %v1363_v8, %v3018_v28  ;;  %v1252_v11 = vpop.f32.mrb[30].mxu0  ;;  %v1365_v12 = vpop.f32.mrb[30].mxu1 }
 0x355   : > { %v1684_v13 = vmax.f32 %v1249_v5, 0.0  ;;  %v1686_v15 = vmax.f32 %v1362_v6, 0.0  ;;  %v1253_v16 = vadd.f32 %v1252_v11, %v3009_v26  ;;  %v1366_v17 = vadd.f32 %v1365_v12, %v3012_v23  ;;  %v1254_v18 = vpop.f32.mrb[31].mxu0  ;;  %v1367_v33 = vpop.f32.mrb[31].mxu1 }
 0x356   : > { %v1685_v19 = vmax.f32 %v1251_v9, 0.0  ;;  %v1687_v20 = vmax.f32 %v1364_v10, 0.0  ;;  %v1255_v21 = vadd.f32 %v1254_v18, %v3015_v27  ;;  %v1368_v49 = vadd.f32 %v1367_v33, %v3018_v28 }
 0x357   : > { %v1770_v14 = vmax.f32 %v1769_v63, %v1684_v13  ;;  %v1812_v58 = vmax.f32 %v1811_v0, %v1686_v15  ;;  %v1692_v24 = vmax.f32 %v1253_v16, 0.0  ;;  %v1694_v25 = vmax.f32 %v1366_v17, 0.0 }
 0x358   : > { %v1791_v29 = vmax.f32 %v1790_v1, %v1685_v19  ;;  %v1833_v30 = vmax.f32 %v1832_v2, %v1687_v20  ;;  %v1693_v31 = vmax.f32 %v1255_v21, 0.0  ;;  %v1695_v34 = vmax.f32 %v1368_v49, 0.0 }
 0x359   : > { %v1771_v36 = vmax.f32 %v1770_v14, %v1692_v24  ;;  %v1813_v37 = vmax.f32 %v1812_v58, %v1694_v25 }
 0x35a   : > { %v1792_v39 = vmax.f32 %v1791_v29, %v1693_v31  ;;  %v1834_v32 = vmax.f32 %v1833_v30, %v1695_v34  ;;  %v1258_v35 = vpop.f32.mrb[32].mxu0  ;;  %v1371_v38 = vpop.f32.mrb[32].mxu1 }
 0x35b   : > { %v1259_v40 = vadd.f32 %v1258_v35, %v3009_v26  ;;  %v1372_v41 = vadd.f32 %v1371_v38, %v3012_v23  ;;  %v1260_v42 = vpop.f32.mrb[33].mxu0  ;;  %v1373_v43 = vpop.f32.mrb[33].mxu1 }
 0x35c   : > { %v1261_v44 = vadd.f32 %v1260_v42, %v3015_v27  ;;  %v1374_v45 = vadd.f32 %v1373_v43, %v3018_v28  ;;  %v1262_v46 = vpop.f32.mrb[34].mxu0  ;;  %v1375_v47 = vpop.f32.mrb[34].mxu1 }
 0x35d   : > { %v1700_v48 = vmax.f32 %v1259_v40, 0.0  ;;  %v1702_v51 = vmax.f32 %v1372_v41, 0.0  ;;  %v1263_v52 = vadd.f32 %v1262_v46, %v3009_v26  ;;  %v1376_v53 = vadd.f32 %v1375_v47, %v3012_v23  ;;  %v1264_v54 = vpop.f32.mrb[35].mxu0  ;;  %v1377_v55 = vpop.f32.mrb[35].mxu1 }
 0x35e   : > { %v1701_v56 = vmax.f32 %v1261_v44, 0.0  ;;  %v1703_v57 = vmax.f32 %v1374_v45, 0.0  ;;  %v1265_v59 = vadd.f32 %v1264_v54, %v3015_v27  ;;  %v1378_v60 = vadd.f32 %v1377_v55, %v3018_v28 }
 0x35f   : > { %v1772_v61 = vmax.f32 %v1771_v36, %v1700_v48  ;;  %v1814_v62 = vmax.f32 %v1813_v37, %v1702_v51  ;;  %v1708_v63 = vmax.f32 %v1263_v52, 0.0  ;;  %v1710_v0 = vmax.f32 %v1376_v53, 0.0 }
 0x360   : > { %v1793_v1 = vmax.f32 %v1792_v39, %v1701_v56  ;;  %v1835_v2 = vmax.f32 %v1834_v32, %v1703_v57  ;;  %v1709_v3 = vmax.f32 %v1265_v59, 0.0  ;;  %v1711_v4 = vmax.f32 %v1378_v60, 0.0 }
 0x361   : > { %v1773_v5 = vmax.f32 %v1772_v61, %v1708_v63  ;;  %v1815_v6 = vmax.f32 %v1814_v62, %v1710_v0  ;;  %v842_v46 = vsub.s32 4, %v3000_v50  ;;  %v850_v53 = vsub.s32 6, %v3000_v50 }
 0x362   : > { %v1794_v7 = vmax.f32 %v1793_v1, %v1709_v3  ;;  %v1836_v8 = vmax.f32 %v1835_v2, %v1711_v4  ;;  %v1268_v9 = vpop.f32.mrb[36].mxu0  ;;  %v1381_v10 = vpop.f32.mrb[36].mxu1  ;;  %v846_v54 = vsub.s32 5, %v3000_v50  ;;  %v2609_v60 = vmov 1966171168  }
 0x363   : > { %v1269_v11 = vadd.f32 %v1268_v9, %v3009_v26  ;;  %v1382_v12 = vadd.f32 %v1381_v10, %v3012_v23  ;;  %v1270_v13 = vpop.f32.mrb[37].mxu0  ;;  %v1383_v15 = vpop.f32.mrb[37].mxu1  ;;  %v1946_v61 = vunpack.c.l.s4 %v2609_v60  ;;  %v854_v62 = vsub.s32 7, %v3000_v50 }
 0x364   : > { %v1271_v16 = vadd.f32 %v1270_v13, %v3015_v27  ;;  %v1384_v17 = vadd.f32 %v1383_v15, %v3018_v28  ;;  %v1272_v18 = vpop.f32.mrb[38].mxu0  ;;  %v1385_v33 = vpop.f32.mrb[38].mxu1 }
 0x365   : > { %v1716_v19 = vmax.f32 %v1269_v11, 0.0  ;;  %v1718_v20 = vmax.f32 %v1382_v12, 0.0  ;;  %v1273_v21 = vadd.f32 %v1272_v18, %v3009_v26  ;;  %v1386_v49 = vadd.f32 %v1385_v33, %v3012_v23  ;;  %v1274_v14 = vpop.f32.mrb[39].mxu0  ;;  %v1387_v58 = vpop.f32.mrb[39].mxu1 }
 0x366   : > { %v1717_v24 = vmax.f32 %v1271_v16, 0.0  ;;  %v1719_v25 = vmax.f32 %v1384_v17, 0.0  ;;  %v1275_v29 = vadd.f32 %v1274_v14, %v3015_v27  ;;  %v1388_v30 = vadd.f32 %v1387_v58, %v3018_v28 }
 0x367   : > { %v1774_v31 = vmax.f32 %v1773_v5, %v1716_v19  ;;  %v1816_v34 = vmax.f32 %v1815_v6, %v1718_v20  ;;  %v1724_v36 = vmax.f32 %v1273_v21, 0.0  ;;  %v1726_v37 = vmax.f32 %v1386_v49, 0.0 }
 0x368   : > { %v1795_v39 = vmax.f32 %v1794_v7, %v1717_v24  ;;  %v1837_v32 = vmax.f32 %v1836_v8, %v1719_v25  ;;  %v1725_v35 = vmax.f32 %v1275_v29, 0.0  ;;  %v1727_v38 = vmax.f32 %v1388_v30, 0.0 }
 0x369   : > { %v1775_v40 = vmax.f32 %v1774_v31, %v1724_v36  ;;  %v1817_v41 = vmax.f32 %v1816_v34, %v1726_v37  ;;  %v3081_v14 = vrot.slane %v3004_v22, %v842_v46  ;;  %v3086_v30 = vrot.slane %v3004_v22, %v850_v53 }
 0x36a   : > { %v1796_v42 = vmax.f32 %v1795_v39, %v1725_v35  ;;  %v1838_v43 = vmax.f32 %v1837_v32, %v1727_v38  ;;  %v1278_v44 = vpop.f32.mrb[40].mxu0  ;;  %v1391_v45 = vpop.f32.mrb[40].mxu1  ;;  %v3089_v31 = vrot.slane %v3004_v22, %v846_v54  ;;  %v1947_v32 = vunpack.c.0.s8 %v1946_v61 }
 0x36b   : > { %v1279_v47 = vadd.f32 %v1278_v44, %v3009_v26  ;;  %v1392_v48 = vadd.f32 %v1391_v45, %v3012_v23  ;;  %v1280_v51 = vpop.f32.mrb[41].mxu0  ;;  %v1393_v52 = vpop.f32.mrb[41].mxu1  ;;  %v3094_v35 = vrot.slane %v3004_v22, %v854_v62 }
 0x36c   : > { %v1281_v55 = vadd.f32 %v1280_v51, %v3015_v27  ;;  %v1394_v56 = vadd.f32 %v1393_v52, %v3018_v28  ;;  %v1282_v57 = vpop.f32.mrb[42].mxu0  ;;  %v1395_v59 = vpop.f32.mrb[42].mxu1 }
 0x36d   : > { %v1732_v63 = vmax.f32 %v1279_v47, 0.0  ;;  %v1734_v0 = vmax.f32 %v1392_v48, 0.0  ;;  %v1283_v1 = vadd.f32 %v1282_v57, %v3009_v26  ;;  %v1396_v2 = vadd.f32 %v1395_v59, %v3012_v23  ;;  %v1284_v3 = vpop.f32.mrb[43].mxu0  ;;  %v1397_v4 = vpop.f32.mrb[43].mxu1 }
 0x36e   : > { %v1733_v5 = vmax.f32 %v1281_v55, 0.0  ;;  %v1735_v6 = vmax.f32 %v1394_v56, 0.0  ;;  %v1285_v7 = vadd.f32 %v1284_v3, %v3015_v27  ;;  %v1398_v8 = vadd.f32 %v1397_v4, %v3018_v28 }
 0x36f   : > { %v1776_v9 = vmax.f32 %v1775_v40, %v1732_v63  ;;  %v1818_v10 = vmax.f32 %v1817_v41, %v1734_v0  ;;  %v1740_v11 = vmax.f32 %v1283_v1, 0.0  ;;  %v1742_v12 = vmax.f32 %v1396_v2, 0.0 }
 0x370   : > { %v1797_v13 = vmax.f32 %v1796_v42, %v1733_v5  ;;  %v1839_v15 = vmax.f32 %v1838_v43, %v1735_v6  ;;  %v1741_v16 = vmax.f32 %v1285_v7, 0.0  ;;  %v1743_v17 = vmax.f32 %v1398_v8, 0.0 }
 0x371   : > { %v1777_v18 = vmax.f32 %v1776_v9, %v1740_v11  ;;  %v1819_v33 = vmax.f32 %v1818_v10, %v1742_v12 }
 0x372   : > { %v1798_v19 = vmax.f32 %v1797_v13, %v1741_v16  ;;  %v1840_v20 = vmax.f32 %v1839_v15, %v1743_v17  ;;  %v1288_v21 = vpop.f32.mrb[44].mxu0  ;;  %v1401_v49 = vpop.f32.mrb[44].mxu1 }
 0x373   : > { %v1289_v58 = vadd.f32 %v1288_v21, %v3009_v26  ;;  %v1402_v24 = vadd.f32 %v1401_v49, %v3012_v23  ;;  %v1290_v25 = vpop.f32.mrb[45].mxu0  ;;  %v1403_v29 = vpop.f32.mrb[45].mxu1 }
 0x374   : > { %v1291_v34 = vadd.f32 %v1290_v25, %v3015_v27  ;;  %v1404_v36 = vadd.f32 %v1403_v29, %v3018_v28  ;;  %v1292_v37 = vpop.f32.mrb[46].mxu0  ;;  %v1405_v39 = vpop.f32.mrb[46].mxu1 }
 0x375   : > { %v1748_v38 = vmax.f32 %v1289_v58, 0.0  ;;  %v1750_v40 = vmax.f32 %v1402_v24, 0.0  ;;  %v1293_v41 = vadd.f32 %v1292_v37, %v3009_v26  ;;  %v1406_v42 = vadd.f32 %v1405_v39, %v3012_v23  ;;  %v1294_v43 = vpop.f32.mrb[47].mxu0  ;;  %v1407_v44 = vpop.f32.mrb[47].mxu1 }
 0x376   : > { %v1749_v45 = vmax.f32 %v1291_v34, 0.0  ;;  %v1751_v46 = vmax.f32 %v1404_v36, 0.0  ;;  %v1295_v47 = vadd.f32 %v1294_v43, %v3015_v27  ;;  %v1408_v48 = vadd.f32 %v1407_v44, %v3018_v28 }
 0x377   : > { %v1778_v51 = vmax.f32 %v1777_v18, %v1748_v38  ;;  %v1820_v52 = vmax.f32 %v1819_v33, %v1750_v40  ;;  %v1756_v53 = vmax.f32 %v1293_v41, 0.0  ;;  %v1758_v54 = vmax.f32 %v1406_v42, 0.0 }
 0x378   : > { %v1799_v22 = vmax.f32 %v1798_v19, %v1749_v45  ;;  %v1841_v55 = vmax.f32 %v1840_v20, %v1751_v46  ;;  %v1757_v56 = vmax.f32 %v1295_v47, 0.0  ;;  %v1759_v57 = vmax.f32 %v1408_v48, 0.0 }
 0x379   : > { %v1779_v59 = vmax.f32 %v1778_v51, %v1756_v53  ;;  %v1821_v26 = vmax.f32 %v1820_v52, %v1758_v54  ;;  %v3101_v23 = vsub.s32 %v1947_v32, %v3000_v50 }
 0x37a   : > { %v1800_v60 = vmax.f32 %v1799_v22, %v1757_v56  ;;  %v1842_v61 = vmax.f32 %v1841_v55, %v1759_v57  ;;  %v1444_v62 = vpop.f32.mrb[48].mxu0  ;;  %v1557_v63 = vpop.f32.mrb[48].mxu1 }
 0x37b   : > { %v1780_v27 = vrot.slane %v1779_v59, 4  ;;  %v1822_v0 = vrot.slane %v1821_v26, 4  ;;  %v1445_v28 = vadd.f32 %v1444_v62, %v3081_v14  ;;  %v1558_v1 = vadd.f32 %v1557_v63, %v3086_v30  ;;  %v1446_v2 = vpop.f32.mrb[49].mxu0  ;;  %v1559_v3 = vpop.f32.mrb[49].mxu1 }
 0x37c   : > { %v1801_v4 = vrot.slane %v1800_v60, 4  ;;  %v1843_v5 = vrot.slane %v1842_v61, 4  ;;  %v1447_v6 = vadd.f32 %v1446_v2, %v3089_v31  ;;  %v1560_v7 = vadd.f32 %v1559_v3, %v3094_v35  ;;  %v1448_v8 = vpop.f32.mrb[50].mxu0  ;;  %v1561_v50 = vpop.f32.mrb[50].mxu1 }
 0x37d   : > { %v1781_v9 = vmax.f32 %v1779_v59, %v1780_v27  ;;  %v1823_v10 = vmax.f32 %v1821_v26, %v1822_v0  ;;  %v1640_v11 = vmax.f32 %v1445_v28, 0.0  ;;  %v1642_v12 = vmax.f32 %v1558_v1, 0.0  ;;  %v1450_v13 = vpop.f32.mrb[51].mxu0  ;;  %v1563_v15 = vpop.f32.mrb[51].mxu1 }
 0x37e   : > { %v1802_v16 = vmax.f32 %v1800_v60, %v1801_v4  ;;  %v1844_v17 = vmax.f32 %v1842_v61, %v1843_v5  ;;  %v1641_v18 = vmax.f32 %v1447_v6, 0.0  ;;  %v1643_v33 = vmax.f32 %v1560_v7, 0.0 }
 0x37f   : > { %v1782_v19 = vrot.slane %v1781_v9, 2  ;;  %v1824_v20 = vrot.slane %v1823_v10, 2  ;;  %v1449_v21 = vadd.f32 %v1448_v8, %v3081_v14  ;;  %v1562_v49 = vadd.f32 %v1561_v50, %v3086_v30 }
 0x380   : > { %v1803_v58 = vrot.slane %v1802_v16, 2  ;;  %v1845_v24 = vrot.slane %v1844_v17, 2  ;;  %v1451_v25 = vadd.f32 %v1450_v13, %v3089_v31  ;;  %v1564_v29 = vadd.f32 %v1563_v15, %v3094_v35 }
 0x381   : > { %v1783_v34 = vmax.f32 %v1781_v9, %v1782_v19  ;;  %v1825_v36 = vmax.f32 %v1823_v10, %v1824_v20  ;;  %v1648_v37 = vmax.f32 %v1449_v21, 0.0  ;;  %v1650_v39 = vmax.f32 %v1562_v49, 0.0 }
 0x382   : > { %v1804_v32 = vmax.f32 %v1802_v16, %v1803_v58  ;;  %v1846_v38 = vmax.f32 %v1844_v17, %v1845_v24  ;;  %v1649_v40 = vmax.f32 %v1451_v25, 0.0  ;;  %v1651_v41 = vmax.f32 %v1564_v29, 0.0  ;;  %v1454_v42 = vpop.f32.mrb[52].mxu0  ;;  %v1567_v43 = vpop.f32.mrb[52].mxu1 }
 0x383   : > { %v1784_v44 = vrot.slane %v1783_v34, 1  ;;  %v1826_v45 = vrot.slane %v1825_v36, 1  ;;  %v1849_v46 = vmax.f32 %v1640_v11, %v1648_v37  ;;  %v1891_v47 = vmax.f32 %v1642_v12, %v1650_v39  ;;  %v1456_v48 = vpop.f32.mrb[53].mxu0  ;;  %v1569_v51 = vpop.f32.mrb[53].mxu1 }
 0x384   : > { %v1805_v52 = vrot.slane %v1804_v32, 1  ;;  %v1847_v53 = vrot.slane %v1846_v38, 1  ;;  %v1870_v54 = vmax.f32 %v1641_v18, %v1649_v40  ;;  %v1912_v22 = vmax.f32 %v1643_v33, %v1651_v41  ;;  %v1458_v55 = vpop.f32.mrb[54].mxu0  ;;  %v1571_v56 = vpop.f32.mrb[54].mxu1 }
 0x385   : > { %v1785_v57 = vmax.f32 %v1783_v34, %v1784_v44  ;;  %v1827_v59 = vmax.f32 %v1825_v36, %v1826_v45  ;;  %v1455_v26 = vadd.f32 %v1454_v42, %v3081_v14  ;;  %v1568_v60 = vadd.f32 %v1567_v43, %v3086_v30  ;;  %v1460_v61 = vpop.f32.mrb[55].mxu0  ;;  %v1573_v62 = vpop.f32.mrb[55].mxu1 }
 0x386   : > { %v1806_v63 = vmax.f32 %v1804_v32, %v1805_v52  ;;  %v1848_v27 = vmax.f32 %v1846_v38, %v1847_v53  ;;  %v1457_v0 = vadd.f32 %v1456_v48, %v3089_v31  ;;  %v1570_v28 = vadd.f32 %v1569_v51, %v3094_v35 }
 0x387   : > { %v1656_v1 = vmax.f32 %v1455_v26, 0.0  ;;  %v1658_v2 = vmax.f32 %v1568_v60, 0.0  ;;  %v1459_v3 = vadd.f32 %v1458_v55, %v3081_v14  ;;  %v1572_v4 = vadd.f32 %v1571_v56, %v3086_v30 }
 0x388   : > { %v1941_v5 = vcombine.low %v1785_v57, %v1806_v63  ;;  %v1942_v6 = vcombine.low %v1827_v59, %v1848_v27  ;;  %v1657_v7 = vmax.f32 %v1457_v0, 0.0  ;;  %v1659_v8 = vmax.f32 %v1570_v28, 0.0 }
 0x389   : > { %v1850_v50 = vmax.f32 %v1849_v46, %v1656_v1  ;;  %v1892_v9 = vmax.f32 %v1891_v47, %v1658_v2  ;;  %v1664_v10 = vmax.f32 %v1459_v3, 0.0  ;;  %v1666_v11 = vmax.f32 %v1572_v4, 0.0 }
 0x38a   : > { %v3118_v12 = vrot.slane %v1941_v5, %v3101_v23  ;;  %v3121_v13 = vrot.slane %v1942_v6, %v3101_v23  ;;  %v1871_v15 = vmax.f32 %v1870_v54, %v1657_v7  ;;  %v1913_v16 = vmax.f32 %v1912_v22, %v1659_v8  ;;  %v1464_v17 = vpop.f32.mrb[56].mxu0  ;;  %v1577_v18 = vpop.f32.mrb[56].mxu1 }
 0x38b   : > { %v1851_v33 = vmax.f32 %v1850_v50, %v1664_v10  ;;  %v1893_v19 = vmax.f32 %v1892_v9, %v1666_v11  ;;  %v1461_v20 = vadd.f32 %v1460_v61, %v3089_v31  ;;  %v1574_v21 = vadd.f32 %v1573_v62, %v3094_v35  ;;  %v1466_v49 = vpop.f32.mrb[57].mxu0  ;;  %v1579_v58 = vpop.f32.mrb[57].mxu1 }
 0x38c   : > { %v1973_v24 = vcombine.low %v3118_v12, %v3121_v13  ;;  %v1465_v25 = vadd.f32 %v1464_v17, %v3081_v14  ;;  %v1578_v29 = vadd.f32 %v1577_v18, %v3086_v30  ;;  %v1467_v34 = vadd.f32 %v1466_v49, %v3089_v31  ;;  %v1468_v36 = vpop.f32.mrb[58].mxu0  ;;  %v1581_v37 = vpop.f32.mrb[58].mxu1 }
 0x38d   : > { %v1665_v39 = vmax.f32 %v1461_v20, 0.0  ;;  %v1667_v32 = vmax.f32 %v1574_v21, 0.0  ;;  %v1580_v38 = vadd.f32 %v1579_v58, %v3094_v35  ;;  %v1469_v40 = vadd.f32 %v1468_v36, %v3081_v14  ;;  %v1470_v41 = vpop.f32.mrb[59].mxu0  ;;  %v1583_v42 = vpop.f32.mrb[59].mxu1 }
 0x38e   : > { %v1672_v43 = vmax.f32 %v1465_v25, 0.0  ;;  %v1674_v44 = vmax.f32 %v1578_v29, 0.0  ;;  %v1673_v45 = vmax.f32 %v1467_v34, 0.0  ;;  %v1582_v54 = vadd.f32 %v1581_v37, %v3086_v30 }
 0x38f   : > { %v1872_v46 = vmax.f32 %v1871_v15, %v1665_v39  ;;  %v1914_v47 = vmax.f32 %v1913_v16, %v1667_v32  ;;  %v1675_v48 = vmax.f32 %v1580_v38, 0.0  ;;  %v1680_v51 = vmax.f32 %v1469_v40, 0.0 }
 0x390   : > { %v1852_v52 = vmax.f32 %v1851_v33, %v1672_v43  ;;  %v1894_v53 = vmax.f32 %v1893_v19, %v1674_v44  ;;  %v1471_v22 = vadd.f32 %v1470_v41, %v3089_v31  ;;  %v1584_v57 = vadd.f32 %v1583_v42, %v3094_v35 }
 0x391   : > { %v1873_v55 = vmax.f32 %v1872_v46, %v1673_v45  ;;  %v1915_v56 = vmax.f32 %v1914_v47, %v1675_v48  ;;  %v1682_v26 = vmax.f32 %v1582_v54, 0.0 }
 0x392   : > { %v1853_v59 = vmax.f32 %v1852_v52, %v1680_v51  ;;  %v1681_v60 = vmax.f32 %v1471_v22, 0.0  ;;  %v1474_v61 = vpop.f32.mrb[60].mxu0  ;;  %v1587_v62 = vpop.f32.mrb[60].mxu1  ;;  %v1683_v63 = vmax.f32 %v1584_v57, 0.0 }
 0x393   : > { %v1475_v27 = vadd.f32 %v1474_v61, %v3081_v14  ;;  %v1588_v0 = vadd.f32 %v1587_v62, %v3086_v30  ;;  %v1476_v28 = vpop.f32.mrb[61].mxu0  ;;  %v1589_v1 = vpop.f32.mrb[61].mxu1  ;;  %v1895_v2 = vmax.f32 %v1894_v53, %v1682_v26 }
 0x394   : > { %v1874_v3 = vmax.f32 %v1873_v55, %v1681_v60  ;;  %v1477_v4 = vadd.f32 %v1476_v28, %v3089_v31  ;;  %v1590_v5 = vadd.f32 %v1589_v1, %v3094_v35  ;;  %v1478_v6 = vpop.f32.mrb[62].mxu0  ;;  %v1591_v7 = vpop.f32.mrb[62].mxu1  ;;  %v1916_v8 = vmax.f32 %v1915_v56, %v1683_v63 }
 0x395   : > { %v1688_v50 = vmax.f32 %v1475_v27, 0.0  ;;  %v1690_v9 = vmax.f32 %v1588_v0, 0.0  ;;  %v1479_v10 = vadd.f32 %v1478_v6, %v3081_v14  ;;  %v1480_v11 = vpop.f32.mrb[63].mxu0  ;;  %v1593_v15 = vpop.f32.mrb[63].mxu1  ;;  %v1592_v18 = vadd.f32 %v1591_v7, %v3086_v30 }
 0x396   : > { %v1689_v16 = vmax.f32 %v1477_v4, 0.0  ;;  %v1691_v17 = vmax.f32 %v1590_v5, 0.0  ;;  %v1481_v33 = vadd.f32 %v1480_v11, %v3089_v31  ;;  %v1594_v49 = vadd.f32 %v1593_v15, %v3094_v35 }
 0x397   : > { %v1854_v19 = vmax.f32 %v1853_v59, %v1688_v50  ;;  %v1896_v20 = vmax.f32 %v1895_v2, %v1690_v9  ;;  %v1696_v21 = vmax.f32 %v1479_v10, 0.0  ;;  %v1698_v29 = vmax.f32 %v1592_v18, 0.0 }
 0x398   : > { %v1875_v58 = vmax.f32 %v1874_v3, %v1689_v16  ;;  %v1917_v25 = vmax.f32 %v1916_v8, %v1691_v17  ;;  %v1697_v34 = vmax.f32 %v1481_v33, 0.0  ;;  %v1699_v37 = vmax.f32 %v1594_v49, 0.0 }
 0x399   : > { %v1855_v36 = vmax.f32 %v1854_v19, %v1696_v21  ;;  %v1897_v39 = vmax.f32 %v1896_v20, %v1698_v29 }
 0x39a   : > { %v1876_v32 = vmax.f32 %v1875_v58, %v1697_v34  ;;  %v1484_v38 = vpop.f32.mrb[64].mxu0  ;;  %v1597_v40 = vpop.f32.mrb[64].mxu1  ;;  %v1918_v41 = vmax.f32 %v1917_v25, %v1699_v37 }
 0x39b   : > { %v1485_v42 = vadd.f32 %v1484_v38, %v3081_v14  ;;  %v1598_v43 = vadd.f32 %v1597_v40, %v3086_v30  ;;  %v1486_v44 = vpop.f32.mrb[65].mxu0  ;;  %v1599_v45 = vpop.f32.mrb[65].mxu1 }
 0x39c   : > { %v1487_v46 = vadd.f32 %v1486_v44, %v3089_v31  ;;  %v1600_v47 = vadd.f32 %v1599_v45, %v3094_v35  ;;  %v1488_v48 = vpop.f32.mrb[66].mxu0  ;;  %v1601_v51 = vpop.f32.mrb[66].mxu1 }
 0x39d   : > { %v1704_v52 = vmax.f32 %v1485_v42, 0.0  ;;  %v1706_v53 = vmax.f32 %v1598_v43, 0.0  ;;  %v1489_v54 = vadd.f32 %v1488_v48, %v3081_v14  ;;  %v1602_v22 = vadd.f32 %v1601_v51, %v3086_v30  ;;  %v1490_v55 = vpop.f32.mrb[67].mxu0  ;;  %v1603_v56 = vpop.f32.mrb[67].mxu1 }
 0x39e   : > { %v1705_v57 = vmax.f32 %v1487_v46, 0.0  ;;  %v1707_v59 = vmax.f32 %v1600_v47, 0.0  ;;  %v1491_v26 = vadd.f32 %v1490_v55, %v3089_v31  ;;  %v1604_v60 = vadd.f32 %v1603_v56, %v3094_v35 }
 0x39f   : > { %v1856_v61 = vmax.f32 %v1855_v36, %v1704_v52  ;;  %v1898_v62 = vmax.f32 %v1897_v39, %v1706_v53  ;;  %v1712_v63 = vmax.f32 %v1489_v54, 0.0  ;;  %v1714_v27 = vmax.f32 %v1602_v22, 0.0 }
 0x3a0   : > { %v1877_v0 = vmax.f32 %v1876_v32, %v1705_v57  ;;  %v1919_v28 = vmax.f32 %v1918_v41, %v1707_v59  ;;  %v1713_v1 = vmax.f32 %v1491_v26, 0.0  ;;  %v1715_v2 = vmax.f32 %v1604_v60, 0.0 }
 0x3a1   : > { %v1857_v3 = vmax.f32 %v1856_v61, %v1712_v63  ;;  %v1899_v4 = vmax.f32 %v1898_v62, %v1714_v27 }
 0x3a2   : > { %v1878_v5 = vmax.f32 %v1877_v0, %v1713_v1  ;;  %v1920_v6 = vmax.f32 %v1919_v28, %v1715_v2  ;;  %v1494_v7 = vpop.f32.mrb[68].mxu0  ;;  %v1607_v8 = vpop.f32.mrb[68].mxu1 }
 0x3a3   : > { %v1495_v50 = vadd.f32 %v1494_v7, %v3081_v14  ;;  %v1608_v9 = vadd.f32 %v1607_v8, %v3086_v30  ;;  %v1496_v10 = vpop.f32.mrb[69].mxu0  ;;  %v1609_v11 = vpop.f32.mrb[69].mxu1 }
 0x3a4   : > { %v1497_v15 = vadd.f32 %v1496_v10, %v3089_v31  ;;  %v1610_v16 = vadd.f32 %v1609_v11, %v3094_v35  ;;  %v1498_v17 = vpop.f32.mrb[70].mxu0  ;;  %v1611_v18 = vpop.f32.mrb[70].mxu1 }
 0x3a5   : > { %v1720_v33 = vmax.f32 %v1495_v50, 0.0  ;;  %v1722_v19 = vmax.f32 %v1608_v9, 0.0  ;;  %v1499_v20 = vadd.f32 %v1498_v17, %v3081_v14  ;;  %v1612_v21 = vadd.f32 %v1611_v18, %v3086_v30  ;;  %v1500_v49 = vpop.f32.mrb[71].mxu0  ;;  %v1613_v58 = vpop.f32.mrb[71].mxu1 }
 0x3a6   : > { %v1721_v25 = vmax.f32 %v1497_v15, 0.0  ;;  %v1723_v29 = vmax.f32 %v1610_v16, 0.0  ;;  %v1501_v34 = vadd.f32 %v1500_v49, %v3089_v31  ;;  %v1614_v36 = vadd.f32 %v1613_v58, %v3094_v35 }
 0x3a7   : > { %v1858_v37 = vmax.f32 %v1857_v3, %v1720_v33  ;;  %v1900_v39 = vmax.f32 %v1899_v4, %v1722_v19  ;;  %v1728_v32 = vmax.f32 %v1499_v20, 0.0  ;;  %v1730_v38 = vmax.f32 %v1612_v21, 0.0 }
 0x3a8   : > { %v1879_v40 = vmax.f32 %v1878_v5, %v1721_v25  ;;  %v1921_v41 = vmax.f32 %v1920_v6, %v1723_v29  ;;  %v1729_v42 = vmax.f32 %v1501_v34, 0.0  ;;  %v1731_v43 = vmax.f32 %v1614_v36, 0.0 }
 0x3a9   : > { %v1859_v44 = vmax.f32 %v1858_v37, %v1728_v32  ;;  %v1901_v45 = vmax.f32 %v1900_v39, %v1730_v38 }
 0x3aa   : > { %v1880_v46 = vmax.f32 %v1879_v40, %v1729_v42  ;;  %v1922_v47 = vmax.f32 %v1921_v41, %v1731_v43  ;;  %v1504_v48 = vpop.f32.mrb[72].mxu0  ;;  %v1617_v51 = vpop.f32.mrb[72].mxu1 }
 0x3ab   : > { %v1505_v52 = vadd.f32 %v1504_v48, %v3081_v14  ;;  %v1618_v53 = vadd.f32 %v1617_v51, %v3086_v30  ;;  %v1506_v54 = vpop.f32.mrb[73].mxu0  ;;  %v1619_v22 = vpop.f32.mrb[73].mxu1 }
 0x3ac   : > { %v1507_v55 = vadd.f32 %v1506_v54, %v3089_v31  ;;  %v1620_v56 = vadd.f32 %v1619_v22, %v3094_v35  ;;  %v1508_v57 = vpop.f32.mrb[74].mxu0  ;;  %v1621_v59 = vpop.f32.mrb[74].mxu1 }
 0x3ad   : > { %v1736_v26 = vmax.f32 %v1505_v52, 0.0  ;;  %v1738_v60 = vmax.f32 %v1618_v53, 0.0  ;;  %v1509_v61 = vadd.f32 %v1508_v57, %v3081_v14  ;;  %v1622_v62 = vadd.f32 %v1621_v59, %v3086_v30  ;;  %v1510_v63 = vpop.f32.mrb[75].mxu0  ;;  %v1623_v27 = vpop.f32.mrb[75].mxu1 }
 0x3ae   : > { %v1737_v0 = vmax.f32 %v1507_v55, 0.0  ;;  %v1739_v28 = vmax.f32 %v1620_v56, 0.0  ;;  %v1511_v1 = vadd.f32 %v1510_v63, %v3089_v31  ;;  %v1624_v2 = vadd.f32 %v1623_v27, %v3094_v35 }
 0x3af   : > { %v1860_v3 = vmax.f32 %v1859_v44, %v1736_v26  ;;  %v1902_v4 = vmax.f32 %v1901_v45, %v1738_v60  ;;  %v1744_v5 = vmax.f32 %v1509_v61, 0.0  ;;  %v1746_v6 = vmax.f32 %v1622_v62, 0.0 }
 0x3b0   : > { %v1881_v7 = vmax.f32 %v1880_v46, %v1737_v0  ;;  %v1923_v8 = vmax.f32 %v1922_v47, %v1739_v28  ;;  %v1745_v50 = vmax.f32 %v1511_v1, 0.0  ;;  %v1747_v9 = vmax.f32 %v1624_v2, 0.0 }
 0x3b1   : > { %v1861_v10 = vmax.f32 %v1860_v3, %v1744_v5  ;;  %v1903_v11 = vmax.f32 %v1902_v4, %v1746_v6 }
 0x3b2   : > { %v1882_v15 = vmax.f32 %v1881_v7, %v1745_v50  ;;  %v1924_v16 = vmax.f32 %v1923_v8, %v1747_v9  ;;  %v1514_v17 = vpop.f32.mrb[76].mxu0  ;;  %v1627_v18 = vpop.f32.mrb[76].mxu1 }
 0x3b3   : > { %v1515_v33 = vadd.f32 %v1514_v17, %v3081_v14  ;;  %v1628_v19 = vadd.f32 %v1627_v18, %v3086_v30  ;;  %v1516_v20 = vpop.f32.mrb[77].mxu0  ;;  %v1629_v21 = vpop.f32.mrb[77].mxu1  ;;  %v1981_v18 = vrot.slane %v1973_v24, %v3101_v23 }
 0x3b4   : > { %v1517_v49 = vadd.f32 %v1516_v20, %v3089_v31  ;;  %v1630_v58 = vadd.f32 %v1629_v21, %v3094_v35  ;;  %v1518_v25 = vpop.f32.mrb[78].mxu0  ;;  %v1631_v29 = vpop.f32.mrb[78].mxu1 }
 0x3b5   : > { %v1752_v34 = vmax.f32 %v1515_v33, 0.0  ;;  %v1754_v36 = vmax.f32 %v1628_v19, 0.0  ;;  %v1519_v37 = vadd.f32 %v1518_v25, %v3081_v14  ;;  %v1632_v39 = vadd.f32 %v1631_v29, %v3086_v30  ;;  %v1520_v32 = vpop.f32.mrb[79].mxu0  ;;  %v1633_v38 = vpop.f32.mrb[79].mxu1 }
 0x3b6   : > { %v1753_v40 = vmax.f32 %v1517_v49, 0.0  ;;  %v1755_v41 = vmax.f32 %v1630_v58, 0.0  ;;  %v1521_v42 = vadd.f32 %v1520_v32, %v3089_v31  ;;  %v1634_v43 = vadd.f32 %v1633_v38, %v3094_v35 }
 0x3b7   : > { %v1862_v44 = vmax.f32 %v1861_v10, %v1752_v34  ;;  %v1904_v45 = vmax.f32 %v1903_v11, %v1754_v36  ;;  %v1760_v46 = vmax.f32 %v1519_v37, 0.0  ;;  %v1762_v47 = vmax.f32 %v1632_v39, 0.0 }
 0x3b8   : > { %v1883_v48 = vmax.f32 %v1882_v15, %v1753_v40  ;;  %v1925_v51 = vmax.f32 %v1924_v16, %v1755_v41  ;;  %v1761_v52 = vmax.f32 %v1521_v42, 0.0  ;;  %v1763_v53 = vmax.f32 %v1634_v43, 0.0 }
 0x3b9   : > { %v1863_v54 = vmax.f32 %v1862_v44, %v1760_v46  ;;  %v1905_v14 = vmax.f32 %v1904_v45, %v1762_v47 }
 0x3ba   : > { %v1884_v22 = vmax.f32 %v1883_v48, %v1761_v52  ;;  %v1926_v30 = vmax.f32 %v1925_v51, %v1763_v53 }
 0x3bb   : > { %v1864_v55 = vrot.slane %v1863_v54, 4  ;;  %v1906_v56 = vrot.slane %v1905_v14, 4 }
 0x3bc   : > { %v1885_v57 = vrot.slane %v1884_v22, 4  ;;  %v1927_v59 = vrot.slane %v1926_v30, 4 }
 0x3bd   : > { %v1865_v26 = vmax.f32 %v1863_v54, %v1864_v55  ;;  %v1907_v31 = vmax.f32 %v1905_v14, %v1906_v56 }
 0x3be   : > { %v1886_v60 = vmax.f32 %v1884_v22, %v1885_v57  ;;  %v1928_v35 = vmax.f32 %v1926_v30, %v1927_v59 }
 0x3bf   : > { %v1866_v61 = vrot.slane %v1865_v26, 2  ;;  %v1908_v62 = vrot.slane %v1907_v31, 2 }
 0x3c0   : > { %v1887_v63 = vrot.slane %v1886_v60, 2  ;;  %v1929_v27 = vrot.slane %v1928_v35, 2 }
 0x3c1   : > { %v1867_v0 = vmax.f32 %v1865_v26, %v1866_v61  ;;  %v1909_v28 = vmax.f32 %v1907_v31, %v1908_v62 }
 0x3c2   : > { %v1888_v1 = vmax.f32 %v1886_v60, %v1887_v63  ;;  %v1930_v2 = vmax.f32 %v1928_v35, %v1929_v27 }
 0x3c3   : > { %v1868_v3 = vrot.slane %v1867_v0, 1  ;;  %v1910_v4 = vrot.slane %v1909_v28, 1 }
 0x3c4   : > { %v1889_v5 = vrot.slane %v1888_v1, 1  ;;  %v1931_v6 = vrot.slane %v1930_v2, 1 }
 0x3c5   : > { %v1869_v7 = vmax.f32 %v1867_v0, %v1868_v3  ;;  %v1911_v8 = vmax.f32 %v1909_v28, %v1910_v4 }
 0x3c6   : > { %v1890_v50 = vmax.f32 %v1888_v1, %v1889_v5  ;;  %v1932_v9 = vmax.f32 %v1930_v2, %v1931_v6 }
 0x3c8   : > { %v1943_v10 = vcombine.low %v1869_v7, %v1890_v50  ;;  %v1944_v11 = vcombine.low %v1911_v8, %v1932_v9 }
 0x3ca   : > { %v1965_v15 = vrot.slane %v1943_v10, %v3101_v23  ;;  %v1972_v16 = vrot.slane %v1944_v11, %v3101_v23 }
 0x3cc   : > { %v1974_v17 = vcombine.low %v1965_v15, %v1972_v16 }
 0x3ce   : > { %v1988_v33 = vrot.slane %v1974_v17, %v3101_v23 }
 0x3d0   : > { %v1989_v19 = vcombine.low %v1981_v18, %v1988_v33 }
 0x3d2   : > { %1992 = vst [vmem:[%s384_s28] sm:$0xff] %v1989_v19 }
 0x3d3 PF: > { %s21_s26 = sadd.s32 1, %s2596_s26   ;;  %s3214_s24 = smov %s2592_s25 }
 0x3d4   : > { %p18_p8 = scmp.ge.s32.totalorder %s21_s26, 4   ;;  %s3215_s25 = smov %s3217_s12 }
 0x3d6   :  { %20 = sbr.rel (!%p18_p8) target bundleno = 5 (0x5), region = 107 }
 0x3dd   :  { %2012 = vsyncpa [#allocation3], 1 }
 0x3de   :  { %2014 = vsyncpa [#allocation3 + $0x1], 1 }
 0x3df   :  { %2015 = vsyncpa [#allocation5], 1 }
 0x3e0   :  { %2016 = vsyncpa [#allocation8], 1 }
 0x3e1   :  { %2017 = vsyncpa [#allocation11], 1 }

// kernel: pointnet_part_seg_forward.5
= control target key start
LH: loop header
LB: loop body
LE: loop exit
PB: predicated region body
PF: predicated region fallthrough
CT: control target
= control target key end

     0   :  { %s3085_s21 = smov 0   ;;  %s3087_s22 = smov 0   ;;  %s3780_s0 = inlined_call_operand.vmem [shape: f32[2,128,8], index: 0, kind: input, shape index: {}]   ;;  %s3781_s1 = inlined_call_operand.vmem [shape: bf16[2,8,64], index: 1, kind: input, shape index: {}]   ;;  %s3782_s2 = inlined_call_operand.vmem [shape: f32[1,64], index: 2, kind: input, shape index: {}]   ;;  %s3783_s3 = inlined_call_operand.vmem [shape: bf16[64,64], index: 3, kind: input, shape index: {}]   ;;  %s3784_s4 = inlined_call_operand.vmem [shape: f32[1,64], index: 4, kind: input, shape index: {}]   ;;  %s3785_s5 = inlined_call_operand.vmem [shape: bf16[64,64], index: 5, kind: input, shape index: {}]   ;;  %s3786_s6 = inlined_call_operand.vmem [shape: f32[1,64], index: 6, kind: input, shape index: {}]   ;;  %s3787_s7 = inlined_call_operand.vmem [shape: bf16[64,128], index: 7, kind: input, shape index: {}]   ;;  %s3788_s8 = inlined_call_operand.vmem [shape: f32[1,128], index: 8, kind: input, shape index: {}]   ;;  %s3789_s9 = inlined_call_operand.vmem [shape: bf16[128,1024], index: 9, kind: input, shape index: {}]   ;;  %s3790_s10 = inlined_call_operand.vmem [shape: f32[1,1024], index: 10, kind: input, shape index: {}]   ;;  %s3791_s11 = inlined_call_operand.vmem [shape: bf16[2,128,64], index: 11, kind: output, shape index: {0}]   ;;  %s3792_s12 = inlined_call_operand.vmem [shape: f32[2,1,1024], index: 12, kind: output, shape index: {1}]  }
   0x1   :  { %s3089_s23 = smov 0  }
   0x2 LB: > { %s35_s24 = sadd.s32 1, %s3012_s22  ;;  %p2664_p0 = scmp.ge.s32.totalorder %s3016_s23, 1  ;;  %s3016_s23 = sphi %s3089_s23, %s23_s23   ;;  %s3012_s22 = sphi %s3087_s22, %s3794_s22   ;;  %s3008_s21 = sphi %s3085_s21, %s3793_s21  }
   0x3   : > { %p37_p1 = scmp.ge.s32.totalorder %s35_s24, 2  ;;  %p395_p2 = scmp.lt.s32.totalorder %s3016_s23, 3 }
   0x5   : > { %s3796_s24 = smov (%p37_p1, %s35_s24), 0  ;;  %p396_p3 = pnand %p2664_p0, %p395_p2 }
   0x6   : > { %p454_p4 = scmp.lt.s32.totalorder (!%p396_p3), %s3008_s21, 1  ;;  %vm544_vm0 = vcmask (!%p396_p3), 1043456   ;;  %v2982_v0 = vld [vmem:[%s3783_s3] sm:$0xff] (!%p396_p3)   ;;  %v2983_v1 = vld [vmem:[%s3783_s3 + $0x8] sm:$0xff] (!%p396_p3)   ;;  %vm519_vm1 = vcmask (!%p396_p3), 64512   ;;  %v2984_v28 = vld [vmem:[%s3783_s3 + $0x10] sm:$0xff] (!%p396_p3)  }
   0x7   : > { %399 = sbr.rel (%p396_p3) target bundleno = 1273 (0x4f9), region = 64  ;;  %2882 = vmatprep.subr.bf16.mxu1 (!%p396_p3), %v2982_v0  ;;  %v2985_v29 = vld [vmem:[%s3783_s3 + $0x18] sm:$0xff] (!%p396_p3)   ;;  %v2986_v30 = vld [vmem:[%s3785_s5] sm:$0xff] (!%p396_p3)   ;;  %v2987_v31 = vld [vmem:[%s3785_s5 + $0x8] sm:$0xff] (!%p396_p3)   ;;  %vm708_vm2 = vcmask (!%p396_p3), 523264   ;;  %vm910_vm3 = vcmask (!%p396_p3), 519168  }
   0x8   : > { %2883 = vmatpush3.bf16.msra.mxu1 (!%p396_p3), %v2982_v0  ;;  %v2988_v32 = vld [vmem:[%s3785_s5 + $0x10] sm:$0xff] (!%p396_p3)   ;;  %v2671_v33 = vld [vmem:[%s3782_s2] ss:$0 sm:$0xff] (!%p396_p3) }
   0x9   : > { %2884 = vmatprep.subr.bf16.mxu1 (!%p396_p3), %v2983_v1 }
   0xc   : > { %2885 = vmatpush3.bf16.msra.mxu1 (!%p396_p3), %v2983_v1 }
   0xd   : > { %2886 = vmatprep.subr.bf16.mxu1 (!%p396_p3), %v2984_v28 }
   0xe   : > { %s3798_s21 = smov (!%p454_p4, %s3008_s21), 1 }
   0xf   : > { %s2801_s29 = sshll.u32 %s3798_s21, 7  ;;  %s2667_s30 = sshll.u32 %s3798_s21, 2 }
  0x10   : > { %s3116_s15 = scalar_lea.vmem %s3780_s0, %s2801_s29  ;;  %s466_s18 = scalar_lea.vmem %s3781_s1, %s2667_s30  ;;  %2887 = vmatpush3.bf16.msra.mxu1 %v2984_v28  ;;  %v2991_v28 = vld [vmem:[%s3787_s7 + $0x8] sm:$0xff]  }
  0x11   : > { %v503_v2 = vld [vmem:[%s466_s18] sm:$0xf]  ;;  %v488_v4 = vld [vmem:[%s3116_s15 + $0x8] sm:$0xff]  ;;  %v489_v7 = vld [vmem:[%s3116_s15 + $0x10] sm:$0xff]  ;;  %2888 = vmatprep.subr.bf16.mxu1 %v2985_v29  ;;  %s2802_s13 = sshll.u32 %s3798_s21, 6 }
  0x12   : > { %v487_v3 = vld [vmem:[%s3116_s15] sm:$0xff]  ;;  %2954 = vmatprep.subr.msk.bf16.mxu0 %vm544_vm0, %v503_v2  ;;  %v546_v5 = vsel %vm544_vm0, %v503_v2, 0  ;;  %v490_v8 = vld [vmem:[%s3116_s15 + $0x18] sm:$0xff]  ;;  %v492_v11 = vld [vmem:[%s3116_s15 + $0x28] sm:$0xff]  ;;  %s3197_s16 = scalar_lea.vmem %s3791_s11, %s2802_s13  ;;  %s2670_s13 = sshll.u32 %s3798_s21, 3 }
  0x13   : > { %v504_v6 = vpack.c.bf16 %v488_v4, %v487_v3  ;;  %v491_v9 = vld [vmem:[%s3116_s15 + $0x20] sm:$0xff]  ;;  %2865 = vmatpush3.bf16.msra.mxu0 %v546_v5  ;;  %v505_v10 = vpack.c.bf16 %v490_v8, %v489_v7  ;;  %v493_v13 = vld [vmem:[%s3116_s15 + $0x30] sm:$0xff]  ;;  %v494_v14 = vld [vmem:[%s3116_s15 + $0x38] sm:$0xff] }
  0x14   : > { %v506_v12 = vpack.c.bf16 %v492_v11, %v491_v9  ;;  %v495_v15 = vld [vmem:[%s3116_s15 + $0x40] sm:$0xff]  ;;  %v496_v16 = vld [vmem:[%s3116_s15 + $0x48] sm:$0xff]  ;;  %v507_v17 = vpack.c.bf16 %v494_v14, %v493_v13  ;;  %v497_v19 = vld [vmem:[%s3116_s15 + $0x50] sm:$0xff]  ;;  %2889 = vmatpush3.bf16.msra.mxu1 %v2985_v29  ;;  %2906 = vmatprep.subr.bf16.mxu0 %v2986_v30 }
  0x15   : > { %2866 = vmatprep.mubr.msk.bf16.mxu0 %vm519_vm1, %v504_v6  ;;  %v508_v18 = vpack.c.bf16 %v496_v16, %v495_v15  ;;  %v498_v20 = vld [vmem:[%s3116_s15 + $0x58] sm:$0xff]  ;;  %v499_v21 = vld [vmem:[%s3116_s15 + $0x60] sm:$0xff]  ;;  %v500_v22 = vld [vmem:[%s3116_s15 + $0x68] sm:$0xff] }
  0x16   : > { %2867 = vmatmul.mubr.msk.bf16.vlgmr.msra.gmra.mrb[0].mxu0 %vm519_vm1, %v505_v10  ;;  %v509_v23 = vpack.c.bf16 %v498_v20, %v497_v19  ;;  %v510_v24 = vpack.c.bf16 %v500_v22, %v499_v21  ;;  %v501_v25 = vld [vmem:[%s3116_s15 + $0x70] sm:$0xff]  ;;  %v502_v26 = vld [vmem:[%s3116_s15 + $0x78] sm:$0xff] }
  0x17   : > { %2870 = vmatprep.mubr.msk.bf16.mxu0 %vm519_vm1, %v506_v12  ;;  %v511_v27 = vpack.c.bf16 %v502_v26, %v501_v25  ;;  %2907 = vmatpush3.bf16.msra.mxu0 %v2986_v30  ;;  %v2989_v26 = vld [vmem:[%s3785_s5 + $0x18] sm:$0xff]   ;;  %v2992_v29 = vld [vmem:[%s3787_s7 + $0x10] sm:$0xff]   ;;  %v3188_v30 = vld [vmem:[%s3784_s4] ss:$0 sm:$0xff] }
  0x18   : > { %2908 = vmatprep.subr.bf16.mxu0 %v2987_v31 }
  0x1b   : > { %2909 = vmatpush3.bf16.msra.mxu0 %v2987_v31 }
  0x1c   : > { %2910 = vmatprep.subr.bf16.mxu0 %v2988_v32 }
  0x1e   : > { %2871 = vmatmul.mubr.msk.bf16.gmra.mrb[4].mxu0 %vm519_vm1, %v507_v17 }
  0x1f   : > { %2874 = vmatprep.mubr.msk.bf16.mxu0 %vm519_vm1, %v508_v18  ;;  %2911 = vmatpush3.bf16.msra.mxu0 %v2988_v32 }
  0x20   : > { %2912 = vmatprep.subr.bf16.mxu0 %v2989_v26 }
  0x23   : > { %2913 = vmatpush3.bf16.msra.mxu0 %v2989_v26 }
  0x26   : > { %2875 = vmatmul.mubr.msk.bf16.gmra.mrb[8].mxu0 %vm519_vm1, %v509_v23 }
  0x27   : > { %2878 = vmatprep.mubr.msk.bf16.mxu0 %vm519_vm1, %v510_v24 }
  0x2e   : > { %2879 = vmatmul.mubr.msk.bf16.gmra.mrb[12].mxu0 %vm519_vm1, %v511_v27  ;;  %v2990_v27 = vld [vmem:[%s3787_s7] sm:$0xff]  }
  0x2f   : > { %2930 = vmatprep.subr.bf16.mxu1 %v2990_v27 }
  0xe9   : > { %v2868_v34 = vpop.f32.mrb[0].mxu0 }
  0xea   : > { %v591_v35 = vadd.f32 %v2868_v34, %v2671_v33  ;;  %v582_v36 = vpop.f32.mrb[1].mxu0 }
  0xeb   : > { %v583_v37 = vadd.f32 %v2671_v33, %v582_v36  ;;  %v2869_v38 = vpop.f32.mrb[2].mxu0 }
  0xec   : > { %v594_v39 = vadd.f32 %v2869_v38, %v2671_v33  ;;  %v585_v40 = vpop.f32.mrb[3].mxu0  ;;  %v647_v42 = vmax.f32 %v591_v35, 0.0 }
  0xed   : > { %v586_v41 = vadd.f32 %v2671_v33, %v585_v40  ;;  %v645_v44 = vmax.f32 %v583_v37, 0.0 }
  0xee   : > { %v648_v43 = vmax.f32 %v594_v39, 0.0 }
  0xef   : > { %v646_v45 = vmax.f32 %v586_v41, 0.0 }
  0xf0   : > { %v670_v46 = vpack.c.bf16 %v648_v43, %v647_v42 }
  0xf1   : > { %v2872_v47 = vpop.f32.mrb[4].mxu0  ;;  %v669_v48 = vpack.c.bf16 %v646_v45, %v645_v44 }
  0xf2   : > { %v607_v49 = vadd.f32 %v2872_v47, %v2671_v33  ;;  %v598_v50 = vpop.f32.mrb[5].mxu0 }
  0xf3   : > { %v599_v51 = vadd.f32 %v2671_v33, %v598_v50  ;;  %v2873_v52 = vpop.f32.mrb[6].mxu0  ;;  %2890 = vmatprep.mubr.msk.bf16.mxu1 %vm708_vm2, %v669_v48 }
  0xf4   : > { %v651_v53 = vmax.f32 %v607_v49, 0.0  ;;  %v610_v54 = vadd.f32 %v2873_v52, %v2671_v33  ;;  %v601_v55 = vpop.f32.mrb[7].mxu0  ;;  %2891 = vmatmul.mubr.msk.bf16.vlgmr.msra.gmra.mrb[0].mxu1 %vm708_vm2, %v670_v46 }
  0xf5   : > { %v649_v56 = vmax.f32 %v599_v51, 0.0  ;;  %v602_v57 = vadd.f32 %v2671_v33, %v601_v55  ;;  %2931 = vmatpush3.bf16.msra.mxu1 %v2990_v27 }
  0xf6   : > { %v652_v58 = vmax.f32 %v610_v54, 0.0  ;;  %2932 = vmatprep.subr.bf16.mxu1 %v2991_v28 }
  0xf7   : > { %v650_v59 = vmax.f32 %v602_v57, 0.0 }
  0xf8   : > { %v672_v60 = vpack.c.bf16 %v652_v58, %v651_v53 }
  0xf9   : > { %v671_v61 = vpack.c.bf16 %v650_v59, %v649_v56  ;;  %v2876_v62 = vpop.f32.mrb[8].mxu0  ;;  %2933 = vmatpush3.bf16.msra.mxu1 %v2991_v28 }
  0xfa   : > { %v623_v63 = vadd.f32 %v2876_v62, %v2671_v33  ;;  %v614_v0 = vpop.f32.mrb[9].mxu0  ;;  %2934 = vmatprep.subr.bf16.mxu1 %v2992_v29 }
  0xfb   : > { %v615_v1 = vadd.f32 %v2671_v33, %v614_v0  ;;  %2894 = vmatprep.mubr.msk.bf16.mxu1 %vm708_vm2, %v671_v61  ;;  %v2877_v2 = vpop.f32.mrb[10].mxu0 }
  0xfc   : > { %v655_v3 = vmax.f32 %v623_v63, 0.0  ;;  %v626_v4 = vadd.f32 %v2877_v2, %v2671_v33  ;;  %2895 = vmatmul.mubr.msk.bf16.gmra.mrb[4].mxu1 %vm708_vm2, %v672_v60  ;;  %v617_v5 = vpop.f32.mrb[11].mxu0 }
  0xfd   : > { %v653_v6 = vmax.f32 %v615_v1, 0.0  ;;  %v618_v7 = vadd.f32 %v2671_v33, %v617_v5  ;;  %2935 = vmatpush3.bf16.msra.mxu1 %v2992_v29 }
  0xfe   : > { %v656_v8 = vmax.f32 %v626_v4, 0.0 }
  0xff   : > { %v654_v9 = vmax.f32 %v618_v7, 0.0 }
 0x100   : > { %v674_v10 = vpack.c.bf16 %v656_v8, %v655_v3 }
 0x101   : > { %v673_v11 = vpack.c.bf16 %v654_v9, %v653_v6  ;;  %v2880_v12 = vpop.f32.mrb[12].mxu0 }
 0x102   : > { %v639_v13 = vadd.f32 %v2880_v12, %v2671_v33  ;;  %v630_v14 = vpop.f32.mrb[13].mxu0 }
 0x103   : > { %2898 = vmatprep.mubr.msk.bf16.mxu1 %vm708_vm2, %v673_v11  ;;  %v631_v15 = vadd.f32 %v2671_v33, %v630_v14  ;;  %v2881_v16 = vpop.f32.mrb[14].mxu0 }
 0x104   : > { %2899 = vmatmul.mubr.msk.bf16.gmra.mrb[8].mxu1 %vm708_vm2, %v674_v10  ;;  %v659_v17 = vmax.f32 %v639_v13, 0.0  ;;  %v642_v18 = vadd.f32 %v2881_v16, %v2671_v33  ;;  %v633_v19 = vpop.f32.mrb[15].mxu0 }
 0x105   : > { %v657_v20 = vmax.f32 %v631_v15, 0.0  ;;  %v634_v21 = vadd.f32 %v2671_v33, %v633_v19 }
 0x106   : > { %v660_v22 = vmax.f32 %v642_v18, 0.0 }
 0x107   : > { %v658_v23 = vmax.f32 %v634_v21, 0.0 }
 0x108   : > { %v676_v24 = vpack.c.bf16 %v660_v22, %v659_v17 }
 0x109   : > { %v675_v25 = vpack.c.bf16 %v658_v23, %v657_v20 }
 0x10b   : > { %2902 = vmatprep.mubr.msk.bf16.mxu1 %vm708_vm2, %v675_v25 }
 0x10c   : > { %2903 = vmatmul.mubr.msk.bf16.gmra.mrb[12].mxu1 %vm708_vm2, %v676_v24 }
 0x1c7   : > { %v2892_v31 = vpop.f32.mrb[0].mxu1 }
 0x1c8   : > { %v776_v32 = vadd.f32 %v2892_v31, %v3188_v30  ;;  %v767_v33 = vpop.f32.mrb[1].mxu1 }
 0x1c9   : > { %v768_v34 = vadd.f32 %v3188_v30, %v767_v33  ;;  %v2893_v35 = vpop.f32.mrb[2].mxu1 }
 0x1ca   : > { %v832_v36 = vmax.f32 %v776_v32, 0.0  ;;  %v779_v37 = vadd.f32 %v2893_v35, %v3188_v30  ;;  %v770_v38 = vpop.f32.mrb[3].mxu1 }
 0x1cb   : > { %v830_v39 = vmax.f32 %v768_v34, 0.0  ;;  %v771_v40 = vadd.f32 %v3188_v30, %v770_v38 }
 0x1cc   : > { %v2805_v41 = vpack.c.bf16 %v832_v36, %v832_v36  ;;  %v833_v42 = vmax.f32 %v779_v37, 0.0 }
 0x1cd   : > { %v2803_v43 = vpack.c.bf16 %v830_v39, %v830_v39  ;;  %v831_v44 = vmax.f32 %v771_v40, 0.0  ;;  %v1287_v40 = vld [vmem:[%s3789_s9] sm:$0xff] }
 0x1ce   : > { %913 = vst.msk [vmem:[%s3197_s16 + $0x8] sm:$0xf] %vm910_vm3, %v2805_v41  ;;  %v847_v45 = vpack.c.bf16 %v833_v42, %v832_v36  ;;  %v2806_v46 = vpack.c.bf16 %v833_v42, %v833_v42  ;;  %v1291_v41 = vld [vmem:[%s3789_s9 + $0x20] sm:$0xff]  ;;  %v3264_v42 = vld [vmem:[%s3789_s9 + $0x8] sm:$0xff] }
 0x1cf   : > { %911 = vst.msk [vmem:[%s3197_s16] sm:$0xf] %vm910_vm3, %v2803_v43  ;;  %v846_v47 = vpack.c.bf16 %v831_v44, %v830_v39  ;;  %v2804_v48 = vpack.c.bf16 %v831_v44, %v831_v44  ;;  %v2896_v49 = vpop.f32.mrb[4].mxu1  ;;  %v2735_v43 = vcombine.low %v1287_v40, %v1291_v41  ;;  %v2736_v44 = vcombine.high %v1287_v40, %v1291_v41 }
 0x1d0   : > { %914 = vst.msk [vmem:[%s3197_s16 + $0xc] sm:$0xf] %vm910_vm3, %v2806_v46  ;;  %v792_v50 = vadd.f32 %v2896_v49, %v3188_v30  ;;  %v783_v51 = vpop.f32.mrb[5].mxu1  ;;  %v1295_v46 = vld [vmem:[%s3789_s9 + $0x40] sm:$0xff] }
 0x1d1   : > { %912 = vst.msk [vmem:[%s3197_s16 + $0x4] sm:$0xf] %vm910_vm3, %v2804_v48  ;;  %v784_v52 = vadd.f32 %v3188_v30, %v783_v51  ;;  %v2897_v53 = vpop.f32.mrb[6].mxu1  ;;  %2914 = vmatprep.mubr.msk.bf16.mxu0 %vm708_vm2, %v846_v47  ;;  %v1299_v47 = vld [vmem:[%s3789_s9 + $0x60] sm:$0xff]  ;;  %1721 = vmatprep.subr.bf16.mxu0 %v2736_v44 }
 0x1d2   : > { %v836_v54 = vmax.f32 %v792_v50, 0.0  ;;  %v795_v55 = vadd.f32 %v2897_v53, %v3188_v30  ;;  %v786_v56 = vpop.f32.mrb[7].mxu1  ;;  %2915 = vmatmul.mubr.msk.bf16.vlgmr.msra.gmra.mrb[16].mxu0 %vm708_vm2, %v847_v45  ;;  %v3269_v45 = vld [vmem:[%s3789_s9 + $0x28] sm:$0xff]  ;;  %v2744_v50 = vcombine.high %v1295_v46, %v1299_v47  ;;  %v1303_v51 = vld [vmem:[%s3789_s9 + $0x80] sm:$0xff]  ;;  %v2743_v53 = vcombine.low %v1295_v46, %v1299_v47 }
 0x1d3   : > { %v834_v57 = vmax.f32 %v784_v52, 0.0  ;;  %v787_v58 = vadd.f32 %v3188_v30, %v786_v56  ;;  %v2737_v48 = vcombine.low %v3264_v42, %v3269_v45  ;;  %v2738_v49 = vcombine.high %v3264_v42, %v3269_v45  ;;  %v1307_v52 = vld [vmem:[%s3789_s9 + $0xa0] sm:$0xff]  ;;  %1722 = vmatpush1.bf16.msra.mxu0 %v2735_v43 }
 0x1d4   : > { %v2809_v59 = vpack.c.bf16 %v836_v54, %v836_v54  ;;  %v837_v60 = vmax.f32 %v795_v55, 0.0  ;;  %1723 = vmatprep.subr.bf16.mxu0 %v2744_v50  ;;  %v1311_v55 = vld [vmem:[%s3789_s9 + $0xc0] sm:$0xff]  ;;  %v1324_v50 = vld [vmem:[%s3789_s9 + $0x128] sm:$0xff] }
 0x1d5   : > { %v2807_v61 = vpack.c.bf16 %v834_v57, %v834_v57  ;;  %v835_v62 = vmax.f32 %v787_v58, 0.0  ;;  %v1315_v56 = vld [vmem:[%s3789_s9 + $0xe0] sm:$0xff] }
 0x1d6   : > { %917 = vst.msk [vmem:[%s3197_s16 + $0x18] sm:$0xf] %vm910_vm3, %v2809_v59  ;;  %v849_v63 = vpack.c.bf16 %v837_v60, %v836_v54  ;;  %v2810_v0 = vpack.c.bf16 %v837_v60, %v837_v60  ;;  %v2752_v54 = vcombine.high %v1303_v51, %v1307_v52  ;;  %v2760_v58 = vcombine.high %v1311_v55, %v1315_v56  ;;  %v1319_v59 = vld [vmem:[%s3789_s9 + $0x100] sm:$0xff] }
 0x1d7   : > { %915 = vst.msk [vmem:[%s3197_s16 + $0x10] sm:$0xf] %vm910_vm3, %v2807_v61  ;;  %v848_v1 = vpack.c.bf16 %v835_v62, %v834_v57  ;;  %v2808_v2 = vpack.c.bf16 %v835_v62, %v835_v62  ;;  %v2900_v3 = vpop.f32.mrb[8].mxu1  ;;  %1724 = vmatpush1.bf16.msra.mxu0 %v2743_v53  ;;  %v2751_v57 = vcombine.low %v1303_v51, %v1307_v52  ;;  %v1323_v60 = vld [vmem:[%s3789_s9 + $0x120] sm:$0xff] }
 0x1d8   : > { %918 = vst.msk [vmem:[%s3197_s16 + $0x1c] sm:$0xf] %vm910_vm3, %v2810_v0  ;;  %v808_v4 = vadd.f32 %v2900_v3, %v3188_v30  ;;  %v799_v5 = vpop.f32.mrb[9].mxu1  ;;  %1725 = vmatprep.subr.bf16.mxu0 %v2752_v54  ;;  %v2759_v61 = vcombine.low %v1311_v55, %v1315_v56  ;;  %v2768_v62 = vcombine.high %v1319_v59, %v1323_v60  ;;  %v1331_v0 = vld [vmem:[%s3789_s9 + $0x160] sm:$0xff] }
 0x1d9   : > { %916 = vst.msk [vmem:[%s3197_s16 + $0x14] sm:$0xf] %vm910_vm3, %v2808_v2  ;;  %v800_v6 = vadd.f32 %v3188_v30, %v799_v5  ;;  %2918 = vmatprep.mubr.msk.bf16.mxu0 %vm708_vm2, %v848_v1  ;;  %v2901_v7 = vpop.f32.mrb[10].mxu1  ;;  %v2767_v1 = vcombine.low %v1319_v59, %v1323_v60  ;;  %v1328_v60 = vld [vmem:[%s3789_s9 + $0x148] sm:$0xff] }
 0x1da   : > { %v840_v8 = vmax.f32 %v808_v4, 0.0  ;;  %v811_v9 = vadd.f32 %v2901_v7, %v3188_v30  ;;  %2919 = vmatmul.mubr.msk.bf16.gmra.mrb[20].mxu0 %vm708_vm2, %v849_v63  ;;  %v802_v10 = vpop.f32.mrb[11].mxu1  ;;  %v1327_v63 = vld [vmem:[%s3789_s9 + $0x140] sm:$0xff] }
 0x1db   : > { %v838_v11 = vmax.f32 %v800_v6, 0.0  ;;  %v803_v12 = vadd.f32 %v3188_v30, %v802_v10  ;;  %1726 = vmatpush1.bf16.msra.mxu0 %v2751_v57  ;;  %v2776_v2 = vcombine.high %v1327_v63, %v1331_v0  ;;  %v2775_v3 = vcombine.low %v1327_v63, %v1331_v0  ;;  %v3308_v4 = vld [vmem:[%s3786_s6] ss:$0 sm:$0xff] }
 0x1dc   : > { %v2813_v13 = vpack.c.bf16 %v840_v8, %v840_v8  ;;  %v841_v14 = vmax.f32 %v811_v9, 0.0  ;;  %1727 = vmatprep.subr.bf16.mxu0 %v2760_v58 }
 0x1dd   : > { %v2811_v15 = vpack.c.bf16 %v838_v11, %v838_v11  ;;  %v839_v16 = vmax.f32 %v803_v12, 0.0 }
 0x1de   : > { %921 = vst.msk [vmem:[%s3197_s16 + $0x28] sm:$0xf] %vm910_vm3, %v2813_v13  ;;  %v851_v17 = vpack.c.bf16 %v841_v14, %v840_v8  ;;  %v2814_v18 = vpack.c.bf16 %v841_v14, %v841_v14 }
 0x1df   : > { %919 = vst.msk [vmem:[%s3197_s16 + $0x20] sm:$0xf] %vm910_vm3, %v2811_v15  ;;  %v850_v19 = vpack.c.bf16 %v839_v16, %v838_v11  ;;  %v2812_v20 = vpack.c.bf16 %v839_v16, %v839_v16  ;;  %v2904_v21 = vpop.f32.mrb[12].mxu1  ;;  %1728 = vmatpush1.bf16.msra.mxu0 %v2759_v61  ;;  %v1332_v61 = vld [vmem:[%s3789_s9 + $0x168] sm:$0xff] }
 0x1e0   : > { %922 = vst.msk [vmem:[%s3197_s16 + $0x2c] sm:$0xf] %vm910_vm3, %v2814_v18  ;;  %v824_v22 = vadd.f32 %v2904_v21, %v3188_v30  ;;  %v815_v23 = vpop.f32.mrb[13].mxu1  ;;  %1729 = vmatprep.subr.bf16.mxu0 %v2768_v62  ;;  %v1300_v18 = vld [vmem:[%s3789_s9 + $0x68] sm:$0xff] }
 0x1e1   : > { %920 = vst.msk [vmem:[%s3197_s16 + $0x24] sm:$0xf] %vm910_vm3, %v2812_v20  ;;  %2922 = vmatprep.mubr.msk.bf16.mxu0 %vm708_vm2, %v850_v19  ;;  %v816_v24 = vadd.f32 %v3188_v30, %v815_v23  ;;  %v2905_v25 = vpop.f32.mrb[14].mxu1 }
 0x1e2   : > { %2923 = vmatmul.mubr.msk.bf16.gmra.mrb[24].mxu0 %vm708_vm2, %v851_v17  ;;  %v844_v26 = vmax.f32 %v824_v22, 0.0  ;;  %v827_v27 = vadd.f32 %v2905_v25, %v3188_v30  ;;  %v818_v28 = vpop.f32.mrb[15].mxu1  ;;  %v1296_v17 = vld [vmem:[%s3789_s9 + $0x48] sm:$0xff] }
 0x1e3   : > { %v842_v29 = vmax.f32 %v816_v24, 0.0  ;;  %v819_v31 = vadd.f32 %v3188_v30, %v818_v28  ;;  %v2993_v30 = vld [vmem:[%s3787_s7 + $0x18] sm:$0xff]   ;;  %1730 = vmatpush1.bf16.msra.mxu0 %v2767_v1  ;;  %v2746_v24 = vcombine.high %v1296_v17, %v1300_v18  ;;  %v1308_v28 = vld [vmem:[%s3789_s9 + $0xa8] sm:$0xff] }
 0x1e4   : > { %v2817_v32 = vpack.c.bf16 %v844_v26, %v844_v26  ;;  %v845_v33 = vmax.f32 %v827_v27, 0.0  ;;  %2936 = vmatprep.subr.bf16.mxu1 %v2993_v30  ;;  %1731 = vmatprep.subr.bf16.mxu0 %v2776_v2  ;;  %v1304_v27 = vld [vmem:[%s3789_s9 + $0x88] sm:$0xff] }
 0x1e5   : > { %v2815_v34 = vpack.c.bf16 %v842_v29, %v842_v29  ;;  %v843_v35 = vmax.f32 %v819_v31, 0.0  ;;  %2937 = vmatpush3.bf16.msra.mxu1 %v2993_v30  ;;  %v1316_v30 = vld [vmem:[%s3789_s9 + $0xe8] sm:$0xff]  ;;  %v2753_v42 = vcombine.low %v1304_v27, %v1308_v28 }
 0x1e6   : > { %925 = vst.msk [vmem:[%s3197_s16 + $0x38] sm:$0xf] %vm910_vm3, %v2817_v32  ;;  %v853_v36 = vpack.c.bf16 %v845_v33, %v844_v26  ;;  %v2818_v37 = vpack.c.bf16 %v845_v33, %v845_v33  ;;  %1834 = vmatprep.subr.bf16.mxu1 %v2738_v49  ;;  %v2745_v33 = vcombine.low %v1296_v17, %v1300_v18  ;;  %v1320_v49 = vld [vmem:[%s3789_s9 + $0x108] sm:$0xff]  ;;  %v1335_v18 = vld [vmem:[%s3789_s9 + $0x180] sm:$0xff] }
 0x1e7   : > { %923 = vst.msk [vmem:[%s3197_s16 + $0x30] sm:$0xf] %vm910_vm3, %v2815_v34  ;;  %v852_v38 = vpack.c.bf16 %v843_v35, %v842_v29  ;;  %v2816_v39 = vpack.c.bf16 %v843_v35, %v843_v35  ;;  %1732 = vmatpush1.bf16.msra.mxu0 %v2775_v3  ;;  %v2770_v58 = vcombine.high %v1320_v49, %v1324_v50 }
 0x1e8   : > { %926 = vst.msk [vmem:[%s3197_s16 + $0x3c] sm:$0xf] %vm910_vm3, %v2818_v37  ;;  %v2769_v1 = vcombine.low %v1320_v49, %v1324_v50 }
 0x1e9   : > { %924 = vst.msk [vmem:[%s3197_s16 + $0x34] sm:$0xf] %vm910_vm3, %v2816_v39  ;;  %2926 = vmatprep.mubr.msk.bf16.mxu0 %vm708_vm2, %v852_v38  ;;  %v1312_v39 = vld [vmem:[%s3789_s9 + $0xc8] sm:$0xff]  ;;  %s480_s16 = scalar_lea.vmem %s3792_s12, %s2670_s13 }
 0x1ea   : > { %2927 = vmatmul.mubr.msk.bf16.gmra.mrb[28].mxu0 %vm708_vm2, %v853_v36  ;;  %v2754_v36 = vcombine.high %v1304_v27, %v1308_v28  ;;  %v2762_v46 = vcombine.high %v1312_v39, %v1316_v30  ;;  %v2761_v56 = vcombine.low %v1312_v39, %v1316_v30  ;;  %v1344_v27 = vld [vmem:[%s3789_s9 + $0x1c8] sm:$0xff]  ;;  %v1294_v30 = vld [vmem:[%s3789_s9 + $0x38] sm:$0xff] }
 0x2a5   : > { %v2916_v5 = vpop.f32.mrb[16].mxu0 }
 0x2a6   : > { %v1033_v6 = vadd.f32 %v2916_v5, %v3308_v4  ;;  %v1024_v7 = vpop.f32.mrb[17].mxu0  ;;  %v2778_v5 = vcombine.high %v1328_v60, %v1332_v61 }
 0x2a7   : > { %v1025_v8 = vadd.f32 %v3308_v4, %v1024_v7  ;;  %v2917_v9 = vpop.f32.mrb[18].mxu0 }
 0x2a8   : > { %v1036_v10 = vadd.f32 %v2917_v9, %v3308_v4  ;;  %v1027_v11 = vpop.f32.mrb[19].mxu0  ;;  %v1089_v13 = vmax.f32 %v1033_v6, 0.0 }
 0x2a9   : > { %v1028_v12 = vadd.f32 %v3308_v4, %v1027_v11  ;;  %v1087_v15 = vmax.f32 %v1025_v8, 0.0 }
 0x2aa   : > { %v1090_v14 = vmax.f32 %v1036_v10, 0.0 }
 0x2ab   : > { %v1088_v16 = vmax.f32 %v1028_v12, 0.0 }
 0x2ac   : > { %v1112_v19 = vpack.c.bf16 %v1090_v14, %v1089_v13  ;;  %v2777_v13 = vcombine.low %v1328_v60, %v1332_v61 }
 0x2ad   : > { %v1111_v20 = vpack.c.bf16 %v1088_v16, %v1087_v15  ;;  %v2920_v21 = vpop.f32.mrb[20].mxu0 }
 0x2ae   : > { %v1049_v22 = vadd.f32 %v2920_v21, %v3308_v4  ;;  %v1040_v23 = vpop.f32.mrb[21].mxu0  ;;  %v1340_v21 = vld [vmem:[%s3789_s9 + $0x1a8] sm:$0xff] }
 0x2af   : > { %v1041_v25 = vadd.f32 %v3308_v4, %v1040_v23  ;;  %v2921_v26 = vpop.f32.mrb[22].mxu0  ;;  %2938 = vmatprep.mubr.msk.bf16.mxu1 %vm708_vm2, %v1111_v20 }
 0x2b0   : > { %v1052_v29 = vadd.f32 %v2921_v26, %v3308_v4  ;;  %v1043_v31 = vpop.f32.mrb[23].mxu0  ;;  %2939 = vmatmul.mubr.msk.bf16.vlgmr.msra.gmra.mrb[16].mxu1 %vm708_vm2, %v1112_v19  ;;  %v1093_v34 = vmax.f32 %v1049_v22, 0.0  ;;  %v1336_v19 = vld [vmem:[%s3789_s9 + $0x188] sm:$0xff]  ;;  %v1347_v26 = vld [vmem:[%s3789_s9 + $0x1e0] sm:$0xff] }
 0x2b1   : > { %v1044_v32 = vadd.f32 %v3308_v4, %v1043_v31  ;;  %1835 = vmatpush1.bf16.msra.mxu1 %v2737_v48  ;;  %v1091_v37 = vmax.f32 %v1041_v25, 0.0  ;;  %v2785_v23 = vcombine.low %v1336_v19, %v1340_v21  ;;  %v1343_v25 = vld [vmem:[%s3789_s9 + $0x1c0] sm:$0xff] }
 0x2b2   : > { %v1094_v35 = vmax.f32 %v1052_v29, 0.0  ;;  %1836 = vmatprep.subr.bf16.mxu1 %v2746_v24  ;;  %v2786_v24 = vcombine.high %v1336_v19, %v1340_v21  ;;  %v2792_v28 = vcombine.high %v1343_v25, %v1347_v26  ;;  %v1348_v29 = vld [vmem:[%s3789_s9 + $0x1e8] sm:$0xff]  ;;  %v2791_v31 = vcombine.low %v1343_v25, %v1347_v26  ;;  %v1314_v21 = vld [vmem:[%s3789_s9 + $0xd8] sm:$0xff] }
 0x2b3   : > { %v1092_v38 = vmax.f32 %v1044_v32, 0.0  ;;  %v2793_v32 = vcombine.low %v1344_v27, %v1348_v29 }
 0x2b4   : > { %v1114_v40 = vpack.c.bf16 %v1094_v35, %v1093_v34  ;;  %v3018_v34 = vmov 0   ;;  %v1289_v35 = vld [vmem:[%s3789_s9 + $0x10] sm:$0xff] }
 0x2b5   : > { %v1113_v41 = vpack.c.bf16 %v1092_v38, %v1091_v37  ;;  %v2924_v43 = vpop.f32.mrb[24].mxu0  ;;  %1837 = vmatpush1.bf16.msra.mxu1 %v2745_v33  ;;  %v2794_v33 = vcombine.high %v1344_v27, %v1348_v29  ;;  %1753 = vmatprep.mubr.bf16.mxu0 %v3018_v34  ;;  %v1290_v37 = vld [vmem:[%s3789_s9 + $0x18] sm:$0xff] }
 0x2b6   : > { %v1065_v44 = vadd.f32 %v2924_v43, %v3308_v4  ;;  %v1056_v45 = vpop.f32.mrb[25].mxu0  ;;  %1838 = vmatprep.subr.bf16.mxu1 %v2754_v36  ;;  %v1293_v36 = vld [vmem:[%s3789_s9 + $0x30] sm:$0xff]  ;;  %v3408_v43 = vld [vmem:[%s3788_s8] ss:$0 sm:$0xff] }
 0x2b7   : > { %v1057_v47 = vadd.f32 %v3308_v4, %v1056_v45  ;;  %2942 = vmatprep.mubr.msk.bf16.mxu1 %vm708_vm2, %v1113_v41  ;;  %v2925_v48 = vpop.f32.mrb[26].mxu0  ;;  %v2739_v38 = vcombine.low %v1289_v35, %v1293_v36  ;;  %v2740_v39 = vcombine.high %v1289_v35, %v1293_v36  ;;  %v2742_v41 = vcombine.high %v1290_v37, %v1294_v30 }
 0x2b8   : > { %v1097_v51 = vmax.f32 %v1065_v44, 0.0  ;;  %v1068_v52 = vadd.f32 %v2925_v48, %v3308_v4  ;;  %2943 = vmatmul.mubr.msk.bf16.gmra.mrb[20].mxu1 %vm708_vm2, %v1114_v40  ;;  %v1059_v53 = vpop.f32.mrb[27].mxu0  ;;  %v2741_v40 = vcombine.low %v1290_v37, %v1294_v30  ;;  %v1325_v37 = vld [vmem:[%s3789_s9 + $0x130] sm:$0xff] }
 0x2b9   : > { %v1095_v54 = vmax.f32 %v1057_v47, 0.0  ;;  %v1060_v55 = vadd.f32 %v3308_v4, %v1059_v53  ;;  %1839 = vmatpush1.bf16.msra.mxu1 %v2753_v42  ;;  %v1297_v53 = vld [vmem:[%s3789_s9 + $0x50] sm:$0xff] }
 0x2ba   : > { %v1098_v57 = vmax.f32 %v1068_v52, 0.0  ;;  %1840 = vmatprep.subr.bf16.mxu1 %v2762_v46 }
 0x2bb   : > { %v1096_v59 = vmax.f32 %v1060_v55, 0.0 }
 0x2bc   : > { %v1116_v62 = vpack.c.bf16 %v1098_v57, %v1097_v51  ;;  %v1298_v57 = vld [vmem:[%s3789_s9 + $0x58] sm:$0xff] }
 0x2bd   : > { %v1115_v63 = vpack.c.bf16 %v1096_v59, %v1095_v54  ;;  %v2928_v0 = vpop.f32.mrb[28].mxu0  ;;  %1841 = vmatpush1.bf16.msra.mxu1 %v2761_v56  ;;  %v1301_v56 = vld [vmem:[%s3789_s9 + $0x70] sm:$0xff] }
 0x2be   : > { %v1081_v2 = vadd.f32 %v2928_v0, %v3308_v4  ;;  %v1072_v3 = vpop.f32.mrb[29].mxu0  ;;  %1842 = vmatprep.subr.bf16.mxu1 %v2770_v58  ;;  %v1302_v58 = vld [vmem:[%s3789_s9 + $0x78] sm:$0xff] }
 0x2bf   : > { %2946 = vmatprep.mubr.msk.bf16.mxu1 %vm708_vm2, %v1115_v63  ;;  %v1073_v6 = vadd.f32 %v3308_v4, %v1072_v3  ;;  %v2929_v7 = vpop.f32.mrb[30].mxu0  ;;  %v1309_v3 = vld [vmem:[%s3789_s9 + $0xb0] sm:$0xff] }
 0x2c0   : > { %2947 = vmatmul.mubr.msk.bf16.gmra.mrb[24].mxu1 %vm708_vm2, %v1116_v62  ;;  %v1101_v8 = vmax.f32 %v1081_v2, 0.0  ;;  %v1084_v9 = vadd.f32 %v2929_v7, %v3308_v4  ;;  %v1075_v10 = vpop.f32.mrb[31].mxu0  ;;  %v1305_v62 = vld [vmem:[%s3789_s9 + $0x90] sm:$0xff]  ;;  %v2750_v2 = vcombine.high %v1298_v57, %v1302_v58 }
 0x2c1   : > { %v1099_v11 = vmax.f32 %v1073_v6, 0.0  ;;  %v1076_v12 = vadd.f32 %v3308_v4, %v1075_v10  ;;  %1843 = vmatpush1.bf16.msra.mxu1 %v2769_v1  ;;  %v1339_v4 = vld [vmem:[%s3789_s9 + $0x1a0] sm:$0xff]  ;;  %v2748_v1 = vcombine.high %v1297_v53, %v1301_v56  ;;  %v1310_v6 = vld [vmem:[%s3789_s9 + $0xb8] sm:$0xff]  ;;  %v2755_v26 = vcombine.low %v1305_v62, %v1309_v3 }
 0x2c2   : > { %v1102_v14 = vmax.f32 %v1084_v9, 0.0  ;;  %1844 = vmatprep.subr.bf16.mxu1 %v2778_v5  ;;  %v2784_v20 = vcombine.high %v1335_v18, %v1339_v4  ;;  %v2783_v22 = vcombine.low %v1335_v18, %v1339_v4  ;;  %v1306_v5 = vld [vmem:[%s3789_s9 + $0x98] sm:$0xff]  ;;  %v1313_v18 = vld [vmem:[%s3789_s9 + $0xd0] sm:$0xff] }
 0x2c3   : > { %v1100_v15 = vmax.f32 %v1076_v12, 0.0  ;;  %v2749_v12 = vcombine.low %v1298_v57, %v1302_v58  ;;  %v2757_v27 = vcombine.low %v1306_v5, %v1310_v6 }
 0x2c4   : > { %v1118_v16 = vpack.c.bf16 %v1102_v14, %v1101_v8  ;;  %1733 = vmatprep.subr.bf16.mxu0 %v2784_v20  ;;  %v2756_v14 = vcombine.high %v1305_v62, %v1309_v3  ;;  %v1317_v20 = vld [vmem:[%s3789_s9 + $0xf0] sm:$0xff] }
 0x2c5   : > { %v1117_v17 = vpack.c.bf16 %v1100_v15, %v1099_v11  ;;  %1845 = vmatpush1.bf16.msra.mxu1 %v2777_v13  ;;  %1734 = vmatpush1.bf16.msra.mxu0 %v2783_v22  ;;  %v2747_v11 = vcombine.low %v1297_v53, %v1301_v56  ;;  %v2758_v15 = vcombine.high %v1306_v5, %v1310_v6  ;;  %v1318_v22 = vld [vmem:[%s3789_s9 + $0xf8] sm:$0xff]  ;;  %v1341_v6 = vld [vmem:[%s3789_s9 + $0x1b0] sm:$0xff] }
 0x2c6   : > { %1846 = vmatprep.subr.bf16.mxu1 %v2786_v24  ;;  %1735 = vmatprep.subr.bf16.mxu0 %v2792_v28  ;;  %v1330_v53 = vld [vmem:[%s3789_s9 + $0x158] sm:$0xff] }
 0x2c7   : > { %2950 = vmatprep.mubr.msk.bf16.mxu1 %vm708_vm2, %v1117_v17 }
 0x2c8   : > { %2951 = vmatmul.mubr.msk.bf16.gmra.mrb[28].mxu1 %vm708_vm2, %v1118_v16 }
 0x2c9   : > { %1847 = vmatpush1.bf16.msra.mxu1 %v2785_v23  ;;  %1736 = vmatpush1.bf16.msra.mxu0 %v2791_v31  ;;  %v2764_v31 = vcombine.high %v1313_v18, %v1317_v20 }
 0x2ca   : > { %1848 = vmatprep.subr.bf16.mxu1 %v2794_v33  ;;  %1866 = vmatprep.mubr.bf16.mxu1 %v3018_v34  ;;  %v1321_v33 = vld [vmem:[%s3789_s9 + $0x110] sm:$0xff] }
 0x2cb   : > { %1947 = vmatprep.subr.bf16.mxu0 %v2740_v39  ;;  %v1326_v39 = vld [vmem:[%s3789_s9 + $0x138] sm:$0xff]  ;;  %v2771_v58 = vcombine.low %v1321_v33, %v1325_v37 }
 0x2cd   : > { %1849 = vmatpush1.bf16.msra.mxu1 %v2793_v32  ;;  %v2766_v32 = vcombine.high %v1314_v21, %v1318_v22 }
 0x2ce   : > { %2060 = vmatprep.subr.bf16.mxu1 %v2742_v41 }
 0x383   : > { %v2940_v42 = vpop.f32.mrb[16].mxu1 }
 0x384   : > { %v1217_v44 = vadd.f32 %v2940_v42, %v3408_v43  ;;  %v1208_v45 = vpop.f32.mrb[17].mxu1 }
 0x385   : > { %v1209_v46 = vadd.f32 %v3408_v43, %v1208_v45  ;;  %v2941_v47 = vpop.f32.mrb[18].mxu1  ;;  %v2763_v45 = vcombine.low %v1313_v18, %v1317_v20  ;;  %v1349_v20 = vld [vmem:[%s3789_s9 + $0x1f0] sm:$0xff] }
 0x386   : > { %v1220_v48 = vadd.f32 %v2941_v47, %v3408_v43  ;;  %v1211_v49 = vpop.f32.mrb[19].mxu1  ;;  %v1273_v51 = vmax.f32 %v1217_v44, 0.0 }
 0x387   : > { %v1212_v50 = vadd.f32 %v3408_v43, %v1211_v49  ;;  %v1271_v54 = vmax.f32 %v1209_v46, 0.0  ;;  %v2765_v46 = vcombine.low %v1314_v21, %v1318_v22  ;;  %v1350_v21 = vld [vmem:[%s3789_s9 + $0x1f8] sm:$0xff] }
 0x388   : > { %v1274_v52 = vmax.f32 %v1220_v48, 0.0  ;;  %v2772_v48 = vcombine.high %v1321_v33, %v1325_v37  ;;  %v3589_v33 = vld [vmem:[%s3790_s10] sm:$0xff] }
 0x389   : > { %v1272_v55 = vmax.f32 %v1212_v50, 0.0  ;;  %v1329_v50 = vld [vmem:[%s3789_s9 + $0x150] sm:$0xff] }
 0x38a   : > { %v3426_v59 = vpack.c.bf16 %v1274_v52, %v1273_v51  ;;  %v1333_v52 = vld [vmem:[%s3789_s9 + $0x170] sm:$0xff] }
 0x38b   : > { %v3428_v60 = vpack.c.bf16 %v1272_v55, %v1271_v54  ;;  %v2944_v61 = vpop.f32.mrb[20].mxu1  ;;  %v1334_v54 = vld [vmem:[%s3789_s9 + $0x178] sm:$0xff] }
 0x38c   : > { %v1233_v63 = vadd.f32 %v2944_v61, %v3408_v43  ;;  %v1224_v0 = vpop.f32.mrb[21].mxu1 }
 0x38d   : > { %v1225_v7 = vadd.f32 %v3408_v43, %v1224_v0  ;;  %v2945_v8 = vpop.f32.mrb[22].mxu1  ;;  %1754 = vmatmul.mubr.bf16.vlgmr.msra.gmra.mrb[32].mxu0 %v3428_v60  ;;  %1867 = vmatmul.mubr.bf16.vlgmr.msra.gmra.mrb[32].mxu1 %v3428_v60  ;;  %v2780_v0 = vcombine.high %v1329_v50, %v1333_v52 }
 0x38e   : > { %v1236_v9 = vadd.f32 %v2945_v8, %v3408_v43  ;;  %1948 = vmatpush1.bf16.msra.mxu0 %v2739_v38  ;;  %2061 = vmatpush1.bf16.msra.mxu1 %v2741_v40  ;;  %v1227_v10 = vpop.f32.mrb[23].mxu1  ;;  %v1277_v16 = vmax.f32 %v1233_v63, 0.0  ;;  %v1322_v38 = vld [vmem:[%s3789_s9 + $0x118] sm:$0xff] }
 0x38f   : > { %v1228_v13 = vadd.f32 %v3408_v43, %v1227_v10  ;;  %1763 = vmatprep.mubr.bf16.mxu0 %v3018_v34  ;;  %1876 = vmatprep.mubr.bf16.mxu1 %v3018_v34  ;;  %v1275_v4 = vmax.f32 %v1225_v7, 0.0  ;;  %v2774_v49 = vcombine.high %v1322_v38, %v1326_v39  ;;  %v2773_v61 = vcombine.low %v1322_v38, %v1326_v39  ;;  %v1338_v7 = vld [vmem:[%s3789_s9 + $0x198] sm:$0xff] }
 0x390   : > { %v1278_v17 = vmax.f32 %v1236_v9, 0.0  ;;  %1949 = vmatprep.subr.bf16.mxu0 %v2748_v1  ;;  %2062 = vmatprep.subr.bf16.mxu1 %v2750_v2  ;;  %v2782_v1 = vcombine.high %v1330_v53, %v1334_v54  ;;  %v1337_v2 = vld [vmem:[%s3789_s9 + $0x190] sm:$0xff]  ;;  %v1342_v8 = vld [vmem:[%s3789_s9 + $0x1b8] sm:$0xff] }
 0x391   : > { %v1276_v19 = vmax.f32 %v1228_v13, 0.0  ;;  %v2790_v18 = vcombine.high %v1338_v7, %v1342_v8 }
 0x392   : > { %v3462_v23 = vpack.c.bf16 %v1278_v17, %v1277_v16  ;;  %1950 = vmatpush1.bf16.msra.mxu0 %v2747_v11  ;;  %2063 = vmatpush1.bf16.msra.mxu1 %v2749_v12  ;;  %v2788_v17 = vcombine.high %v1337_v2, %v1341_v6 }
 0x393   : > { %v3464_v24 = vpack.c.bf16 %v1276_v19, %v1275_v4  ;;  %v2948_v25 = vpop.f32.mrb[24].mxu1  ;;  %1951 = vmatprep.subr.bf16.mxu0 %v2756_v14  ;;  %2064 = vmatprep.subr.bf16.mxu1 %v2758_v15  ;;  %v2779_v14 = vcombine.low %v1329_v50, %v1333_v52  ;;  %v2781_v15 = vcombine.low %v1330_v53, %v1334_v54  ;;  %v1345_v4 = vld [vmem:[%s3789_s9 + $0x1d0] sm:$0xff] }
 0x394   : > { %v1249_v28 = vadd.f32 %v2948_v25, %v3408_v43  ;;  %v1240_v29 = vpop.f32.mrb[25].mxu1 }
 0x395   : > { %v1241_v35 = vadd.f32 %v3408_v43, %v1240_v29  ;;  %1764 = vmatmul.mubr.bf16.gmra.mrb[36].mxu0 %v3426_v59  ;;  %1877 = vmatmul.mubr.bf16.gmra.mrb[36].mxu1 %v3426_v59  ;;  %v2949_v36 = vpop.f32.mrb[26].mxu1 }
 0x396   : > { %v1281_v30 = vmax.f32 %v1249_v28, 0.0  ;;  %v1252_v40 = vadd.f32 %v2949_v36, %v3408_v43  ;;  %v1243_v41 = vpop.f32.mrb[27].mxu1  ;;  %1773 = vmatprep.mubr.bf16.mxu0 %v3018_v34  ;;  %1886 = vmatprep.mubr.bf16.mxu1 %v3018_v34  ;;  %v2796_v28 = vcombine.high %v1345_v4, %v1349_v20 }
 0x397   : > { %v1279_v42 = vmax.f32 %v1241_v35, 0.0  ;;  %v1244_v44 = vadd.f32 %v3408_v43, %v1243_v41  ;;  %1952 = vmatpush1.bf16.msra.mxu0 %v2755_v26  ;;  %2065 = vmatpush1.bf16.msra.mxu1 %v2757_v27  ;;  %v2787_v26 = vcombine.low %v1337_v2, %v1341_v6  ;;  %v2789_v27 = vcombine.low %v1338_v7, %v1342_v8 }
 0x398   : > { %v1282_v47 = vmax.f32 %v1252_v40, 0.0  ;;  %1953 = vmatprep.subr.bf16.mxu0 %v2764_v31  ;;  %2066 = vmatprep.subr.bf16.mxu1 %v2766_v32  ;;  %v2795_v31 = vcombine.low %v1345_v4, %v1349_v20 }
 0x399   : > { %v1280_v51 = vmax.f32 %v1244_v44, 0.0 }
 0x39a   : > { %v3498_v55 = vpack.c.bf16 %v1282_v47, %v1281_v30 }
 0x39b   : > { %v3500_v56 = vpack.c.bf16 %v1280_v51, %v1279_v42  ;;  %v2952_v57 = vpop.f32.mrb[28].mxu1  ;;  %1954 = vmatpush1.bf16.msra.mxu0 %v2763_v45  ;;  %2067 = vmatpush1.bf16.msra.mxu1 %v2765_v46 }
 0x39c   : > { %v1265_v62 = vadd.f32 %v2952_v57, %v3408_v43  ;;  %v1256_v63 = vpop.f32.mrb[29].mxu1  ;;  %1955 = vmatprep.subr.bf16.mxu0 %v2772_v48  ;;  %2068 = vmatprep.subr.bf16.mxu1 %v2774_v49 }
 0x39d   : > { %1774 = vmatmul.mubr.bf16.gmra.mrb[40].mxu0 %v3464_v24  ;;  %1887 = vmatmul.mubr.bf16.gmra.mrb[40].mxu1 %v3464_v24  ;;  %v1257_v3 = vadd.f32 %v3408_v43, %v1256_v63  ;;  %v2953_v5 = vpop.f32.mrb[30].mxu1 }
 0x39e   : > { %v1285_v9 = vmax.f32 %v1265_v62, 0.0  ;;  %1783 = vmatprep.mubr.bf16.mxu0 %v3018_v34  ;;  %1896 = vmatprep.mubr.bf16.mxu1 %v3018_v34  ;;  %v1268_v10 = vadd.f32 %v2953_v5, %v3408_v43  ;;  %v1259_v11 = vpop.f32.mrb[31].mxu1 }
 0x39f   : > { %v1283_v12 = vmax.f32 %v1257_v3, 0.0  ;;  %v1260_v13 = vadd.f32 %v3408_v43, %v1259_v11  ;;  %1956 = vmatpush1.bf16.msra.mxu0 %v2771_v58  ;;  %2069 = vmatpush1.bf16.msra.mxu1 %v2773_v61  ;;  %v1346_v43 = vld [vmem:[%s3789_s9 + $0x1d8] sm:$0xff] }
 0x3a0   : > { %v1286_v16 = vmax.f32 %v1268_v10, 0.0  ;;  %1957 = vmatprep.subr.bf16.mxu0 %v2780_v0  ;;  %2070 = vmatprep.subr.bf16.mxu1 %v2782_v1  ;;  %v2798_v29 = vcombine.high %v1346_v43, %v1350_v21  ;;  %v2797_v32 = vcombine.low %v1346_v43, %v1350_v21 }
 0x3a1   : > { %v1284_v19 = vmax.f32 %v1260_v13, 0.0 }
 0x3a2   : > { %v3534_v22 = vpack.c.bf16 %v1286_v16, %v1285_v9 }
 0x3a3   : > { %v1357_v25 = vpack.c.bf16 %v1284_v19, %v1283_v12  ;;  %1958 = vmatpush1.bf16.msra.mxu0 %v2779_v14  ;;  %2071 = vmatpush1.bf16.msra.mxu1 %v2781_v15 }
 0x3a4   : > { %1959 = vmatprep.subr.bf16.mxu0 %v2788_v17  ;;  %2072 = vmatprep.subr.bf16.mxu1 %v2790_v18 }
 0x3a5   : > { %1784 = vmatmul.mubr.bf16.gmra.mrb[44].mxu0 %v3462_v23  ;;  %1897 = vmatmul.mubr.bf16.gmra.mrb[44].mxu1 %v3462_v23 }
 0x3a6   : > { %1793 = vmatprep.mubr.bf16.mxu0 %v3018_v34  ;;  %1906 = vmatprep.mubr.bf16.mxu1 %v3018_v34 }
 0x3a7   : > { %1960 = vmatpush1.bf16.msra.mxu0 %v2787_v26  ;;  %2073 = vmatpush1.bf16.msra.mxu1 %v2789_v27 }
 0x3a8   : > { %1961 = vmatprep.subr.bf16.mxu0 %v2796_v28  ;;  %2074 = vmatprep.subr.bf16.mxu1 %v2798_v29 }
 0x3ab   : > { %1962 = vmatpush1.bf16.msra.mxu0 %v2795_v31  ;;  %2075 = vmatpush1.bf16.msra.mxu1 %v2797_v32 }
 0x3ad   : > { %1794 = vmatmul.mubr.bf16.gmra.mrb[48].mxu0 %v3500_v56  ;;  %1907 = vmatmul.mubr.bf16.gmra.mrb[48].mxu1 %v3500_v56 }
 0x3ae   : > { %1803 = vmatprep.mubr.bf16.mxu0 %v3018_v34  ;;  %1916 = vmatprep.mubr.bf16.mxu1 %v3018_v34 }
 0x3b5   : > { %1804 = vmatmul.mubr.bf16.gmra.mrb[52].mxu0 %v3498_v55  ;;  %1917 = vmatmul.mubr.bf16.gmra.mrb[52].mxu1 %v3498_v55 }
 0x3b6   : > { %1813 = vmatprep.mubr.bf16.mxu0 %v3018_v34  ;;  %1926 = vmatprep.mubr.bf16.mxu1 %v3018_v34 }
 0x3bd   : > { %1814 = vmatmul.mubr.bf16.gmra.mrb[56].mxu0 %v1357_v25  ;;  %1927 = vmatmul.mubr.bf16.gmra.mrb[56].mxu1 %v1357_v25 }
 0x3be   : > { %1823 = vmatprep.mubr.bf16.mxu0 %v3018_v34  ;;  %1936 = vmatprep.mubr.bf16.mxu1 %v3018_v34 }
 0x3c5   : > { %1824 = vmatmul.mubr.bf16.gmra.mrb[60].mxu0 %v3534_v22  ;;  %1937 = vmatmul.mubr.bf16.gmra.mrb[60].mxu1 %v3534_v22 }
 0x3c6   : > { %1979 = vmatprep.mubr.bf16.mxu0 %v3018_v34  ;;  %2092 = vmatprep.mubr.bf16.mxu1 %v3018_v34 }
 0x3cd   : > { %1980 = vmatmul.mubr.bf16.vlgmr.msra.gmra.mrb[64].mxu0 %v3428_v60  ;;  %2093 = vmatmul.mubr.bf16.vlgmr.msra.gmra.mrb[64].mxu1 %v3428_v60 }
 0x3ce   : > { %1989 = vmatprep.mubr.bf16.mxu0 %v3018_v34  ;;  %2102 = vmatprep.mubr.bf16.mxu1 %v3018_v34 }
 0x3d5   : > { %1990 = vmatmul.mubr.bf16.gmra.mrb[68].mxu0 %v3426_v59  ;;  %2103 = vmatmul.mubr.bf16.gmra.mrb[68].mxu1 %v3426_v59  ;;  %v1361_v59 = vlaneseq }
 0x3d6   : > { %1999 = vmatprep.mubr.bf16.mxu0 %v3018_v34  ;;  %2112 = vmatprep.mubr.bf16.mxu1 %v3018_v34 }
 0x3d7   : > { %v3582_v60 = vshrl.u32 %v1361_v59, 7 }
 0x3d9   : > { %v1367_v35 = vsub.s32 1, %v3582_v60 }
 0x3db   : > { %v3600_v38 = vrot.slane %v3589_v33, %v1367_v35 }
 0x3dd   : > { %2000 = vmatmul.mubr.bf16.gmra.mrb[72].mxu0 %v3464_v24  ;;  %2113 = vmatmul.mubr.bf16.gmra.mrb[72].mxu1 %v3464_v24  ;;  %v1371_v24 = vsub.s32 2, %v3582_v60 }
 0x3de   : > { %2009 = vmatprep.mubr.bf16.mxu0 %v3018_v34  ;;  %2122 = vmatprep.mubr.bf16.mxu1 %v3018_v34 }
 0x3df   : > { %v3597_v37 = vrot.slane %v3589_v33, %v1371_v24 }
 0x3e5   : > { %2010 = vmatmul.mubr.bf16.gmra.mrb[76].mxu0 %v3462_v23  ;;  %2123 = vmatmul.mubr.bf16.gmra.mrb[76].mxu1 %v3462_v23  ;;  %v1363_v23 = vsub.s32 0, %v3582_v60 }
 0x3e6   : > { %2019 = vmatprep.mubr.bf16.mxu0 %v3018_v34  ;;  %2132 = vmatprep.mubr.bf16.mxu1 %v3018_v34 }
 0x3e7   : > { %v3594_v36 = vrot.slane %v3589_v33, %v1363_v23 }
 0x3ed   : > { %2020 = vmatmul.mubr.bf16.gmra.mrb[80].mxu0 %v3500_v56  ;;  %2133 = vmatmul.mubr.bf16.gmra.mrb[80].mxu1 %v3500_v56 }
 0x3ee   : > { %2029 = vmatprep.mubr.bf16.mxu0 %v3018_v34  ;;  %2142 = vmatprep.mubr.bf16.mxu1 %v3018_v34 }
 0x3f5   : > { %2030 = vmatmul.mubr.bf16.gmra.mrb[84].mxu0 %v3498_v55  ;;  %2143 = vmatmul.mubr.bf16.gmra.mrb[84].mxu1 %v3498_v55 }
 0x3f6   : > { %2039 = vmatprep.mubr.bf16.mxu0 %v3018_v34  ;;  %2152 = vmatprep.mubr.bf16.mxu1 %v3018_v34 }
 0x3fd   : > { %2040 = vmatmul.mubr.bf16.gmra.mrb[88].mxu0 %v1357_v25  ;;  %2153 = vmatmul.mubr.bf16.gmra.mrb[88].mxu1 %v1357_v25 }
 0x3fe   : > { %2049 = vmatprep.mubr.bf16.mxu0 %v3018_v34  ;;  %2162 = vmatprep.mubr.bf16.mxu1 %v3018_v34  ;;  %v1375_v34 = vsub.s32 3, %v3582_v60 }
 0x400   : > { %v3603_v39 = vrot.slane %v3589_v33, %v1375_v34 }
 0x405   : > { %2050 = vmatmul.mubr.bf16.gmra.mrb[92].mxu0 %v3534_v22  ;;  %2163 = vmatmul.mubr.bf16.gmra.mrb[92].mxu1 %v3534_v22 }
 0x460   : > { %v1755_v30 = vpop.f32.mrb[32].mxu0  ;;  %v1868_v40 = vpop.f32.mrb[32].mxu1 }
 0x461   : > { %v1756_v41 = vadd.f32 %v1755_v30, %v3594_v36  ;;  %v1869_v42 = vadd.f32 %v1868_v40, %v3597_v37  ;;  %v1757_v44 = vpop.f32.mrb[33].mxu0  ;;  %v1870_v45 = vpop.f32.mrb[33].mxu1 }
 0x462   : > { %v1758_v46 = vadd.f32 %v1757_v44, %v3600_v38  ;;  %v1871_v47 = vadd.f32 %v1870_v45, %v3603_v39  ;;  %v1759_v48 = vpop.f32.mrb[34].mxu0  ;;  %v1872_v49 = vpop.f32.mrb[34].mxu1 }
 0x463   : > { %v1760_v50 = vadd.f32 %v1759_v48, %v3594_v36  ;;  %v1873_v51 = vadd.f32 %v1872_v49, %v3597_v37  ;;  %v1761_v52 = vpop.f32.mrb[35].mxu0  ;;  %v1874_v53 = vpop.f32.mrb[35].mxu1  ;;  %v2173_v56 = vmax.f32 %v1756_v41, 0.0  ;;  %v2175_v57 = vmax.f32 %v1869_v42, 0.0 }
 0x464   : > { %v1762_v54 = vadd.f32 %v1761_v52, %v3600_v38  ;;  %v1875_v55 = vadd.f32 %v1874_v53, %v3603_v39  ;;  %v2174_v62 = vmax.f32 %v1758_v46, 0.0  ;;  %v2176_v63 = vmax.f32 %v1871_v47, 0.0 }
 0x465   : > { %v2181_v58 = vmax.f32 %v1760_v50, 0.0  ;;  %v2183_v61 = vmax.f32 %v1873_v51, 0.0 }
 0x466   : > { %v2182_v0 = vmax.f32 %v1762_v54, 0.0  ;;  %v2184_v1 = vmax.f32 %v1875_v55, 0.0 }
 0x467   : > { %v2302_v2 = vmax.f32 %v2173_v56, %v2181_v58  ;;  %v2344_v3 = vmax.f32 %v2175_v57, %v2183_v61 }
 0x468   : > { %v2323_v5 = vmax.f32 %v2174_v62, %v2182_v0  ;;  %v2365_v6 = vmax.f32 %v2176_v63, %v2184_v1  ;;  %v1765_v7 = vpop.f32.mrb[36].mxu0  ;;  %v1878_v8 = vpop.f32.mrb[36].mxu1 }
 0x469   : > { %v1766_v9 = vadd.f32 %v1765_v7, %v3594_v36  ;;  %v1879_v10 = vadd.f32 %v1878_v8, %v3597_v37  ;;  %v1767_v11 = vpop.f32.mrb[37].mxu0  ;;  %v1880_v12 = vpop.f32.mrb[37].mxu1 }
 0x46a   : > { %v1768_v13 = vadd.f32 %v1767_v11, %v3600_v38  ;;  %v1881_v14 = vadd.f32 %v1880_v12, %v3603_v39  ;;  %v1769_v15 = vpop.f32.mrb[38].mxu0  ;;  %v1882_v16 = vpop.f32.mrb[38].mxu1 }
 0x46b   : > { %v2189_v17 = vmax.f32 %v1766_v9, 0.0  ;;  %v2191_v18 = vmax.f32 %v1879_v10, 0.0  ;;  %v1770_v4 = vadd.f32 %v1769_v15, %v3594_v36  ;;  %v1883_v19 = vadd.f32 %v1882_v16, %v3597_v37  ;;  %v1771_v20 = vpop.f32.mrb[39].mxu0  ;;  %v1884_v43 = vpop.f32.mrb[39].mxu1 }
 0x46c   : > { %v2190_v21 = vmax.f32 %v1768_v13, 0.0  ;;  %v2192_v22 = vmax.f32 %v1881_v14, 0.0  ;;  %v1772_v25 = vadd.f32 %v1771_v20, %v3600_v38  ;;  %v1885_v26 = vadd.f32 %v1884_v43, %v3603_v39 }
 0x46d   : > { %v2303_v27 = vmax.f32 %v2302_v2, %v2189_v17  ;;  %v2345_v28 = vmax.f32 %v2344_v3, %v2191_v18  ;;  %v2197_v29 = vmax.f32 %v1770_v4, 0.0  ;;  %v2199_v31 = vmax.f32 %v1883_v19, 0.0 }
 0x46e   : > { %v2324_v32 = vmax.f32 %v2323_v5, %v2190_v21  ;;  %v2366_v59 = vmax.f32 %v2365_v6, %v2192_v22  ;;  %v2198_v23 = vmax.f32 %v1772_v25, 0.0  ;;  %v2200_v24 = vmax.f32 %v1885_v26, 0.0 }
 0x46f   : > { %v2304_v35 = vmax.f32 %v2303_v27, %v2197_v29  ;;  %v2346_v34 = vmax.f32 %v2345_v28, %v2199_v31 }
 0x470   : > { %v2325_v30 = vmax.f32 %v2324_v32, %v2198_v23  ;;  %v2367_v40 = vmax.f32 %v2366_v59, %v2200_v24  ;;  %v1775_v41 = vpop.f32.mrb[40].mxu0  ;;  %v1888_v42 = vpop.f32.mrb[40].mxu1 }
 0x471   : > { %v1776_v44 = vadd.f32 %v1775_v41, %v3594_v36  ;;  %v1889_v45 = vadd.f32 %v1888_v42, %v3597_v37  ;;  %v1777_v46 = vpop.f32.mrb[41].mxu0  ;;  %v1890_v47 = vpop.f32.mrb[41].mxu1 }
 0x472   : > { %v1778_v48 = vadd.f32 %v1777_v46, %v3600_v38  ;;  %v1891_v49 = vadd.f32 %v1890_v47, %v3603_v39  ;;  %v1779_v50 = vpop.f32.mrb[42].mxu0  ;;  %v1892_v51 = vpop.f32.mrb[42].mxu1 }
 0x473   : > { %v2205_v52 = vmax.f32 %v1776_v44, 0.0  ;;  %v2207_v53 = vmax.f32 %v1889_v45, 0.0  ;;  %v1780_v54 = vadd.f32 %v1779_v50, %v3594_v36  ;;  %v1893_v55 = vadd.f32 %v1892_v51, %v3597_v37  ;;  %v1781_v56 = vpop.f32.mrb[43].mxu0  ;;  %v1894_v57 = vpop.f32.mrb[43].mxu1 }
 0x474   : > { %v2206_v58 = vmax.f32 %v1778_v48, 0.0  ;;  %v2208_v61 = vmax.f32 %v1891_v49, 0.0  ;;  %v1782_v62 = vadd.f32 %v1781_v56, %v3600_v38  ;;  %v1895_v63 = vadd.f32 %v1894_v57, %v3603_v39 }
 0x475   : > { %v2305_v0 = vmax.f32 %v2304_v35, %v2205_v52  ;;  %v2347_v1 = vmax.f32 %v2346_v34, %v2207_v53  ;;  %v2213_v2 = vmax.f32 %v1780_v54, 0.0  ;;  %v2215_v3 = vmax.f32 %v1893_v55, 0.0 }
 0x476   : > { %v2326_v5 = vmax.f32 %v2325_v30, %v2206_v58  ;;  %v2368_v6 = vmax.f32 %v2367_v40, %v2208_v61  ;;  %v2214_v7 = vmax.f32 %v1782_v62, 0.0  ;;  %v2216_v8 = vmax.f32 %v1895_v63, 0.0 }
 0x477   : > { %v2306_v9 = vmax.f32 %v2305_v0, %v2213_v2  ;;  %v2348_v10 = vmax.f32 %v2347_v1, %v2215_v3 }
 0x478   : > { %v2327_v11 = vmax.f32 %v2326_v5, %v2214_v7  ;;  %v2369_v12 = vmax.f32 %v2368_v6, %v2216_v8  ;;  %v1785_v13 = vpop.f32.mrb[44].mxu0  ;;  %v1898_v14 = vpop.f32.mrb[44].mxu1 }
 0x479   : > { %v1786_v15 = vadd.f32 %v1785_v13, %v3594_v36  ;;  %v1899_v16 = vadd.f32 %v1898_v14, %v3597_v37  ;;  %v1787_v17 = vpop.f32.mrb[45].mxu0  ;;  %v1900_v18 = vpop.f32.mrb[45].mxu1 }
 0x47a   : > { %v1788_v4 = vadd.f32 %v1787_v17, %v3600_v38  ;;  %v1901_v19 = vadd.f32 %v1900_v18, %v3603_v39  ;;  %v1789_v20 = vpop.f32.mrb[46].mxu0  ;;  %v1902_v43 = vpop.f32.mrb[46].mxu1 }
 0x47b   : > { %v2221_v21 = vmax.f32 %v1786_v15, 0.0  ;;  %v2223_v22 = vmax.f32 %v1899_v16, 0.0  ;;  %v1790_v25 = vadd.f32 %v1789_v20, %v3594_v36  ;;  %v1903_v26 = vadd.f32 %v1902_v43, %v3597_v37  ;;  %v1791_v27 = vpop.f32.mrb[47].mxu0  ;;  %v1904_v28 = vpop.f32.mrb[47].mxu1 }
 0x47c   : > { %v2222_v29 = vmax.f32 %v1788_v4, 0.0  ;;  %v2224_v31 = vmax.f32 %v1901_v19, 0.0  ;;  %v1792_v32 = vadd.f32 %v1791_v27, %v3600_v38  ;;  %v1905_v59 = vadd.f32 %v1904_v28, %v3603_v39 }
 0x47d   : > { %v2307_v23 = vmax.f32 %v2306_v9, %v2221_v21  ;;  %v2349_v24 = vmax.f32 %v2348_v10, %v2223_v22  ;;  %v2229_v35 = vmax.f32 %v1790_v25, 0.0  ;;  %v2231_v34 = vmax.f32 %v1903_v26, 0.0 }
 0x47e   : > { %v2328_v30 = vmax.f32 %v2327_v11, %v2222_v29  ;;  %v2370_v40 = vmax.f32 %v2369_v12, %v2224_v31  ;;  %v2230_v41 = vmax.f32 %v1792_v32, 0.0  ;;  %v2232_v42 = vmax.f32 %v1905_v59, 0.0 }
 0x47f   : > { %v2308_v44 = vmax.f32 %v2307_v23, %v2229_v35  ;;  %v2350_v45 = vmax.f32 %v2349_v24, %v2231_v34 }
 0x480   : > { %v2329_v46 = vmax.f32 %v2328_v30, %v2230_v41  ;;  %v2371_v47 = vmax.f32 %v2370_v40, %v2232_v42  ;;  %v1795_v48 = vpop.f32.mrb[48].mxu0  ;;  %v1908_v49 = vpop.f32.mrb[48].mxu1 }
 0x481   : > { %v1796_v50 = vadd.f32 %v1795_v48, %v3594_v36  ;;  %v1909_v51 = vadd.f32 %v1908_v49, %v3597_v37  ;;  %v1797_v52 = vpop.f32.mrb[49].mxu0  ;;  %v1910_v53 = vpop.f32.mrb[49].mxu1 }
 0x482   : > { %v1798_v54 = vadd.f32 %v1797_v52, %v3600_v38  ;;  %v1911_v55 = vadd.f32 %v1910_v53, %v3603_v39  ;;  %v1799_v56 = vpop.f32.mrb[50].mxu0  ;;  %v1912_v57 = vpop.f32.mrb[50].mxu1 }
 0x483   : > { %v2237_v58 = vmax.f32 %v1796_v50, 0.0  ;;  %v2239_v61 = vmax.f32 %v1909_v51, 0.0  ;;  %v1800_v62 = vadd.f32 %v1799_v56, %v3594_v36  ;;  %v1913_v63 = vadd.f32 %v1912_v57, %v3597_v37  ;;  %v1801_v0 = vpop.f32.mrb[51].mxu0  ;;  %v1914_v1 = vpop.f32.mrb[51].mxu1 }
 0x484   : > { %v2238_v2 = vmax.f32 %v1798_v54, 0.0  ;;  %v2240_v3 = vmax.f32 %v1911_v55, 0.0  ;;  %v1802_v5 = vadd.f32 %v1801_v0, %v3600_v38  ;;  %v1915_v6 = vadd.f32 %v1914_v1, %v3603_v39 }
 0x485   : > { %v2309_v7 = vmax.f32 %v2308_v44, %v2237_v58  ;;  %v2351_v8 = vmax.f32 %v2350_v45, %v2239_v61  ;;  %v2245_v9 = vmax.f32 %v1800_v62, 0.0  ;;  %v2247_v10 = vmax.f32 %v1913_v63, 0.0 }
 0x486   : > { %v2330_v11 = vmax.f32 %v2329_v46, %v2238_v2  ;;  %v2372_v12 = vmax.f32 %v2371_v47, %v2240_v3  ;;  %v2246_v13 = vmax.f32 %v1802_v5, 0.0  ;;  %v2248_v14 = vmax.f32 %v1915_v6, 0.0 }
 0x487   : > { %v2310_v15 = vmax.f32 %v2309_v7, %v2245_v9  ;;  %v2352_v16 = vmax.f32 %v2351_v8, %v2247_v10  ;;  %v1379_v56 = vsub.s32 4, %v3582_v60  ;;  %v1387_v63 = vsub.s32 6, %v3582_v60 }
 0x488   : > { %v2331_v17 = vmax.f32 %v2330_v11, %v2246_v13  ;;  %v2373_v18 = vmax.f32 %v2372_v12, %v2248_v14  ;;  %v1805_v4 = vpop.f32.mrb[52].mxu0  ;;  %v1918_v19 = vpop.f32.mrb[52].mxu1  ;;  %v1383_v0 = vsub.s32 5, %v3582_v60  ;;  %v3019_v6 = vmov 1966171168  }
 0x489   : > { %v1806_v20 = vadd.f32 %v1805_v4, %v3594_v36  ;;  %v1919_v43 = vadd.f32 %v1918_v19, %v3597_v37  ;;  %v1807_v21 = vpop.f32.mrb[53].mxu0  ;;  %v1920_v22 = vpop.f32.mrb[53].mxu1  ;;  %v2483_v7 = vunpack.c.l.s4 %v3019_v6  ;;  %v1391_v8 = vsub.s32 7, %v3582_v60 }
 0x48a   : > { %v1808_v25 = vadd.f32 %v1807_v21, %v3600_v38  ;;  %v1921_v26 = vadd.f32 %v1920_v22, %v3603_v39  ;;  %v1809_v27 = vpop.f32.mrb[54].mxu0  ;;  %v1922_v28 = vpop.f32.mrb[54].mxu1 }
 0x48b   : > { %v2253_v29 = vmax.f32 %v1806_v20, 0.0  ;;  %v2255_v31 = vmax.f32 %v1919_v43, 0.0  ;;  %v1810_v32 = vadd.f32 %v1809_v27, %v3594_v36  ;;  %v1923_v59 = vadd.f32 %v1922_v28, %v3597_v37  ;;  %v1811_v23 = vpop.f32.mrb[55].mxu0  ;;  %v1924_v24 = vpop.f32.mrb[55].mxu1 }
 0x48c   : > { %v2254_v35 = vmax.f32 %v1808_v25, 0.0  ;;  %v2256_v34 = vmax.f32 %v1921_v26, 0.0  ;;  %v1812_v30 = vadd.f32 %v1811_v23, %v3600_v38  ;;  %v1925_v40 = vadd.f32 %v1924_v24, %v3603_v39 }
 0x48d   : > { %v2311_v41 = vmax.f32 %v2310_v15, %v2253_v29  ;;  %v2353_v42 = vmax.f32 %v2352_v16, %v2255_v31  ;;  %v2261_v44 = vmax.f32 %v1810_v32, 0.0  ;;  %v2263_v45 = vmax.f32 %v1923_v59, 0.0 }
 0x48e   : > { %v2332_v46 = vmax.f32 %v2331_v17, %v2254_v35  ;;  %v2374_v47 = vmax.f32 %v2373_v18, %v2256_v34  ;;  %v2262_v48 = vmax.f32 %v1812_v30, 0.0  ;;  %v2264_v49 = vmax.f32 %v1925_v40, 0.0 }
 0x48f   : > { %v2312_v50 = vmax.f32 %v2311_v41, %v2261_v44  ;;  %v2354_v51 = vmax.f32 %v2353_v42, %v2263_v45  ;;  %v3666_v23 = vrot.slane %v3589_v33, %v1379_v56  ;;  %v3671_v40 = vrot.slane %v3589_v33, %v1387_v63 }
 0x490   : > { %v2333_v52 = vmax.f32 %v2332_v46, %v2262_v48  ;;  %v2375_v53 = vmax.f32 %v2374_v47, %v2264_v49  ;;  %v1815_v54 = vpop.f32.mrb[56].mxu0  ;;  %v1928_v55 = vpop.f32.mrb[56].mxu1  ;;  %v3674_v41 = vrot.slane %v3589_v33, %v1383_v0  ;;  %v2484_v47 = vunpack.c.0.s8 %v2483_v7 }
 0x491   : > { %v1816_v57 = vadd.f32 %v1815_v54, %v3594_v36  ;;  %v1929_v58 = vadd.f32 %v1928_v55, %v3597_v37  ;;  %v1817_v61 = vpop.f32.mrb[57].mxu0  ;;  %v1930_v62 = vpop.f32.mrb[57].mxu1  ;;  %v3679_v48 = vrot.slane %v3589_v33, %v1391_v8 }
 0x492   : > { %v1818_v1 = vadd.f32 %v1817_v61, %v3600_v38  ;;  %v1931_v2 = vadd.f32 %v1930_v62, %v3603_v39  ;;  %v1819_v3 = vpop.f32.mrb[58].mxu0  ;;  %v1932_v5 = vpop.f32.mrb[58].mxu1 }
 0x493   : > { %v2269_v9 = vmax.f32 %v1816_v57, 0.0  ;;  %v2271_v10 = vmax.f32 %v1929_v58, 0.0  ;;  %v1820_v11 = vadd.f32 %v1819_v3, %v3594_v36  ;;  %v1933_v12 = vadd.f32 %v1932_v5, %v3597_v37  ;;  %v1821_v13 = vpop.f32.mrb[59].mxu0  ;;  %v1934_v14 = vpop.f32.mrb[59].mxu1 }
 0x494   : > { %v2270_v15 = vmax.f32 %v1818_v1, 0.0  ;;  %v2272_v16 = vmax.f32 %v1931_v2, 0.0  ;;  %v1822_v17 = vadd.f32 %v1821_v13, %v3600_v38  ;;  %v1935_v18 = vadd.f32 %v1934_v14, %v3603_v39 }
 0x495   : > { %v2313_v4 = vmax.f32 %v2312_v50, %v2269_v9  ;;  %v2355_v19 = vmax.f32 %v2354_v51, %v2271_v10  ;;  %v2277_v20 = vmax.f32 %v1820_v11, 0.0  ;;  %v2279_v43 = vmax.f32 %v1933_v12, 0.0 }
 0x496   : > { %v2334_v21 = vmax.f32 %v2333_v52, %v2270_v15  ;;  %v2376_v22 = vmax.f32 %v2375_v53, %v2272_v16  ;;  %v2278_v25 = vmax.f32 %v1822_v17, 0.0  ;;  %v2280_v26 = vmax.f32 %v1935_v18, 0.0 }
 0x497   : > { %v2314_v27 = vmax.f32 %v2313_v4, %v2277_v20  ;;  %v2356_v28 = vmax.f32 %v2355_v19, %v2279_v43 }
 0x498   : > { %v2335_v29 = vmax.f32 %v2334_v21, %v2278_v25  ;;  %v2377_v31 = vmax.f32 %v2376_v22, %v2280_v26  ;;  %v1825_v32 = vpop.f32.mrb[60].mxu0  ;;  %v1938_v59 = vpop.f32.mrb[60].mxu1 }
 0x499   : > { %v1826_v24 = vadd.f32 %v1825_v32, %v3594_v36  ;;  %v1939_v35 = vadd.f32 %v1938_v59, %v3597_v37  ;;  %v1827_v34 = vpop.f32.mrb[61].mxu0  ;;  %v1940_v30 = vpop.f32.mrb[61].mxu1 }
 0x49a   : > { %v1828_v42 = vadd.f32 %v1827_v34, %v3600_v38  ;;  %v1941_v44 = vadd.f32 %v1940_v30, %v3603_v39  ;;  %v1829_v45 = vpop.f32.mrb[62].mxu0  ;;  %v1942_v46 = vpop.f32.mrb[62].mxu1 }
 0x49b   : > { %v2285_v49 = vmax.f32 %v1826_v24, 0.0  ;;  %v2287_v50 = vmax.f32 %v1939_v35, 0.0  ;;  %v1830_v51 = vadd.f32 %v1829_v45, %v3594_v36  ;;  %v1943_v52 = vadd.f32 %v1942_v46, %v3597_v37  ;;  %v1831_v53 = vpop.f32.mrb[63].mxu0  ;;  %v1944_v54 = vpop.f32.mrb[63].mxu1 }
 0x49c   : > { %v2286_v55 = vmax.f32 %v1828_v42, 0.0  ;;  %v2288_v56 = vmax.f32 %v1941_v44, 0.0  ;;  %v1832_v57 = vadd.f32 %v1831_v53, %v3600_v38  ;;  %v1945_v58 = vadd.f32 %v1944_v54, %v3603_v39 }
 0x49d   : > { %v2315_v61 = vmax.f32 %v2314_v27, %v2285_v49  ;;  %v2357_v62 = vmax.f32 %v2356_v28, %v2287_v50  ;;  %v2293_v63 = vmax.f32 %v1830_v51, 0.0  ;;  %v2295_v0 = vmax.f32 %v1943_v52, 0.0 }
 0x49e   : > { %v2336_v33 = vmax.f32 %v2335_v29, %v2286_v55  ;;  %v2378_v1 = vmax.f32 %v2377_v31, %v2288_v56  ;;  %v2294_v2 = vmax.f32 %v1832_v57, 0.0  ;;  %v2296_v3 = vmax.f32 %v1945_v58, 0.0 }
 0x49f   : > { %v2316_v5 = vmax.f32 %v2315_v61, %v2293_v63  ;;  %v2358_v36 = vmax.f32 %v2357_v62, %v2295_v0  ;;  %v3686_v37 = vsub.s32 %v2484_v47, %v3582_v60 }
 0x4a0   : > { %v2337_v6 = vmax.f32 %v2336_v33, %v2294_v2  ;;  %v2379_v7 = vmax.f32 %v2378_v1, %v2296_v3  ;;  %v1981_v8 = vpop.f32.mrb[64].mxu0  ;;  %v2094_v9 = vpop.f32.mrb[64].mxu1 }
 0x4a1   : > { %v2317_v38 = vrot.slane %v2316_v5, 4  ;;  %v2359_v10 = vrot.slane %v2358_v36, 4  ;;  %v1982_v39 = vadd.f32 %v1981_v8, %v3666_v23  ;;  %v2095_v11 = vadd.f32 %v2094_v9, %v3671_v40  ;;  %v1983_v12 = vpop.f32.mrb[65].mxu0  ;;  %v2096_v13 = vpop.f32.mrb[65].mxu1 }
 0x4a2   : > { %v2338_v14 = vrot.slane %v2337_v6, 4  ;;  %v2380_v15 = vrot.slane %v2379_v7, 4  ;;  %v1984_v16 = vadd.f32 %v1983_v12, %v3674_v41  ;;  %v2097_v17 = vadd.f32 %v2096_v13, %v3679_v48  ;;  %v1985_v18 = vpop.f32.mrb[66].mxu0  ;;  %v2098_v60 = vpop.f32.mrb[66].mxu1 }
 0x4a3   : > { %v2318_v4 = vmax.f32 %v2316_v5, %v2317_v38  ;;  %v2360_v19 = vmax.f32 %v2358_v36, %v2359_v10  ;;  %v2177_v20 = vmax.f32 %v1982_v39, 0.0  ;;  %v2179_v43 = vmax.f32 %v2095_v11, 0.0  ;;  %v1987_v21 = vpop.f32.mrb[67].mxu0  ;;  %v2100_v22 = vpop.f32.mrb[67].mxu1 }
 0x4a4   : > { %v2339_v25 = vmax.f32 %v2337_v6, %v2338_v14  ;;  %v2381_v26 = vmax.f32 %v2379_v7, %v2380_v15  ;;  %v2178_v27 = vmax.f32 %v1984_v16, 0.0  ;;  %v2180_v28 = vmax.f32 %v2097_v17, 0.0 }
 0x4a5   : > { %v2319_v29 = vrot.slane %v2318_v4, 2  ;;  %v2361_v31 = vrot.slane %v2360_v19, 2  ;;  %v1986_v32 = vadd.f32 %v1985_v18, %v3666_v23  ;;  %v2099_v59 = vadd.f32 %v2098_v60, %v3671_v40 }
 0x4a6   : > { %v2340_v24 = vrot.slane %v2339_v25, 2  ;;  %v2382_v35 = vrot.slane %v2381_v26, 2  ;;  %v1988_v34 = vadd.f32 %v1987_v21, %v3674_v41  ;;  %v2101_v30 = vadd.f32 %v2100_v22, %v3679_v48 }
 0x4a7   : > { %v2320_v42 = vmax.f32 %v2318_v4, %v2319_v29  ;;  %v2362_v44 = vmax.f32 %v2360_v19, %v2361_v31  ;;  %v2185_v45 = vmax.f32 %v1986_v32, 0.0  ;;  %v2187_v46 = vmax.f32 %v2099_v59, 0.0 }
 0x4a8   : > { %v2341_v47 = vmax.f32 %v2339_v25, %v2340_v24  ;;  %v2383_v49 = vmax.f32 %v2381_v26, %v2382_v35  ;;  %v2186_v50 = vmax.f32 %v1988_v34, 0.0  ;;  %v2188_v51 = vmax.f32 %v2101_v30, 0.0  ;;  %v1991_v52 = vpop.f32.mrb[68].mxu0  ;;  %v2104_v53 = vpop.f32.mrb[68].mxu1 }
 0x4a9   : > { %v2321_v54 = vrot.slane %v2320_v42, 1  ;;  %v2363_v55 = vrot.slane %v2362_v44, 1  ;;  %v2386_v56 = vmax.f32 %v2177_v20, %v2185_v45  ;;  %v2428_v57 = vmax.f32 %v2179_v43, %v2187_v46  ;;  %v1993_v58 = vpop.f32.mrb[69].mxu0  ;;  %v2106_v61 = vpop.f32.mrb[69].mxu1 }
 0x4aa   : > { %v2342_v62 = vrot.slane %v2341_v47, 1  ;;  %v2384_v63 = vrot.slane %v2383_v49, 1  ;;  %v2407_v0 = vmax.f32 %v2178_v27, %v2186_v50  ;;  %v2449_v33 = vmax.f32 %v2180_v28, %v2188_v51  ;;  %v1995_v1 = vpop.f32.mrb[70].mxu0  ;;  %v2108_v2 = vpop.f32.mrb[70].mxu1 }
 0x4ab   : > { %v2322_v3 = vmax.f32 %v2320_v42, %v2321_v54  ;;  %v2364_v5 = vmax.f32 %v2362_v44, %v2363_v55  ;;  %v1992_v36 = vadd.f32 %v1991_v52, %v3666_v23  ;;  %v2105_v6 = vadd.f32 %v2104_v53, %v3671_v40  ;;  %v1997_v7 = vpop.f32.mrb[71].mxu0  ;;  %v2110_v8 = vpop.f32.mrb[71].mxu1 }
 0x4ac   : > { %v2343_v9 = vmax.f32 %v2341_v47, %v2342_v62  ;;  %v2385_v38 = vmax.f32 %v2383_v49, %v2384_v63  ;;  %v1994_v10 = vadd.f32 %v1993_v58, %v3674_v41  ;;  %v2107_v39 = vadd.f32 %v2106_v61, %v3679_v48 }
 0x4ad   : > { %v2193_v11 = vmax.f32 %v1992_v36, 0.0  ;;  %v2195_v12 = vmax.f32 %v2105_v6, 0.0  ;;  %v1996_v13 = vadd.f32 %v1995_v1, %v3666_v23  ;;  %v2109_v14 = vadd.f32 %v2108_v2, %v3671_v40 }
 0x4ae   : > { %v2478_v15 = vcombine.low %v2322_v3, %v2343_v9  ;;  %v2479_v16 = vcombine.low %v2364_v5, %v2385_v38  ;;  %v2194_v17 = vmax.f32 %v1994_v10, 0.0  ;;  %v2196_v18 = vmax.f32 %v2107_v39, 0.0 }
 0x4af   : > { %v2387_v60 = vmax.f32 %v2386_v56, %v2193_v11  ;;  %v2429_v4 = vmax.f32 %v2428_v57, %v2195_v12  ;;  %v2201_v19 = vmax.f32 %v1996_v13, 0.0  ;;  %v2203_v20 = vmax.f32 %v2109_v14, 0.0 }
 0x4b0   : > { %v3703_v43 = vrot.slane %v2478_v15, %v3686_v37  ;;  %v3706_v21 = vrot.slane %v2479_v16, %v3686_v37  ;;  %v2408_v22 = vmax.f32 %v2407_v0, %v2194_v17  ;;  %v2450_v25 = vmax.f32 %v2449_v33, %v2196_v18  ;;  %v2001_v26 = vpop.f32.mrb[72].mxu0  ;;  %v2114_v27 = vpop.f32.mrb[72].mxu1 }
 0x4b1   : > { %v2388_v28 = vmax.f32 %v2387_v60, %v2201_v19  ;;  %v2430_v29 = vmax.f32 %v2429_v4, %v2203_v20  ;;  %v1998_v31 = vadd.f32 %v1997_v7, %v3674_v41  ;;  %v2111_v32 = vadd.f32 %v2110_v8, %v3679_v48  ;;  %v2003_v59 = vpop.f32.mrb[73].mxu0  ;;  %v2116_v24 = vpop.f32.mrb[73].mxu1 }
 0x4b2   : > { %v2510_v35 = vcombine.low %v3703_v43, %v3706_v21  ;;  %v2002_v34 = vadd.f32 %v2001_v26, %v3666_v23  ;;  %v2115_v30 = vadd.f32 %v2114_v27, %v3671_v40  ;;  %v2004_v42 = vadd.f32 %v2003_v59, %v3674_v41  ;;  %v2005_v44 = vpop.f32.mrb[74].mxu0  ;;  %v2118_v45 = vpop.f32.mrb[74].mxu1 }
 0x4b3   : > { %v2202_v46 = vmax.f32 %v1998_v31, 0.0  ;;  %v2204_v47 = vmax.f32 %v2111_v32, 0.0  ;;  %v2117_v49 = vadd.f32 %v2116_v24, %v3679_v48  ;;  %v2006_v50 = vadd.f32 %v2005_v44, %v3666_v23  ;;  %v2007_v51 = vpop.f32.mrb[75].mxu0  ;;  %v2120_v52 = vpop.f32.mrb[75].mxu1 }
 0x4b4   : > { %v2209_v53 = vmax.f32 %v2002_v34, 0.0  ;;  %v2211_v54 = vmax.f32 %v2115_v30, 0.0  ;;  %v2210_v55 = vmax.f32 %v2004_v42, 0.0  ;;  %v2119_v0 = vadd.f32 %v2118_v45, %v3671_v40 }
 0x4b5   : > { %v2409_v56 = vmax.f32 %v2408_v22, %v2202_v46  ;;  %v2451_v57 = vmax.f32 %v2450_v25, %v2204_v47  ;;  %v2212_v58 = vmax.f32 %v2117_v49, 0.0  ;;  %v2217_v61 = vmax.f32 %v2006_v50, 0.0 }
 0x4b6   : > { %v2389_v62 = vmax.f32 %v2388_v28, %v2209_v53  ;;  %v2431_v63 = vmax.f32 %v2430_v29, %v2211_v54  ;;  %v2008_v33 = vadd.f32 %v2007_v51, %v3674_v41  ;;  %v2121_v3 = vadd.f32 %v2120_v52, %v3679_v48 }
 0x4b7   : > { %v2410_v1 = vmax.f32 %v2409_v56, %v2210_v55  ;;  %v2452_v2 = vmax.f32 %v2451_v57, %v2212_v58  ;;  %v2219_v36 = vmax.f32 %v2119_v0, 0.0 }
 0x4b8   : > { %v2390_v5 = vmax.f32 %v2389_v62, %v2217_v61  ;;  %v2218_v6 = vmax.f32 %v2008_v33, 0.0  ;;  %v2011_v7 = vpop.f32.mrb[76].mxu0  ;;  %v2124_v8 = vpop.f32.mrb[76].mxu1  ;;  %v2220_v9 = vmax.f32 %v2121_v3, 0.0 }
 0x4b9   : > { %v2012_v38 = vadd.f32 %v2011_v7, %v3666_v23  ;;  %v2125_v10 = vadd.f32 %v2124_v8, %v3671_v40  ;;  %v2013_v39 = vpop.f32.mrb[77].mxu0  ;;  %v2126_v11 = vpop.f32.mrb[77].mxu1  ;;  %v2432_v12 = vmax.f32 %v2431_v63, %v2219_v36 }
 0x4ba   : > { %v2411_v13 = vmax.f32 %v2410_v1, %v2218_v6  ;;  %v2014_v14 = vadd.f32 %v2013_v39, %v3674_v41  ;;  %v2127_v15 = vadd.f32 %v2126_v11, %v3679_v48  ;;  %v2015_v16 = vpop.f32.mrb[78].mxu0  ;;  %v2128_v17 = vpop.f32.mrb[78].mxu1  ;;  %v2453_v18 = vmax.f32 %v2452_v2, %v2220_v9 }
 0x4bb   : > { %v2225_v60 = vmax.f32 %v2012_v38, 0.0  ;;  %v2227_v4 = vmax.f32 %v2125_v10, 0.0  ;;  %v2016_v19 = vadd.f32 %v2015_v16, %v3666_v23  ;;  %v2017_v20 = vpop.f32.mrb[79].mxu0  ;;  %v2130_v22 = vpop.f32.mrb[79].mxu1  ;;  %v2129_v27 = vadd.f32 %v2128_v17, %v3671_v40 }
 0x4bc   : > { %v2226_v25 = vmax.f32 %v2014_v14, 0.0  ;;  %v2228_v26 = vmax.f32 %v2127_v15, 0.0  ;;  %v2018_v28 = vadd.f32 %v2017_v20, %v3674_v41  ;;  %v2131_v59 = vadd.f32 %v2130_v22, %v3679_v48 }
 0x4bd   : > { %v2391_v29 = vmax.f32 %v2390_v5, %v2225_v60  ;;  %v2433_v31 = vmax.f32 %v2432_v12, %v2227_v4  ;;  %v2233_v32 = vmax.f32 %v2016_v19, 0.0  ;;  %v2235_v30 = vmax.f32 %v2129_v27, 0.0 }
 0x4be   : > { %v2412_v24 = vmax.f32 %v2411_v13, %v2226_v25  ;;  %v2454_v34 = vmax.f32 %v2453_v18, %v2228_v26  ;;  %v2234_v42 = vmax.f32 %v2018_v28, 0.0  ;;  %v2236_v45 = vmax.f32 %v2131_v59, 0.0 }
 0x4bf   : > { %v2392_v44 = vmax.f32 %v2391_v29, %v2233_v32  ;;  %v2434_v46 = vmax.f32 %v2433_v31, %v2235_v30 }
 0x4c0   : > { %v2413_v47 = vmax.f32 %v2412_v24, %v2234_v42  ;;  %v2021_v49 = vpop.f32.mrb[80].mxu0  ;;  %v2134_v50 = vpop.f32.mrb[80].mxu1  ;;  %v2455_v51 = vmax.f32 %v2454_v34, %v2236_v45 }
 0x4c1   : > { %v2022_v52 = vadd.f32 %v2021_v49, %v3666_v23  ;;  %v2135_v53 = vadd.f32 %v2134_v50, %v3671_v40  ;;  %v2023_v54 = vpop.f32.mrb[81].mxu0  ;;  %v2136_v55 = vpop.f32.mrb[81].mxu1 }
 0x4c2   : > { %v2024_v56 = vadd.f32 %v2023_v54, %v3674_v41  ;;  %v2137_v57 = vadd.f32 %v2136_v55, %v3679_v48  ;;  %v2025_v58 = vpop.f32.mrb[82].mxu0  ;;  %v2138_v61 = vpop.f32.mrb[82].mxu1 }
 0x4c3   : > { %v2241_v62 = vmax.f32 %v2022_v52, 0.0  ;;  %v2243_v63 = vmax.f32 %v2135_v53, 0.0  ;;  %v2026_v0 = vadd.f32 %v2025_v58, %v3666_v23  ;;  %v2139_v33 = vadd.f32 %v2138_v61, %v3671_v40  ;;  %v2027_v1 = vpop.f32.mrb[83].mxu0  ;;  %v2140_v2 = vpop.f32.mrb[83].mxu1 }
 0x4c4   : > { %v2242_v3 = vmax.f32 %v2024_v56, 0.0  ;;  %v2244_v5 = vmax.f32 %v2137_v57, 0.0  ;;  %v2028_v36 = vadd.f32 %v2027_v1, %v3674_v41  ;;  %v2141_v6 = vadd.f32 %v2140_v2, %v3679_v48 }
 0x4c5   : > { %v2393_v7 = vmax.f32 %v2392_v44, %v2241_v62  ;;  %v2435_v8 = vmax.f32 %v2434_v46, %v2243_v63  ;;  %v2249_v9 = vmax.f32 %v2026_v0, 0.0  ;;  %v2251_v38 = vmax.f32 %v2139_v33, 0.0 }
 0x4c6   : > { %v2414_v10 = vmax.f32 %v2413_v47, %v2242_v3  ;;  %v2456_v39 = vmax.f32 %v2455_v51, %v2244_v5  ;;  %v2250_v11 = vmax.f32 %v2028_v36, 0.0  ;;  %v2252_v12 = vmax.f32 %v2141_v6, 0.0 }
 0x4c7   : > { %v2394_v13 = vmax.f32 %v2393_v7, %v2249_v9  ;;  %v2436_v14 = vmax.f32 %v2435_v8, %v2251_v38 }
 0x4c8   : > { %v2415_v15 = vmax.f32 %v2414_v10, %v2250_v11  ;;  %v2457_v16 = vmax.f32 %v2456_v39, %v2252_v12  ;;  %v2031_v17 = vpop.f32.mrb[84].mxu0  ;;  %v2144_v18 = vpop.f32.mrb[84].mxu1 }
 0x4c9   : > { %v2032_v60 = vadd.f32 %v2031_v17, %v3666_v23  ;;  %v2145_v4 = vadd.f32 %v2144_v18, %v3671_v40  ;;  %v2033_v19 = vpop.f32.mrb[85].mxu0  ;;  %v2146_v20 = vpop.f32.mrb[85].mxu1 }
 0x4ca   : > { %v2034_v22 = vadd.f32 %v2033_v19, %v3674_v41  ;;  %v2147_v25 = vadd.f32 %v2146_v20, %v3679_v48  ;;  %v2035_v26 = vpop.f32.mrb[86].mxu0  ;;  %v2148_v27 = vpop.f32.mrb[86].mxu1 }
 0x4cb   : > { %v2257_v28 = vmax.f32 %v2032_v60, 0.0  ;;  %v2259_v29 = vmax.f32 %v2145_v4, 0.0  ;;  %v2036_v31 = vadd.f32 %v2035_v26, %v3666_v23  ;;  %v2149_v32 = vadd.f32 %v2148_v27, %v3671_v40  ;;  %v2037_v59 = vpop.f32.mrb[87].mxu0  ;;  %v2150_v24 = vpop.f32.mrb[87].mxu1 }
 0x4cc   : > { %v2258_v34 = vmax.f32 %v2034_v22, 0.0  ;;  %v2260_v30 = vmax.f32 %v2147_v25, 0.0  ;;  %v2038_v42 = vadd.f32 %v2037_v59, %v3674_v41  ;;  %v2151_v44 = vadd.f32 %v2150_v24, %v3679_v48 }
 0x4cd   : > { %v2395_v45 = vmax.f32 %v2394_v13, %v2257_v28  ;;  %v2437_v46 = vmax.f32 %v2436_v14, %v2259_v29  ;;  %v2265_v47 = vmax.f32 %v2036_v31, 0.0  ;;  %v2267_v49 = vmax.f32 %v2149_v32, 0.0 }
 0x4ce   : > { %v2416_v50 = vmax.f32 %v2415_v15, %v2258_v34  ;;  %v2458_v51 = vmax.f32 %v2457_v16, %v2260_v30  ;;  %v2266_v52 = vmax.f32 %v2038_v42, 0.0  ;;  %v2268_v53 = vmax.f32 %v2151_v44, 0.0 }
 0x4cf   : > { %v2396_v54 = vmax.f32 %v2395_v45, %v2265_v47  ;;  %v2438_v55 = vmax.f32 %v2437_v46, %v2267_v49 }
 0x4d0   : > { %v2417_v56 = vmax.f32 %v2416_v50, %v2266_v52  ;;  %v2459_v57 = vmax.f32 %v2458_v51, %v2268_v53  ;;  %v2041_v58 = vpop.f32.mrb[88].mxu0  ;;  %v2154_v61 = vpop.f32.mrb[88].mxu1 }
 0x4d1   : > { %v2042_v62 = vadd.f32 %v2041_v58, %v3666_v23  ;;  %v2155_v63 = vadd.f32 %v2154_v61, %v3671_v40  ;;  %v2043_v0 = vpop.f32.mrb[89].mxu0  ;;  %v2156_v33 = vpop.f32.mrb[89].mxu1 }
 0x4d2   : > { %v2044_v1 = vadd.f32 %v2043_v0, %v3674_v41  ;;  %v2157_v2 = vadd.f32 %v2156_v33, %v3679_v48  ;;  %v2045_v3 = vpop.f32.mrb[90].mxu0  ;;  %v2158_v5 = vpop.f32.mrb[90].mxu1 }
 0x4d3   : > { %v2273_v36 = vmax.f32 %v2042_v62, 0.0  ;;  %v2275_v6 = vmax.f32 %v2155_v63, 0.0  ;;  %v2046_v7 = vadd.f32 %v2045_v3, %v3666_v23  ;;  %v2159_v8 = vadd.f32 %v2158_v5, %v3671_v40  ;;  %v2047_v9 = vpop.f32.mrb[91].mxu0  ;;  %v2160_v38 = vpop.f32.mrb[91].mxu1 }
 0x4d4   : > { %v2274_v10 = vmax.f32 %v2044_v1, 0.0  ;;  %v2276_v39 = vmax.f32 %v2157_v2, 0.0  ;;  %v2048_v11 = vadd.f32 %v2047_v9, %v3674_v41  ;;  %v2161_v12 = vadd.f32 %v2160_v38, %v3679_v48 }
 0x4d5   : > { %v2397_v13 = vmax.f32 %v2396_v54, %v2273_v36  ;;  %v2439_v14 = vmax.f32 %v2438_v55, %v2275_v6  ;;  %v2281_v15 = vmax.f32 %v2046_v7, 0.0  ;;  %v2283_v16 = vmax.f32 %v2159_v8, 0.0 }
 0x4d6   : > { %v2418_v17 = vmax.f32 %v2417_v56, %v2274_v10  ;;  %v2460_v18 = vmax.f32 %v2459_v57, %v2276_v39  ;;  %v2282_v60 = vmax.f32 %v2048_v11, 0.0  ;;  %v2284_v4 = vmax.f32 %v2161_v12, 0.0 }
 0x4d7   : > { %v2398_v19 = vmax.f32 %v2397_v13, %v2281_v15  ;;  %v2440_v20 = vmax.f32 %v2439_v14, %v2283_v16 }
 0x4d8   : > { %v2419_v22 = vmax.f32 %v2418_v17, %v2282_v60  ;;  %v2461_v25 = vmax.f32 %v2460_v18, %v2284_v4  ;;  %v2051_v26 = vpop.f32.mrb[92].mxu0  ;;  %v2164_v27 = vpop.f32.mrb[92].mxu1 }
 0x4d9   : > { %v2052_v28 = vadd.f32 %v2051_v26, %v3666_v23  ;;  %v2165_v29 = vadd.f32 %v2164_v27, %v3671_v40  ;;  %v2053_v31 = vpop.f32.mrb[93].mxu0  ;;  %v2166_v32 = vpop.f32.mrb[93].mxu1  ;;  %v2518_v27 = vrot.slane %v2510_v35, %v3686_v37 }
 0x4da   : > { %v2054_v59 = vadd.f32 %v2053_v31, %v3674_v41  ;;  %v2167_v24 = vadd.f32 %v2166_v32, %v3679_v48  ;;  %v2055_v34 = vpop.f32.mrb[94].mxu0  ;;  %v2168_v30 = vpop.f32.mrb[94].mxu1 }
 0x4db   : > { %v2289_v42 = vmax.f32 %v2052_v28, 0.0  ;;  %v2291_v44 = vmax.f32 %v2165_v29, 0.0  ;;  %v2056_v45 = vadd.f32 %v2055_v34, %v3666_v23  ;;  %v2169_v46 = vadd.f32 %v2168_v30, %v3671_v40  ;;  %v2057_v47 = vpop.f32.mrb[95].mxu0  ;;  %v2170_v49 = vpop.f32.mrb[95].mxu1 }
 0x4dc   : > { %v2290_v50 = vmax.f32 %v2054_v59, 0.0  ;;  %v2292_v51 = vmax.f32 %v2167_v24, 0.0  ;;  %v2058_v52 = vadd.f32 %v2057_v47, %v3674_v41  ;;  %v2171_v53 = vadd.f32 %v2170_v49, %v3679_v48 }
 0x4dd   : > { %v2399_v54 = vmax.f32 %v2398_v19, %v2289_v42  ;;  %v2441_v55 = vmax.f32 %v2440_v20, %v2291_v44  ;;  %v2297_v56 = vmax.f32 %v2056_v45, 0.0  ;;  %v2299_v57 = vmax.f32 %v2169_v46, 0.0 }
 0x4de   : > { %v2420_v58 = vmax.f32 %v2419_v22, %v2290_v50  ;;  %v2462_v61 = vmax.f32 %v2461_v25, %v2292_v51  ;;  %v2298_v62 = vmax.f32 %v2058_v52, 0.0  ;;  %v2300_v63 = vmax.f32 %v2171_v53, 0.0 }
 0x4df   : > { %v2400_v0 = vmax.f32 %v2399_v54, %v2297_v56  ;;  %v2442_v23 = vmax.f32 %v2441_v55, %v2299_v57 }
 0x4e0   : > { %v2421_v33 = vmax.f32 %v2420_v58, %v2298_v62  ;;  %v2463_v40 = vmax.f32 %v2462_v61, %v2300_v63 }
 0x4e1   : > { %v2401_v1 = vrot.slane %v2400_v0, 4  ;;  %v2443_v2 = vrot.slane %v2442_v23, 4 }
 0x4e2   : > { %v2422_v3 = vrot.slane %v2421_v33, 4  ;;  %v2464_v5 = vrot.slane %v2463_v40, 4 }
 0x4e3   : > { %v2402_v36 = vmax.f32 %v2400_v0, %v2401_v1  ;;  %v2444_v41 = vmax.f32 %v2442_v23, %v2443_v2 }
 0x4e4   : > { %v2423_v6 = vmax.f32 %v2421_v33, %v2422_v3  ;;  %v2465_v48 = vmax.f32 %v2463_v40, %v2464_v5 }
 0x4e5   : > { %v2403_v7 = vrot.slane %v2402_v36, 2  ;;  %v2445_v8 = vrot.slane %v2444_v41, 2 }
 0x4e6   : > { %v2424_v9 = vrot.slane %v2423_v6, 2  ;;  %v2466_v38 = vrot.slane %v2465_v48, 2 }
 0x4e7   : > { %v2404_v10 = vmax.f32 %v2402_v36, %v2403_v7  ;;  %v2446_v39 = vmax.f32 %v2444_v41, %v2445_v8 }
 0x4e8   : > { %v2425_v11 = vmax.f32 %v2423_v6, %v2424_v9  ;;  %v2467_v12 = vmax.f32 %v2465_v48, %v2466_v38 }
 0x4e9   : > { %v2405_v13 = vrot.slane %v2404_v10, 1  ;;  %v2447_v14 = vrot.slane %v2446_v39, 1 }
 0x4ea   : > { %v2426_v15 = vrot.slane %v2425_v11, 1  ;;  %v2468_v16 = vrot.slane %v2467_v12, 1 }
 0x4eb   : > { %v2406_v17 = vmax.f32 %v2404_v10, %v2405_v13  ;;  %v2448_v18 = vmax.f32 %v2446_v39, %v2447_v14 }
 0x4ec   : > { %v2427_v60 = vmax.f32 %v2425_v11, %v2426_v15  ;;  %v2469_v4 = vmax.f32 %v2467_v12, %v2468_v16 }
 0x4ee   : > { %v2480_v19 = vcombine.low %v2406_v17, %v2427_v60  ;;  %v2481_v20 = vcombine.low %v2448_v18, %v2469_v4 }
 0x4f0   : > { %v2502_v22 = vrot.slane %v2480_v19, %v3686_v37  ;;  %v2509_v25 = vrot.slane %v2481_v20, %v3686_v37 }
 0x4f2   : > { %v2511_v26 = vcombine.low %v2502_v22, %v2509_v25 }
 0x4f4   : > { %v2525_v28 = vrot.slane %v2511_v26, %v3686_v37 }
 0x4f6   : > { %v2526_v29 = vcombine.low %v2518_v27, %v2525_v28 }
 0x4f8   : > { %2529 = vst [vmem:[%s480_s16] sm:$0xff] %v2526_v29 }
 0x4f9 PF: > { %s23_s23 = sadd.s32 1, %s3016_s23   ;;  %s3793_s21 = smov %s3012_s22 }
 0x4fa   : > { %p20_p5 = scmp.ge.s32.totalorder %s23_s23, 4   ;;  %s3794_s22 = smov %s3796_s24 }
 0x4fc   :  { %22 = sbr.rel (!%p20_p5) target bundleno = 2 (0x2), region = 113 }

// kernel: pointnet_part_seg_forward.6
= control target key start
LH: loop header
LB: loop body
LE: loop exit
PB: predicated region body
PF: predicated region fallthrough
CT: control target
= control target key end

     0   :  { %s2363_s24 = smov 0   ;;  %s2365_s25 = smov 0   ;;  %s2936_s0 = inlined_call_operand.vmem [shape: bf16[2,128,64], index: 0, kind: input, shape index: {}]   ;;  %s2937_s1 = inlined_call_operand.vmem [shape: bf16[2,64,64], index: 1, kind: input, shape index: {}]   ;;  %s2938_s2 = inlined_call_operand.vmem [shape: f32[1,64], index: 2, kind: input, shape index: {}]   ;;  %s2939_s3 = inlined_call_operand.vmem [shape: bf16[64,128], index: 3, kind: input, shape index: {}]   ;;  %s2940_s4 = inlined_call_operand.vmem [shape: f32[1,128], index: 4, kind: input, shape index: {}]   ;;  %s2941_s5 = inlined_call_operand.vmem [shape: bf16[128,1024], index: 5, kind: input, shape index: {}]   ;;  %s2942_s6 = inlined_call_operand.vmem [shape: f32[1,1024], index: 6, kind: input, shape index: {}]   ;;  %s2943_s7 = inlined_call_operand.vmem [shape: f32[2,1,1024], index: 7, kind: output, shape index: {}]  }
   0x1   :  { %s2367_s26 = smov 0  }
   0x2 LB: > { %s29_s27 = sadd.s32 1, %s2315_s25  ;;  %p2074_p0 = scmp.ge.s32.totalorder %s2319_s26, 1  ;;  %s2319_s26 = sphi %s2367_s26, %s17_s26   ;;  %s2315_s25 = sphi %s2365_s25, %s2945_s25   ;;  %s2311_s24 = sphi %s2363_s24, %s2944_s24  }
   0x3   : > { %p31_p1 = scmp.ge.s32.totalorder %s29_s27, 2  ;;  %p266_p2 = scmp.lt.s32.totalorder %s2319_s26, 3 }
   0x5   : > { %s2947_s27 = smov (%p31_p1, %s29_s27), 0  ;;  %p267_p3 = pnand %p2074_p0, %p266_p2 }
   0x6   : > { %p307_p4 = scmp.lt.s32.totalorder (!%p267_p3), %s2311_s24, 1  ;;  %v2293_v0 = vld [vmem:[%s2939_s3] sm:$0xff] (!%p267_p3)   ;;  %v2294_v1 = vld [vmem:[%s2939_s3 + $0x8] sm:$0xff] (!%p267_p3)   ;;  %vm426_vm0 = vcmask (!%p267_p3), 523264   ;;  %v2295_v14 = vld [vmem:[%s2939_s3 + $0x10] sm:$0xff] (!%p267_p3)  }
   0x7   : > { %270 = sbr.rel (%p267_p3) target bundleno = 841 (0x349), region = 48  ;;  %2230 = vmatprep.subr.bf16.mxu1 (!%p267_p3), %v2293_v0  ;;  %v2296_v15 = vld [vmem:[%s2939_s3 + $0x18] sm:$0xff] (!%p267_p3)   ;;  %v748_v16 = vld [vmem:[%s2941_s5] sm:$0xff] (!%p267_p3)  ;;  %v2420_v18 = vld [vmem:[%s2941_s5 + $0x8] sm:$0xff] (!%p267_p3) }
   0x8   : > { %2231 = vmatpush3.bf16.msra.mxu1 (!%p267_p3), %v2293_v0  ;;  %v752_v17 = vld [vmem:[%s2941_s5 + $0x20] sm:$0xff] (!%p267_p3)  ;;  %v2425_v21 = vld [vmem:[%s2941_s5 + $0x28] sm:$0xff] (!%p267_p3) }
   0x9   : > { %2232 = vmatprep.subr.bf16.mxu1 (!%p267_p3), %v2294_v1  ;;  %v2114_v19 = vcombine.low (!%p267_p3), %v748_v16, %v752_v17  ;;  %v2115_v20 = vcombine.high (!%p267_p3), %v748_v16, %v752_v17  ;;  %v756_v22 = vld [vmem:[%s2941_s5 + $0x40] sm:$0xff] (!%p267_p3)  ;;  %v2116_v24 = vcombine.low (!%p267_p3), %v2420_v18, %v2425_v21  ;;  %v2117_v25 = vcombine.high (!%p267_p3), %v2420_v18, %v2425_v21  ;;  %v757_v57 = vld [vmem:[%s2941_s5 + $0x48] sm:$0xff] (!%p267_p3) }
   0xa   : > { %v760_v23 = vld [vmem:[%s2941_s5 + $0x60] sm:$0xff] (!%p267_p3)  ;;  %v761_v58 = vld [vmem:[%s2941_s5 + $0x68] sm:$0xff] (!%p267_p3) }
   0xb   : > { %v2123_v26 = vcombine.high (!%p267_p3), %v756_v22, %v760_v23  ;;  %v764_v27 = vld [vmem:[%s2941_s5 + $0x80] sm:$0xff] (!%p267_p3)  ;;  %v2122_v29 = vcombine.low (!%p267_p3), %v756_v22, %v760_v23  ;;  %v2125_v0 = vcombine.high (!%p267_p3), %v757_v57, %v761_v58 }
   0xc   : > { %2233 = vmatpush3.bf16.msra.mxu1 (!%p267_p3), %v2294_v1  ;;  %v768_v28 = vld [vmem:[%s2941_s5 + $0xa0] sm:$0xff] (!%p267_p3) }
   0xd   : > { %2234 = vmatprep.subr.bf16.mxu1 (!%p267_p3), %v2295_v14  ;;  %v2131_v30 = vcombine.high (!%p267_p3), %v764_v27, %v768_v28  ;;  %v772_v31 = vld [vmem:[%s2941_s5 + $0xc0] sm:$0xff] (!%p267_p3)  ;;  %v2130_v33 = vcombine.low (!%p267_p3), %v764_v27, %v768_v28 }
   0xe   : > { %s2949_s24 = smov (!%p307_p4, %s2311_s24), 1  ;;  %v776_v32 = vld [vmem:[%s2941_s5 + $0xe0] sm:$0xff] }
   0xf   : > { %s2180_s9 = sshll.u32 %s2949_s24, 6  ;;  %s2181_s10 = sshll.u32 %s2949_s24, 5  ;;  %v2139_v34 = vcombine.high %v772_v31, %v776_v32  ;;  %v780_v35 = vld [vmem:[%s2941_s5 + $0x100] sm:$0xff]  ;;  %v2138_v37 = vcombine.low %v772_v31, %v776_v32 }
  0x10   : > { %s320_s13 = scalar_lea.vmem %s2937_s1, %s2181_s10  ;;  %s314_s16 = scalar_lea.vmem %s2936_s0, %s2180_s9  ;;  %2235 = vmatpush3.bf16.msra.mxu1 %v2295_v14  ;;  %v784_v36 = vld [vmem:[%s2941_s5 + $0x120] sm:$0xff]  ;;  %v773_v14 = vld [vmem:[%s2941_s5 + $0xc8] sm:$0xff] }
  0x11   : > { %v2281_v2 = vld [vmem:[%s320_s13] sm:$0xff]   ;;  %v2282_v3 = vld [vmem:[%s320_s13 + $0x8] sm:$0xff]   ;;  %v2283_v4 = vld [vmem:[%s320_s13 + $0x10] sm:$0xff]   ;;  %2236 = vmatprep.subr.bf16.mxu1 %v2296_v15  ;;  %v2147_v38 = vcombine.high %v780_v35, %v784_v36  ;;  %v2146_v41 = vcombine.low %v780_v35, %v784_v36  ;;  %s2079_s22 = sshll.u32 %s2949_s24, 3 }
  0x12   : > { %2206 = vmatprep.subr.bf16.mxu0 %v2281_v2  ;;  %v2285_v5 = vld [vmem:[%s314_s16] sm:$0xff]   ;;  %v2284_v6 = vld [vmem:[%s320_s13 + $0x18] sm:$0xff]   ;;  %v2286_v7 = vld [vmem:[%s314_s16 + $0x8] sm:$0xff]   ;;  %s324_s29 = scalar_lea.vmem %s2943_s7, %s2079_s22 }
  0x13   : > { %2207 = vmatpush3.bf16.msra.mxu0 %v2281_v2  ;;  %2214 = vmatprep.mubr.msk.bf16.mxu0 %vm426_vm0, %v2285_v5  ;;  %v2287_v8 = vld [vmem:[%s314_s16 + $0x10] sm:$0xff]   ;;  %v2288_v9 = vld [vmem:[%s314_s16 + $0x18] sm:$0xff]   ;;  %v2289_v10 = vld [vmem:[%s314_s16 + $0x20] sm:$0xff]  }
  0x14   : > { %2208 = vmatprep.subr.bf16.mxu0 %v2282_v3  ;;  %v2290_v11 = vld [vmem:[%s314_s16 + $0x28] sm:$0xff]   ;;  %v2291_v12 = vld [vmem:[%s314_s16 + $0x30] sm:$0xff]   ;;  %v2292_v13 = vld [vmem:[%s314_s16 + $0x38] sm:$0xff]   ;;  %2237 = vmatpush3.bf16.msra.mxu1 %v2296_v15 }
  0x15   : > { %1295 = vmatprep.subr.bf16.mxu1 %v2117_v25  ;;  %v788_v39 = vld [vmem:[%s2941_s5 + $0x140] sm:$0xff]  ;;  %v777_v15 = vld [vmem:[%s2941_s5 + $0xe8] sm:$0xff] }
  0x16   : > { %v792_v40 = vld [vmem:[%s2941_s5 + $0x160] sm:$0xff]  ;;  %v2141_v22 = vcombine.high %v773_v14, %v777_v15  ;;  %v781_v25 = vld [vmem:[%s2941_s5 + $0x108] sm:$0xff]  ;;  %v2140_v32 = vcombine.low %v773_v14, %v777_v15  ;;  %v755_v15 = vld [vmem:[%s2941_s5 + $0x38] sm:$0xff] }
  0x17   : > { %2209 = vmatpush3.bf16.msra.mxu0 %v2282_v3  ;;  %v2155_v42 = vcombine.high %v788_v39, %v792_v40  ;;  %v2154_v43 = vcombine.low %v788_v39, %v792_v40  ;;  %v2464_v44 = vld [vmem:[%s2938_s2] ss:$0 sm:$0xff]  ;;  %v765_v3 = vld [vmem:[%s2941_s5 + $0x88] sm:$0xff] }
  0x18   : > { %2210 = vmatprep.subr.bf16.mxu0 %v2283_v4  ;;  %v789_v36 = vld [vmem:[%s2941_s5 + $0x148] sm:$0xff] }
  0x1b   : > { %2211 = vmatpush3.bf16.msra.mxu0 %v2283_v4  ;;  %v769_v4 = vld [vmem:[%s2941_s5 + $0xa8] sm:$0xff] }
  0x1c   : > { %2212 = vmatprep.subr.bf16.mxu0 %v2284_v6 }
  0x1f   : > { %2213 = vmatpush3.bf16.msra.mxu0 %v2284_v6 }
  0x20   : > { %1182 = vmatprep.subr.bf16.mxu0 %v2115_v20  ;;  %v2132_v20 = vcombine.low %v765_v3, %v769_v4 }
  0x22   : > { %2215 = vmatmul.mubr.msk.bf16.vlgmr.msra.gmra.mrb[0].mxu0 %vm426_vm0, %v2286_v7 }
  0x23   : > { %2218 = vmatprep.mubr.msk.bf16.mxu0 %vm426_vm0, %v2287_v8  ;;  %1183 = vmatpush1.bf16.msra.mxu0 %v2114_v19 }
  0x24   : > { %1184 = vmatprep.subr.bf16.mxu0 %v2123_v26  ;;  %v785_v26 = vld [vmem:[%s2941_s5 + $0x128] sm:$0xff] }
  0x27   : > { %1185 = vmatpush1.bf16.msra.mxu0 %v2122_v29 }
  0x28   : > { %1186 = vmatprep.subr.bf16.mxu0 %v2131_v30 }
  0x2a   : > { %2219 = vmatmul.mubr.msk.bf16.gmra.mrb[4].mxu0 %vm426_vm0, %v2288_v9 }
  0x2b   : > { %2222 = vmatprep.mubr.msk.bf16.mxu0 %vm426_vm0, %v2289_v10  ;;  %1187 = vmatpush1.bf16.msra.mxu0 %v2130_v33  ;;  %v2124_v10 = vcombine.low %v757_v57, %v761_v58  ;;  %v796_v58 = vld [vmem:[%s2941_s5 + $0x180] sm:$0xff] }
  0x2c   : > { %1188 = vmatprep.subr.bf16.mxu0 %v2139_v34  ;;  %v2149_v34 = vcombine.high %v781_v25, %v785_v26 }
  0x2f   : > { %1189 = vmatpush1.bf16.msra.mxu0 %v2138_v37  ;;  %v793_v37 = vld [vmem:[%s2941_s5 + $0x168] sm:$0xff] }
  0x30   : > { %1190 = vmatprep.subr.bf16.mxu0 %v2147_v38 }
  0x32   : > { %2223 = vmatmul.mubr.msk.bf16.gmra.mrb[8].mxu0 %vm426_vm0, %v2290_v11 }
  0x33   : > { %2226 = vmatprep.mubr.msk.bf16.mxu0 %vm426_vm0, %v2291_v12  ;;  %1191 = vmatpush1.bf16.msra.mxu0 %v2146_v41  ;;  %v2133_v12 = vcombine.high %v765_v3, %v769_v4  ;;  %v2148_v41 = vcombine.low %v781_v25, %v785_v26  ;;  %v805_v3 = vld [vmem:[%s2941_s5 + $0x1c8] sm:$0xff] }
  0x34   : > { %1192 = vmatprep.subr.bf16.mxu0 %v2155_v42 }
  0x37   : > { %1193 = vmatpush1.bf16.msra.mxu0 %v2154_v43 }
  0x3a   : > { %2227 = vmatmul.mubr.msk.bf16.gmra.mrb[12].mxu0 %vm426_vm0, %v2292_v13 }
  0xf5   : > { %v2216_v45 = vpop.f32.mrb[0].mxu0 }
  0xf6   : > { %v494_v46 = vadd.f32 %v2216_v45, %v2464_v44  ;;  %v485_v47 = vpop.f32.mrb[1].mxu0  ;;  %v2157_v45 = vcombine.high %v789_v36, %v793_v37 }
  0xf7   : > { %v486_v48 = vadd.f32 %v2464_v44, %v485_v47  ;;  %v2217_v49 = vpop.f32.mrb[2].mxu0 }
  0xf8   : > { %v497_v50 = vadd.f32 %v2217_v49, %v2464_v44  ;;  %v488_v51 = vpop.f32.mrb[3].mxu0  ;;  %v550_v53 = vmax.f32 %v494_v46, 0.0 }
  0xf9   : > { %v489_v52 = vadd.f32 %v2464_v44, %v488_v51  ;;  %v548_v55 = vmax.f32 %v486_v48, 0.0 }
  0xfa   : > { %v551_v54 = vmax.f32 %v497_v50, 0.0 }
  0xfb   : > { %v549_v56 = vmax.f32 %v489_v52, 0.0 }
  0xfc   : > { %v573_v59 = vpack.c.bf16 %v551_v54, %v550_v53  ;;  %v2156_v53 = vcombine.low %v789_v36, %v793_v37 }
  0xfd   : > { %v2220_v60 = vpop.f32.mrb[4].mxu0  ;;  %v572_v61 = vpack.c.bf16 %v549_v56, %v548_v55 }
  0xfe   : > { %v510_v62 = vadd.f32 %v2220_v60, %v2464_v44  ;;  %v501_v63 = vpop.f32.mrb[5].mxu0 }
  0xff   : > { %v502_v1 = vadd.f32 %v2464_v44, %v501_v63  ;;  %2238 = vmatprep.mubr.msk.bf16.mxu1 %vm426_vm0, %v572_v61  ;;  %v2221_v2 = vpop.f32.mrb[6].mxu0  ;;  %v801_v61 = vld [vmem:[%s2941_s5 + $0x1a8] sm:$0xff] }
 0x100   : > { %v554_v5 = vmax.f32 %v510_v62, 0.0  ;;  %v513_v6 = vadd.f32 %v2221_v2, %v2464_v44  ;;  %2239 = vmatmul.mubr.msk.bf16.vlgmr.msra.gmra.mrb[0].mxu1 %vm426_vm0, %v573_v59  ;;  %v504_v7 = vpop.f32.mrb[7].mxu0  ;;  %v797_v59 = vld [vmem:[%s2941_s5 + $0x188] sm:$0xff]  ;;  %v808_v2 = vld [vmem:[%s2941_s5 + $0x1e0] sm:$0xff] }
 0x101   : > { %v552_v8 = vmax.f32 %v502_v1, 0.0  ;;  %v505_v9 = vadd.f32 %v2464_v44, %v504_v7  ;;  %1296 = vmatpush1.bf16.msra.mxu1 %v2116_v24  ;;  %v2164_v63 = vcombine.low %v797_v59, %v801_v61  ;;  %v804_v1 = vld [vmem:[%s2941_s5 + $0x1c0] sm:$0xff] }
 0x102   : > { %v555_v11 = vmax.f32 %v513_v6, 0.0  ;;  %1297 = vmatprep.subr.bf16.mxu1 %v2125_v0  ;;  %v2165_v0 = vcombine.high %v797_v59, %v801_v61  ;;  %v2171_v4 = vcombine.high %v804_v1, %v808_v2  ;;  %v2170_v6 = vcombine.low %v804_v1, %v808_v2  ;;  %v775_v61 = vld [vmem:[%s2941_s5 + $0xd8] sm:$0xff] }
 0x103   : > { %v553_v13 = vmax.f32 %v505_v9, 0.0  ;;  %v2321_v9 = vmov 0  }
 0x104   : > { %v575_v16 = vpack.c.bf16 %v555_v11, %v554_v5  ;;  %v809_v5 = vld [vmem:[%s2941_s5 + $0x1e8] sm:$0xff]  ;;  %1214 = vmatprep.mubr.bf16.mxu0 %v2321_v9  ;;  %v754_v11 = vld [vmem:[%s2941_s5 + $0x30] sm:$0xff] }
 0x105   : > { %v574_v17 = vpack.c.bf16 %v553_v13, %v552_v8  ;;  %v2224_v19 = vpop.f32.mrb[8].mxu0  ;;  %1298 = vmatpush1.bf16.msra.mxu1 %v2124_v10  ;;  %v2172_v7 = vcombine.low %v805_v3, %v809_v5  ;;  %v2173_v8 = vcombine.high %v805_v3, %v809_v5  ;;  %v750_v10 = vld [vmem:[%s2941_s5 + $0x10] sm:$0xff] }
 0x106   : > { %v526_v18 = vadd.f32 %v2224_v19, %v2464_v44  ;;  %v517_v21 = vpop.f32.mrb[9].mxu0  ;;  %1299 = vmatprep.subr.bf16.mxu1 %v2133_v12  ;;  %v751_v12 = vld [vmem:[%s2941_s5 + $0x18] sm:$0xff]  ;;  %v2118_v13 = vcombine.low %v750_v10, %v754_v11  ;;  %v2119_v14 = vcombine.high %v750_v10, %v754_v11  ;;  %v2564_v19 = vld [vmem:[%s2940_s4] ss:$0 sm:$0xff] }
 0x107   : > { %2242 = vmatprep.mubr.msk.bf16.mxu1 %vm426_vm0, %v574_v17  ;;  %v518_v23 = vadd.f32 %v2464_v44, %v517_v21  ;;  %v2225_v24 = vpop.f32.mrb[10].mxu0  ;;  %v2121_v17 = vcombine.high %v751_v12, %v755_v15 }
 0x108   : > { %2243 = vmatmul.mubr.msk.bf16.gmra.mrb[4].mxu1 %vm426_vm0, %v575_v16  ;;  %v558_v27 = vmax.f32 %v526_v18, 0.0  ;;  %v529_v28 = vadd.f32 %v2225_v24, %v2464_v44  ;;  %v520_v29 = vpop.f32.mrb[11].mxu0  ;;  %v2120_v16 = vcombine.low %v751_v12, %v755_v15  ;;  %v786_v12 = vld [vmem:[%s2941_s5 + $0x130] sm:$0xff] }
 0x109   : > { %v556_v30 = vmax.f32 %v518_v23, 0.0  ;;  %v521_v31 = vadd.f32 %v2464_v44, %v520_v29  ;;  %1300 = vmatpush1.bf16.msra.mxu1 %v2132_v20  ;;  %v758_v29 = vld [vmem:[%s2941_s5 + $0x50] sm:$0xff] }
 0x10a   : > { %v559_v33 = vmax.f32 %v529_v28, 0.0  ;;  %1301 = vmatprep.subr.bf16.mxu1 %v2141_v22 }
 0x10b   : > { %v557_v35 = vmax.f32 %v521_v31, 0.0 }
 0x10c   : > { %v577_v38 = vpack.c.bf16 %v559_v33, %v558_v27  ;;  %v759_v33 = vld [vmem:[%s2941_s5 + $0x58] sm:$0xff] }
 0x10d   : > { %v576_v39 = vpack.c.bf16 %v557_v35, %v556_v30  ;;  %v2228_v40 = vpop.f32.mrb[12].mxu0  ;;  %1302 = vmatpush1.bf16.msra.mxu1 %v2140_v32  ;;  %v762_v32 = vld [vmem:[%s2941_s5 + $0x70] sm:$0xff] }
 0x10e   : > { %v542_v42 = vadd.f32 %v2228_v40, %v2464_v44  ;;  %v533_v43 = vpop.f32.mrb[13].mxu0  ;;  %1303 = vmatprep.subr.bf16.mxu1 %v2149_v34  ;;  %v763_v34 = vld [vmem:[%s2941_s5 + $0x78] sm:$0xff] }
 0x10f   : > { %2246 = vmatprep.mubr.msk.bf16.mxu1 %vm426_vm0, %v576_v39  ;;  %v534_v46 = vadd.f32 %v2464_v44, %v533_v43  ;;  %v2229_v47 = vpop.f32.mrb[14].mxu0  ;;  %v770_v43 = vld [vmem:[%s2941_s5 + $0xb0] sm:$0xff] }
 0x110   : > { %2247 = vmatmul.mubr.msk.bf16.gmra.mrb[8].mxu1 %vm426_vm0, %v577_v38  ;;  %v562_v48 = vmax.f32 %v542_v42, 0.0  ;;  %v545_v49 = vadd.f32 %v2229_v47, %v2464_v44  ;;  %v536_v50 = vpop.f32.mrb[15].mxu0  ;;  %v766_v38 = vld [vmem:[%s2941_s5 + $0x90] sm:$0xff]  ;;  %v2129_v42 = vcombine.high %v759_v33, %v763_v34 }
 0x111   : > { %v560_v51 = vmax.f32 %v534_v46, 0.0  ;;  %v537_v52 = vadd.f32 %v2464_v44, %v536_v50  ;;  %1304 = vmatpush1.bf16.msra.mxu1 %v2148_v41  ;;  %v800_v44 = vld [vmem:[%s2941_s5 + $0x1a0] sm:$0xff]  ;;  %v2127_v41 = vcombine.high %v758_v29, %v762_v32  ;;  %v771_v46 = vld [vmem:[%s2941_s5 + $0xb8] sm:$0xff]  ;;  %v2134_v2 = vcombine.low %v766_v38, %v770_v43 }
 0x112   : > { %v563_v54 = vmax.f32 %v545_v49, 0.0  ;;  %1305 = vmatprep.subr.bf16.mxu1 %v2157_v45  ;;  %v2163_v60 = vcombine.high %v796_v58, %v800_v44  ;;  %v2162_v62 = vcombine.low %v796_v58, %v800_v44  ;;  %v767_v45 = vld [vmem:[%s2941_s5 + $0x98] sm:$0xff]  ;;  %v774_v44 = vld [vmem:[%s2941_s5 + $0xd0] sm:$0xff] }
 0x113   : > { %v561_v55 = vmax.f32 %v537_v52, 0.0  ;;  %v2126_v52 = vcombine.low %v758_v29, %v762_v32  ;;  %v2136_v3 = vcombine.low %v767_v45, %v771_v46  ;;  %v791_v29 = vld [vmem:[%s2941_s5 + $0x158] sm:$0xff] }
 0x114   : > { %v579_v56 = vpack.c.bf16 %v563_v54, %v562_v48  ;;  %1194 = vmatprep.subr.bf16.mxu0 %v2163_v60  ;;  %v778_v60 = vld [vmem:[%s2941_s5 + $0xf0] sm:$0xff] }
 0x115   : > { %v578_v57 = vpack.c.bf16 %v561_v55, %v560_v51  ;;  %1306 = vmatpush1.bf16.msra.mxu1 %v2156_v53  ;;  %1195 = vmatpush1.bf16.msra.mxu0 %v2162_v62  ;;  %v2128_v53 = vcombine.low %v759_v33, %v763_v34  ;;  %v779_v62 = vld [vmem:[%s2941_s5 + $0xf8] sm:$0xff] }
 0x116   : > { %1307 = vmatprep.subr.bf16.mxu1 %v2165_v0  ;;  %1196 = vmatprep.subr.bf16.mxu0 %v2171_v4 }
 0x117   : > { %2250 = vmatprep.mubr.msk.bf16.mxu1 %vm426_vm0, %v578_v57  ;;  %v2137_v57 = vcombine.high %v767_v45, %v771_v46  ;;  %v802_v46 = vld [vmem:[%s2941_s5 + $0x1b0] sm:$0xff] }
 0x118   : > { %2251 = vmatmul.mubr.msk.bf16.gmra.mrb[12].mxu1 %vm426_vm0, %v579_v56  ;;  %v2135_v56 = vcombine.high %v766_v38, %v770_v43 }
 0x119   : > { %1308 = vmatpush1.bf16.msra.mxu1 %v2164_v63  ;;  %1197 = vmatpush1.bf16.msra.mxu0 %v2170_v6  ;;  %v2143_v6 = vcombine.high %v774_v44, %v778_v60 }
 0x11a   : > { %1309 = vmatprep.subr.bf16.mxu1 %v2173_v8  ;;  %1327 = vmatprep.mubr.bf16.mxu1 %v2321_v9  ;;  %v782_v8 = vld [vmem:[%s2941_s5 + $0x110] sm:$0xff] }
 0x11b   : > { %1408 = vmatprep.subr.bf16.mxu0 %v2119_v14  ;;  %v787_v14 = vld [vmem:[%s2941_s5 + $0x138] sm:$0xff]  ;;  %v2150_v34 = vcombine.low %v782_v8, %v786_v12 }
 0x11d   : > { %1310 = vmatpush1.bf16.msra.mxu1 %v2172_v7  ;;  %v2145_v7 = vcombine.high %v775_v61, %v779_v62 }
 0x11e   : > { %1521 = vmatprep.subr.bf16.mxu1 %v2121_v17 }
 0x1d3   : > { %v2240_v20 = vpop.f32.mrb[0].mxu1 }
 0x1d4   : > { %v678_v18 = vadd.f32 %v2240_v20, %v2564_v19  ;;  %v669_v21 = vpop.f32.mrb[1].mxu1 }
 0x1d5   : > { %v670_v22 = vadd.f32 %v2564_v19, %v669_v21  ;;  %v2241_v23 = vpop.f32.mrb[2].mxu1  ;;  %v2142_v21 = vcombine.low %v774_v44, %v778_v60  ;;  %v806_v44 = vld [vmem:[%s2941_s5 + $0x1d0] sm:$0xff] }
 0x1d6   : > { %v681_v24 = vadd.f32 %v2241_v23, %v2564_v19  ;;  %v672_v25 = vpop.f32.mrb[3].mxu1  ;;  %v734_v27 = vmax.f32 %v678_v18, 0.0  ;;  %v810_v60 = vld [vmem:[%s2941_s5 + $0x1f0] sm:$0xff] }
 0x1d7   : > { %v673_v26 = vadd.f32 %v2564_v19, %v672_v25  ;;  %v732_v30 = vmax.f32 %v670_v22, 0.0  ;;  %v2144_v22 = vcombine.low %v775_v61, %v779_v62  ;;  %v811_v61 = vld [vmem:[%s2941_s5 + $0x1f8] sm:$0xff] }
 0x1d8   : > { %v735_v28 = vmax.f32 %v681_v24, 0.0  ;;  %v2151_v24 = vcombine.high %v782_v8, %v786_v12  ;;  %v2745_v8 = vld [vmem:[%s2942_s6] sm:$0xff] }
 0x1d9   : > { %v733_v31 = vmax.f32 %v673_v26, 0.0  ;;  %v790_v26 = vld [vmem:[%s2941_s5 + $0x150] sm:$0xff] }
 0x1da   : > { %v2582_v35 = vpack.c.bf16 %v735_v28, %v734_v27  ;;  %v794_v28 = vld [vmem:[%s2941_s5 + $0x170] sm:$0xff] }
 0x1db   : > { %v2584_v36 = vpack.c.bf16 %v733_v31, %v732_v30  ;;  %v2244_v37 = vpop.f32.mrb[4].mxu1  ;;  %v795_v30 = vld [vmem:[%s2941_s5 + $0x178] sm:$0xff] }
 0x1dc   : > { %v694_v39 = vadd.f32 %v2244_v37, %v2564_v19  ;;  %v685_v40 = vpop.f32.mrb[5].mxu1 }
 0x1dd   : > { %v686_v47 = vadd.f32 %v2564_v19, %v685_v40  ;;  %1215 = vmatmul.mubr.bf16.vlgmr.msra.gmra.mrb[16].mxu0 %v2584_v36  ;;  %1328 = vmatmul.mubr.bf16.vlgmr.msra.gmra.mrb[16].mxu1 %v2584_v36  ;;  %v2245_v48 = vpop.f32.mrb[6].mxu1  ;;  %v2159_v40 = vcombine.high %v790_v26, %v794_v28 }
 0x1de   : > { %v738_v49 = vmax.f32 %v694_v39, 0.0  ;;  %1409 = vmatpush1.bf16.msra.mxu0 %v2118_v13  ;;  %1522 = vmatpush1.bf16.msra.mxu1 %v2120_v16  ;;  %v697_v50 = vadd.f32 %v2245_v48, %v2564_v19  ;;  %v688_v51 = vpop.f32.mrb[7].mxu1  ;;  %v783_v13 = vld [vmem:[%s2941_s5 + $0x118] sm:$0xff] }
 0x1df   : > { %v736_v54 = vmax.f32 %v686_v47, 0.0  ;;  %v689_v55 = vadd.f32 %v2564_v19, %v688_v51  ;;  %1224 = vmatprep.mubr.bf16.mxu0 %v2321_v9  ;;  %1337 = vmatprep.mubr.bf16.mxu1 %v2321_v9  ;;  %v2153_v25 = vcombine.high %v783_v13, %v787_v14  ;;  %v2152_v37 = vcombine.low %v783_v13, %v787_v14  ;;  %v799_v47 = vld [vmem:[%s2941_s5 + $0x198] sm:$0xff] }
 0x1e0   : > { %v739_v58 = vmax.f32 %v697_v50, 0.0  ;;  %1410 = vmatprep.subr.bf16.mxu0 %v2127_v41  ;;  %1523 = vmatprep.subr.bf16.mxu1 %v2129_v42  ;;  %v2161_v41 = vcombine.high %v791_v29, %v795_v30  ;;  %v798_v42 = vld [vmem:[%s2941_s5 + $0x190] sm:$0xff]  ;;  %v803_v48 = vld [vmem:[%s2941_s5 + $0x1b8] sm:$0xff] }
 0x1e1   : > { %v737_v59 = vmax.f32 %v689_v55, 0.0  ;;  %v2160_v55 = vcombine.low %v791_v29, %v795_v30 }
 0x1e2   : > { %v2618_v63 = vpack.c.bf16 %v739_v58, %v738_v49  ;;  %1411 = vmatpush1.bf16.msra.mxu0 %v2126_v52  ;;  %1524 = vmatpush1.bf16.msra.mxu1 %v2128_v53  ;;  %v2169_v58 = vcombine.high %v799_v47, %v803_v48 }
 0x1e3   : > { %v2620_v0 = vpack.c.bf16 %v737_v59, %v736_v54  ;;  %v2248_v1 = vpop.f32.mrb[8].mxu1  ;;  %1412 = vmatprep.subr.bf16.mxu0 %v2135_v56  ;;  %1525 = vmatprep.subr.bf16.mxu1 %v2137_v57  ;;  %v2158_v54 = vcombine.low %v790_v26, %v794_v28  ;;  %v2167_v57 = vcombine.high %v798_v42, %v802_v46 }
 0x1e4   : > { %v710_v4 = vadd.f32 %v2248_v1, %v2564_v19  ;;  %v701_v5 = vpop.f32.mrb[9].mxu1 }
 0x1e5   : > { %1225 = vmatmul.mubr.bf16.gmra.mrb[20].mxu0 %v2582_v35  ;;  %1338 = vmatmul.mubr.bf16.gmra.mrb[20].mxu1 %v2582_v35  ;;  %v702_v10 = vadd.f32 %v2564_v19, %v701_v5  ;;  %v2249_v11 = vpop.f32.mrb[10].mxu1 }
 0x1e6   : > { %v742_v15 = vmax.f32 %v710_v4, 0.0  ;;  %1234 = vmatprep.mubr.bf16.mxu0 %v2321_v9  ;;  %1347 = vmatprep.mubr.bf16.mxu1 %v2321_v9  ;;  %v713_v16 = vadd.f32 %v2249_v11, %v2564_v19  ;;  %v704_v17 = vpop.f32.mrb[11].mxu1  ;;  %v2175_v4 = vcombine.high %v806_v44, %v810_v60 }
 0x1e7   : > { %v740_v20 = vmax.f32 %v702_v10, 0.0  ;;  %1413 = vmatpush1.bf16.msra.mxu0 %v2134_v2  ;;  %1526 = vmatpush1.bf16.msra.mxu1 %v2136_v3  ;;  %v705_v18 = vadd.f32 %v2564_v19, %v704_v17  ;;  %v2166_v2 = vcombine.low %v798_v42, %v802_v46  ;;  %v2168_v3 = vcombine.low %v799_v47, %v803_v48 }
 0x1e8   : > { %v743_v23 = vmax.f32 %v713_v16, 0.0  ;;  %1414 = vmatprep.subr.bf16.mxu0 %v2143_v6  ;;  %1527 = vmatprep.subr.bf16.mxu1 %v2145_v7  ;;  %v2174_v6 = vcombine.low %v806_v44, %v810_v60 }
 0x1e9   : > { %v741_v27 = vmax.f32 %v705_v18, 0.0 }
 0x1ea   : > { %v2654_v31 = vpack.c.bf16 %v743_v23, %v742_v15 }
 0x1eb   : > { %v2656_v32 = vpack.c.bf16 %v741_v27, %v740_v20  ;;  %1415 = vmatpush1.bf16.msra.mxu0 %v2142_v21  ;;  %1528 = vmatpush1.bf16.msra.mxu1 %v2144_v22  ;;  %v2252_v33 = vpop.f32.mrb[12].mxu1 }
 0x1ec   : > { %v726_v38 = vadd.f32 %v2252_v33, %v2564_v19  ;;  %1416 = vmatprep.subr.bf16.mxu0 %v2151_v24  ;;  %1529 = vmatprep.subr.bf16.mxu1 %v2153_v25  ;;  %v717_v39 = vpop.f32.mrb[13].mxu1 }
 0x1ed   : > { %1235 = vmatmul.mubr.bf16.gmra.mrb[24].mxu0 %v2620_v0  ;;  %1348 = vmatmul.mubr.bf16.gmra.mrb[24].mxu1 %v2620_v0  ;;  %v718_v43 = vadd.f32 %v2564_v19, %v717_v39  ;;  %v2253_v45 = vpop.f32.mrb[14].mxu1 }
 0x1ee   : > { %1244 = vmatprep.mubr.bf16.mxu0 %v2321_v9  ;;  %1357 = vmatprep.mubr.bf16.mxu1 %v2321_v9  ;;  %v746_v49 = vmax.f32 %v726_v38, 0.0  ;;  %v729_v50 = vadd.f32 %v2253_v45, %v2564_v19  ;;  %v720_v51 = vpop.f32.mrb[15].mxu1 }
 0x1ef   : > { %v744_v52 = vmax.f32 %v718_v43, 0.0  ;;  %1417 = vmatpush1.bf16.msra.mxu0 %v2150_v34  ;;  %1530 = vmatpush1.bf16.msra.mxu1 %v2152_v37  ;;  %v721_v53 = vadd.f32 %v2564_v19, %v720_v51  ;;  %v807_v19 = vld [vmem:[%s2941_s5 + $0x1d8] sm:$0xff] }
 0x1f0   : > { %v747_v56 = vmax.f32 %v729_v50, 0.0  ;;  %1418 = vmatprep.subr.bf16.mxu0 %v2159_v40  ;;  %1531 = vmatprep.subr.bf16.mxu1 %v2161_v41  ;;  %v2177_v5 = vcombine.high %v807_v19, %v811_v61  ;;  %v2176_v7 = vcombine.low %v807_v19, %v811_v61 }
 0x1f1   : > { %v745_v59 = vmax.f32 %v721_v53, 0.0 }
 0x1f2   : > { %v2690_v62 = vpack.c.bf16 %v747_v56, %v746_v49 }
 0x1f3   : > { %v818_v1 = vpack.c.bf16 %v745_v59, %v744_v52  ;;  %1419 = vmatpush1.bf16.msra.mxu0 %v2158_v54  ;;  %1532 = vmatpush1.bf16.msra.mxu1 %v2160_v55 }
 0x1f4   : > { %1420 = vmatprep.subr.bf16.mxu0 %v2167_v57  ;;  %1533 = vmatprep.subr.bf16.mxu1 %v2169_v58 }
 0x1f5   : > { %1245 = vmatmul.mubr.bf16.gmra.mrb[28].mxu0 %v2618_v63  ;;  %1358 = vmatmul.mubr.bf16.gmra.mrb[28].mxu1 %v2618_v63 }
 0x1f6   : > { %1254 = vmatprep.mubr.bf16.mxu0 %v2321_v9  ;;  %1367 = vmatprep.mubr.bf16.mxu1 %v2321_v9 }
 0x1f7   : > { %1421 = vmatpush1.bf16.msra.mxu0 %v2166_v2  ;;  %1534 = vmatpush1.bf16.msra.mxu1 %v2168_v3 }
 0x1f8   : > { %1422 = vmatprep.subr.bf16.mxu0 %v2175_v4  ;;  %1535 = vmatprep.subr.bf16.mxu1 %v2177_v5 }
 0x1fb   : > { %1423 = vmatpush1.bf16.msra.mxu0 %v2174_v6  ;;  %1536 = vmatpush1.bf16.msra.mxu1 %v2176_v7 }
 0x1fd   : > { %1255 = vmatmul.mubr.bf16.gmra.mrb[32].mxu0 %v2656_v32  ;;  %1368 = vmatmul.mubr.bf16.gmra.mrb[32].mxu1 %v2656_v32 }
 0x1fe   : > { %1264 = vmatprep.mubr.bf16.mxu0 %v2321_v9  ;;  %1377 = vmatprep.mubr.bf16.mxu1 %v2321_v9 }
 0x205   : > { %1265 = vmatmul.mubr.bf16.gmra.mrb[36].mxu0 %v2654_v31  ;;  %1378 = vmatmul.mubr.bf16.gmra.mrb[36].mxu1 %v2654_v31 }
 0x206   : > { %1274 = vmatprep.mubr.bf16.mxu0 %v2321_v9  ;;  %1387 = vmatprep.mubr.bf16.mxu1 %v2321_v9 }
 0x20d   : > { %1275 = vmatmul.mubr.bf16.gmra.mrb[40].mxu0 %v818_v1  ;;  %1388 = vmatmul.mubr.bf16.gmra.mrb[40].mxu1 %v818_v1 }
 0x20e   : > { %1284 = vmatprep.mubr.bf16.mxu0 %v2321_v9  ;;  %1397 = vmatprep.mubr.bf16.mxu1 %v2321_v9 }
 0x215   : > { %1285 = vmatmul.mubr.bf16.gmra.mrb[44].mxu0 %v2690_v62  ;;  %1398 = vmatmul.mubr.bf16.gmra.mrb[44].mxu1 %v2690_v62 }
 0x216   : > { %1440 = vmatprep.mubr.bf16.mxu0 %v2321_v9  ;;  %1553 = vmatprep.mubr.bf16.mxu1 %v2321_v9 }
 0x21d   : > { %1441 = vmatmul.mubr.bf16.vlgmr.msra.gmra.mrb[48].mxu0 %v2584_v36  ;;  %1554 = vmatmul.mubr.bf16.vlgmr.msra.gmra.mrb[48].mxu1 %v2584_v36 }
 0x21e   : > { %1450 = vmatprep.mubr.bf16.mxu0 %v2321_v9  ;;  %1563 = vmatprep.mubr.bf16.mxu1 %v2321_v9 }
 0x225   : > { %1451 = vmatmul.mubr.bf16.gmra.mrb[52].mxu0 %v2582_v35  ;;  %1564 = vmatmul.mubr.bf16.gmra.mrb[52].mxu1 %v2582_v35  ;;  %v822_v35 = vlaneseq }
 0x226   : > { %1460 = vmatprep.mubr.bf16.mxu0 %v2321_v9  ;;  %1573 = vmatprep.mubr.bf16.mxu1 %v2321_v9 }
 0x227   : > { %v2738_v36 = vshrl.u32 %v822_v35, 7 }
 0x229   : > { %v828_v10 = vsub.s32 1, %v2738_v36 }
 0x22b   : > { %v2756_v13 = vrot.slane %v2745_v8, %v828_v10 }
 0x22d   : > { %1461 = vmatmul.mubr.bf16.gmra.mrb[56].mxu0 %v2620_v0  ;;  %1574 = vmatmul.mubr.bf16.gmra.mrb[56].mxu1 %v2620_v0  ;;  %v832_v0 = vsub.s32 2, %v2738_v36 }
 0x22e   : > { %1470 = vmatprep.mubr.bf16.mxu0 %v2321_v9  ;;  %1583 = vmatprep.mubr.bf16.mxu1 %v2321_v9 }
 0x22f   : > { %v2753_v12 = vrot.slane %v2745_v8, %v832_v0 }
 0x235   : > { %1471 = vmatmul.mubr.bf16.gmra.mrb[60].mxu0 %v2618_v63  ;;  %1584 = vmatmul.mubr.bf16.gmra.mrb[60].mxu1 %v2618_v63  ;;  %v824_v63 = vsub.s32 0, %v2738_v36 }
 0x236   : > { %1480 = vmatprep.mubr.bf16.mxu0 %v2321_v9  ;;  %1593 = vmatprep.mubr.bf16.mxu1 %v2321_v9 }
 0x237   : > { %v2750_v11 = vrot.slane %v2745_v8, %v824_v63 }
 0x23d   : > { %1481 = vmatmul.mubr.bf16.gmra.mrb[64].mxu0 %v2656_v32  ;;  %1594 = vmatmul.mubr.bf16.gmra.mrb[64].mxu1 %v2656_v32 }
 0x23e   : > { %1490 = vmatprep.mubr.bf16.mxu0 %v2321_v9  ;;  %1603 = vmatprep.mubr.bf16.mxu1 %v2321_v9 }
 0x245   : > { %1491 = vmatmul.mubr.bf16.gmra.mrb[68].mxu0 %v2654_v31  ;;  %1604 = vmatmul.mubr.bf16.gmra.mrb[68].mxu1 %v2654_v31 }
 0x246   : > { %1500 = vmatprep.mubr.bf16.mxu0 %v2321_v9  ;;  %1613 = vmatprep.mubr.bf16.mxu1 %v2321_v9 }
 0x24d   : > { %1501 = vmatmul.mubr.bf16.gmra.mrb[72].mxu0 %v818_v1  ;;  %1614 = vmatmul.mubr.bf16.gmra.mrb[72].mxu1 %v818_v1 }
 0x24e   : > { %1510 = vmatprep.mubr.bf16.mxu0 %v2321_v9  ;;  %1623 = vmatprep.mubr.bf16.mxu1 %v2321_v9  ;;  %v836_v9 = vsub.s32 3, %v2738_v36 }
 0x250   : > { %v2759_v14 = vrot.slane %v2745_v8, %v836_v9 }
 0x255   : > { %1511 = vmatmul.mubr.bf16.gmra.mrb[76].mxu0 %v2690_v62  ;;  %1624 = vmatmul.mubr.bf16.gmra.mrb[76].mxu1 %v2690_v62 }
 0x2b0   : > { %v1216_v15 = vpop.f32.mrb[16].mxu0  ;;  %v1329_v16 = vpop.f32.mrb[16].mxu1 }
 0x2b1   : > { %v1217_v17 = vadd.f32 %v1216_v15, %v2750_v11  ;;  %v1330_v20 = vadd.f32 %v1329_v16, %v2753_v12  ;;  %v1218_v18 = vpop.f32.mrb[17].mxu0  ;;  %v1331_v21 = vpop.f32.mrb[17].mxu1 }
 0x2b2   : > { %v1219_v22 = vadd.f32 %v1218_v18, %v2756_v13  ;;  %v1332_v23 = vadd.f32 %v1331_v21, %v2759_v14  ;;  %v1220_v24 = vpop.f32.mrb[18].mxu0  ;;  %v1333_v25 = vpop.f32.mrb[18].mxu1 }
 0x2b3   : > { %v1221_v26 = vadd.f32 %v1220_v24, %v2750_v11  ;;  %v1334_v27 = vadd.f32 %v1333_v25, %v2753_v12  ;;  %v1222_v28 = vpop.f32.mrb[19].mxu0  ;;  %v1335_v29 = vpop.f32.mrb[19].mxu1  ;;  %v1634_v32 = vmax.f32 %v1217_v17, 0.0  ;;  %v1636_v33 = vmax.f32 %v1330_v20, 0.0 }
 0x2b4   : > { %v1223_v30 = vadd.f32 %v1222_v28, %v2756_v13  ;;  %v1336_v31 = vadd.f32 %v1335_v29, %v2759_v14  ;;  %v1635_v38 = vmax.f32 %v1219_v22, 0.0  ;;  %v1637_v39 = vmax.f32 %v1332_v23, 0.0 }
 0x2b5   : > { %v1642_v34 = vmax.f32 %v1221_v26, 0.0  ;;  %v1644_v37 = vmax.f32 %v1334_v27, 0.0 }
 0x2b6   : > { %v1643_v40 = vmax.f32 %v1223_v30, 0.0  ;;  %v1645_v41 = vmax.f32 %v1336_v31, 0.0 }
 0x2b7   : > { %v1763_v42 = vmax.f32 %v1634_v32, %v1642_v34  ;;  %v1805_v43 = vmax.f32 %v1636_v33, %v1644_v37 }
 0x2b8   : > { %v1784_v45 = vmax.f32 %v1635_v38, %v1643_v40  ;;  %v1826_v46 = vmax.f32 %v1637_v39, %v1645_v41  ;;  %v1226_v47 = vpop.f32.mrb[20].mxu0  ;;  %v1339_v48 = vpop.f32.mrb[20].mxu1 }
 0x2b9   : > { %v1227_v49 = vadd.f32 %v1226_v47, %v2750_v11  ;;  %v1340_v50 = vadd.f32 %v1339_v48, %v2753_v12  ;;  %v1228_v51 = vpop.f32.mrb[21].mxu0  ;;  %v1341_v52 = vpop.f32.mrb[21].mxu1 }
 0x2ba   : > { %v1229_v53 = vadd.f32 %v1228_v51, %v2756_v13  ;;  %v1342_v54 = vadd.f32 %v1341_v52, %v2759_v14  ;;  %v1230_v55 = vpop.f32.mrb[22].mxu0  ;;  %v1343_v56 = vpop.f32.mrb[22].mxu1 }
 0x2bb   : > { %v1650_v57 = vmax.f32 %v1227_v49, 0.0  ;;  %v1652_v58 = vmax.f32 %v1340_v50, 0.0  ;;  %v1231_v44 = vadd.f32 %v1230_v55, %v2750_v11  ;;  %v1344_v59 = vadd.f32 %v1343_v56, %v2753_v12  ;;  %v1232_v60 = vpop.f32.mrb[23].mxu0  ;;  %v1345_v19 = vpop.f32.mrb[23].mxu1 }
 0x2bc   : > { %v1651_v61 = vmax.f32 %v1229_v53, 0.0  ;;  %v1653_v62 = vmax.f32 %v1342_v54, 0.0  ;;  %v1233_v1 = vadd.f32 %v1232_v60, %v2756_v13  ;;  %v1346_v2 = vadd.f32 %v1345_v19, %v2759_v14 }
 0x2bd   : > { %v1764_v3 = vmax.f32 %v1763_v42, %v1650_v57  ;;  %v1806_v4 = vmax.f32 %v1805_v43, %v1652_v58  ;;  %v1658_v5 = vmax.f32 %v1231_v44, 0.0  ;;  %v1660_v6 = vmax.f32 %v1344_v59, 0.0 }
 0x2be   : > { %v1785_v7 = vmax.f32 %v1784_v45, %v1651_v61  ;;  %v1827_v35 = vmax.f32 %v1826_v46, %v1653_v62  ;;  %v1659_v63 = vmax.f32 %v1233_v1, 0.0  ;;  %v1661_v0 = vmax.f32 %v1346_v2, 0.0 }
 0x2bf   : > { %v1765_v10 = vmax.f32 %v1764_v3, %v1658_v5  ;;  %v1807_v9 = vmax.f32 %v1806_v4, %v1660_v6 }
 0x2c0   : > { %v1786_v15 = vmax.f32 %v1785_v7, %v1659_v63  ;;  %v1828_v16 = vmax.f32 %v1827_v35, %v1661_v0  ;;  %v1236_v17 = vpop.f32.mrb[24].mxu0  ;;  %v1349_v20 = vpop.f32.mrb[24].mxu1 }
 0x2c1   : > { %v1237_v18 = vadd.f32 %v1236_v17, %v2750_v11  ;;  %v1350_v21 = vadd.f32 %v1349_v20, %v2753_v12  ;;  %v1238_v22 = vpop.f32.mrb[25].mxu0  ;;  %v1351_v23 = vpop.f32.mrb[25].mxu1 }
 0x2c2   : > { %v1239_v24 = vadd.f32 %v1238_v22, %v2756_v13  ;;  %v1352_v25 = vadd.f32 %v1351_v23, %v2759_v14  ;;  %v1240_v26 = vpop.f32.mrb[26].mxu0  ;;  %v1353_v27 = vpop.f32.mrb[26].mxu1 }
 0x2c3   : > { %v1666_v28 = vmax.f32 %v1237_v18, 0.0  ;;  %v1668_v29 = vmax.f32 %v1350_v21, 0.0  ;;  %v1241_v30 = vadd.f32 %v1240_v26, %v2750_v11  ;;  %v1354_v31 = vadd.f32 %v1353_v27, %v2753_v12  ;;  %v1242_v32 = vpop.f32.mrb[27].mxu0  ;;  %v1355_v33 = vpop.f32.mrb[27].mxu1 }
 0x2c4   : > { %v1667_v34 = vmax.f32 %v1239_v24, 0.0  ;;  %v1669_v37 = vmax.f32 %v1352_v25, 0.0  ;;  %v1243_v38 = vadd.f32 %v1242_v32, %v2756_v13  ;;  %v1356_v39 = vadd.f32 %v1355_v33, %v2759_v14 }
 0x2c5   : > { %v1766_v40 = vmax.f32 %v1765_v10, %v1666_v28  ;;  %v1808_v41 = vmax.f32 %v1807_v9, %v1668_v29  ;;  %v1674_v42 = vmax.f32 %v1241_v30, 0.0  ;;  %v1676_v43 = vmax.f32 %v1354_v31, 0.0 }
 0x2c6   : > { %v1787_v45 = vmax.f32 %v1786_v15, %v1667_v34  ;;  %v1829_v46 = vmax.f32 %v1828_v16, %v1669_v37  ;;  %v1675_v47 = vmax.f32 %v1243_v38, 0.0  ;;  %v1677_v48 = vmax.f32 %v1356_v39, 0.0 }
 0x2c7   : > { %v1767_v49 = vmax.f32 %v1766_v40, %v1674_v42  ;;  %v1809_v50 = vmax.f32 %v1808_v41, %v1676_v43 }
 0x2c8   : > { %v1788_v51 = vmax.f32 %v1787_v45, %v1675_v47  ;;  %v1830_v52 = vmax.f32 %v1829_v46, %v1677_v48  ;;  %v1246_v53 = vpop.f32.mrb[28].mxu0  ;;  %v1359_v54 = vpop.f32.mrb[28].mxu1 }
 0x2c9   : > { %v1247_v55 = vadd.f32 %v1246_v53, %v2750_v11  ;;  %v1360_v56 = vadd.f32 %v1359_v54, %v2753_v12  ;;  %v1248_v57 = vpop.f32.mrb[29].mxu0  ;;  %v1361_v58 = vpop.f32.mrb[29].mxu1 }
 0x2ca   : > { %v1249_v44 = vadd.f32 %v1248_v57, %v2756_v13  ;;  %v1362_v59 = vadd.f32 %v1361_v58, %v2759_v14  ;;  %v1250_v60 = vpop.f32.mrb[30].mxu0  ;;  %v1363_v19 = vpop.f32.mrb[30].mxu1 }
 0x2cb   : > { %v1682_v61 = vmax.f32 %v1247_v55, 0.0  ;;  %v1684_v62 = vmax.f32 %v1360_v56, 0.0  ;;  %v1251_v1 = vadd.f32 %v1250_v60, %v2750_v11  ;;  %v1364_v2 = vadd.f32 %v1363_v19, %v2753_v12  ;;  %v1252_v3 = vpop.f32.mrb[31].mxu0  ;;  %v1365_v4 = vpop.f32.mrb[31].mxu1 }
 0x2cc   : > { %v1683_v5 = vmax.f32 %v1249_v44, 0.0  ;;  %v1685_v6 = vmax.f32 %v1362_v59, 0.0  ;;  %v1253_v7 = vadd.f32 %v1252_v3, %v2756_v13  ;;  %v1366_v35 = vadd.f32 %v1365_v4, %v2759_v14 }
 0x2cd   : > { %v1768_v63 = vmax.f32 %v1767_v49, %v1682_v61  ;;  %v1810_v0 = vmax.f32 %v1809_v50, %v1684_v62  ;;  %v1690_v10 = vmax.f32 %v1251_v1, 0.0  ;;  %v1692_v9 = vmax.f32 %v1364_v2, 0.0 }
 0x2ce   : > { %v1789_v15 = vmax.f32 %v1788_v51, %v1683_v5  ;;  %v1831_v16 = vmax.f32 %v1830_v52, %v1685_v6  ;;  %v1691_v17 = vmax.f32 %v1253_v7, 0.0  ;;  %v1693_v20 = vmax.f32 %v1366_v35, 0.0 }
 0x2cf   : > { %v1769_v18 = vmax.f32 %v1768_v63, %v1690_v10  ;;  %v1811_v21 = vmax.f32 %v1810_v0, %v1692_v9 }
 0x2d0   : > { %v1790_v22 = vmax.f32 %v1789_v15, %v1691_v17  ;;  %v1832_v23 = vmax.f32 %v1831_v16, %v1693_v20  ;;  %v1256_v24 = vpop.f32.mrb[32].mxu0  ;;  %v1369_v25 = vpop.f32.mrb[32].mxu1 }
 0x2d1   : > { %v1257_v26 = vadd.f32 %v1256_v24, %v2750_v11  ;;  %v1370_v27 = vadd.f32 %v1369_v25, %v2753_v12  ;;  %v1258_v28 = vpop.f32.mrb[33].mxu0  ;;  %v1371_v29 = vpop.f32.mrb[33].mxu1 }
 0x2d2   : > { %v1259_v30 = vadd.f32 %v1258_v28, %v2756_v13  ;;  %v1372_v31 = vadd.f32 %v1371_v29, %v2759_v14  ;;  %v1260_v32 = vpop.f32.mrb[34].mxu0  ;;  %v1373_v33 = vpop.f32.mrb[34].mxu1 }
 0x2d3   : > { %v1698_v34 = vmax.f32 %v1257_v26, 0.0  ;;  %v1700_v37 = vmax.f32 %v1370_v27, 0.0  ;;  %v1261_v38 = vadd.f32 %v1260_v32, %v2750_v11  ;;  %v1374_v39 = vadd.f32 %v1373_v33, %v2753_v12  ;;  %v1262_v40 = vpop.f32.mrb[35].mxu0  ;;  %v1375_v41 = vpop.f32.mrb[35].mxu1 }
 0x2d4   : > { %v1699_v42 = vmax.f32 %v1259_v30, 0.0  ;;  %v1701_v43 = vmax.f32 %v1372_v31, 0.0  ;;  %v1263_v45 = vadd.f32 %v1262_v40, %v2756_v13  ;;  %v1376_v46 = vadd.f32 %v1375_v41, %v2759_v14 }
 0x2d5   : > { %v1770_v47 = vmax.f32 %v1769_v18, %v1698_v34  ;;  %v1812_v48 = vmax.f32 %v1811_v21, %v1700_v37  ;;  %v1706_v49 = vmax.f32 %v1261_v38, 0.0  ;;  %v1708_v50 = vmax.f32 %v1374_v39, 0.0 }
 0x2d6   : > { %v1791_v51 = vmax.f32 %v1790_v22, %v1699_v42  ;;  %v1833_v52 = vmax.f32 %v1832_v23, %v1701_v43  ;;  %v1707_v53 = vmax.f32 %v1263_v45, 0.0  ;;  %v1709_v54 = vmax.f32 %v1376_v46, 0.0 }
 0x2d7   : > { %v1771_v55 = vmax.f32 %v1770_v47, %v1706_v49  ;;  %v1813_v56 = vmax.f32 %v1812_v48, %v1708_v50  ;;  %v840_v32 = vsub.s32 4, %v2738_v36  ;;  %v848_v39 = vsub.s32 6, %v2738_v36 }
 0x2d8   : > { %v1792_v57 = vmax.f32 %v1791_v51, %v1707_v53  ;;  %v1834_v58 = vmax.f32 %v1833_v52, %v1709_v54  ;;  %v1266_v44 = vpop.f32.mrb[36].mxu0  ;;  %v1379_v59 = vpop.f32.mrb[36].mxu1  ;;  %v844_v40 = vsub.s32 5, %v2738_v36  ;;  %v2322_v46 = vmov 1966171168  }
 0x2d9   : > { %v1267_v60 = vadd.f32 %v1266_v44, %v2750_v11  ;;  %v1380_v19 = vadd.f32 %v1379_v59, %v2753_v12  ;;  %v1268_v61 = vpop.f32.mrb[37].mxu0  ;;  %v1381_v62 = vpop.f32.mrb[37].mxu1  ;;  %v1944_v47 = vunpack.c.l.s4 %v2322_v46  ;;  %v852_v48 = vsub.s32 7, %v2738_v36 }
 0x2da   : > { %v1269_v1 = vadd.f32 %v1268_v61, %v2756_v13  ;;  %v1382_v2 = vadd.f32 %v1381_v62, %v2759_v14  ;;  %v1270_v3 = vpop.f32.mrb[38].mxu0  ;;  %v1383_v4 = vpop.f32.mrb[38].mxu1 }
 0x2db   : > { %v1714_v5 = vmax.f32 %v1267_v60, 0.0  ;;  %v1716_v6 = vmax.f32 %v1380_v19, 0.0  ;;  %v1271_v7 = vadd.f32 %v1270_v3, %v2750_v11  ;;  %v1384_v35 = vadd.f32 %v1383_v4, %v2753_v12  ;;  %v1272_v63 = vpop.f32.mrb[39].mxu0  ;;  %v1385_v0 = vpop.f32.mrb[39].mxu1 }
 0x2dc   : > { %v1715_v10 = vmax.f32 %v1269_v1, 0.0  ;;  %v1717_v9 = vmax.f32 %v1382_v2, 0.0  ;;  %v1273_v15 = vadd.f32 %v1272_v63, %v2756_v13  ;;  %v1386_v16 = vadd.f32 %v1385_v0, %v2759_v14 }
 0x2dd   : > { %v1772_v17 = vmax.f32 %v1771_v55, %v1714_v5  ;;  %v1814_v20 = vmax.f32 %v1813_v56, %v1716_v6  ;;  %v1722_v18 = vmax.f32 %v1271_v7, 0.0  ;;  %v1724_v21 = vmax.f32 %v1384_v35, 0.0 }
 0x2de   : > { %v1793_v22 = vmax.f32 %v1792_v57, %v1715_v10  ;;  %v1835_v23 = vmax.f32 %v1834_v58, %v1717_v9  ;;  %v1723_v24 = vmax.f32 %v1273_v15, 0.0  ;;  %v1725_v25 = vmax.f32 %v1386_v16, 0.0 }
 0x2df   : > { %v1773_v26 = vmax.f32 %v1772_v17, %v1722_v18  ;;  %v1815_v27 = vmax.f32 %v1814_v20, %v1724_v21  ;;  %v2822_v63 = vrot.slane %v2745_v8, %v840_v32  ;;  %v2827_v16 = vrot.slane %v2745_v8, %v848_v39 }
 0x2e0   : > { %v1794_v28 = vmax.f32 %v1793_v22, %v1723_v24  ;;  %v1836_v29 = vmax.f32 %v1835_v23, %v1725_v25  ;;  %v1276_v30 = vpop.f32.mrb[40].mxu0  ;;  %v1389_v31 = vpop.f32.mrb[40].mxu1  ;;  %v2830_v17 = vrot.slane %v2745_v8, %v844_v40  ;;  %v1945_v23 = vunpack.c.0.s8 %v1944_v47 }
 0x2e1   : > { %v1277_v33 = vadd.f32 %v1276_v30, %v2750_v11  ;;  %v1390_v34 = vadd.f32 %v1389_v31, %v2753_v12  ;;  %v1278_v37 = vpop.f32.mrb[41].mxu0  ;;  %v1391_v38 = vpop.f32.mrb[41].mxu1  ;;  %v2835_v24 = vrot.slane %v2745_v8, %v852_v48 }
 0x2e2   : > { %v1279_v41 = vadd.f32 %v1278_v37, %v2756_v13  ;;  %v1392_v42 = vadd.f32 %v1391_v38, %v2759_v14  ;;  %v1280_v43 = vpop.f32.mrb[42].mxu0  ;;  %v1393_v45 = vpop.f32.mrb[42].mxu1 }
 0x2e3   : > { %v1730_v49 = vmax.f32 %v1277_v33, 0.0  ;;  %v1732_v50 = vmax.f32 %v1390_v34, 0.0  ;;  %v1281_v51 = vadd.f32 %v1280_v43, %v2750_v11  ;;  %v1394_v52 = vadd.f32 %v1393_v45, %v2753_v12  ;;  %v1282_v53 = vpop.f32.mrb[43].mxu0  ;;  %v1395_v54 = vpop.f32.mrb[43].mxu1 }
 0x2e4   : > { %v1731_v55 = vmax.f32 %v1279_v41, 0.0  ;;  %v1733_v56 = vmax.f32 %v1392_v42, 0.0  ;;  %v1283_v57 = vadd.f32 %v1282_v53, %v2756_v13  ;;  %v1396_v58 = vadd.f32 %v1395_v54, %v2759_v14 }
 0x2e5   : > { %v1774_v44 = vmax.f32 %v1773_v26, %v1730_v49  ;;  %v1816_v59 = vmax.f32 %v1815_v27, %v1732_v50  ;;  %v1738_v60 = vmax.f32 %v1281_v51, 0.0  ;;  %v1740_v19 = vmax.f32 %v1394_v52, 0.0 }
 0x2e6   : > { %v1795_v61 = vmax.f32 %v1794_v28, %v1731_v55  ;;  %v1837_v62 = vmax.f32 %v1836_v29, %v1733_v56  ;;  %v1739_v1 = vmax.f32 %v1283_v57, 0.0  ;;  %v1741_v2 = vmax.f32 %v1396_v58, 0.0 }
 0x2e7   : > { %v1775_v3 = vmax.f32 %v1774_v44, %v1738_v60  ;;  %v1817_v4 = vmax.f32 %v1816_v59, %v1740_v19 }
 0x2e8   : > { %v1796_v5 = vmax.f32 %v1795_v61, %v1739_v1  ;;  %v1838_v6 = vmax.f32 %v1837_v62, %v1741_v2  ;;  %v1286_v7 = vpop.f32.mrb[44].mxu0  ;;  %v1399_v35 = vpop.f32.mrb[44].mxu1 }
 0x2e9   : > { %v1287_v0 = vadd.f32 %v1286_v7, %v2750_v11  ;;  %v1400_v10 = vadd.f32 %v1399_v35, %v2753_v12  ;;  %v1288_v9 = vpop.f32.mrb[45].mxu0  ;;  %v1401_v15 = vpop.f32.mrb[45].mxu1 }
 0x2ea   : > { %v1289_v20 = vadd.f32 %v1288_v9, %v2756_v13  ;;  %v1402_v18 = vadd.f32 %v1401_v15, %v2759_v14  ;;  %v1290_v21 = vpop.f32.mrb[46].mxu0  ;;  %v1403_v22 = vpop.f32.mrb[46].mxu1 }
 0x2eb   : > { %v1746_v25 = vmax.f32 %v1287_v0, 0.0  ;;  %v1748_v26 = vmax.f32 %v1400_v10, 0.0  ;;  %v1291_v27 = vadd.f32 %v1290_v21, %v2750_v11  ;;  %v1404_v28 = vadd.f32 %v1403_v22, %v2753_v12  ;;  %v1292_v29 = vpop.f32.mrb[47].mxu0  ;;  %v1405_v30 = vpop.f32.mrb[47].mxu1 }
 0x2ec   : > { %v1747_v31 = vmax.f32 %v1289_v20, 0.0  ;;  %v1749_v32 = vmax.f32 %v1402_v18, 0.0  ;;  %v1293_v33 = vadd.f32 %v1292_v29, %v2756_v13  ;;  %v1406_v34 = vadd.f32 %v1405_v30, %v2759_v14 }
 0x2ed   : > { %v1776_v37 = vmax.f32 %v1775_v3, %v1746_v25  ;;  %v1818_v38 = vmax.f32 %v1817_v4, %v1748_v26  ;;  %v1754_v39 = vmax.f32 %v1291_v27, 0.0  ;;  %v1756_v40 = vmax.f32 %v1404_v28, 0.0 }
 0x2ee   : > { %v1797_v8 = vmax.f32 %v1796_v5, %v1747_v31  ;;  %v1839_v41 = vmax.f32 %v1838_v6, %v1749_v32  ;;  %v1755_v42 = vmax.f32 %v1293_v33, 0.0  ;;  %v1757_v43 = vmax.f32 %v1406_v34, 0.0 }
 0x2ef   : > { %v1777_v45 = vmax.f32 %v1776_v37, %v1754_v39  ;;  %v1819_v11 = vmax.f32 %v1818_v38, %v1756_v40  ;;  %v2842_v12 = vsub.s32 %v1945_v23, %v2738_v36 }
 0x2f0   : > { %v1798_v46 = vmax.f32 %v1797_v8, %v1755_v42  ;;  %v1840_v47 = vmax.f32 %v1839_v41, %v1757_v43  ;;  %v1442_v48 = vpop.f32.mrb[48].mxu0  ;;  %v1555_v49 = vpop.f32.mrb[48].mxu1 }
 0x2f1   : > { %v1778_v13 = vrot.slane %v1777_v45, 4  ;;  %v1820_v50 = vrot.slane %v1819_v11, 4  ;;  %v1443_v14 = vadd.f32 %v1442_v48, %v2822_v63  ;;  %v1556_v51 = vadd.f32 %v1555_v49, %v2827_v16  ;;  %v1444_v52 = vpop.f32.mrb[49].mxu0  ;;  %v1557_v53 = vpop.f32.mrb[49].mxu1 }
 0x2f2   : > { %v1799_v54 = vrot.slane %v1798_v46, 4  ;;  %v1841_v55 = vrot.slane %v1840_v47, 4  ;;  %v1445_v56 = vadd.f32 %v1444_v52, %v2830_v17  ;;  %v1558_v57 = vadd.f32 %v1557_v53, %v2835_v24  ;;  %v1446_v58 = vpop.f32.mrb[50].mxu0  ;;  %v1559_v36 = vpop.f32.mrb[50].mxu1 }
 0x2f3   : > { %v1779_v44 = vmax.f32 %v1777_v45, %v1778_v13  ;;  %v1821_v59 = vmax.f32 %v1819_v11, %v1820_v50  ;;  %v1638_v60 = vmax.f32 %v1443_v14, 0.0  ;;  %v1640_v19 = vmax.f32 %v1556_v51, 0.0  ;;  %v1448_v61 = vpop.f32.mrb[51].mxu0  ;;  %v1561_v62 = vpop.f32.mrb[51].mxu1 }
 0x2f4   : > { %v1800_v1 = vmax.f32 %v1798_v46, %v1799_v54  ;;  %v1842_v2 = vmax.f32 %v1840_v47, %v1841_v55  ;;  %v1639_v3 = vmax.f32 %v1445_v56, 0.0  ;;  %v1641_v4 = vmax.f32 %v1558_v57, 0.0 }
 0x2f5   : > { %v1780_v5 = vrot.slane %v1779_v44, 2  ;;  %v1822_v6 = vrot.slane %v1821_v59, 2  ;;  %v1447_v7 = vadd.f32 %v1446_v58, %v2822_v63  ;;  %v1560_v35 = vadd.f32 %v1559_v36, %v2827_v16 }
 0x2f6   : > { %v1801_v0 = vrot.slane %v1800_v1, 2  ;;  %v1843_v10 = vrot.slane %v1842_v2, 2  ;;  %v1449_v9 = vadd.f32 %v1448_v61, %v2830_v17  ;;  %v1562_v15 = vadd.f32 %v1561_v62, %v2835_v24 }
 0x2f7   : > { %v1781_v20 = vmax.f32 %v1779_v44, %v1780_v5  ;;  %v1823_v18 = vmax.f32 %v1821_v59, %v1822_v6  ;;  %v1646_v21 = vmax.f32 %v1447_v7, 0.0  ;;  %v1648_v22 = vmax.f32 %v1560_v35, 0.0 }
 0x2f8   : > { %v1802_v23 = vmax.f32 %v1800_v1, %v1801_v0  ;;  %v1844_v25 = vmax.f32 %v1842_v2, %v1843_v10  ;;  %v1647_v26 = vmax.f32 %v1449_v9, 0.0  ;;  %v1649_v27 = vmax.f32 %v1562_v15, 0.0  ;;  %v1452_v28 = vpop.f32.mrb[52].mxu0  ;;  %v1565_v29 = vpop.f32.mrb[52].mxu1 }
 0x2f9   : > { %v1782_v30 = vrot.slane %v1781_v20, 1  ;;  %v1824_v31 = vrot.slane %v1823_v18, 1  ;;  %v1847_v32 = vmax.f32 %v1638_v60, %v1646_v21  ;;  %v1889_v33 = vmax.f32 %v1640_v19, %v1648_v22  ;;  %v1454_v34 = vpop.f32.mrb[53].mxu0  ;;  %v1567_v37 = vpop.f32.mrb[53].mxu1 }
 0x2fa   : > { %v1803_v38 = vrot.slane %v1802_v23, 1  ;;  %v1845_v39 = vrot.slane %v1844_v25, 1  ;;  %v1868_v40 = vmax.f32 %v1639_v3, %v1647_v26  ;;  %v1910_v8 = vmax.f32 %v1641_v4, %v1649_v27  ;;  %v1456_v41 = vpop.f32.mrb[54].mxu0  ;;  %v1569_v42 = vpop.f32.mrb[54].mxu1 }
 0x2fb   : > { %v1783_v43 = vmax.f32 %v1781_v20, %v1782_v30  ;;  %v1825_v45 = vmax.f32 %v1823_v18, %v1824_v31  ;;  %v1453_v11 = vadd.f32 %v1452_v28, %v2822_v63  ;;  %v1566_v46 = vadd.f32 %v1565_v29, %v2827_v16  ;;  %v1458_v47 = vpop.f32.mrb[55].mxu0  ;;  %v1571_v48 = vpop.f32.mrb[55].mxu1 }
 0x2fc   : > { %v1804_v49 = vmax.f32 %v1802_v23, %v1803_v38  ;;  %v1846_v13 = vmax.f32 %v1844_v25, %v1845_v39  ;;  %v1455_v50 = vadd.f32 %v1454_v34, %v2830_v17  ;;  %v1568_v14 = vadd.f32 %v1567_v37, %v2835_v24 }
 0x2fd   : > { %v1654_v51 = vmax.f32 %v1453_v11, 0.0  ;;  %v1656_v52 = vmax.f32 %v1566_v46, 0.0  ;;  %v1457_v53 = vadd.f32 %v1456_v41, %v2822_v63  ;;  %v1570_v54 = vadd.f32 %v1569_v42, %v2827_v16 }
 0x2fe   : > { %v1939_v55 = vcombine.low %v1783_v43, %v1804_v49  ;;  %v1940_v56 = vcombine.low %v1825_v45, %v1846_v13  ;;  %v1655_v57 = vmax.f32 %v1455_v50, 0.0  ;;  %v1657_v58 = vmax.f32 %v1568_v14, 0.0 }
 0x2ff   : > { %v1848_v36 = vmax.f32 %v1847_v32, %v1654_v51  ;;  %v1890_v44 = vmax.f32 %v1889_v33, %v1656_v52  ;;  %v1662_v59 = vmax.f32 %v1457_v53, 0.0  ;;  %v1664_v60 = vmax.f32 %v1570_v54, 0.0 }
 0x300   : > { %v2859_v19 = vrot.slane %v1939_v55, %v2842_v12  ;;  %v2862_v61 = vrot.slane %v1940_v56, %v2842_v12  ;;  %v1869_v62 = vmax.f32 %v1868_v40, %v1655_v57  ;;  %v1911_v1 = vmax.f32 %v1910_v8, %v1657_v58  ;;  %v1462_v2 = vpop.f32.mrb[56].mxu0  ;;  %v1575_v3 = vpop.f32.mrb[56].mxu1 }
 0x301   : > { %v1849_v4 = vmax.f32 %v1848_v36, %v1662_v59  ;;  %v1891_v5 = vmax.f32 %v1890_v44, %v1664_v60  ;;  %v1459_v6 = vadd.f32 %v1458_v47, %v2830_v17  ;;  %v1572_v7 = vadd.f32 %v1571_v48, %v2835_v24  ;;  %v1464_v35 = vpop.f32.mrb[57].mxu0  ;;  %v1577_v0 = vpop.f32.mrb[57].mxu1 }
 0x302   : > { %v1971_v10 = vcombine.low %v2859_v19, %v2862_v61  ;;  %v1463_v9 = vadd.f32 %v1462_v2, %v2822_v63  ;;  %v1576_v15 = vadd.f32 %v1575_v3, %v2827_v16  ;;  %v1465_v20 = vadd.f32 %v1464_v35, %v2830_v17  ;;  %v1466_v18 = vpop.f32.mrb[58].mxu0  ;;  %v1579_v21 = vpop.f32.mrb[58].mxu1 }
 0x303   : > { %v1663_v22 = vmax.f32 %v1459_v6, 0.0  ;;  %v1665_v23 = vmax.f32 %v1572_v7, 0.0  ;;  %v1578_v25 = vadd.f32 %v1577_v0, %v2835_v24  ;;  %v1467_v26 = vadd.f32 %v1466_v18, %v2822_v63  ;;  %v1468_v27 = vpop.f32.mrb[59].mxu0  ;;  %v1581_v28 = vpop.f32.mrb[59].mxu1 }
 0x304   : > { %v1670_v29 = vmax.f32 %v1463_v9, 0.0  ;;  %v1672_v30 = vmax.f32 %v1576_v15, 0.0  ;;  %v1671_v31 = vmax.f32 %v1465_v20, 0.0  ;;  %v1580_v40 = vadd.f32 %v1579_v21, %v2827_v16 }
 0x305   : > { %v1870_v32 = vmax.f32 %v1869_v62, %v1663_v22  ;;  %v1912_v33 = vmax.f32 %v1911_v1, %v1665_v23  ;;  %v1673_v34 = vmax.f32 %v1578_v25, 0.0  ;;  %v1678_v37 = vmax.f32 %v1467_v26, 0.0 }
 0x306   : > { %v1850_v38 = vmax.f32 %v1849_v4, %v1670_v29  ;;  %v1892_v39 = vmax.f32 %v1891_v5, %v1672_v30  ;;  %v1469_v8 = vadd.f32 %v1468_v27, %v2830_v17  ;;  %v1582_v43 = vadd.f32 %v1581_v28, %v2835_v24 }
 0x307   : > { %v1871_v41 = vmax.f32 %v1870_v32, %v1671_v31  ;;  %v1913_v42 = vmax.f32 %v1912_v33, %v1673_v34  ;;  %v1680_v11 = vmax.f32 %v1580_v40, 0.0 }
 0x308   : > { %v1851_v45 = vmax.f32 %v1850_v38, %v1678_v37  ;;  %v1679_v46 = vmax.f32 %v1469_v8, 0.0  ;;  %v1472_v47 = vpop.f32.mrb[60].mxu0  ;;  %v1585_v48 = vpop.f32.mrb[60].mxu1  ;;  %v1681_v49 = vmax.f32 %v1582_v43, 0.0 }
 0x309   : > { %v1473_v13 = vadd.f32 %v1472_v47, %v2822_v63  ;;  %v1586_v50 = vadd.f32 %v1585_v48, %v2827_v16  ;;  %v1474_v14 = vpop.f32.mrb[61].mxu0  ;;  %v1587_v51 = vpop.f32.mrb[61].mxu1  ;;  %v1893_v52 = vmax.f32 %v1892_v39, %v1680_v11 }
 0x30a   : > { %v1872_v53 = vmax.f32 %v1871_v41, %v1679_v46  ;;  %v1475_v54 = vadd.f32 %v1474_v14, %v2830_v17  ;;  %v1588_v55 = vadd.f32 %v1587_v51, %v2835_v24  ;;  %v1476_v56 = vpop.f32.mrb[62].mxu0  ;;  %v1589_v57 = vpop.f32.mrb[62].mxu1  ;;  %v1914_v58 = vmax.f32 %v1913_v42, %v1681_v49 }
 0x30b   : > { %v1686_v36 = vmax.f32 %v1473_v13, 0.0  ;;  %v1688_v44 = vmax.f32 %v1586_v50, 0.0  ;;  %v1477_v59 = vadd.f32 %v1476_v56, %v2822_v63  ;;  %v1478_v60 = vpop.f32.mrb[63].mxu0  ;;  %v1591_v62 = vpop.f32.mrb[63].mxu1  ;;  %v1590_v3 = vadd.f32 %v1589_v57, %v2827_v16 }
 0x30c   : > { %v1687_v1 = vmax.f32 %v1475_v54, 0.0  ;;  %v1689_v2 = vmax.f32 %v1588_v55, 0.0  ;;  %v1479_v4 = vadd.f32 %v1478_v60, %v2830_v17  ;;  %v1592_v35 = vadd.f32 %v1591_v62, %v2835_v24 }
 0x30d   : > { %v1852_v5 = vmax.f32 %v1851_v45, %v1686_v36  ;;  %v1894_v6 = vmax.f32 %v1893_v52, %v1688_v44  ;;  %v1694_v7 = vmax.f32 %v1477_v59, 0.0  ;;  %v1696_v15 = vmax.f32 %v1590_v3, 0.0 }
 0x30e   : > { %v1873_v0 = vmax.f32 %v1872_v53, %v1687_v1  ;;  %v1915_v9 = vmax.f32 %v1914_v58, %v1689_v2  ;;  %v1695_v20 = vmax.f32 %v1479_v4, 0.0  ;;  %v1697_v21 = vmax.f32 %v1592_v35, 0.0 }
 0x30f   : > { %v1853_v18 = vmax.f32 %v1852_v5, %v1694_v7  ;;  %v1895_v22 = vmax.f32 %v1894_v6, %v1696_v15 }
 0x310   : > { %v1874_v23 = vmax.f32 %v1873_v0, %v1695_v20  ;;  %v1482_v25 = vpop.f32.mrb[64].mxu0  ;;  %v1595_v26 = vpop.f32.mrb[64].mxu1  ;;  %v1916_v27 = vmax.f32 %v1915_v9, %v1697_v21 }
 0x311   : > { %v1483_v28 = vadd.f32 %v1482_v25, %v2822_v63  ;;  %v1596_v29 = vadd.f32 %v1595_v26, %v2827_v16  ;;  %v1484_v30 = vpop.f32.mrb[65].mxu0  ;;  %v1597_v31 = vpop.f32.mrb[65].mxu1 }
 0x312   : > { %v1485_v32 = vadd.f32 %v1484_v30, %v2830_v17  ;;  %v1598_v33 = vadd.f32 %v1597_v31, %v2835_v24  ;;  %v1486_v34 = vpop.f32.mrb[66].mxu0  ;;  %v1599_v37 = vpop.f32.mrb[66].mxu1 }
 0x313   : > { %v1702_v38 = vmax.f32 %v1483_v28, 0.0  ;;  %v1704_v39 = vmax.f32 %v1596_v29, 0.0  ;;  %v1487_v40 = vadd.f32 %v1486_v34, %v2822_v63  ;;  %v1600_v8 = vadd.f32 %v1599_v37, %v2827_v16  ;;  %v1488_v41 = vpop.f32.mrb[67].mxu0  ;;  %v1601_v42 = vpop.f32.mrb[67].mxu1 }
 0x314   : > { %v1703_v43 = vmax.f32 %v1485_v32, 0.0  ;;  %v1705_v45 = vmax.f32 %v1598_v33, 0.0  ;;  %v1489_v11 = vadd.f32 %v1488_v41, %v2830_v17  ;;  %v1602_v46 = vadd.f32 %v1601_v42, %v2835_v24 }
 0x315   : > { %v1854_v47 = vmax.f32 %v1853_v18, %v1702_v38  ;;  %v1896_v48 = vmax.f32 %v1895_v22, %v1704_v39  ;;  %v1710_v49 = vmax.f32 %v1487_v40, 0.0  ;;  %v1712_v13 = vmax.f32 %v1600_v8, 0.0 }
 0x316   : > { %v1875_v50 = vmax.f32 %v1874_v23, %v1703_v43  ;;  %v1917_v14 = vmax.f32 %v1916_v27, %v1705_v45  ;;  %v1711_v51 = vmax.f32 %v1489_v11, 0.0  ;;  %v1713_v52 = vmax.f32 %v1602_v46, 0.0 }
 0x317   : > { %v1855_v53 = vmax.f32 %v1854_v47, %v1710_v49  ;;  %v1897_v54 = vmax.f32 %v1896_v48, %v1712_v13 }
 0x318   : > { %v1876_v55 = vmax.f32 %v1875_v50, %v1711_v51  ;;  %v1918_v56 = vmax.f32 %v1917_v14, %v1713_v52  ;;  %v1492_v57 = vpop.f32.mrb[68].mxu0  ;;  %v1605_v58 = vpop.f32.mrb[68].mxu1 }
 0x319   : > { %v1493_v36 = vadd.f32 %v1492_v57, %v2822_v63  ;;  %v1606_v44 = vadd.f32 %v1605_v58, %v2827_v16  ;;  %v1494_v59 = vpop.f32.mrb[69].mxu0  ;;  %v1607_v60 = vpop.f32.mrb[69].mxu1 }
 0x31a   : > { %v1495_v62 = vadd.f32 %v1494_v59, %v2830_v17  ;;  %v1608_v1 = vadd.f32 %v1607_v60, %v2835_v24  ;;  %v1496_v2 = vpop.f32.mrb[70].mxu0  ;;  %v1609_v3 = vpop.f32.mrb[70].mxu1 }
 0x31b   : > { %v1718_v4 = vmax.f32 %v1493_v36, 0.0  ;;  %v1720_v5 = vmax.f32 %v1606_v44, 0.0  ;;  %v1497_v6 = vadd.f32 %v1496_v2, %v2822_v63  ;;  %v1610_v7 = vadd.f32 %v1609_v3, %v2827_v16  ;;  %v1498_v35 = vpop.f32.mrb[71].mxu0  ;;  %v1611_v0 = vpop.f32.mrb[71].mxu1 }
 0x31c   : > { %v1719_v9 = vmax.f32 %v1495_v62, 0.0  ;;  %v1721_v15 = vmax.f32 %v1608_v1, 0.0  ;;  %v1499_v20 = vadd.f32 %v1498_v35, %v2830_v17  ;;  %v1612_v18 = vadd.f32 %v1611_v0, %v2835_v24 }
 0x31d   : > { %v1856_v21 = vmax.f32 %v1855_v53, %v1718_v4  ;;  %v1898_v22 = vmax.f32 %v1897_v54, %v1720_v5  ;;  %v1726_v23 = vmax.f32 %v1497_v6, 0.0  ;;  %v1728_v25 = vmax.f32 %v1610_v7, 0.0 }
 0x31e   : > { %v1877_v26 = vmax.f32 %v1876_v55, %v1719_v9  ;;  %v1919_v27 = vmax.f32 %v1918_v56, %v1721_v15  ;;  %v1727_v28 = vmax.f32 %v1499_v20, 0.0  ;;  %v1729_v29 = vmax.f32 %v1612_v18, 0.0 }
 0x31f   : > { %v1857_v30 = vmax.f32 %v1856_v21, %v1726_v23  ;;  %v1899_v31 = vmax.f32 %v1898_v22, %v1728_v25 }
 0x320   : > { %v1878_v32 = vmax.f32 %v1877_v26, %v1727_v28  ;;  %v1920_v33 = vmax.f32 %v1919_v27, %v1729_v29  ;;  %v1502_v34 = vpop.f32.mrb[72].mxu0  ;;  %v1615_v37 = vpop.f32.mrb[72].mxu1 }
 0x321   : > { %v1503_v38 = vadd.f32 %v1502_v34, %v2822_v63  ;;  %v1616_v39 = vadd.f32 %v1615_v37, %v2827_v16  ;;  %v1504_v40 = vpop.f32.mrb[73].mxu0  ;;  %v1617_v8 = vpop.f32.mrb[73].mxu1 }
 0x322   : > { %v1505_v41 = vadd.f32 %v1504_v40, %v2830_v17  ;;  %v1618_v42 = vadd.f32 %v1617_v8, %v2835_v24  ;;  %v1506_v43 = vpop.f32.mrb[74].mxu0  ;;  %v1619_v45 = vpop.f32.mrb[74].mxu1 }
 0x323   : > { %v1734_v11 = vmax.f32 %v1503_v38, 0.0  ;;  %v1736_v46 = vmax.f32 %v1616_v39, 0.0  ;;  %v1507_v47 = vadd.f32 %v1506_v43, %v2822_v63  ;;  %v1620_v48 = vadd.f32 %v1619_v45, %v2827_v16  ;;  %v1508_v49 = vpop.f32.mrb[75].mxu0  ;;  %v1621_v13 = vpop.f32.mrb[75].mxu1 }
 0x324   : > { %v1735_v50 = vmax.f32 %v1505_v41, 0.0  ;;  %v1737_v14 = vmax.f32 %v1618_v42, 0.0  ;;  %v1509_v51 = vadd.f32 %v1508_v49, %v2830_v17  ;;  %v1622_v52 = vadd.f32 %v1621_v13, %v2835_v24 }
 0x325   : > { %v1858_v53 = vmax.f32 %v1857_v30, %v1734_v11  ;;  %v1900_v54 = vmax.f32 %v1899_v31, %v1736_v46  ;;  %v1742_v55 = vmax.f32 %v1507_v47, 0.0  ;;  %v1744_v56 = vmax.f32 %v1620_v48, 0.0 }
 0x326   : > { %v1879_v57 = vmax.f32 %v1878_v32, %v1735_v50  ;;  %v1921_v58 = vmax.f32 %v1920_v33, %v1737_v14  ;;  %v1743_v36 = vmax.f32 %v1509_v51, 0.0  ;;  %v1745_v44 = vmax.f32 %v1622_v52, 0.0 }
 0x327   : > { %v1859_v59 = vmax.f32 %v1858_v53, %v1742_v55  ;;  %v1901_v60 = vmax.f32 %v1900_v54, %v1744_v56 }
 0x328   : > { %v1880_v62 = vmax.f32 %v1879_v57, %v1743_v36  ;;  %v1922_v1 = vmax.f32 %v1921_v58, %v1745_v44  ;;  %v1512_v2 = vpop.f32.mrb[76].mxu0  ;;  %v1625_v3 = vpop.f32.mrb[76].mxu1 }
 0x329   : > { %v1513_v4 = vadd.f32 %v1512_v2, %v2822_v63  ;;  %v1626_v5 = vadd.f32 %v1625_v3, %v2827_v16  ;;  %v1514_v6 = vpop.f32.mrb[77].mxu0  ;;  %v1627_v7 = vpop.f32.mrb[77].mxu1  ;;  %v1979_v3 = vrot.slane %v1971_v10, %v2842_v12 }
 0x32a   : > { %v1515_v35 = vadd.f32 %v1514_v6, %v2830_v17  ;;  %v1628_v0 = vadd.f32 %v1627_v7, %v2835_v24  ;;  %v1516_v9 = vpop.f32.mrb[78].mxu0  ;;  %v1629_v15 = vpop.f32.mrb[78].mxu1 }
 0x32b   : > { %v1750_v20 = vmax.f32 %v1513_v4, 0.0  ;;  %v1752_v18 = vmax.f32 %v1626_v5, 0.0  ;;  %v1517_v21 = vadd.f32 %v1516_v9, %v2822_v63  ;;  %v1630_v22 = vadd.f32 %v1629_v15, %v2827_v16  ;;  %v1518_v23 = vpop.f32.mrb[79].mxu0  ;;  %v1631_v25 = vpop.f32.mrb[79].mxu1 }
 0x32c   : > { %v1751_v26 = vmax.f32 %v1515_v35, 0.0  ;;  %v1753_v27 = vmax.f32 %v1628_v0, 0.0  ;;  %v1519_v28 = vadd.f32 %v1518_v23, %v2830_v17  ;;  %v1632_v29 = vadd.f32 %v1631_v25, %v2835_v24 }
 0x32d   : > { %v1860_v30 = vmax.f32 %v1859_v59, %v1750_v20  ;;  %v1902_v31 = vmax.f32 %v1901_v60, %v1752_v18  ;;  %v1758_v32 = vmax.f32 %v1517_v21, 0.0  ;;  %v1760_v33 = vmax.f32 %v1630_v22, 0.0 }
 0x32e   : > { %v1881_v34 = vmax.f32 %v1880_v62, %v1751_v26  ;;  %v1923_v37 = vmax.f32 %v1922_v1, %v1753_v27  ;;  %v1759_v38 = vmax.f32 %v1519_v28, 0.0  ;;  %v1761_v39 = vmax.f32 %v1632_v29, 0.0 }
 0x32f   : > { %v1861_v40 = vmax.f32 %v1860_v30, %v1758_v32  ;;  %v1903_v63 = vmax.f32 %v1902_v31, %v1760_v33 }
 0x330   : > { %v1882_v8 = vmax.f32 %v1881_v34, %v1759_v38  ;;  %v1924_v16 = vmax.f32 %v1923_v37, %v1761_v39 }
 0x331   : > { %v1862_v41 = vrot.slane %v1861_v40, 4  ;;  %v1904_v42 = vrot.slane %v1903_v63, 4 }
 0x332   : > { %v1883_v43 = vrot.slane %v1882_v8, 4  ;;  %v1925_v45 = vrot.slane %v1924_v16, 4 }
 0x333   : > { %v1863_v11 = vmax.f32 %v1861_v40, %v1862_v41  ;;  %v1905_v17 = vmax.f32 %v1903_v63, %v1904_v42 }
 0x334   : > { %v1884_v46 = vmax.f32 %v1882_v8, %v1883_v43  ;;  %v1926_v24 = vmax.f32 %v1924_v16, %v1925_v45 }
 0x335   : > { %v1864_v47 = vrot.slane %v1863_v11, 2  ;;  %v1906_v48 = vrot.slane %v1905_v17, 2 }
 0x336   : > { %v1885_v49 = vrot.slane %v1884_v46, 2  ;;  %v1927_v13 = vrot.slane %v1926_v24, 2 }
 0x337   : > { %v1865_v50 = vmax.f32 %v1863_v11, %v1864_v47  ;;  %v1907_v14 = vmax.f32 %v1905_v17, %v1906_v48 }
 0x338   : > { %v1886_v51 = vmax.f32 %v1884_v46, %v1885_v49  ;;  %v1928_v52 = vmax.f32 %v1926_v24, %v1927_v13 }
 0x339   : > { %v1866_v53 = vrot.slane %v1865_v50, 1  ;;  %v1908_v54 = vrot.slane %v1907_v14, 1 }
 0x33a   : > { %v1887_v55 = vrot.slane %v1886_v51, 1  ;;  %v1929_v56 = vrot.slane %v1928_v52, 1 }
 0x33b   : > { %v1867_v57 = vmax.f32 %v1865_v50, %v1866_v53  ;;  %v1909_v58 = vmax.f32 %v1907_v14, %v1908_v54 }
 0x33c   : > { %v1888_v36 = vmax.f32 %v1886_v51, %v1887_v55  ;;  %v1930_v44 = vmax.f32 %v1928_v52, %v1929_v56 }
 0x33e   : > { %v1941_v59 = vcombine.low %v1867_v57, %v1888_v36  ;;  %v1942_v60 = vcombine.low %v1909_v58, %v1930_v44 }
 0x340   : > { %v1963_v62 = vrot.slane %v1941_v59, %v2842_v12  ;;  %v1970_v1 = vrot.slane %v1942_v60, %v2842_v12 }
 0x342   : > { %v1972_v2 = vcombine.low %v1963_v62, %v1970_v1 }
 0x344   : > { %v1986_v4 = vrot.slane %v1972_v2, %v2842_v12 }
 0x346   : > { %v1987_v5 = vcombine.low %v1979_v3, %v1986_v4 }
 0x348   : > { %1990 = vst [vmem:[%s324_s29] sm:$0xff] %v1987_v5 }
 0x349 PF: > { %s17_s26 = sadd.s32 1, %s2319_s26   ;;  %s2944_s24 = smov %s2315_s25 }
 0x34a   : > { %p14_p5 = scmp.ge.s32.totalorder %s17_s26, 4   ;;  %s2945_s25 = smov %s2947_s27 }
 0x34c   :  { %16 = sbr.rel (!%p14_p5) target bundleno = 2 (0x2), region = 85 }

// kernel: pointnet_part_seg_forward.7
= control target key start
LH: loop header
LB: loop body
LE: loop exit
PB: predicated region body
PF: predicated region fallthrough
CT: control target
= control target key end

     0   :  { %s2727_s30 = smov 0   ;;  %s2729_s10 = smov 0   ;;  %s3305_s0 = inlined_call_operand.vmem [shape: bf16[2,128,64], index: 0, kind: input, shape index: {}]   ;;  %s3306_s1 = inlined_call_operand.vmem [shape: bf16[2,64,512], index: 1, kind: input, shape index: {}]   ;;  %s3307_s2 = inlined_call_operand.vmem [shape: f32[2,1,512], index: 2, kind: input, shape index: {}]   ;;  %s3308_s3 = inlined_call_operand.vmem [shape: bf16[512,256], index: 3, kind: input, shape index: {}]   ;;  %s3309_s4 = inlined_call_operand.vmem [shape: f32[1,256], index: 4, kind: input, shape index: {}]   ;;  %s3310_s5 = inlined_call_operand.vmem [shape: bf16[256,128], index: 5, kind: input, shape index: {}]   ;;  %s3311_s6 = inlined_call_operand.vmem [shape: f32[1,128], index: 6, kind: input, shape index: {}]   ;;  %s3312_s7 = inlined_call_operand.vmem [shape: bf16[128,128], index: 7, kind: input, shape index: {}]   ;;  %s3313_s8 = inlined_call_operand.vmem [shape: f32[1,128], index: 8, kind: input, shape index: {}]   ;;  %s3314_s9 = inlined_call_operand.vmem [shape: f32[2,128,128], index: 9, kind: output, shape index: {}]  }
   0x1   :  { %s2731_s11 = smov 0  }
   0x2 LB: > { %s31_s12 = sadd.s32 1, %s2670_s10  ;;  %p2156_p0 = scmp.ge.s32.totalorder %s2674_s11, 1  ;;  %s2674_s11 = sphi %s2731_s11, %s19_s11   ;;  %s2670_s10 = sphi %s2729_s10, %s3316_s10   ;;  %s2666_s30 = sphi %s2727_s30, %s3315_s30  }
   0x3   : > { %p33_p1 = scmp.ge.s32.totalorder %s31_s12, 2  ;;  %p327_p2 = scmp.lt.s32.totalorder %s2674_s11, 3 }
   0x5   : > { %s3318_s12 = smov (%p33_p1, %s31_s12), 0  ;;  %p328_p3 = pnand %p2156_p0, %p327_p2 }
   0x6   : > { %p381_p4 = scmp.lt.s32.totalorder (!%p328_p3), %s2666_s30, 1  ;;  %v444_v0 = vlaneseq (!%p328_p3)  ;;  %v2676_v1 = vmov (!%p328_p3), 0   ;;  %v2534_v14 = vld [vmem:[%s3308_s3 + $0x4] ss:$8 sps:$4 sm:$0xff] (!%p328_p3)   ;;  %vm584_vm0 = vcmask (!%p328_p3), 523264  }
   0x7   : > { %331 = sbr.rel (%p328_p3) target bundleno = 1039 (0x40f), region = 56  ;;  %641 = vmatprep.mubr.bf16.mxu0 (!%p328_p3), %v2676_v1  ;;  %754 = vmatprep.mubr.bf16.mxu1 (!%p328_p3), %v2676_v1  ;;  %v2532_v21 = vld [vmem:[%s3308_s3] ss:$8 sps:$4 sm:$0xff] (!%p328_p3)   ;;  %v2537_v22 = vld [vmem:[%s3308_s3 + $0x14] ss:$8 sps:$4 sm:$0xff] (!%p328_p3)  }
   0x8   : > { %v2749_v2 = vshrl.u32 (!%p328_p3), %v444_v0, 7  ;;  %v2535_v25 = vld [vmem:[%s3308_s3 + $0x10] ss:$8 sps:$4 sm:$0xff] (!%p328_p3)   ;;  %v2540_v26 = vld [vmem:[%s3308_s3 + $0x24] ss:$8 sps:$4 sm:$0xff] (!%p328_p3)  }
   0x9   : > { %v2538_v29 = vld [vmem:[%s3308_s3 + $0x20] ss:$8 sps:$4 sm:$0xff] (!%p328_p3)   ;;  %v2543_v30 = vld [vmem:[%s3308_s3 + $0x34] ss:$8 sps:$4 sm:$0xff] (!%p328_p3)   ;;  %v2541_v31 = vld [vmem:[%s3308_s3 + $0x30] ss:$8 sps:$4 sm:$0xff] (!%p328_p3)  }
   0xa   : > { %v454_v3 = vsub.s32 (!%p328_p3), 2, %v2749_v2  ;;  %v2546_v32 = vld [vmem:[%s3308_s3 + $0x44] ss:$8 sps:$4 sm:$0xff] (!%p328_p3)   ;;  %v2544_v34 = vld [vmem:[%s3308_s3 + $0x40] ss:$8 sps:$4 sm:$0xff] (!%p328_p3)   ;;  %v446_v63 = vsub.s32 (!%p328_p3), 0, %v2749_v2 }
   0xb   : > { %v2549_v35 = vld [vmem:[%s3308_s3 + $0x54] ss:$8 sps:$4 sm:$0xff] (!%p328_p3)   ;;  %v2547_v36 = vld [vmem:[%s3308_s3 + $0x50] ss:$8 sps:$4 sm:$0xff] (!%p328_p3)   ;;  %v2552_v37 = vld [vmem:[%s3308_s3 + $0x64] ss:$8 sps:$4 sm:$0xff] (!%p328_p3)  }
   0xc   : > { %v2550_v39 = vld [vmem:[%s3308_s3 + $0x60] ss:$8 sps:$4 sm:$0xff] (!%p328_p3)   ;;  %v2555_v40 = vld [vmem:[%s3308_s3 + $0x74] ss:$8 sps:$4 sm:$0xff] (!%p328_p3)   ;;  %v2553_v41 = vld [vmem:[%s3308_s3 + $0x70] ss:$8 sps:$4 sm:$0xff] (!%p328_p3)  }
   0xd   : > { %v2558_v42 = vld [vmem:[%s3308_s3 + $0x84] ss:$8 sps:$4 sm:$0xff] (!%p328_p3)   ;;  %v2556_v44 = vld [vmem:[%s3308_s3 + $0x80] ss:$8 sps:$4 sm:$0xff] (!%p328_p3)   ;;  %v2561_v45 = vld [vmem:[%s3308_s3 + $0x94] ss:$8 sps:$4 sm:$0xff] (!%p328_p3)  }
   0xe   : > { %s3320_s30 = smov (!%p381_p4, %s2666_s30), 1  ;;  %v2559_v46 = vld [vmem:[%s3308_s3 + $0x90] ss:$8 sps:$4 sm:$0xff]   ;;  %v2564_v47 = vld [vmem:[%s3308_s3 + $0xa4] ss:$8 sps:$4 sm:$0xff]   ;;  %v450_v0 = vsub.s32 1, %v2749_v2 }
   0xf   : > { %s2297_s13 = sshll.u32 %s3320_s30, 7  ;;  %s2161_s14 = sshll.u32 %s3320_s30, 2  ;;  %v2562_v49 = vld [vmem:[%s3308_s3 + $0xa0] ss:$8 sps:$4 sm:$0xff]   ;;  %v2567_v50 = vld [vmem:[%s3308_s3 + $0xb4] ss:$8 sps:$4 sm:$0xff]  }
  0x10   : > { %s2759_s17 = scalar_lea.vmem %s3306_s1, %s2297_s13  ;;  %s398_s20 = scalar_lea.vmem %s3307_s2, %s2161_s14  ;;  %v2565_v51 = vld [vmem:[%s3308_s3 + $0xb0] ss:$8 sps:$4 sm:$0xff]   ;;  %v2570_v52 = vld [vmem:[%s3308_s3 + $0xc4] ss:$8 sps:$4 sm:$0xff]   ;;  %v2568_v54 = vld [vmem:[%s3308_s3 + $0xc0] ss:$8 sps:$4 sm:$0xff]  }
  0x11   : > { %v2764_v4 = vld [vmem:[%s398_s20] sm:$0xf]  ;;  %v2500_v6 = vld [vmem:[%s2759_s17 + $0x4] ss:$16 sps:$4 sm:$0xff]   ;;  %s2296_s21 = sshll.u32 %s3320_s30, 6 }
  0x12   : > { %v2767_v5 = vrot.slane %v2764_v4, %v454_v3  ;;  %v2502_v7 = vld [vmem:[%s2759_s17] ss:$16 sps:$4 sm:$0xff]   ;;  %v2503_v8 = vld [vmem:[%s2759_s17 + $0x24] ss:$16 sps:$4 sm:$0xff]   ;;  %609 = vmatprep.subr.bf16.mxu0 %v2500_v6  ;;  %s2777_s24 = scalar_lea.vmem %s3305_s0, %s2296_s21  ;;  %v2518_v15 = vld [vmem:[%s2759_s17 + $0xc] ss:$16 sps:$4 sm:$0xff]   ;;  %v2938_v3 = vrot.slane %v2764_v4, %v450_v0  ;;  %s3278_s21 = scalar_lea.vmem %s3314_s9, %s2297_s13 }
  0x13   : > { %610 = vmatpush1.bf16.msra.mxu0 %v2502_v7  ;;  %v2505_v9 = vld [vmem:[%s2759_s17 + $0x20] ss:$16 sps:$4 sm:$0xff]   ;;  %v2506_v10 = vld [vmem:[%s2759_s17 + $0x44] ss:$16 sps:$4 sm:$0xff]   ;;  %v2520_v16 = vld [vmem:[%s2759_s17 + $0x8] ss:$16 sps:$4 sm:$0xff]   ;;  %722 = vmatprep.subr.bf16.mxu1 %v2518_v15 }
  0x14   : > { %611 = vmatprep.subr.bf16.mxu0 %v2503_v8  ;;  %v2508_v11 = vld [vmem:[%s2759_s17 + $0x40] ss:$16 sps:$4 sm:$0xff]   ;;  %v2509_v12 = vld [vmem:[%s2759_s17 + $0x64] ss:$16 sps:$4 sm:$0xff]   ;;  %v2522_v18 = vld [vmem:[%s2759_s17 + $0x2c] ss:$16 sps:$4 sm:$0xff]   ;;  %723 = vmatpush1.bf16.msra.mxu1 %v2520_v16 }
  0x15   : > { %v2511_v13 = vld [vmem:[%s2759_s17 + $0x60] ss:$16 sps:$4 sm:$0xff]   ;;  %v2524_v19 = vld [vmem:[%s2759_s17 + $0x28] ss:$16 sps:$4 sm:$0xff]   ;;  %724 = vmatprep.subr.bf16.mxu1 %v2522_v18  ;;  %v2525_v20 = vld [vmem:[%s2759_s17 + $0x4c] ss:$16 sps:$4 sm:$0xff]  }
  0x16   : > { %v2512_v17 = vld [vmem:[%s2777_s24] sm:$0xff]   ;;  %v2527_v23 = vld [vmem:[%s2759_s17 + $0x48] ss:$16 sps:$4 sm:$0xff]   ;;  %v2529_v24 = vld [vmem:[%s2759_s17 + $0x6c] ss:$16 sps:$4 sm:$0xff]  }
  0x17   : > { %612 = vmatpush1.bf16.msra.mxu0 %v2505_v9  ;;  %v2513_v27 = vld [vmem:[%s2777_s24 + $0x8] sm:$0xff]   ;;  %v2514_v33 = vld [vmem:[%s2777_s24 + $0x10] sm:$0xff]   ;;  %v2515_v38 = vld [vmem:[%s2777_s24 + $0x18] sm:$0xff]  }
  0x18   : > { %613 = vmatprep.subr.bf16.mxu0 %v2506_v10  ;;  %725 = vmatpush1.bf16.msra.mxu1 %v2524_v19  ;;  %v2531_v28 = vld [vmem:[%s2759_s17 + $0x68] ss:$16 sps:$4 sm:$0xff]   ;;  %v2516_v43 = vld [vmem:[%s2777_s24 + $0x20] sm:$0xff]   ;;  %v2521_v53 = vld [vmem:[%s2777_s24 + $0x30] sm:$0xff]  }
  0x19   : > { %726 = vmatprep.subr.bf16.mxu1 %v2525_v20  ;;  %v2517_v48 = vld [vmem:[%s2777_s24 + $0x28] sm:$0xff]   ;;  %v2573_v55 = vld [vmem:[%s3308_s3 + $0xd4] ss:$8 sps:$4 sm:$0xff]   ;;  %v2571_v56 = vld [vmem:[%s3308_s3 + $0xd0] ss:$8 sps:$4 sm:$0xff]  }
  0x1a   : > { %v2528_v57 = vld [vmem:[%s2777_s24 + $0x38] sm:$0xff]   ;;  %v2576_v58 = vld [vmem:[%s3308_s3 + $0xe4] ss:$8 sps:$4 sm:$0xff]   ;;  %v2574_v59 = vld [vmem:[%s3308_s3 + $0xe0] ss:$8 sps:$4 sm:$0xff]  }
  0x1b   : > { %614 = vmatpush1.bf16.msra.mxu0 %v2508_v11  ;;  %v2579_v60 = vld [vmem:[%s3308_s3 + $0xf4] ss:$8 sps:$4 sm:$0xff]   ;;  %v2577_v61 = vld [vmem:[%s3308_s3 + $0xf0] ss:$8 sps:$4 sm:$0xff]   ;;  %v2582_v62 = vld [vmem:[%s3308_s3 + $0x104] ss:$8 sps:$4 sm:$0xff]  }
  0x1c   : > { %615 = vmatprep.subr.bf16.mxu0 %v2509_v12  ;;  %727 = vmatpush1.bf16.msra.mxu1 %v2527_v23  ;;  %v2630_v15 = vld [vmem:[%s3310_s5 + $0x48] sm:$0xff]  }
  0x1d   : > { %728 = vmatprep.subr.bf16.mxu1 %v2529_v24  ;;  %v2632_v24 = vld [vmem:[%s3310_s5 + $0x50] sm:$0xff]  }
  0x1f   : > { %616 = vmatpush1.bf16.msra.mxu0 %v2511_v13  ;;  %v2628_v13 = vld [vmem:[%s3310_s5 + $0x40] sm:$0xff]  }
  0x20   : > { %1327 = vmatprep.subr.bf16.mxu0 %v2534_v14  ;;  %729 = vmatpush1.bf16.msra.mxu1 %v2531_v28  ;;  %v2629_v14 = vld [vmem:[%s3310_s5] sm:$0xff]  }
  0x21   : > { %2299 = vmatprep.subr.bf16.mxu1 %v2628_v13 }
  0x22   : > { %2188 = vmatmul.mubr.msk.bf16.vlgmr.msra.gmra.mrb[0].mxu0 %vm584_vm0, %v2512_v17 }
  0x23   : > { %651 = vmatprep.mubr.bf16.mxu0 %v2676_v1  ;;  %1328 = vmatpush1.bf16.msra.mxu0 %v2532_v21 }
  0x24   : > { %1329 = vmatprep.subr.bf16.mxu0 %v2537_v22  ;;  %2196 = vmatmul.mubr.msk.bf16.vlgmr.msra.gmra.mrb[0].mxu1 %vm584_vm0, %v2512_v17  ;;  %v458_v17 = vsub.s32 3, %v2749_v2  ;;  %v2631_v22 = vld [vmem:[%s3310_s5 + $0x8] sm:$0xff]  }
  0x25   : > { %764 = vmatprep.mubr.bf16.mxu1 %v2676_v1  ;;  %2300 = vmatpush3.bf16.msra.mxu1 %v2629_v14 }
  0x26   : > { %2301 = vmatprep.subr.bf16.mxu1 %v2630_v15  ;;  %v2964_v28 = vrot.slane %v2764_v4, %v458_v17 }
  0x27   : > { %1330 = vmatpush1.bf16.msra.mxu0 %v2535_v25 }
  0x28   : > { %1331 = vmatprep.subr.bf16.mxu0 %v2540_v26 }
  0x29   : > { %2302 = vmatpush3.bf16.msra.mxu1 %v2631_v22 }
  0x2a   : > { %2189 = vmatmul.mubr.msk.bf16.gmra.mrb[4].mxu0 %vm584_vm0, %v2513_v27  ;;  %2303 = vmatprep.subr.bf16.mxu1 %v2632_v24 }
  0x2b   : > { %661 = vmatprep.mubr.bf16.mxu0 %v2676_v1  ;;  %1332 = vmatpush1.bf16.msra.mxu0 %v2538_v29 }
  0x2c   : > { %1333 = vmatprep.subr.bf16.mxu0 %v2543_v30  ;;  %2197 = vmatmul.mubr.msk.bf16.gmra.mrb[4].mxu1 %vm584_vm0, %v2513_v27  ;;  %v2580_v27 = vld [vmem:[%s3308_s3 + $0x100] ss:$8 sps:$4 sm:$0xff]  }
  0x2d   : > { %774 = vmatprep.mubr.bf16.mxu1 %v2676_v1 }
  0x2f   : > { %1334 = vmatpush1.bf16.msra.mxu0 %v2541_v31  ;;  %v2585_v31 = vld [vmem:[%s3308_s3 + $0x114] ss:$8 sps:$4 sm:$0xff]  }
  0x30   : > { %1335 = vmatprep.subr.bf16.mxu0 %v2546_v32 }
  0x32   : > { %2190 = vmatmul.mubr.msk.bf16.gmra.mrb[8].mxu0 %vm584_vm0, %v2514_v33 }
  0x33   : > { %671 = vmatprep.mubr.bf16.mxu0 %v2676_v1  ;;  %1336 = vmatpush1.bf16.msra.mxu0 %v2544_v34  ;;  %v2633_v34 = vld [vmem:[%s3310_s5 + $0x10] sm:$0xff]  }
  0x34   : > { %1337 = vmatprep.subr.bf16.mxu0 %v2549_v35  ;;  %2198 = vmatmul.mubr.msk.bf16.gmra.mrb[8].mxu1 %vm584_vm0, %v2514_v33 }
  0x35   : > { %784 = vmatprep.mubr.bf16.mxu1 %v2676_v1  ;;  %2304 = vmatpush3.bf16.msra.mxu1 %v2633_v34 }
  0x37   : > { %1338 = vmatpush1.bf16.msra.mxu0 %v2547_v36 }
  0x38   : > { %1339 = vmatprep.subr.bf16.mxu0 %v2552_v37  ;;  %v2634_v37 = vld [vmem:[%s3310_s5 + $0x58] sm:$0xff]  }
  0x39   : > { %2305 = vmatprep.subr.bf16.mxu1 %v2634_v37 }
  0x3a   : > { %2191 = vmatmul.mubr.msk.bf16.gmra.mrb[12].mxu0 %vm584_vm0, %v2515_v38 }
  0x3b   : > { %681 = vmatprep.mubr.bf16.mxu0 %v2676_v1  ;;  %1340 = vmatpush1.bf16.msra.mxu0 %v2550_v39  ;;  %v2583_v39 = vld [vmem:[%s3308_s3 + $0x110] ss:$8 sps:$4 sm:$0xff]  }
  0x3c   : > { %1341 = vmatprep.subr.bf16.mxu0 %v2555_v40  ;;  %2199 = vmatmul.mubr.msk.bf16.gmra.mrb[12].mxu1 %vm584_vm0, %v2515_v38 }
  0x3d   : > { %794 = vmatprep.mubr.bf16.mxu1 %v2676_v1 }
  0x3f   : > { %1342 = vmatpush1.bf16.msra.mxu0 %v2553_v41 }
  0x40   : > { %1343 = vmatprep.subr.bf16.mxu0 %v2558_v42 }
  0x42   : > { %2192 = vmatmul.mubr.msk.bf16.gmra.mrb[16].mxu0 %vm584_vm0, %v2516_v43 }
  0x43   : > { %691 = vmatprep.mubr.bf16.mxu0 %v2676_v1  ;;  %1344 = vmatpush1.bf16.msra.mxu0 %v2556_v44  ;;  %v2588_v44 = vld [vmem:[%s3308_s3 + $0x124] ss:$8 sps:$4 sm:$0xff]  }
  0x44   : > { %1345 = vmatprep.subr.bf16.mxu0 %v2561_v45  ;;  %2200 = vmatmul.mubr.msk.bf16.gmra.mrb[16].mxu1 %vm584_vm0, %v2516_v43 }
  0x45   : > { %804 = vmatprep.mubr.bf16.mxu1 %v2676_v1 }
  0x47   : > { %1346 = vmatpush1.bf16.msra.mxu0 %v2559_v46 }
  0x48   : > { %1347 = vmatprep.subr.bf16.mxu0 %v2564_v47 }
  0x4a   : > { %2193 = vmatmul.mubr.msk.bf16.gmra.mrb[20].mxu0 %vm584_vm0, %v2517_v48 }
  0x4b   : > { %701 = vmatprep.mubr.bf16.mxu0 %v2676_v1  ;;  %1348 = vmatpush1.bf16.msra.mxu0 %v2562_v49 }
  0x4c   : > { %1349 = vmatprep.subr.bf16.mxu0 %v2567_v50  ;;  %2201 = vmatmul.mubr.msk.bf16.gmra.mrb[20].mxu1 %vm584_vm0, %v2517_v48 }
  0x4d   : > { %814 = vmatprep.mubr.bf16.mxu1 %v2676_v1 }
  0x4f   : > { %1350 = vmatpush1.bf16.msra.mxu0 %v2565_v51 }
  0x50   : > { %1351 = vmatprep.subr.bf16.mxu0 %v2570_v52  ;;  %v2635_v52 = vld [vmem:[%s3310_s5 + $0x18] sm:$0xff]  }
  0x51   : > { %2306 = vmatpush3.bf16.msra.mxu1 %v2635_v52 }
  0x52   : > { %2194 = vmatmul.mubr.msk.bf16.gmra.mrb[24].mxu0 %vm584_vm0, %v2521_v53 }
  0x53   : > { %711 = vmatprep.mubr.bf16.mxu0 %v2676_v1  ;;  %1352 = vmatpush1.bf16.msra.mxu0 %v2568_v54 }
  0x54   : > { %1353 = vmatprep.subr.bf16.mxu0 %v2573_v55  ;;  %2202 = vmatmul.mubr.msk.bf16.gmra.mrb[24].mxu1 %vm584_vm0, %v2521_v53 }
  0x55   : > { %824 = vmatprep.mubr.bf16.mxu1 %v2676_v1  ;;  %v2933_v1 = vrot.slane %v2764_v4, %v446_v63 }
  0x57   : > { %1354 = vmatpush1.bf16.msra.mxu0 %v2571_v56  ;;  %v2636_v56 = vld [vmem:[%s3310_s5 + $0x60] sm:$0xff]  }
  0x58   : > { %1355 = vmatprep.subr.bf16.mxu0 %v2576_v58  ;;  %2307 = vmatprep.subr.bf16.mxu1 %v2636_v56 }
  0x5a   : > { %2195 = vmatmul.mubr.msk.bf16.gmra.mrb[28].mxu0 %vm584_vm0, %v2528_v57 }
  0x5b   : > { %1356 = vmatpush1.bf16.msra.mxu0 %v2574_v59  ;;  %v2586_v59 = vld [vmem:[%s3308_s3 + $0x120] ss:$8 sps:$4 sm:$0xff]  }
  0x5c   : > { %2203 = vmatmul.mubr.msk.bf16.gmra.mrb[28].mxu1 %vm584_vm0, %v2528_v57  ;;  %1357 = vmatprep.subr.bf16.mxu0 %v2579_v60 }
  0x5f   : > { %1358 = vmatpush1.bf16.msra.mxu0 %v2577_v61 }
  0x60   : > { %1440 = vmatprep.subr.bf16.mxu0 %v2582_v62 }
  0xf5   : > { %v643_v6 = vpop.f32.mrb[0].mxu0 }
  0xf6   : > { %v644_v7 = vadd.f32 %v643_v6, %v2933_v1  ;;  %v645_v8 = vpop.f32.mrb[1].mxu0  ;;  %v2591_v6 = vld [vmem:[%s3308_s3 + $0x134] ss:$8 sps:$4 sm:$0xff]  }
  0xf7   : > { %v646_v9 = vadd.f32 %v645_v8, %v2938_v3  ;;  %v647_v10 = vpop.f32.mrb[2].mxu0  ;;  %v756_v36 = vpop.f32.mrb[0].mxu1 }
  0xf8   : > { %v648_v11 = vadd.f32 %v647_v10, %v2933_v1  ;;  %v649_v12 = vpop.f32.mrb[3].mxu0  ;;  %v835_v18 = vmax.f32 %v644_v7, 0.0  ;;  %v757_v40 = vadd.f32 %v756_v36, %v2767_v5  ;;  %v758_v41 = vpop.f32.mrb[1].mxu1 }
  0xf9   : > { %v650_v16 = vadd.f32 %v649_v12, %v2938_v3  ;;  %v836_v20 = vmax.f32 %v646_v9, 0.0  ;;  %v759_v45 = vadd.f32 %v758_v41, %v2964_v28  ;;  %v760_v46 = vpop.f32.mrb[2].mxu1 }
  0xfa   : > { %v839_v19 = vmax.f32 %v648_v11, 0.0  ;;  %v837_v49 = vmax.f32 %v757_v40, 0.0  ;;  %v761_v50 = vadd.f32 %v760_v46, %v2767_v5  ;;  %v762_v51 = vpop.f32.mrb[3].mxu1  ;;  %v2637_v11 = vld [vmem:[%s3310_s5 + $0x20] sm:$0xff]  }
  0xfb   : > { %v840_v21 = vmax.f32 %v650_v16, 0.0  ;;  %v838_v54 = vmax.f32 %v759_v45, 0.0  ;;  %v763_v55 = vadd.f32 %v762_v51, %v2964_v28  ;;  %v2638_v16 = vld [vmem:[%s3310_s5 + $0x68] sm:$0xff]   ;;  %2308 = vmatpush3.bf16.msra.mxu1 %v2637_v11 }
  0xfc   : > { %v963_v23 = vpack.c.bf16 %v839_v19, %v835_v18  ;;  %v841_v60 = vmax.f32 %v761_v50, 0.0  ;;  %v2589_v18 = vld [vmem:[%s3308_s3 + $0x130] ss:$8 sps:$4 sm:$0xff]   ;;  %2309 = vmatprep.subr.bf16.mxu1 %v2638_v16  ;;  %v2598_v16 = vld [vmem:[%s3308_s3 + $0x160] ss:$8 sps:$4 sm:$0xff]  }
  0xfd   : > { %v964_v25 = vpack.c.bf16 %v840_v21, %v836_v20  ;;  %v653_v26 = vpop.f32.mrb[4].mxu0  ;;  %v842_v7 = vmax.f32 %v763_v55, 0.0 }
  0xfe   : > { %v654_v29 = vadd.f32 %v653_v26, %v2933_v1  ;;  %v655_v30 = vpop.f32.mrb[5].mxu0  ;;  %v3003_v10 = vpack.c.bf16 %v841_v60, %v837_v49 }
  0xff   : > { %v656_v32 = vadd.f32 %v655_v30, %v2938_v3  ;;  %v657_v33 = vpop.f32.mrb[6].mxu0  ;;  %1359 = vmatprep.mubr.bf16.mxu0 %v964_v25  ;;  %v3009_v14 = vpack.c.bf16 %v842_v7, %v838_v54  ;;  %v766_v15 = vpop.f32.mrb[4].mxu1 }
 0x100   : > { %v658_v35 = vadd.f32 %v657_v33, %v2933_v1  ;;  %v659_v4 = vpop.f32.mrb[7].mxu0  ;;  %1360 = vmatmul.mubr.bf16.vlgmr.msra.gmra.mrb[32].mxu0 %v963_v23  ;;  %v843_v42 = vmax.f32 %v654_v29, 0.0  ;;  %v767_v19 = vadd.f32 %v766_v15, %v2767_v5  ;;  %v768_v20 = vpop.f32.mrb[5].mxu1  ;;  %v2594_v23 = vld [vmem:[%s3308_s3 + $0x144] ss:$8 sps:$4 sm:$0xff]  }
 0x101   : > { %v660_v38 = vadd.f32 %v659_v4, %v2938_v3  ;;  %1441 = vmatpush1.bf16.msra.mxu0 %v2580_v27  ;;  %v844_v47 = vmax.f32 %v656_v32, 0.0  ;;  %v769_v24 = vadd.f32 %v768_v20, %v2964_v28  ;;  %v770_v25 = vpop.f32.mrb[6].mxu1  ;;  %v2639_v32 = vld [vmem:[%s3310_s5 + $0x28] sm:$0xff]   ;;  %v2640_v4 = vld [vmem:[%s3310_s5 + $0x70] sm:$0xff]  }
 0x102   : > { %v847_v43 = vmax.f32 %v658_v35, 0.0  ;;  %1442 = vmatprep.subr.bf16.mxu0 %v2585_v31  ;;  %v845_v29 = vmax.f32 %v767_v19, 0.0  ;;  %v771_v30 = vadd.f32 %v770_v25, %v2767_v5  ;;  %v772_v31 = vpop.f32.mrb[7].mxu1  ;;  %2310 = vmatpush3.bf16.msra.mxu1 %v2639_v32  ;;  %v2603_v20 = vld [vmem:[%s3308_s3 + $0x174] ss:$8 sps:$4 sm:$0xff]  }
 0x103   : > { %v848_v48 = vmax.f32 %v660_v38, 0.0  ;;  %v846_v34 = vmax.f32 %v769_v24, 0.0  ;;  %v773_v35 = vadd.f32 %v772_v31, %v2964_v28  ;;  %v2592_v38 = vld [vmem:[%s3308_s3 + $0x140] ss:$8 sps:$4 sm:$0xff]   ;;  %2311 = vmatprep.subr.bf16.mxu1 %v2640_v4  ;;  %v2601_v31 = vld [vmem:[%s3308_s3 + $0x170] ss:$8 sps:$4 sm:$0xff]  }
 0x104   : > { %v967_v53 = vpack.c.bf16 %v847_v43, %v843_v42  ;;  %v2597_v42 = vld [vmem:[%s3308_s3 + $0x154] ss:$8 sps:$4 sm:$0xff]   ;;  %v2606_v4 = vld [vmem:[%s3308_s3 + $0x184] ss:$8 sps:$4 sm:$0xff]  }
 0x105   : > { %v968_v57 = vpack.c.bf16 %v848_v48, %v844_v47  ;;  %1443 = vmatpush1.bf16.msra.mxu0 %v2583_v39  ;;  %v663_v58 = vpop.f32.mrb[8].mxu0  ;;  %v849_v39 = vmax.f32 %v771_v30, 0.0  ;;  %v850_v43 = vmax.f32 %v773_v35, 0.0  ;;  %v2641_v47 = vld [vmem:[%s3310_s5 + $0x30] sm:$0xff]  }
 0x106   : > { %v664_v61 = vadd.f32 %v663_v58, %v2933_v1  ;;  %v665_v62 = vpop.f32.mrb[9].mxu0  ;;  %1444 = vmatprep.subr.bf16.mxu0 %v2588_v44  ;;  %v2600_v58 = vld [vmem:[%s3308_s3 + $0x164] ss:$8 sps:$4 sm:$0xff]   ;;  %2312 = vmatpush3.bf16.msra.mxu1 %v2641_v47 }
 0x107   : > { %v666_v8 = vadd.f32 %v665_v62, %v2938_v3  ;;  %v667_v9 = vpop.f32.mrb[10].mxu0  ;;  %1369 = vmatprep.mubr.bf16.mxu0 %v968_v57  ;;  %v3039_v46 = vpack.c.bf16 %v849_v39, %v845_v29  ;;  %v3045_v50 = vpack.c.bf16 %v850_v43, %v846_v34  ;;  %v776_v51 = vpop.f32.mrb[8].mxu1 }
 0x108   : > { %v668_v12 = vadd.f32 %v667_v9, %v2933_v1  ;;  %v669_v13 = vpop.f32.mrb[11].mxu0  ;;  %1370 = vmatmul.mubr.bf16.gmra.mrb[36].mxu0 %v967_v53  ;;  %v851_v21 = vmax.f32 %v664_v61, 0.0  ;;  %v2595_v53 = vld [vmem:[%s3308_s3 + $0x150] ss:$8 sps:$4 sm:$0xff]   ;;  %v777_v54 = vadd.f32 %v776_v51, %v2767_v5  ;;  %v778_v55 = vpop.f32.mrb[9].mxu1 }
 0x109   : > { %v670_v17 = vadd.f32 %v669_v13, %v2938_v3  ;;  %1445 = vmatpush1.bf16.msra.mxu0 %v2586_v59  ;;  %v852_v26 = vmax.f32 %v666_v8, 0.0  ;;  %v779_v59 = vadd.f32 %v778_v55, %v2964_v28  ;;  %v780_v60 = vpop.f32.mrb[10].mxu1 }
 0x10a   : > { %v855_v22 = vmax.f32 %v668_v12, 0.0  ;;  %1446 = vmatprep.subr.bf16.mxu0 %v2591_v6  ;;  %v853_v6 = vmax.f32 %v777_v54, 0.0  ;;  %v781_v7 = vadd.f32 %v780_v60, %v2767_v5  ;;  %v782_v8 = vpop.f32.mrb[11].mxu1  ;;  %v2609_v54 = vld [vmem:[%s3308_s3 + $0x194] ss:$8 sps:$4 sm:$0xff]  }
 0x10b   : > { %v856_v27 = vmax.f32 %v670_v17, 0.0  ;;  %v854_v11 = vmax.f32 %v779_v59, 0.0  ;;  %v783_v12 = vadd.f32 %v782_v8, %v2964_v28 }
 0x10c   : > { %v971_v33 = vpack.c.bf16 %v855_v22, %v851_v21  ;;  %v857_v17 = vmax.f32 %v781_v7, 0.0  ;;  %v2607_v7 = vld [vmem:[%s3308_s3 + $0x190] ss:$8 sps:$4 sm:$0xff]  }
 0x10d   : > { %v972_v36 = vpack.c.bf16 %v856_v27, %v852_v26  ;;  %1447 = vmatpush1.bf16.msra.mxu0 %v2589_v18  ;;  %v673_v37 = vpop.f32.mrb[12].mxu0  ;;  %v858_v21 = vmax.f32 %v783_v12, 0.0 }
 0x10e   : > { %v674_v40 = vadd.f32 %v673_v37, %v2933_v1  ;;  %v675_v41 = vpop.f32.mrb[13].mxu0  ;;  %1448 = vmatprep.subr.bf16.mxu0 %v2594_v23  ;;  %v3066_v24 = vpack.c.bf16 %v857_v17, %v853_v6 }
 0x10f   : > { %v676_v44 = vadd.f32 %v675_v41, %v2938_v3  ;;  %v677_v45 = vpop.f32.mrb[14].mxu0  ;;  %1379 = vmatprep.mubr.bf16.mxu0 %v972_v36  ;;  %v3069_v27 = vpack.c.bf16 %v858_v21, %v854_v11  ;;  %v786_v29 = vpop.f32.mrb[12].mxu1 }
 0x110   : > { %v678_v48 = vadd.f32 %v677_v45, %v2933_v1  ;;  %v679_v49 = vpop.f32.mrb[15].mxu0  ;;  %1380 = vmatmul.mubr.bf16.gmra.mrb[40].mxu0 %v971_v33  ;;  %v859_v56 = vmax.f32 %v674_v40, 0.0  ;;  %v787_v32 = vadd.f32 %v786_v29, %v2767_v5  ;;  %v788_v33 = vpop.f32.mrb[13].mxu1 }
 0x111   : > { %v680_v52 = vadd.f32 %v679_v49, %v2938_v3  ;;  %1449 = vmatpush1.bf16.msra.mxu0 %v2592_v38  ;;  %v860_v61 = vmax.f32 %v676_v44, 0.0  ;;  %v789_v36 = vadd.f32 %v788_v33, %v2964_v28  ;;  %v790_v37 = vpop.f32.mrb[14].mxu1  ;;  %v2604_v49 = vld [vmem:[%s3308_s3 + $0x180] ss:$8 sps:$4 sm:$0xff]  }
 0x112   : > { %v863_v57 = vmax.f32 %v678_v48, 0.0  ;;  %1450 = vmatprep.subr.bf16.mxu0 %v2597_v42  ;;  %v861_v40 = vmax.f32 %v787_v32, 0.0  ;;  %v791_v41 = vadd.f32 %v790_v37, %v2767_v5  ;;  %v792_v42 = vpop.f32.mrb[15].mxu1 }
 0x113   : > { %v864_v62 = vmax.f32 %v680_v52, 0.0  ;;  %v862_v44 = vmax.f32 %v789_v36, 0.0  ;;  %v793_v45 = vadd.f32 %v792_v42, %v2964_v28 }
 0x114   : > { %v975_v9 = vpack.c.bf16 %v863_v57, %v859_v56  ;;  %v865_v51 = vmax.f32 %v791_v41, 0.0 }
 0x115   : > { %v976_v13 = vpack.c.bf16 %v864_v62, %v860_v61  ;;  %1451 = vmatpush1.bf16.msra.mxu0 %v2595_v53  ;;  %v683_v15 = vpop.f32.mrb[16].mxu0  ;;  %v866_v55 = vmax.f32 %v793_v45, 0.0 }
 0x116   : > { %v684_v18 = vadd.f32 %v683_v15, %v2933_v1  ;;  %v685_v19 = vpop.f32.mrb[17].mxu0  ;;  %1452 = vmatprep.subr.bf16.mxu0 %v2600_v58  ;;  %v3090_v58 = vpack.c.bf16 %v865_v51, %v861_v40 }
 0x117   : > { %v686_v22 = vadd.f32 %v685_v19, %v2938_v3  ;;  %v687_v23 = vpop.f32.mrb[18].mxu0  ;;  %1389 = vmatprep.mubr.bf16.mxu0 %v976_v13  ;;  %v3093_v61 = vpack.c.bf16 %v866_v55, %v862_v44  ;;  %v796_v62 = vpop.f32.mrb[16].mxu1  ;;  %v2612_v13 = vld [vmem:[%s3308_s3 + $0x1a4] ss:$8 sps:$4 sm:$0xff]  }
 0x118   : > { %v688_v25 = vadd.f32 %v687_v23, %v2933_v1  ;;  %v689_v26 = vpop.f32.mrb[19].mxu0  ;;  %1390 = vmatmul.mubr.bf16.gmra.mrb[44].mxu0 %v975_v9  ;;  %v867_v34 = vmax.f32 %v684_v18, 0.0  ;;  %v797_v8 = vadd.f32 %v796_v62, %v2767_v5  ;;  %v798_v9 = vpop.f32.mrb[17].mxu1 }
 0x119   : > { %v690_v30 = vadd.f32 %v689_v26, %v2938_v3  ;;  %1453 = vmatpush1.bf16.msra.mxu0 %v2598_v16  ;;  %v868_v38 = vmax.f32 %v686_v22, 0.0  ;;  %v799_v15 = vadd.f32 %v798_v9, %v2964_v28  ;;  %v800_v16 = vpop.f32.mrb[18].mxu1 }
 0x11a   : > { %v871_v35 = vmax.f32 %v688_v25, 0.0  ;;  %1454 = vmatprep.subr.bf16.mxu0 %v2603_v20  ;;  %v869_v19 = vmax.f32 %v797_v8, 0.0  ;;  %v801_v20 = vadd.f32 %v800_v16, %v2767_v5  ;;  %v802_v21 = vpop.f32.mrb[19].mxu1  ;;  %v2616_v8 = vld [vmem:[%s3308_s3 + $0x1c0] ss:$8 sps:$4 sm:$0xff]  }
 0x11b   : > { %v872_v39 = vmax.f32 %v690_v30, 0.0  ;;  %v870_v23 = vmax.f32 %v799_v15, 0.0  ;;  %v803_v25 = vadd.f32 %v802_v21, %v2964_v28  ;;  %v2610_v30 = vld [vmem:[%s3308_s3 + $0x1a0] ss:$8 sps:$4 sm:$0xff]  }
 0x11c   : > { %v979_v43 = vpack.c.bf16 %v871_v35, %v867_v34  ;;  %v2615_v34 = vld [vmem:[%s3308_s3 + $0x1b4] ss:$8 sps:$4 sm:$0xff]  }
 0x11d   : > { %v980_v47 = vpack.c.bf16 %v872_v39, %v868_v38  ;;  %1455 = vmatpush1.bf16.msra.mxu0 %v2601_v31  ;;  %v693_v48 = vpop.f32.mrb[20].mxu0  ;;  %v873_v31 = vmax.f32 %v801_v20, 0.0  ;;  %v874_v35 = vmax.f32 %v803_v25, 0.0  ;;  %v2619_v25 = vld [vmem:[%s3308_s3 + $0x1d0] ss:$8 sps:$4 sm:$0xff]  }
 0x11e   : > { %v694_v52 = vadd.f32 %v693_v48, %v2933_v1  ;;  %v695_v53 = vpop.f32.mrb[21].mxu0  ;;  %1456 = vmatprep.subr.bf16.mxu0 %v2606_v4 }
 0x11f   : > { %v696_v56 = vadd.f32 %v695_v53, %v2938_v3  ;;  %v697_v57 = vpop.f32.mrb[22].mxu0  ;;  %1399 = vmatprep.mubr.bf16.mxu0 %v980_v47  ;;  %v3114_v37 = vpack.c.bf16 %v873_v31, %v869_v19  ;;  %v3117_v40 = vpack.c.bf16 %v874_v35, %v870_v23  ;;  %v806_v41 = vpop.f32.mrb[20].mxu1 }
 0x120   : > { %v698_v59 = vadd.f32 %v697_v57, %v2933_v1  ;;  %v699_v60 = vpop.f32.mrb[23].mxu0  ;;  %1400 = vmatmul.mubr.bf16.gmra.mrb[48].mxu0 %v979_v43  ;;  %v875_v11 = vmax.f32 %v694_v52, 0.0  ;;  %v2613_v43 = vld [vmem:[%s3308_s3 + $0x1b0] ss:$8 sps:$4 sm:$0xff]   ;;  %v807_v44 = vadd.f32 %v806_v41, %v2767_v5  ;;  %v808_v45 = vpop.f32.mrb[21].mxu1 }
 0x121   : > { %v700_v6 = vadd.f32 %v699_v60, %v2938_v3  ;;  %1457 = vmatpush1.bf16.msra.mxu0 %v2604_v49  ;;  %v876_v17 = vmax.f32 %v696_v56, 0.0  ;;  %v2618_v49 = vld [vmem:[%s3308_s3 + $0x1c4] ss:$8 sps:$4 sm:$0xff]   ;;  %v809_v51 = vadd.f32 %v808_v45, %v2964_v28  ;;  %v810_v52 = vpop.f32.mrb[22].mxu1  ;;  %v2627_v45 = vld [vmem:[%s3308_s3 + $0x1f4] ss:$8 sps:$4 sm:$0xff]  }
 0x122   : > { %v879_v12 = vmax.f32 %v698_v59, 0.0  ;;  %1458 = vmatprep.subr.bf16.mxu0 %v2609_v54  ;;  %v877_v55 = vmax.f32 %v807_v44, 0.0  ;;  %v811_v56 = vadd.f32 %v810_v52, %v2767_v5  ;;  %v812_v57 = vpop.f32.mrb[23].mxu1  ;;  %v2625_v52 = vld [vmem:[%s3308_s3 + $0x1f0] ss:$8 sps:$4 sm:$0xff]  }
 0x123   : > { %v880_v18 = vmax.f32 %v700_v6, 0.0  ;;  %v878_v60 = vmax.f32 %v809_v51, 0.0  ;;  %v813_v62 = vadd.f32 %v812_v57, %v2964_v28 }
 0x124   : > { %v983_v22 = vpack.c.bf16 %v879_v12, %v875_v11  ;;  %v881_v9 = vmax.f32 %v811_v56, 0.0 }
 0x125   : > { %v984_v26 = vpack.c.bf16 %v880_v18, %v876_v17  ;;  %1459 = vmatpush1.bf16.msra.mxu0 %v2607_v7  ;;  %v703_v29 = vpop.f32.mrb[24].mxu0  ;;  %v882_v15 = vmax.f32 %v813_v62, 0.0 }
 0x126   : > { %v704_v32 = vadd.f32 %v703_v29, %v2933_v1  ;;  %v705_v33 = vpop.f32.mrb[25].mxu0  ;;  %1460 = vmatprep.subr.bf16.mxu0 %v2612_v13  ;;  %v2621_v13 = vld [vmem:[%s3308_s3 + $0x1d4] ss:$8 sps:$4 sm:$0xff]   ;;  %v3138_v18 = vpack.c.bf16 %v881_v9, %v877_v55 }
 0x127   : > { %v706_v4 = vadd.f32 %v705_v33, %v2938_v3  ;;  %v707_v36 = vpop.f32.mrb[26].mxu0  ;;  %1409 = vmatprep.mubr.bf16.mxu0 %v984_v26  ;;  %v986_v21 = vpack.c.bf16 %v882_v15, %v878_v60 }
 0x128   : > { %v708_v38 = vadd.f32 %v707_v36, %v2933_v1  ;;  %v709_v39 = vpop.f32.mrb[27].mxu0  ;;  %1410 = vmatmul.mubr.bf16.gmra.mrb[52].mxu0 %v983_v22  ;;  %v883_v47 = vmax.f32 %v704_v32, 0.0  ;;  %v816_v22 = vpop.f32.mrb[24].mxu1 }
 0x129   : > { %v710_v42 = vadd.f32 %v709_v39, %v2938_v3  ;;  %1461 = vmatpush1.bf16.msra.mxu0 %v2610_v30  ;;  %v884_v53 = vmax.f32 %v706_v4, 0.0  ;;  %v817_v26 = vadd.f32 %v816_v22, %v2767_v5  ;;  %v818_v29 = vpop.f32.mrb[25].mxu1 }
 0x12a   : > { %v887_v48 = vmax.f32 %v708_v38, 0.0  ;;  %1462 = vmatprep.subr.bf16.mxu0 %v2615_v34  ;;  %v819_v32 = vadd.f32 %v818_v29, %v2964_v28  ;;  %v820_v33 = vpop.f32.mrb[26].mxu1 }
 0x12b   : > { %v888_v54 = vmax.f32 %v710_v42, 0.0  ;;  %v885_v35 = vmax.f32 %v817_v26, 0.0  ;;  %v821_v4 = vadd.f32 %v820_v33, %v2767_v5  ;;  %v822_v36 = vpop.f32.mrb[27].mxu1 }
 0x12c   : > { %v987_v59 = vpack.c.bf16 %v887_v48, %v883_v47  ;;  %v886_v39 = vmax.f32 %v819_v32, 0.0  ;;  %v823_v41 = vadd.f32 %v822_v36, %v2964_v28 }
 0x12d   : > { %v988_v6 = vpack.c.bf16 %v888_v54, %v884_v53  ;;  %1463 = vmatpush1.bf16.msra.mxu0 %v2613_v43  ;;  %v713_v7 = vpop.f32.mrb[28].mxu0  ;;  %v2622_v43 = vld [vmem:[%s3308_s3 + $0x1e0] ss:$8 sps:$4 sm:$0xff]   ;;  %v889_v44 = vmax.f32 %v821_v4, 0.0 }
 0x12e   : > { %v714_v11 = vadd.f32 %v713_v7, %v2933_v1  ;;  %v715_v12 = vpop.f32.mrb[29].mxu0  ;;  %1464 = vmatprep.subr.bf16.mxu0 %v2618_v49  ;;  %v890_v47 = vmax.f32 %v823_v41, 0.0 }
 0x12f   : > { %v716_v16 = vadd.f32 %v715_v12, %v2938_v3  ;;  %v717_v17 = vpop.f32.mrb[30].mxu0  ;;  %1419 = vmatprep.mubr.bf16.mxu0 %v988_v6  ;;  %v989_v48 = vpack.c.bf16 %v889_v44, %v885_v35  ;;  %v826_v51 = vpop.f32.mrb[28].mxu1 }
 0x130   : > { %v718_v19 = vadd.f32 %v717_v17, %v2933_v1  ;;  %v719_v20 = vpop.f32.mrb[31].mxu0  ;;  %1420 = vmatmul.mubr.bf16.gmra.mrb[56].mxu0 %v987_v59  ;;  %v891_v30 = vmax.f32 %v714_v11, 0.0  ;;  %v2624_v1 = vld [vmem:[%s3308_s3 + $0x1e4] ss:$8 sps:$4 sm:$0xff]   ;;  %v990_v49 = vpack.c.bf16 %v890_v47, %v886_v39  ;;  %v827_v53 = vadd.f32 %v826_v51, %v2767_v5  ;;  %v828_v54 = vpop.f32.mrb[29].mxu1 }
 0x131   : > { %v720_v23 = vadd.f32 %v719_v20, %v2938_v3  ;;  %1465 = vmatpush1.bf16.msra.mxu0 %v2616_v8  ;;  %v892_v34 = vmax.f32 %v716_v16, 0.0  ;;  %v829_v55 = vadd.f32 %v828_v54, %v2964_v28  ;;  %v830_v56 = vpop.f32.mrb[30].mxu1 }
 0x132   : > { %v895_v31 = vmax.f32 %v718_v19, 0.0  ;;  %1466 = vmatprep.subr.bf16.mxu0 %v2621_v13  ;;  %v893_v57 = vmax.f32 %v827_v53, 0.0  ;;  %v831_v59 = vadd.f32 %v830_v56, %v2767_v5  ;;  %v832_v60 = vpop.f32.mrb[31].mxu1  ;;  %v2642_v5 = vld [vmem:[%s3310_s5 + $0x78] sm:$0xff]  }
 0x133   : > { %v896_v3 = vmax.f32 %v720_v23, 0.0  ;;  %v894_v62 = vmax.f32 %v829_v55, 0.0  ;;  %v833_v6 = vadd.f32 %v832_v60, %v2964_v28  ;;  %v2643_v28 = vld [vmem:[%s3310_s5 + $0x38] sm:$0xff]   ;;  %2313 = vmatprep.subr.bf16.mxu1 %v2642_v5 }
 0x134   : > { %v991_v38 = vpack.c.bf16 %v895_v31, %v891_v30  ;;  %v897_v7 = vmax.f32 %v831_v59, 0.0  ;;  %2314 = vmatpush3.bf16.msra.mxu1 %v2643_v28 }
 0x135   : > { %v992_v42 = vpack.c.bf16 %v896_v3, %v892_v34  ;;  %1467 = vmatpush1.bf16.msra.mxu0 %v2619_v25  ;;  %v898_v8 = vmax.f32 %v833_v6, 0.0 }
 0x136   : > { %1468 = vmatprep.subr.bf16.mxu0 %v2624_v1  ;;  %v993_v9 = vpack.c.bf16 %v897_v7, %v893_v57  ;;  %v2646_v1 = vld [vmem:[%s3312_s7 + $0x10] sm:$0xff]  }
 0x137   : > { %1429 = vmatprep.mubr.bf16.mxu0 %v992_v42 }
 0x138   : > { %1430 = vmatmul.mubr.bf16.gmra.mrb[60].mxu0 %v991_v38 }
 0x139   : > { %1469 = vmatpush1.bf16.msra.mxu0 %v2622_v43  ;;  %1472 = vmatprep.mubr.bf16.mxu0 %v3009_v14  ;;  %v994_v14 = vpack.c.bf16 %v898_v8, %v894_v62 }
 0x13a   : > { %1470 = vmatprep.subr.bf16.mxu0 %v2627_v45 }
 0x13d   : > { %1471 = vmatpush1.bf16.msra.mxu0 %v2625_v52 }
 0x140   : > { %1473 = vmatmul.mubr.bf16.vlgmr.msra.gmra.mrb[32].mxu0 %v3003_v10  ;;  %v2644_v10 = vld [vmem:[%s3312_s7] sm:$0xff]  }
 0x141   : > { %1482 = vmatprep.mubr.bf16.mxu0 %v3045_v50  ;;  %2379 = vmatprep.subr.bf16.mxu1 %v2644_v10 }
 0x148   : > { %1483 = vmatmul.mubr.bf16.gmra.mrb[36].mxu0 %v3039_v46  ;;  %v995_v46 = vld [vmem:[%s3309_s4] sm:$0x3] }
 0x149   : > { %1492 = vmatprep.mubr.bf16.mxu0 %v3069_v27  ;;  %v3190_v50 = vrot.slane %v995_v46, %v446_v63 }
 0x150   : > { %1493 = vmatmul.mubr.bf16.gmra.mrb[40].mxu0 %v3066_v24  ;;  %v3194_v24 = vrot.slane %v995_v46, %v450_v0 }
 0x151   : > { %1502 = vmatprep.mubr.bf16.mxu0 %v3093_v61 }
 0x158   : > { %1503 = vmatmul.mubr.bf16.gmra.mrb[44].mxu0 %v3090_v58 }
 0x159   : > { %1512 = vmatprep.mubr.bf16.mxu0 %v3117_v40 }
 0x160   : > { %1513 = vmatmul.mubr.bf16.gmra.mrb[48].mxu0 %v3114_v37 }
 0x161   : > { %1522 = vmatprep.mubr.bf16.mxu0 %v986_v21  ;;  %v2645_v21 = vld [vmem:[%s3312_s7 + $0x8] sm:$0xff]  }
 0x168   : > { %1523 = vmatmul.mubr.bf16.gmra.mrb[52].mxu0 %v3138_v18 }
 0x169   : > { %1532 = vmatprep.mubr.bf16.mxu0 %v990_v49 }
 0x170   : > { %1533 = vmatmul.mubr.bf16.gmra.mrb[56].mxu0 %v989_v48 }
 0x171   : > { %1542 = vmatprep.mubr.bf16.mxu0 %v994_v14 }
 0x178   : > { %1543 = vmatmul.mubr.bf16.gmra.mrb[60].mxu0 %v993_v9 }
 0x213   : > { %v1474_v27 = vpop.f32.mrb[32].mxu0 }
 0x214   : > { %v2411_v58 = vadd.f32 %v1474_v27, %v3190_v50  ;;  %v1476_v61 = vpop.f32.mrb[33].mxu0 }
 0x215   : > { %v2412_v37 = vadd.f32 %v1476_v61, %v3194_v24  ;;  %v1478_v40 = vpop.f32.mrb[34].mxu0 }
 0x216   : > { %v2413_v11 = vadd.f32 %v1478_v40, %v3190_v50  ;;  %v1480_v12 = vpop.f32.mrb[35].mxu0  ;;  %v1553_v15 = vmax.f32 %v2411_v58, 0.0 }
 0x217   : > { %v2414_v13 = vadd.f32 %v1480_v12, %v3194_v24  ;;  %v1554_v63 = vmax.f32 %v2412_v37, 0.0 }
 0x218   : > { %v1555_v16 = vmax.f32 %v2413_v11, 0.0 }
 0x219   : > { %v1556_v17 = vmax.f32 %v2414_v13, 0.0 }
 0x21a   : > { %v1617_v18 = vpack.c.bf16 %v1555_v16, %v1553_v15 }
 0x21b   : > { %v1618_v2 = vpack.c.bf16 %v1556_v17, %v1554_v63  ;;  %v1484_v0 = vpop.f32.mrb[36].mxu0 }
 0x21c   : > { %v2415_v19 = vadd.f32 %v1484_v0, %v3190_v50  ;;  %v1486_v20 = vpop.f32.mrb[37].mxu0 }
 0x21d   : > { %v2416_v22 = vadd.f32 %v1486_v20, %v3194_v24  ;;  %v1488_v23 = vpop.f32.mrb[38].mxu0  ;;  %1768 = vmatprep.mubr.bf16.mxu1 %v1618_v2 }
 0x21e   : > { %v2417_v25 = vadd.f32 %v1488_v23, %v3190_v50  ;;  %v1490_v26 = vpop.f32.mrb[39].mxu0  ;;  %1769 = vmatmul.mubr.bf16.vlgmr.msra.gmra.mrb[32].mxu1 %v1617_v18  ;;  %v1557_v30 = vmax.f32 %v2415_v19, 0.0 }
 0x21f   : > { %v2418_v29 = vadd.f32 %v1490_v26, %v3194_v24  ;;  %2380 = vmatpush3.bf16.msra.mxu1 %v2644_v10  ;;  %v1558_v32 = vmax.f32 %v2416_v22, 0.0 }
 0x220   : > { %v1559_v31 = vmax.f32 %v2417_v25, 0.0  ;;  %2381 = vmatprep.subr.bf16.mxu1 %v2645_v21 }
 0x221   : > { %v1560_v33 = vmax.f32 %v2418_v29, 0.0 }
 0x222   : > { %v1619_v34 = vpack.c.bf16 %v1559_v31, %v1557_v30 }
 0x223   : > { %v1620_v3 = vpack.c.bf16 %v1560_v33, %v1558_v32  ;;  %v1494_v35 = vpop.f32.mrb[40].mxu0  ;;  %2382 = vmatpush3.bf16.msra.mxu1 %v2645_v21 }
 0x224   : > { %v2419_v4 = vadd.f32 %v1494_v35, %v3190_v50  ;;  %v1496_v36 = vpop.f32.mrb[41].mxu0  ;;  %2383 = vmatprep.subr.bf16.mxu1 %v2646_v1 }
 0x225   : > { %v2420_v38 = vadd.f32 %v1496_v36, %v3194_v24  ;;  %v1498_v39 = vpop.f32.mrb[42].mxu0  ;;  %1776 = vmatprep.mubr.bf16.mxu1 %v1620_v3 }
 0x226   : > { %v2421_v41 = vadd.f32 %v1498_v39, %v3190_v50  ;;  %v1500_v42 = vpop.f32.mrb[43].mxu0  ;;  %1777 = vmatmul.mubr.bf16.gmra.mrb[36].mxu1 %v1619_v34  ;;  %v1561_v44 = vmax.f32 %v2419_v4, 0.0 }
 0x227   : > { %v2422_v43 = vadd.f32 %v1500_v42, %v3194_v24  ;;  %2384 = vmatpush3.bf16.msra.mxu1 %v2646_v1  ;;  %v1562_v47 = vmax.f32 %v2420_v38, 0.0 }
 0x228   : > { %v1563_v45 = vmax.f32 %v2421_v41, 0.0 }
 0x229   : > { %v1564_v48 = vmax.f32 %v2422_v43, 0.0 }
 0x22a   : > { %v1621_v49 = vpack.c.bf16 %v1563_v45, %v1561_v44 }
 0x22b   : > { %v1622_v51 = vpack.c.bf16 %v1564_v48, %v1562_v47  ;;  %v1504_v52 = vpop.f32.mrb[44].mxu0 }
 0x22c   : > { %v2423_v53 = vadd.f32 %v1504_v52, %v3190_v50  ;;  %v1506_v54 = vpop.f32.mrb[45].mxu0 }
 0x22d   : > { %v2424_v55 = vadd.f32 %v1506_v54, %v3194_v24  ;;  %v1508_v56 = vpop.f32.mrb[46].mxu0  ;;  %1784 = vmatprep.mubr.bf16.mxu1 %v1622_v51 }
 0x22e   : > { %v2425_v57 = vadd.f32 %v1508_v56, %v3190_v50  ;;  %v1510_v59 = vpop.f32.mrb[47].mxu0  ;;  %1785 = vmatmul.mubr.bf16.gmra.mrb[40].mxu1 %v1621_v49  ;;  %v1565_v62 = vmax.f32 %v2423_v53, 0.0 }
 0x22f   : > { %v2426_v60 = vadd.f32 %v1510_v59, %v3194_v24  ;;  %v1566_v7 = vmax.f32 %v2424_v55, 0.0 }
 0x230   : > { %v1567_v6 = vmax.f32 %v2425_v57, 0.0 }
 0x231   : > { %v1568_v8 = vmax.f32 %v2426_v60, 0.0 }
 0x232   : > { %v1623_v9 = vpack.c.bf16 %v1567_v6, %v1565_v62  ;;  %v2647_v62 = vld [vmem:[%s3312_s7 + $0x18] sm:$0xff]   ;;  %v2650_v6 = vld [vmem:[%s3312_s7 + $0x30] sm:$0xff]  }
 0x233   : > { %v1624_v14 = vpack.c.bf16 %v1568_v8, %v1566_v7  ;;  %v1514_v5 = vpop.f32.mrb[48].mxu0  ;;  %2385 = vmatprep.subr.bf16.mxu1 %v2647_v62  ;;  %v2651_v7 = vld [vmem:[%s3312_s7 + $0x38] sm:$0xff]  }
 0x234   : > { %v2427_v28 = vadd.f32 %v1514_v5, %v3190_v50  ;;  %v1516_v10 = vpop.f32.mrb[49].mxu0  ;;  %2386 = vmatpush3.bf16.msra.mxu1 %v2647_v62 }
 0x235   : > { %v2428_v46 = vadd.f32 %v1516_v10, %v3194_v24  ;;  %v1518_v27 = vpop.f32.mrb[50].mxu0  ;;  %1792 = vmatprep.mubr.bf16.mxu1 %v1624_v14 }
 0x236   : > { %v2429_v58 = vadd.f32 %v1518_v27, %v3190_v50  ;;  %v1520_v61 = vpop.f32.mrb[51].mxu0  ;;  %1793 = vmatmul.mubr.bf16.gmra.mrb[44].mxu1 %v1623_v9  ;;  %v1569_v40 = vmax.f32 %v2427_v28, 0.0  ;;  %v3252_v9 = vld [vmem:[%s3311_s6] ss:$0 sm:$0xff] }
 0x237   : > { %v2430_v37 = vadd.f32 %v1520_v61, %v3194_v24  ;;  %v1570_v12 = vmax.f32 %v2428_v46, 0.0 }
 0x238   : > { %v1571_v11 = vmax.f32 %v2429_v58, 0.0 }
 0x239   : > { %v1572_v13 = vmax.f32 %v2430_v37, 0.0 }
 0x23a   : > { %v1625_v15 = vpack.c.bf16 %v1571_v11, %v1569_v40 }
 0x23b   : > { %v1626_v16 = vpack.c.bf16 %v1572_v13, %v1570_v12  ;;  %v1524_v63 = vpop.f32.mrb[52].mxu0 }
 0x23c   : > { %v2431_v17 = vadd.f32 %v1524_v63, %v3190_v50  ;;  %v1526_v18 = vpop.f32.mrb[53].mxu0 }
 0x23d   : > { %v2432_v2 = vadd.f32 %v1526_v18, %v3194_v24  ;;  %v1528_v0 = vpop.f32.mrb[54].mxu0  ;;  %1800 = vmatprep.mubr.bf16.mxu1 %v1626_v16 }
 0x23e   : > { %v2433_v19 = vadd.f32 %v1528_v0, %v3190_v50  ;;  %v1530_v20 = vpop.f32.mrb[55].mxu0  ;;  %1801 = vmatmul.mubr.bf16.gmra.mrb[48].mxu1 %v1625_v15  ;;  %v1573_v22 = vmax.f32 %v2431_v17, 0.0 }
 0x23f   : > { %v2434_v21 = vadd.f32 %v1530_v20, %v3194_v24  ;;  %v1574_v25 = vmax.f32 %v2432_v2, 0.0 }
 0x240   : > { %v1575_v23 = vmax.f32 %v2433_v19, 0.0 }
 0x241   : > { %v1576_v26 = vmax.f32 %v2434_v21, 0.0 }
 0x242   : > { %v1627_v29 = vpack.c.bf16 %v1575_v23, %v1573_v22 }
 0x243   : > { %v1628_v30 = vpack.c.bf16 %v1576_v26, %v1574_v25  ;;  %v1534_v31 = vpop.f32.mrb[56].mxu0 }
 0x244   : > { %v2435_v1 = vadd.f32 %v1534_v31, %v3190_v50  ;;  %v1536_v32 = vpop.f32.mrb[57].mxu0 }
 0x245   : > { %v2436_v33 = vadd.f32 %v1536_v32, %v3194_v24  ;;  %v1538_v34 = vpop.f32.mrb[58].mxu0  ;;  %1808 = vmatprep.mubr.bf16.mxu1 %v1628_v30 }
 0x246   : > { %v2437_v3 = vadd.f32 %v1538_v34, %v3190_v50  ;;  %v1540_v35 = vpop.f32.mrb[59].mxu0  ;;  %1809 = vmatmul.mubr.bf16.gmra.mrb[52].mxu1 %v1627_v29  ;;  %v1577_v36 = vmax.f32 %v2435_v1, 0.0 }
 0x247   : > { %v2438_v4 = vadd.f32 %v1540_v35, %v3194_v24  ;;  %v1578_v39 = vmax.f32 %v2436_v33, 0.0 }
 0x248   : > { %v1579_v38 = vmax.f32 %v2437_v3, 0.0 }
 0x249   : > { %v1580_v41 = vmax.f32 %v2438_v4, 0.0 }
 0x24a   : > { %v1629_v42 = vpack.c.bf16 %v1579_v38, %v1577_v36 }
 0x24b   : > { %v1630_v43 = vpack.c.bf16 %v1580_v41, %v1578_v39  ;;  %v1544_v44 = vpop.f32.mrb[60].mxu0 }
 0x24c   : > { %v2439_v45 = vadd.f32 %v1544_v44, %v3190_v50  ;;  %v1546_v47 = vpop.f32.mrb[61].mxu0 }
 0x24d   : > { %v2440_v48 = vadd.f32 %v1546_v47, %v3194_v24  ;;  %v1548_v49 = vpop.f32.mrb[62].mxu0  ;;  %1816 = vmatprep.mubr.bf16.mxu1 %v1630_v43 }
 0x24e   : > { %v2441_v51 = vadd.f32 %v1548_v49, %v3190_v50  ;;  %v1550_v52 = vpop.f32.mrb[63].mxu0  ;;  %1817 = vmatmul.mubr.bf16.gmra.mrb[56].mxu1 %v1629_v42  ;;  %v1581_v54 = vmax.f32 %v2439_v45, 0.0  ;;  %v2648_v50 = vld [vmem:[%s3312_s7 + $0x20] sm:$0xff]  }
 0x24f   : > { %v2442_v53 = vadd.f32 %v1550_v52, %v3194_v24  ;;  %v1582_v56 = vmax.f32 %v2440_v48, 0.0  ;;  %2387 = vmatprep.subr.bf16.mxu1 %v2648_v50  ;;  %v2649_v24 = vld [vmem:[%s3312_s7 + $0x28] sm:$0xff]  }
 0x250   : > { %v1583_v55 = vmax.f32 %v2441_v51, 0.0  ;;  %2388 = vmatpush3.bf16.msra.mxu1 %v2648_v50 }
 0x251   : > { %v1584_v57 = vmax.f32 %v2442_v53, 0.0  ;;  %2389 = vmatprep.subr.bf16.mxu1 %v2649_v24 }
 0x252   : > { %v1631_v59 = vpack.c.bf16 %v1583_v55, %v1581_v54 }
 0x253   : > { %v1632_v60 = vpack.c.bf16 %v1584_v57, %v1582_v56 }
 0x254   : > { %2390 = vmatpush3.bf16.msra.mxu1 %v2649_v24 }
 0x255   : > { %1824 = vmatprep.mubr.bf16.mxu1 %v1632_v60  ;;  %2391 = vmatprep.subr.bf16.mxu1 %v2650_v6 }
 0x256   : > { %1825 = vmatmul.mubr.bf16.gmra.mrb[60].mxu1 %v1631_v59 }
 0x258   : > { %2392 = vmatpush3.bf16.msra.mxu1 %v2650_v6 }
 0x259   : > { %2393 = vmatprep.subr.bf16.mxu1 %v2651_v7 }
 0x25c   : > { %2394 = vmatpush3.bf16.msra.mxu1 %v2651_v7 }
 0x2f1   : > { %v2315_v8 = vpop.f32.mrb[32].mxu1 }
 0x2f2   : > { %v2316_v14 = vpop.f32.mrb[33].mxu1 }
 0x2f3   : > { %v2317_v5 = vadd.f32 %v2316_v14, %v2315_v8  ;;  %v2318_v28 = vpop.f32.mrb[34].mxu1 }
 0x2f4   : > { %v2319_v10 = vpop.f32.mrb[35].mxu1 }
 0x2f5   : > { %v1771_v46 = vadd.f32 %v2317_v5, %v3252_v9  ;;  %v2320_v27 = vadd.f32 %v2319_v10, %v2318_v28 }
 0x2f7   : > { %v1774_v58 = vadd.f32 %v2320_v27, %v3252_v9  ;;  %v1833_v61 = vmax.f32 %v1771_v46, 0.0 }
 0x2f9   : > { %v1834_v37 = vmax.f32 %v1774_v58, 0.0  ;;  %v2321_v40 = vpop.f32.mrb[36].mxu1 }
 0x2fa   : > { %v2322_v11 = vpop.f32.mrb[37].mxu1 }
 0x2fb   : > { %v2323_v12 = vadd.f32 %v2322_v11, %v2321_v40  ;;  %v2324_v13 = vpop.f32.mrb[38].mxu1  ;;  %v1865_v15 = vpack.c.bf16 %v1834_v37, %v1833_v61 }
 0x2fc   : > { %v2325_v16 = vpop.f32.mrb[39].mxu1 }
 0x2fd   : > { %v1779_v63 = vadd.f32 %v2323_v12, %v3252_v9  ;;  %v2326_v17 = vadd.f32 %v2325_v16, %v2324_v13  ;;  %2395 = vmatprep.mubr.bf16.mxu1 %v1865_v15 }
 0x2ff   : > { %v1782_v18 = vadd.f32 %v2326_v17, %v3252_v9  ;;  %v1835_v2 = vmax.f32 %v1779_v63, 0.0 }
 0x301   : > { %v1836_v0 = vmax.f32 %v1782_v18, 0.0  ;;  %v2327_v19 = vpop.f32.mrb[40].mxu1 }
 0x302   : > { %v2328_v20 = vpop.f32.mrb[41].mxu1 }
 0x303   : > { %v1866_v21 = vpack.c.bf16 %v1836_v0, %v1835_v2  ;;  %v2329_v22 = vadd.f32 %v2328_v20, %v2327_v19  ;;  %v2330_v23 = vpop.f32.mrb[42].mxu1 }
 0x304   : > { %v2331_v25 = vpop.f32.mrb[43].mxu1 }
 0x305   : > { %v1787_v26 = vadd.f32 %v2329_v22, %v3252_v9  ;;  %v2332_v29 = vadd.f32 %v2331_v25, %v2330_v23  ;;  %2396 = vmatmul.mubr.bf16.vlgmr.msra.gmra.mrb[64].mxu1 %v1866_v21  ;;  %v2285_v23 = vld [vmem:[%s3313_s8] ss:$0 sm:$0xff] }
 0x307   : > { %v1790_v30 = vadd.f32 %v2332_v29, %v3252_v9  ;;  %v1837_v31 = vmax.f32 %v1787_v26, 0.0 }
 0x309   : > { %v1838_v1 = vmax.f32 %v1790_v30, 0.0  ;;  %v2333_v32 = vpop.f32.mrb[44].mxu1 }
 0x30a   : > { %v2334_v33 = vpop.f32.mrb[45].mxu1 }
 0x30b   : > { %v2335_v34 = vadd.f32 %v2334_v33, %v2333_v32  ;;  %v2336_v3 = vpop.f32.mrb[46].mxu1  ;;  %v1867_v35 = vpack.c.bf16 %v1838_v1, %v1837_v31 }
 0x30c   : > { %v2337_v4 = vpop.f32.mrb[47].mxu1 }
 0x30d   : > { %v1795_v36 = vadd.f32 %v2335_v34, %v3252_v9  ;;  %v2338_v38 = vadd.f32 %v2337_v4, %v2336_v3  ;;  %2399 = vmatprep.mubr.bf16.mxu1 %v1867_v35 }
 0x30f   : > { %v1798_v39 = vadd.f32 %v2338_v38, %v3252_v9  ;;  %v1839_v41 = vmax.f32 %v1795_v36, 0.0 }
 0x311   : > { %v1840_v42 = vmax.f32 %v1798_v39, 0.0  ;;  %v2339_v43 = vpop.f32.mrb[48].mxu1 }
 0x312   : > { %v2340_v44 = vpop.f32.mrb[49].mxu1 }
 0x313   : > { %v2341_v45 = vadd.f32 %v2340_v44, %v2339_v43  ;;  %v2342_v47 = vpop.f32.mrb[50].mxu1  ;;  %v1868_v48 = vpack.c.bf16 %v1840_v42, %v1839_v41 }
 0x314   : > { %v2343_v49 = vpop.f32.mrb[51].mxu1 }
 0x315   : > { %v1803_v51 = vadd.f32 %v2341_v45, %v3252_v9  ;;  %v2344_v52 = vadd.f32 %v2343_v49, %v2342_v47  ;;  %2400 = vmatmul.mubr.bf16.gmra.mrb[68].mxu1 %v1868_v48 }
 0x317   : > { %v1806_v53 = vadd.f32 %v2344_v52, %v3252_v9  ;;  %v1841_v54 = vmax.f32 %v1803_v51, 0.0 }
 0x319   : > { %v1842_v55 = vmax.f32 %v1806_v53, 0.0  ;;  %v2345_v56 = vpop.f32.mrb[52].mxu1 }
 0x31a   : > { %v2346_v57 = vpop.f32.mrb[53].mxu1 }
 0x31b   : > { %v2347_v59 = vadd.f32 %v2346_v57, %v2345_v56  ;;  %v2348_v60 = vpop.f32.mrb[54].mxu1  ;;  %v1869_v62 = vpack.c.bf16 %v1842_v55, %v1841_v54 }
 0x31c   : > { %v2349_v50 = vpop.f32.mrb[55].mxu1 }
 0x31d   : > { %v1811_v24 = vadd.f32 %v2347_v59, %v3252_v9  ;;  %v2350_v6 = vadd.f32 %v2349_v50, %v2348_v60  ;;  %2403 = vmatprep.mubr.bf16.mxu1 %v1869_v62 }
 0x31f   : > { %v1814_v7 = vadd.f32 %v2350_v6, %v3252_v9  ;;  %v1843_v8 = vmax.f32 %v1811_v24, 0.0 }
 0x321   : > { %v1844_v14 = vmax.f32 %v1814_v7, 0.0  ;;  %v2351_v5 = vpop.f32.mrb[56].mxu1 }
 0x322   : > { %v2352_v28 = vpop.f32.mrb[57].mxu1 }
 0x323   : > { %v2353_v10 = vadd.f32 %v2352_v28, %v2351_v5  ;;  %v2354_v46 = vpop.f32.mrb[58].mxu1  ;;  %v1870_v27 = vpack.c.bf16 %v1844_v14, %v1843_v8 }
 0x324   : > { %v2355_v58 = vpop.f32.mrb[59].mxu1 }
 0x325   : > { %v1819_v61 = vadd.f32 %v2353_v10, %v3252_v9  ;;  %v2356_v37 = vadd.f32 %v2355_v58, %v2354_v46  ;;  %2404 = vmatmul.mubr.bf16.gmra.mrb[72].mxu1 %v1870_v27 }
 0x327   : > { %v1822_v40 = vadd.f32 %v2356_v37, %v3252_v9  ;;  %v1845_v11 = vmax.f32 %v1819_v61, 0.0 }
 0x329   : > { %v1846_v12 = vmax.f32 %v1822_v40, 0.0  ;;  %v2357_v13 = vpop.f32.mrb[60].mxu1 }
 0x32a   : > { %v2358_v15 = vpop.f32.mrb[61].mxu1 }
 0x32b   : > { %v2359_v16 = vadd.f32 %v2358_v15, %v2357_v13  ;;  %v2360_v63 = vpop.f32.mrb[62].mxu1  ;;  %v1871_v17 = vpack.c.bf16 %v1846_v12, %v1845_v11 }
 0x32c   : > { %v2361_v18 = vpop.f32.mrb[63].mxu1 }
 0x32d   : > { %v1827_v2 = vadd.f32 %v2359_v16, %v3252_v9  ;;  %v2362_v0 = vadd.f32 %v2361_v18, %v2360_v63  ;;  %2407 = vmatprep.mubr.bf16.mxu1 %v1871_v17 }
 0x32f   : > { %v1830_v19 = vadd.f32 %v2362_v0, %v3252_v9  ;;  %v1847_v20 = vmax.f32 %v1827_v2, 0.0 }
 0x331   : > { %v1848_v21 = vmax.f32 %v1830_v19, 0.0 }
 0x333   : > { %v1872_v22 = vpack.c.bf16 %v1848_v21, %v1847_v20 }
 0x335   : > { %2408 = vmatmul.mubr.bf16.gmra.mrb[76].mxu1 %v1872_v22 }
 0x3d8   : > { %v2397_v25 = vpop.f32.mrb[64].mxu1 }
 0x3d9   : > { %v1971_v9 = vadd.f32 %v2397_v25, %v2285_v23  ;;  %v1962_v26 = vpop.f32.mrb[65].mxu1 }
 0x3da   : > { %v1963_v29 = vadd.f32 %v2285_v23, %v1962_v26  ;;  %v2398_v30 = vpop.f32.mrb[66].mxu1 }
 0x3db   : > { %2027 = vst [vmem:[%s3278_s21 + $0x10] sm:$0xff] %v1971_v9  ;;  %v1974_v31 = vadd.f32 %v2398_v30, %v2285_v23  ;;  %v1965_v1 = vpop.f32.mrb[67].mxu1 }
 0x3dc   : > { %2025 = vst [vmem:[%s3278_s21] sm:$0xff] %v1963_v29  ;;  %v1966_v32 = vadd.f32 %v2285_v23, %v1965_v1 }
 0x3dd   : > { %2028 = vst [vmem:[%s3278_s21 + $0x18] sm:$0xff] %v1974_v31 }
 0x3de   : > { %2026 = vst [vmem:[%s3278_s21 + $0x8] sm:$0xff] %v1966_v32 }
 0x3e8   : > { %v2401_v33 = vpop.f32.mrb[68].mxu1 }
 0x3e9   : > { %v1987_v34 = vadd.f32 %v2401_v33, %v2285_v23  ;;  %v1978_v3 = vpop.f32.mrb[69].mxu1 }
 0x3ea   : > { %v1979_v35 = vadd.f32 %v2285_v23, %v1978_v3  ;;  %v2402_v4 = vpop.f32.mrb[70].mxu1 }
 0x3eb   : > { %2031 = vst [vmem:[%s3278_s21 + $0x30] sm:$0xff] %v1987_v34  ;;  %v1990_v36 = vadd.f32 %v2402_v4, %v2285_v23  ;;  %v1981_v38 = vpop.f32.mrb[71].mxu1 }
 0x3ec   : > { %2029 = vst [vmem:[%s3278_s21 + $0x20] sm:$0xff] %v1979_v35  ;;  %v1982_v39 = vadd.f32 %v2285_v23, %v1981_v38 }
 0x3ed   : > { %2032 = vst [vmem:[%s3278_s21 + $0x38] sm:$0xff] %v1990_v36 }
 0x3ee   : > { %2030 = vst [vmem:[%s3278_s21 + $0x28] sm:$0xff] %v1982_v39 }
 0x3f8   : > { %v2405_v41 = vpop.f32.mrb[72].mxu1 }
 0x3f9   : > { %v2003_v42 = vadd.f32 %v2405_v41, %v2285_v23  ;;  %v1994_v43 = vpop.f32.mrb[73].mxu1 }
 0x3fa   : > { %v1995_v44 = vadd.f32 %v2285_v23, %v1994_v43  ;;  %v2406_v45 = vpop.f32.mrb[74].mxu1 }
 0x3fb   : > { %2035 = vst [vmem:[%s3278_s21 + $0x50] sm:$0xff] %v2003_v42  ;;  %v2006_v47 = vadd.f32 %v2406_v45, %v2285_v23  ;;  %v1997_v48 = vpop.f32.mrb[75].mxu1 }
 0x3fc   : > { %2033 = vst [vmem:[%s3278_s21 + $0x40] sm:$0xff] %v1995_v44  ;;  %v1998_v49 = vadd.f32 %v2285_v23, %v1997_v48 }
 0x3fd   : > { %2036 = vst [vmem:[%s3278_s21 + $0x58] sm:$0xff] %v2006_v47 }
 0x3fe   : > { %2034 = vst [vmem:[%s3278_s21 + $0x48] sm:$0xff] %v1998_v49 }
 0x408   : > { %v2409_v51 = vpop.f32.mrb[76].mxu1 }
 0x409   : > { %v2019_v52 = vadd.f32 %v2409_v51, %v2285_v23  ;;  %v2010_v53 = vpop.f32.mrb[77].mxu1 }
 0x40a   : > { %v2011_v54 = vadd.f32 %v2285_v23, %v2010_v53  ;;  %v2410_v55 = vpop.f32.mrb[78].mxu1 }
 0x40b   : > { %2039 = vst [vmem:[%s3278_s21 + $0x70] sm:$0xff] %v2019_v52  ;;  %v2022_v56 = vadd.f32 %v2410_v55, %v2285_v23  ;;  %v2013_v57 = vpop.f32.mrb[79].mxu1 }
 0x40c   : > { %2037 = vst [vmem:[%s3278_s21 + $0x60] sm:$0xff] %v2011_v54  ;;  %v2014_v59 = vadd.f32 %v2285_v23, %v2013_v57 }
 0x40d   : > { %2040 = vst [vmem:[%s3278_s21 + $0x78] sm:$0xff] %v2022_v56 }
 0x40e   : > { %2038 = vst [vmem:[%s3278_s21 + $0x68] sm:$0xff] %v2014_v59 }
 0x40f PF: > { %s19_s11 = sadd.s32 1, %s2674_s11   ;;  %s3315_s30 = smov %s2670_s10 }
 0x410   : > { %p16_p5 = scmp.ge.s32.totalorder %s19_s11, 4   ;;  %s3316_s10 = smov %s3318_s12 }
 0x412   :  { %18 = sbr.rel (!%p16_p5) target bundleno = 2 (0x2), region = 92 }

</bundles_post_ra>
